<compile_context>
chip_gen: v7x
topology: tpu7x:2x2x1
jax: 0.10.0
libtpu: 0.0.40
codegen_flags: <defaults>
</compile_context>

<pallas_src>
import functools

import numpy as np
import jax
import jax.numpy as jnp
from jax.experimental import pallas as pl
from jax.experimental.pallas import tpu as pltpu

K = 5          # conv kernel size -> "same" padding of K // 2
PAD = K // 2


# ----------------------------------------------------------------------------
# In-kernel building blocks (all operate on VMEM refs / values).
# ----------------------------------------------------------------------------
def _conv_block(pad_ref, pat_ref, w_ref, b_ref, act_hwc):
    """y = Conv2d_same(act) + b  (the ReLU was already applied by the caller).

    act_hwc : (h, w, cin)               pre-activated input, channels-last value
    pad_ref : (h+2*PAD, w+2*PAD, cin)   VMEM scratch for the zero-padded input
    pat_ref : (K*K*cin, h*w)            VMEM scratch for the im2col matrix
    w_ref   : (cout, K*K*cin)           flat weight index = (dh*K + dw)*cin + ci
    b_ref   : (cout, 1)
    returns : (cout, h*w) float32, lane-dense
    """
    h, w, cin = act_hwc.shape
    # "same" zero padding, done in-kernel (no wrapper jnp.pad glue).
    pad_ref[...] = jnp.zeros_like(pad_ref)
    pad_ref[PAD:PAD + h, PAD:PAD + w, :] = act_hwc
    # im2col: build one (K*K*cin, h*w) patch matrix -> a single deep MXU matmul
    # (instead of 25 matmuls with contraction depth cin).
    for dh in range(K):
        for dw in range(K):
            p = dh * K + dw
            piece = pad_ref[dh:dh + h, dw:dw + w, :]              # (h, w, cin)
            pat_ref[p * cin:(p + 1) * cin, :] = piece.reshape(h * w, cin).T
    y = jnp.dot(w_ref[...], pat_ref[...], preferred_element_type=jnp.float32)
    return y + b_ref[...]                                          # (cout, h*w)


def _max_pool_2x2(pool_ref, y, h, w):
    """2x2 max pool of a conv output y: (cout, h*w) lane-dense.

    pool_ref : (h//2, w, cout) VMEM scratch (holds the H-pooled map so the
               W-direction can be read back with stride-2 window loads).
    returns  : (h//2, w//2, cout) channels-last value.
    """
    cout = y.shape[0]
    g = y.T.reshape(h // 2, 2, w, cout)            # split H into row pairs
    zh = jnp.maximum(g[:, 0], g[:, 1])             # pooled along H
    pool_ref[...] = zh
    p0 = pool_ref[:, pl.ds(0, w // 2, 2), :]       # even columns
    p1 = pool_ref[:, pl.ds(1, w // 2, 2), :]       # odd columns
    return jnp.maximum(p0, p1)                     # (h//2, w//2, cout)


def _unet_kernel(x_ref, *refs, num_blocks):
    """Fused UNet forward for one batch element.

    refs = (w_0, b_0, ..., w_{nb-1}, b_{nb-1}, mt_0..mt_{nd-1}, o_ref,
            pad_0..pad_{nb-1}, pat_0..pat_{nb-1}, pool_0..pool_{nd-1})
    """
    nb = num_blocks
    num_down = nb // 2
    w_refs = [refs[2 * i] for i in range(nb)]
    b_refs = [refs[2 * i + 1] for i in range(nb)]
    mt_refs = refs[2 * nb:2 * nb + num_down]
    o_ref = refs[2 * nb + num_down]
    scratch = refs[2 * nb + num_down + 1:]
    pad_refs = scratch[:nb]
    pat_refs = scratch[nb:2 * nb]
    pool_refs = scratch[2 * nb:2 * nb + num_down]

    _, H, W, _ = x_ref.shape
    h, w = H, W

    # -------------------------- down path --------------------------------
    act = jnp.maximum(x_ref[0], 0.0)               # ReLU of the input (HWC)
    residuals = []                                 # [(value (C, h*w), h, w)]
    for i in range(num_down):
        y = _conv_block(pad_refs[i], pat_refs[i], w_refs[i], b_refs[i], act)
        residuals.append((y, h, w))                # saved pre-pool, pre-ReLU
        pooled = _max_pool_2x2(pool_refs[i], y, h, w)
        h, w = h // 2, w // 2
        act = jnp.maximum(pooled, 0.0)             # next block's ReLU

    # -------------------------- bottleneck -------------------------------
    y = _conv_block(pad_refs[num_down], pat_refs[num_down],
                    w_refs[num_down], b_refs[num_down], act)

    # --------------------------- up path ---------------------------------
    for j in range(num_down):
        blk = num_down + 1 + j
        res, rh, rw = residuals[num_down - 1 - j]
        # Bilinear upsample (align_corners=True) as one matmul with the
        # precomputed interpolation matrix, kept lane-dense:
        #   (C, hs*ws) @ MT -> (C, hd*wd)
        up = jnp.dot(y, mt_refs[j][...], preferred_element_type=jnp.float32)
        # Channel concat (upsampled, residual) fully in VMEM.
        if up.shape[0] == res.shape[0]:
            cat = jnp.stack([up, res], axis=0).reshape(2 * up.shape[0], rh * rw)
        else:  # not hit for the symmetric default config
            cat = jnp.concatenate([up, res], axis=0)
        a = jnp.maximum(cat, 0.0)                  # ReLU of the next ConvBlock
        act = a.T.reshape(rh, rw, a.shape[0])      # back to HWC for im2col
        y = _conv_block(pad_refs[blk], pat_refs[blk], w_refs[blk], b_refs[blk],
                        act)
        h, w = rh, rw

    o_ref[0] = y.astype(o_ref.dtype)               # (Cout, H*W), lane-dense


# ----------------------------------------------------------------------------
# Host-side helpers (config, params, interpolation matrices) and the wrapper.
# ----------------------------------------------------------------------------
def _interp_matrix(out_size, in_size):
    """align_corners=True linear interpolation matrix of shape (out, in)."""
    A = np.zeros((out_size, in_size), np.float32)
    if out_size == 1:
        A[:, 0] = 1.0
        return A
    for o in range(out_size):
        src = o * (in_size - 1) / (out_size - 1)
        i0 = min(int(np.floor(src)), in_size - 1)
        frac = src - i0
        A[o, i0] += 1.0 - frac
        if frac > 0.0:
            A[o, i0 + 1] += frac
    return A


def unet_in_out_channels(num_channels, num_blocks, factor_chan=2,
                         max_num_channels=256):
    assert num_blocks % 2 == 1, f"n_blocks={num_blocks} not odd."
    channel_list = [factor_chan ** i * num_channels
                    for i in range(num_blocks // 2 + 1)]
    channel_list = channel_list + channel_list[::-1]
    channel_list = (channel_list[:1]
                    + [min(c, max_num_channels) for c in channel_list[1:-1]]
                    + channel_list[-1:])
    io = list(zip(channel_list, channel_list[1:]))
    idcs = slice(len(io) // 2 + 1, len(io))
    io[idcs] = [(ic * 2, oc) for ic, oc in io[idcs]]
    return io


def init_params(key, in_out_channels):
    """PyTorch-like Conv2d init, weights pre-flattened to (cout, K*K*cin) with
    flat index (dh*K + dw)*cin + ci; biases as (cout, 1)."""
    params = []
    for cin, cout in in_out_channels:
        key, k1, k2 = jax.random.split(key, 3)
        bound = 1.0 / np.sqrt(cin * K * K)
        w = jax.random.uniform(k1, (cout, K * K * cin), jnp.float32, -bound, bound)
        b = jax.random.uniform(k2, (cout, 1), jnp.float32, -bound, bound)
        params.append((w, b))
    return params


def unet_forward(x, params, num_blocks):
    """x: (N, H, W, C) channels-last (module interface); returns (N, H, W, C_out)."""
    N, H, W, C0 = x.shape
    num_down = num_blocks // 2
    assert H % (1 << num_down) == 0 and W % (1 << num_down) == 0
    # in-kernel layout assumes every level's spatial extent stays a multiple of 8
    assert (H >> num_down) % 8 == 0 and (W >> num_down) % 8 == 0

    cins = [wb[0].shape[1] // (K * K) for wb in params]
    couts = [wb[0].shape[0] for wb in params]
    c_out = couts[-1]

    # spatial size of each conv block's *input*
    sizes = ([(H >> i, W >> i) for i in range(num_down + 1)]
             + [(H >> (num_down - 1 - j), W >> (num_down - 1 - j))
                for j in range(num_down)])

    # Precomputed bilinear (align_corners=True) interpolation matrices,
    # transposed so the upsample is a lane-dense right-multiplication.
    # TODO(synk): switch to the separable (A_h, A_w) form if the spatial size
    # grows enough for the Kronecker matrix to matter for VMEM.
    mts = []
    for j in range(num_down):
        hs, ws = H >> (num_down - j), W >> (num_down - j)
        hd, wd = H >> (num_down - 1 - j), W >> (num_down - 1 - j)
        m = np.kron(_interp_matrix(hd, hs), _interp_matrix(wd, ws))
        mts.append(jnp.asarray(m.T))                       # (hs*ws, hd*wd)

    flat_wb = [a for wb in params for a in wb]
    inputs = [x] + flat_wb + mts

    def _const_spec(a):
        zeros = (0,) * a.ndim
        return pl.BlockSpec(a.shape, lambda n, _z=zeros: _z)

    in_specs = ([pl.BlockSpec((1, H, W, C0), lambda n: (n, 0, 0, 0))]
                + [_const_spec(a) for a in flat_wb + mts])

    pad_scratch = [pltpu.VMEM((sizes[i][0] + 2 * PAD, sizes[i][1] + 2 * PAD,
                               cins[i]), jnp.float32)
                   for i in range(num_blocks)]
    pat_scratch = [pltpu.VMEM((K * K * cins[i], sizes[i][0] * sizes[i][1]),
                              jnp.float32)
                   for i in range(num_blocks)]
    pool_scratch = [pltpu.VMEM((sizes[i][0] // 2, sizes[i][1], couts[i]),
                               jnp.float32)
                    for i in range(num_down)]

    kernel = functools.partial(_unet_kernel, num_blocks=num_blocks)

    out = pl.pallas_call(
        kernel,
        out_shape=jax.ShapeDtypeStruct((N, c_out, H * W), jnp.float32),
        grid=(N,),
        in_specs=in_specs,
        out_specs=pl.BlockSpec((1, c_out, H * W), lambda n: (n, 0, 0)),
        scratch_shapes=pad_scratch + pat_scratch + pool_scratch,
        compiler_params=pltpu.CompilerParams(
            dimension_semantics=("parallel",)),  # v7x: batch over both TCs
    )(*inputs)

    # back to the module's channels-last interface (tiny layout plumbing)
    return out.reshape(N, c_out, H, W).transpose(0, 2, 3, 1)


if __name__ == "__main__":
    key = jax.random.PRNGKey(0)
    k_x, k_p = jax.random.split(key)

    N, H, W, C0 = 2, 16, 16, 4
    num_blocks = 3

    io_channels = unet_in_out_channels(C0, num_blocks)   # [(4, 8), (8, 8), (16, 4)]
    params = init_params(k_p, io_channels)
    x = jax.random.normal(k_x, (N, H, W, C0), jnp.float32)

    out = unet_forward(x, params, num_blocks)
    out = jax.block_until_ready(out)
    assert out.shape == (N, H, W, io_channels[-1][1]), out.shape
    assert bool(jnp.all(jnp.isfinite(out)))
    print("KERNEL_OK")
</pallas_src>

<mosaic_0001>
module attributes {stable_mosaic.version = 11 : i64} {
  func.func @_unet_kernel(%arg0: i32, %arg1: memref<1x16x16x4xf32, #tpu.memory_space<vmem>>, %arg2: memref<8x100xf32, #tpu.memory_space<vmem>>, %arg3: memref<8x1xf32, #tpu.memory_space<vmem>>, %arg4: memref<8x200xf32, #tpu.memory_space<vmem>>, %arg5: memref<8x1xf32, #tpu.memory_space<vmem>>, %arg6: memref<4x400xf32, #tpu.memory_space<vmem>>, %arg7: memref<4x1xf32, #tpu.memory_space<vmem>>, %arg8: memref<64x256xf32, #tpu.memory_space<vmem>>, %arg9: memref<1x4x256xf32, #tpu.memory_space<vmem>>, %arg10: memref<20x20x4xf32, #tpu.memory_space<vmem>>, %arg11: memref<12x12x8xf32, #tpu.memory_space<vmem>>, %arg12: memref<20x20x16xf32, #tpu.memory_space<vmem>>, %arg13: memref<100x256xf32, #tpu.memory_space<vmem>>, %arg14: memref<200x64xf32, #tpu.memory_space<vmem>>, %arg15: memref<400x256xf32, #tpu.memory_space<vmem>>, %arg16: memref<8x16x8xf32, #tpu.memory_space<vmem>>) attributes {dimension_semantics = [#tpu.dimension_semantics<parallel>], iteration_bounds = array<i64: 2>, scalar_prefetch = 0 : i64, scratch_operands = 7 : i64, tpu.core_type = #tpu.core_type<tc>, window_params = [{transform_indices = @transform_0, window_bounds = array<i64: 1, 16, 16, 4>}, {pipeline_mode = #tpu.pipeline_mode<synchronous>, transform_indices = @transform_1, window_bounds = array<i64: 8, 100>}, {pipeline_mode = #tpu.pipeline_mode<synchronous>, transform_indices = @transform_2, window_bounds = array<i64: 8, 1>}, {pipeline_mode = #tpu.pipeline_mode<synchronous>, transform_indices = @transform_3, window_bounds = array<i64: 8, 200>}, {pipeline_mode = #tpu.pipeline_mode<synchronous>, transform_indices = @transform_4, window_bounds = array<i64: 8, 1>}, {pipeline_mode = #tpu.pipeline_mode<synchronous>, transform_indices = @transform_5, window_bounds = array<i64: 4, 400>}, {pipeline_mode = #tpu.pipeline_mode<synchronous>, transform_indices = @transform_6, window_bounds = array<i64: 4, 1>}, {pipeline_mode = #tpu.pipeline_mode<synchronous>, transform_indices = @transform_7, window_bounds = array<i64: 64, 256>}, {transform_indices = @transform_8, window_bounds = array<i64: 1, 4, 256>}]} {
    %c0 = arith.constant 0 : index
    %c0_0 = arith.constant 0 : index
    %c0_1 = arith.constant 0 : index
    %c0_2 = arith.constant 0 : index
    %0 = vector.load %arg1[%c0, %c0_0, %c0_1, %c0_2] : memref<1x16x16x4xf32, #tpu.memory_space<vmem>>, vector<1x16x16x4xf32>
    %1 = vector.shape_cast %0 : vector<1x16x16x4xf32> to vector<16x16x4xf32>
    %cst = arith.constant 0.000000e+00 : f32
    %2 = vector.broadcast %cst : f32 to vector<16x16x4xf32>
    %3 = arith.maximumf %1, %2 : vector<16x16x4xf32>
    %cst_3 = arith.constant 0.000000e+00 : f32
    %4 = vector.broadcast %cst_3 : f32 to vector<20x20x4xf32>
    %c0_4 = arith.constant 0 : index
    %c0_5 = arith.constant 0 : index
    %c0_6 = arith.constant 0 : index
    %5 = vector.load %arg10[%c0_4, %c0_5, %c0_6] : memref<20x20x4xf32, #tpu.memory_space<vmem>>, vector<20x20x4xf32>
    tpu.vector_store %arg10[%c0_4, %c0_5, %c0_6], %4 {strides = array<i32>} : memref<20x20x4xf32, #tpu.memory_space<vmem>>, vector<20x20x4xf32>,
    %c2 = arith.constant 2 : index
    %c2_7 = arith.constant 2 : index
    %c0_8 = arith.constant 0 : index
    %6 = vector.load %arg10[%c2, %c2_7, %c0_8] : memref<20x20x4xf32, #tpu.memory_space<vmem>>, vector<16x16x4xf32>
    tpu.vector_store %arg10[%c2, %c2_7, %c0_8], %3 {strides = array<i32>} : memref<20x20x4xf32, #tpu.memory_space<vmem>>, vector<16x16x4xf32>,
    %c0_9 = arith.constant 0 : index
    %c0_10 = arith.constant 0 : index
    %c0_11 = arith.constant 0 : index
    %7 = vector.load %arg10[%c0_9, %c0_10, %c0_11] : memref<20x20x4xf32, #tpu.memory_space<vmem>>, vector<16x16x4xf32>
    %8 = vector.shape_cast %7 : vector<16x16x4xf32> to vector<256x4xf32>
    %9 = tpu.transpose %8, [1, 0] : vector<256x4xf32> -> vector<4x256xf32>
    %c0_12 = arith.constant 0 : index
    %c0_13 = arith.constant 0 : index
    %10 = vector.load %arg13[%c0_12, %c0_13] : memref<100x256xf32, #tpu.memory_space<vmem>>, vector<4x256xf32>
    tpu.vector_store %arg13[%c0_12, %c0_13], %9 {strides = array<i32>} : memref<100x256xf32, #tpu.memory_space<vmem>>, vector<4x256xf32>,
    %c0_14 = arith.constant 0 : index
    %c1 = arith.constant 1 : index
    %c0_15 = arith.constant 0 : index
    %11 = vector.load %arg10[%c0_14, %c1, %c0_15] : memref<20x20x4xf32, #tpu.memory_space<vmem>>, vector<16x16x4xf32>
    %12 = vector.shape_cast %11 : vector<16x16x4xf32> to vector<256x4xf32>
    %13 = tpu.transpose %12, [1, 0] : vector<256x4xf32> -> vector<4x256xf32>
    %c4 = arith.constant 4 : index
    %c0_16 = arith.constant 0 : index
    %14 = vector.load %arg13[%c4, %c0_16] : memref<100x256xf32, #tpu.memory_space<vmem>>, vector<4x256xf32>
    tpu.vector_store %arg13[%c4, %c0_16], %13 {strides = array<i32>} : memref<100x256xf32, #tpu.memory_space<vmem>>, vector<4x256xf32>,
    %c0_17 = arith.constant 0 : index
    %c2_18 = arith.constant 2 : index
    %c0_19 = arith.constant 0 : index
    %15 = vector.load %arg10[%c0_17, %c2_18, %c0_19] : memref<20x20x4xf32, #tpu.memory_space<vmem>>, vector<16x16x4xf32>
    %16 = vector.shape_cast %15 : vector<16x16x4xf32> to vector<256x4xf32>
    %17 = tpu.transpose %16, [1, 0] : vector<256x4xf32> -> vector<4x256xf32>
    %c8 = arith.constant 8 : index
    %c0_20 = arith.constant 0 : index
    %18 = vector.load %arg13[%c8, %c0_20] : memref<100x256xf32, #tpu.memory_space<vmem>>, vector<4x256xf32>
    tpu.vector_store %arg13[%c8, %c0_20], %17 {strides = array<i32>} : memref<100x256xf32, #tpu.memory_space<vmem>>, vector<4x256xf32>,
    %c0_21 = arith.constant 0 : index
    %c3 = arith.constant 3 : index
    %c0_22 = arith.constant 0 : index
    %19 = vector.load %arg10[%c0_21, %c3, %c0_22] : memref<20x20x4xf32, #tpu.memory_space<vmem>>, vector<16x16x4xf32>
    %20 = vector.shape_cast %19 : vector<16x16x4xf32> to vector<256x4xf32>
    %21 = tpu.transpose %20, [1, 0] : vector<256x4xf32> -> vector<4x256xf32>
    %c12 = arith.constant 12 : index
    %c0_23 = arith.constant 0 : index
    %22 = vector.load %arg13[%c12, %c0_23] : memref<100x256xf32, #tpu.memory_space<vmem>>, vector<4x256xf32>
    tpu.vector_store %arg13[%c12, %c0_23], %21 {strides = array<i32>} : memref<100x256xf32, #tpu.memory_space<vmem>>, vector<4x256xf32>,
    %c0_24 = arith.constant 0 : index
    %c4_25 = arith.constant 4 : index
    %c0_26 = arith.constant 0 : index
    %23 = vector.load %arg10[%c0_24, %c4_25, %c0_26] : memref<20x20x4xf32, #tpu.memory_space<vmem>>, vector<16x16x4xf32>
    %24 = vector.shape_cast %23 : vector<16x16x4xf32> to vector<256x4xf32>
    %25 = tpu.transpose %24, [1, 0] : vector<256x4xf32> -> vector<4x256xf32>
    %c16 = arith.constant 16 : index
    %c0_27 = arith.constant 0 : index
    %26 = vector.load %arg13[%c16, %c0_27] : memref<100x256xf32, #tpu.memory_space<vmem>>, vector<4x256xf32>
    tpu.vector_store %arg13[%c16, %c0_27], %25 {strides = array<i32>} : memref<100x256xf32, #tpu.memory_space<vmem>>, vector<4x256xf32>,
    %c1_28 = arith.constant 1 : index
    %c0_29 = arith.constant 0 : index
    %c0_30 = arith.constant 0 : index
    %27 = vector.load %arg10[%c1_28, %c0_29, %c0_30] : memref<20x20x4xf32, #tpu.memory_space<vmem>>, vector<16x16x4xf32>
    %28 = vector.shape_cast %27 : vector<16x16x4xf32> to vector<256x4xf32>
    %29 = tpu.transpose %28, [1, 0] : vector<256x4xf32> -> vector<4x256xf32>
    %c20 = arith.constant 20 : index
    %c0_31 = arith.constant 0 : index
    %30 = vector.load %arg13[%c20, %c0_31] : memref<100x256xf32, #tpu.memory_space<vmem>>, vector<4x256xf32>
    tpu.vector_store %arg13[%c20, %c0_31], %29 {strides = array<i32>} : memref<100x256xf32, #tpu.memory_space<vmem>>, vector<4x256xf32>,
    %c1_32 = arith.constant 1 : index
    %c1_33 = arith.constant 1 : index
    %c0_34 = arith.constant 0 : index
    %31 = vector.load %arg10[%c1_32, %c1_33, %c0_34] : memref<20x20x4xf32, #tpu.memory_space<vmem>>, vector<16x16x4xf32>
    %32 = vector.shape_cast %31 : vector<16x16x4xf32> to vector<256x4xf32>
    %33 = tpu.transpose %32, [1, 0] : vector<256x4xf32> -> vector<4x256xf32>
    %c24 = arith.constant 24 : index
    %c0_35 = arith.constant 0 : index
    %34 = vector.load %arg13[%c24, %c0_35] : memref<100x256xf32, #tpu.memory_space<vmem>>, vector<4x256xf32>
    tpu.vector_store %arg13[%c24, %c0_35], %33 {strides = array<i32>} : memref<100x256xf32, #tpu.memory_space<vmem>>, vector<4x256xf32>,
    %c1_36 = arith.constant 1 : index
    %c2_37 = arith.constant 2 : index
    %c0_38 = arith.constant 0 : index
    %35 = vector.load %arg10[%c1_36, %c2_37, %c0_38] : memref<20x20x4xf32, #tpu.memory_space<vmem>>, vector<16x16x4xf32>
    %36 = vector.shape_cast %35 : vector<16x16x4xf32> to vector<256x4xf32>
    %37 = tpu.transpose %36, [1, 0] : vector<256x4xf32> -> vector<4x256xf32>
    %c28 = arith.constant 28 : index
    %c0_39 = arith.constant 0 : index
    %38 = vector.load %arg13[%c28, %c0_39] : memref<100x256xf32, #tpu.memory_space<vmem>>, vector<4x256xf32>
    tpu.vector_store %arg13[%c28, %c0_39], %37 {strides = array<i32>} : memref<100x256xf32, #tpu.memory_space<vmem>>, vector<4x256xf32>,
    %c1_40 = arith.constant 1 : index
    %c3_41 = arith.constant 3 : index
    %c0_42 = arith.constant 0 : index
    %39 = vector.load %arg10[%c1_40, %c3_41, %c0_42] : memref<20x20x4xf32, #tpu.memory_space<vmem>>, vector<16x16x4xf32>
    %40 = vector.shape_cast %39 : vector<16x16x4xf32> to vector<256x4xf32>
    %41 = tpu.transpose %40, [1, 0] : vector<256x4xf32> -> vector<4x256xf32>
    %c32 = arith.constant 32 : index
    %c0_43 = arith.constant 0 : index
    %42 = vector.load %arg13[%c32, %c0_43] : memref<100x256xf32, #tpu.memory_space<vmem>>, vector<4x256xf32>
    tpu.vector_store %arg13[%c32, %c0_43], %41 {strides = array<i32>} : memref<100x256xf32, #tpu.memory_space<vmem>>, vector<4x256xf32>,
    %c1_44 = arith.constant 1 : index
    %c4_45 = arith.constant 4 : index
    %c0_46 = arith.constant 0 : index
    %43 = vector.load %arg10[%c1_44, %c4_45, %c0_46] : memref<20x20x4xf32, #tpu.memory_space<vmem>>, vector<16x16x4xf32>
    %44 = vector.shape_cast %43 : vector<16x16x4xf32> to vector<256x4xf32>
    %45 = tpu.transpose %44, [1, 0] : vector<256x4xf32> -> vector<4x256xf32>
    %c36 = arith.constant 36 : index
    %c0_47 = arith.constant 0 : index
    %46 = vector.load %arg13[%c36, %c0_47] : memref<100x256xf32, #tpu.memory_space<vmem>>, vector<4x256xf32>
    tpu.vector_store %arg13[%c36, %c0_47], %45 {strides = array<i32>} : memref<100x256xf32, #tpu.memory_space<vmem>>, vector<4x256xf32>,
    %c2_48 = arith.constant 2 : index
    %c0_49 = arith.constant 0 : index
    %c0_50 = arith.constant 0 : index
    %47 = vector.load %arg10[%c2_48, %c0_49, %c0_50] : memref<20x20x4xf32, #tpu.memory_space<vmem>>, vector<16x16x4xf32>
    %48 = vector.shape_cast %47 : vector<16x16x4xf32> to vector<256x4xf32>
    %49 = tpu.transpose %48, [1, 0] : vector<256x4xf32> -> vector<4x256xf32>
    %c40 = arith.constant 40 : index
    %c0_51 = arith.constant 0 : index
    %50 = vector.load %arg13[%c40, %c0_51] : memref<100x256xf32, #tpu.memory_space<vmem>>, vector<4x256xf32>
    tpu.vector_store %arg13[%c40, %c0_51], %49 {strides = array<i32>} : memref<100x256xf32, #tpu.memory_space<vmem>>, vector<4x256xf32>,
    %c2_52 = arith.constant 2 : index
    %c1_53 = arith.constant 1 : index
    %c0_54 = arith.constant 0 : index
    %51 = vector.load %arg10[%c2_52, %c1_53, %c0_54] : memref<20x20x4xf32, #tpu.memory_space<vmem>>, vector<16x16x4xf32>
    %52 = vector.shape_cast %51 : vector<16x16x4xf32> to vector<256x4xf32>
    %53 = tpu.transpose %52, [1, 0] : vector<256x4xf32> -> vector<4x256xf32>
    %c44 = arith.constant 44 : index
    %c0_55 = arith.constant 0 : index
    %54 = vector.load %arg13[%c44, %c0_55] : memref<100x256xf32, #tpu.memory_space<vmem>>, vector<4x256xf32>
    tpu.vector_store %arg13[%c44, %c0_55], %53 {strides = array<i32>} : memref<100x256xf32, #tpu.memory_space<vmem>>, vector<4x256xf32>,
    %c2_56 = arith.constant 2 : index
    %c2_57 = arith.constant 2 : index
    %c0_58 = arith.constant 0 : index
    %55 = vector.load %arg10[%c2_56, %c2_57, %c0_58] : memref<20x20x4xf32, #tpu.memory_space<vmem>>, vector<16x16x4xf32>
    %56 = vector.shape_cast %55 : vector<16x16x4xf32> to vector<256x4xf32>
    %57 = tpu.transpose %56, [1, 0] : vector<256x4xf32> -> vector<4x256xf32>
    %c48 = arith.constant 48 : index
    %c0_59 = arith.constant 0 : index
    %58 = vector.load %arg13[%c48, %c0_59] : memref<100x256xf32, #tpu.memory_space<vmem>>, vector<4x256xf32>
    tpu.vector_store %arg13[%c48, %c0_59], %57 {strides = array<i32>} : memref<100x256xf32, #tpu.memory_space<vmem>>, vector<4x256xf32>,
    %c2_60 = arith.constant 2 : index
    %c3_61 = arith.constant 3 : index
    %c0_62 = arith.constant 0 : index
    %59 = vector.load %arg10[%c2_60, %c3_61, %c0_62] : memref<20x20x4xf32, #tpu.memory_space<vmem>>, vector<16x16x4xf32>
    %60 = vector.shape_cast %59 : vector<16x16x4xf32> to vector<256x4xf32>
    %61 = tpu.transpose %60, [1, 0] : vector<256x4xf32> -> vector<4x256xf32>
    %c52 = arith.constant 52 : index
    %c0_63 = arith.constant 0 : index
    %62 = vector.load %arg13[%c52, %c0_63] : memref<100x256xf32, #tpu.memory_space<vmem>>, vector<4x256xf32>
    tpu.vector_store %arg13[%c52, %c0_63], %61 {strides = array<i32>} : memref<100x256xf32, #tpu.memory_space<vmem>>, vector<4x256xf32>,
    %c2_64 = arith.constant 2 : index
    %c4_65 = arith.constant 4 : index
    %c0_66 = arith.constant 0 : index
    %63 = vector.load %arg10[%c2_64, %c4_65, %c0_66] : memref<20x20x4xf32, #tpu.memory_space<vmem>>, vector<16x16x4xf32>
    %64 = vector.shape_cast %63 : vector<16x16x4xf32> to vector<256x4xf32>
    %65 = tpu.transpose %64, [1, 0] : vector<256x4xf32> -> vector<4x256xf32>
    %c56 = arith.constant 56 : index
    %c0_67 = arith.constant 0 : index
    %66 = vector.load %arg13[%c56, %c0_67] : memref<100x256xf32, #tpu.memory_space<vmem>>, vector<4x256xf32>
    tpu.vector_store %arg13[%c56, %c0_67], %65 {strides = array<i32>} : memref<100x256xf32, #tpu.memory_space<vmem>>, vector<4x256xf32>,
    %c3_68 = arith.constant 3 : index
    %c0_69 = arith.constant 0 : index
    %c0_70 = arith.constant 0 : index
    %67 = vector.load %arg10[%c3_68, %c0_69, %c0_70] : memref<20x20x4xf32, #tpu.memory_space<vmem>>, vector<16x16x4xf32>
    %68 = vector.shape_cast %67 : vector<16x16x4xf32> to vector<256x4xf32>
    %69 = tpu.transpose %68, [1, 0] : vector<256x4xf32> -> vector<4x256xf32>
    %c60 = arith.constant 60 : index
    %c0_71 = arith.constant 0 : index
    %70 = vector.load %arg13[%c60, %c0_71] : memref<100x256xf32, #tpu.memory_space<vmem>>, vector<4x256xf32>
    tpu.vector_store %arg13[%c60, %c0_71], %69 {strides = array<i32>} : memref<100x256xf32, #tpu.memory_space<vmem>>, vector<4x256xf32>,
    %c3_72 = arith.constant 3 : index
    %c1_73 = arith.constant 1 : index
    %c0_74 = arith.constant 0 : index
    %71 = vector.load %arg10[%c3_72, %c1_73, %c0_74] : memref<20x20x4xf32, #tpu.memory_space<vmem>>, vector<16x16x4xf32>
    %72 = vector.shape_cast %71 : vector<16x16x4xf32> to vector<256x4xf32>
    %73 = tpu.transpose %72, [1, 0] : vector<256x4xf32> -> vector<4x256xf32>
    %c64 = arith.constant 64 : index
    %c0_75 = arith.constant 0 : index
    %74 = vector.load %arg13[%c64, %c0_75] : memref<100x256xf32, #tpu.memory_space<vmem>>, vector<4x256xf32>
    tpu.vector_store %arg13[%c64, %c0_75], %73 {strides = array<i32>} : memref<100x256xf32, #tpu.memory_space<vmem>>, vector<4x256xf32>,
    %c3_76 = arith.constant 3 : index
    %c2_77 = arith.constant 2 : index
    %c0_78 = arith.constant 0 : index
    %75 = vector.load %arg10[%c3_76, %c2_77, %c0_78] : memref<20x20x4xf32, #tpu.memory_space<vmem>>, vector<16x16x4xf32>
    %76 = vector.shape_cast %75 : vector<16x16x4xf32> to vector<256x4xf32>
    %77 = tpu.transpose %76, [1, 0] : vector<256x4xf32> -> vector<4x256xf32>
    %c68 = arith.constant 68 : index
    %c0_79 = arith.constant 0 : index
    %78 = vector.load %arg13[%c68, %c0_79] : memref<100x256xf32, #tpu.memory_space<vmem>>, vector<4x256xf32>
    tpu.vector_store %arg13[%c68, %c0_79], %77 {strides = array<i32>} : memref<100x256xf32, #tpu.memory_space<vmem>>, vector<4x256xf32>,
    %c3_80 = arith.constant 3 : index
    %c3_81 = arith.constant 3 : index
    %c0_82 = arith.constant 0 : index
    %79 = vector.load %arg10[%c3_80, %c3_81, %c0_82] : memref<20x20x4xf32, #tpu.memory_space<vmem>>, vector<16x16x4xf32>
    %80 = vector.shape_cast %79 : vector<16x16x4xf32> to vector<256x4xf32>
    %81 = tpu.transpose %80, [1, 0] : vector<256x4xf32> -> vector<4x256xf32>
    %c72 = arith.constant 72 : index
    %c0_83 = arith.constant 0 : index
    %82 = vector.load %arg13[%c72, %c0_83] : memref<100x256xf32, #tpu.memory_space<vmem>>, vector<4x256xf32>
    tpu.vector_store %arg13[%c72, %c0_83], %81 {strides = array<i32>} : memref<100x256xf32, #tpu.memory_space<vmem>>, vector<4x256xf32>,
    %c3_84 = arith.constant 3 : index
    %c4_85 = arith.constant 4 : index
    %c0_86 = arith.constant 0 : index
    %83 = vector.load %arg10[%c3_84, %c4_85, %c0_86] : memref<20x20x4xf32, #tpu.memory_space<vmem>>, vector<16x16x4xf32>
    %84 = vector.shape_cast %83 : vector<16x16x4xf32> to vector<256x4xf32>
    %85 = tpu.transpose %84, [1, 0] : vector<256x4xf32> -> vector<4x256xf32>
    %c76 = arith.constant 76 : index
    %c0_87 = arith.constant 0 : index
    %86 = vector.load %arg13[%c76, %c0_87] : memref<100x256xf32, #tpu.memory_space<vmem>>, vector<4x256xf32>
    tpu.vector_store %arg13[%c76, %c0_87], %85 {strides = array<i32>} : memref<100x256xf32, #tpu.memory_space<vmem>>, vector<4x256xf32>,
    %c4_88 = arith.constant 4 : index
    %c0_89 = arith.constant 0 : index
    %c0_90 = arith.constant 0 : index
    %87 = vector.load %arg10[%c4_88, %c0_89, %c0_90] : memref<20x20x4xf32, #tpu.memory_space<vmem>>, vector<16x16x4xf32>
    %88 = vector.shape_cast %87 : vector<16x16x4xf32> to vector<256x4xf32>
    %89 = tpu.transpose %88, [1, 0] : vector<256x4xf32> -> vector<4x256xf32>
    %c80 = arith.constant 80 : index
    %c0_91 = arith.constant 0 : index
    %90 = vector.load %arg13[%c80, %c0_91] : memref<100x256xf32, #tpu.memory_space<vmem>>, vector<4x256xf32>
    tpu.vector_store %arg13[%c80, %c0_91], %89 {strides = array<i32>} : memref<100x256xf32, #tpu.memory_space<vmem>>, vector<4x256xf32>,
    %c4_92 = arith.constant 4 : index
    %c1_93 = arith.constant 1 : index
    %c0_94 = arith.constant 0 : index
    %91 = vector.load %arg10[%c4_92, %c1_93, %c0_94] : memref<20x20x4xf32, #tpu.memory_space<vmem>>, vector<16x16x4xf32>
    %92 = vector.shape_cast %91 : vector<16x16x4xf32> to vector<256x4xf32>
    %93 = tpu.transpose %92, [1, 0] : vector<256x4xf32> -> vector<4x256xf32>
    %c84 = arith.constant 84 : index
    %c0_95 = arith.constant 0 : index
    %94 = vector.load %arg13[%c84, %c0_95] : memref<100x256xf32, #tpu.memory_space<vmem>>, vector<4x256xf32>
    tpu.vector_store %arg13[%c84, %c0_95], %93 {strides = array<i32>} : memref<100x256xf32, #tpu.memory_space<vmem>>, vector<4x256xf32>,
    %c4_96 = arith.constant 4 : index
    %c2_97 = arith.constant 2 : index
    %c0_98 = arith.constant 0 : index
    %95 = vector.load %arg10[%c4_96, %c2_97, %c0_98] : memref<20x20x4xf32, #tpu.memory_space<vmem>>, vector<16x16x4xf32>
    %96 = vector.shape_cast %95 : vector<16x16x4xf32> to vector<256x4xf32>
    %97 = tpu.transpose %96, [1, 0] : vector<256x4xf32> -> vector<4x256xf32>
    %c88 = arith.constant 88 : index
    %c0_99 = arith.constant 0 : index
    %98 = vector.load %arg13[%c88, %c0_99] : memref<100x256xf32, #tpu.memory_space<vmem>>, vector<4x256xf32>
    tpu.vector_store %arg13[%c88, %c0_99], %97 {strides = array<i32>} : memref<100x256xf32, #tpu.memory_space<vmem>>, vector<4x256xf32>,
    %c4_100 = arith.constant 4 : index
    %c3_101 = arith.constant 3 : index
    %c0_102 = arith.constant 0 : index
    %99 = vector.load %arg10[%c4_100, %c3_101, %c0_102] : memref<20x20x4xf32, #tpu.memory_space<vmem>>, vector<16x16x4xf32>
    %100 = vector.shape_cast %99 : vector<16x16x4xf32> to vector<256x4xf32>
    %101 = tpu.transpose %100, [1, 0] : vector<256x4xf32> -> vector<4x256xf32>
    %c92 = arith.constant 92 : index
    %c0_103 = arith.constant 0 : index
    %102 = vector.load %arg13[%c92, %c0_103] : memref<100x256xf32, #tpu.memory_space<vmem>>, vector<4x256xf32>
    tpu.vector_store %arg13[%c92, %c0_103], %101 {strides = array<i32>} : memref<100x256xf32, #tpu.memory_space<vmem>>, vector<4x256xf32>,
    %c4_104 = arith.constant 4 : index
    %c4_105 = arith.constant 4 : index
    %c0_106 = arith.constant 0 : index
    %103 = vector.load %arg10[%c4_104, %c4_105, %c0_106] : memref<20x20x4xf32, #tpu.memory_space<vmem>>, vector<16x16x4xf32>
    %104 = vector.shape_cast %103 : vector<16x16x4xf32> to vector<256x4xf32>
    %105 = tpu.transpose %104, [1, 0] : vector<256x4xf32> -> vector<4x256xf32>
    %c96 = arith.constant 96 : index
    %c0_107 = arith.constant 0 : index
    %106 = vector.load %arg13[%c96, %c0_107] : memref<100x256xf32, #tpu.memory_space<vmem>>, vector<4x256xf32>
    tpu.vector_store %arg13[%c96, %c0_107], %105 {strides = array<i32>} : memref<100x256xf32, #tpu.memory_space<vmem>>, vector<4x256xf32>,
    %c0_108 = arith.constant 0 : index
    %c0_109 = arith.constant 0 : index
    %107 = vector.load %arg2[%c0_108, %c0_109] : memref<8x100xf32, #tpu.memory_space<vmem>>, vector<8x100xf32>
    %c0_110 = arith.constant 0 : index
    %c0_111 = arith.constant 0 : index
    %108 = vector.load %arg13[%c0_110, %c0_111] : memref<100x256xf32, #tpu.memory_space<vmem>>, vector<100x256xf32>
    %cst_112 = arith.constant dense<0.000000e+00> : vector<8x256xf32>
    %109 = tpu.matmul %107, %108, %cst_112 {dimension_numbers = #tpu.dot_dimension_numbers<[1], [0], [0], [1], [0, 0, 1, 1], [], []>} : vector<8x100xf32>, vector<100x256xf32>, vector<8x256xf32> -> vector<8x256xf32>
    %c0_113 = arith.constant 0 : index
    %c0_114 = arith.constant 0 : index
    %110 = vector.load %arg3[%c0_113, %c0_114] : memref<8x1xf32, #tpu.memory_space<vmem>>, vector<8x1xf32>
    %111 = vector.broadcast %110 : vector<8x1xf32> to vector<8x256xf32>
    %112 = arith.addf %109, %111 : vector<8x256xf32>
    %113 = tpu.transpose %112, [1, 0] : vector<8x256xf32> -> vector<256x8xf32>
    %114 = vector.shape_cast %113 : vector<256x8xf32> to vector<8x2x16x8xf32>
    %115 = vector.extract_strided_slice %114 {offsets = [0, 0, 0, 0], sizes = [8, 1, 16, 8], strides = [1, 1, 1, 1]} : vector<8x2x16x8xf32> to vector<8x1x16x8xf32>
    %116 = vector.shape_cast %115 : vector<8x1x16x8xf32> to vector<8x16x8xf32>
    %117 = vector.extract_strided_slice %114 {offsets = [0, 1, 0, 0], sizes = [8, 1, 16, 8], strides = [1, 1, 1, 1]} : vector<8x2x16x8xf32> to vector<8x1x16x8xf32>
    %118 = vector.shape_cast %117 : vector<8x1x16x8xf32> to vector<8x16x8xf32>
    %119 = arith.maximumf %116, %118 : vector<8x16x8xf32>
    %c0_115 = arith.constant 0 : index
    %c0_116 = arith.constant 0 : index
    %c0_117 = arith.constant 0 : index
    %120 = vector.load %arg16[%c0_115, %c0_116, %c0_117] : memref<8x16x8xf32, #tpu.memory_space<vmem>>, vector<8x16x8xf32>
    tpu.vector_store %arg16[%c0_115, %c0_116, %c0_117], %119 {strides = array<i32>} : memref<8x16x8xf32, #tpu.memory_space<vmem>>, vector<8x16x8xf32>,
    %c0_118 = arith.constant 0 : index
    %c0_119 = arith.constant 0 : index
    %c0_120 = arith.constant 0 : index
    %121 = tpu.strided_load %arg16[%c0_118, %c0_119, %c0_120] {strides = array<i32: 1, 2, 1>} : memref<8x16x8xf32, #tpu.memory_space<vmem>>, vector<8x8x8xf32>
    %c0_121 = arith.constant 0 : index
    %c1_122 = arith.constant 1 : index
    %c0_123 = arith.constant 0 : index
    %122 = tpu.strided_load %arg16[%c0_121, %c1_122, %c0_123] {strides = array<i32: 1, 2, 1>} : memref<8x16x8xf32, #tpu.memory_space<vmem>>, vector<8x8x8xf32>
    %123 = arith.maximumf %121, %122 : vector<8x8x8xf32>
    %cst_124 = arith.constant 0.000000e+00 : f32
    %124 = vector.broadcast %cst_124 : f32 to vector<8x8x8xf32>
    %125 = arith.maximumf %123, %124 : vector<8x8x8xf32>
    %cst_125 = arith.constant 0.000000e+00 : f32
    %126 = vector.broadcast %cst_125 : f32 to vector<12x12x8xf32>
    %c0_126 = arith.constant 0 : index
    %c0_127 = arith.constant 0 : index
    %c0_128 = arith.constant 0 : index
    %127 = vector.load %arg11[%c0_126, %c0_127, %c0_128] : memref<12x12x8xf32, #tpu.memory_space<vmem>>, vector<12x12x8xf32>
    tpu.vector_store %arg11[%c0_126, %c0_127, %c0_128], %126 {strides = array<i32>} : memref<12x12x8xf32, #tpu.memory_space<vmem>>, vector<12x12x8xf32>,
    %c2_129 = arith.constant 2 : index
    %c2_130 = arith.constant 2 : index
    %c0_131 = arith.constant 0 : index
    %128 = vector.load %arg11[%c2_129, %c2_130, %c0_131] : memref<12x12x8xf32, #tpu.memory_space<vmem>>, vector<8x8x8xf32>
    tpu.vector_store %arg11[%c2_129, %c2_130, %c0_131], %125 {strides = array<i32>} : memref<12x12x8xf32, #tpu.memory_space<vmem>>, vector<8x8x8xf32>,
    %c0_132 = arith.constant 0 : index
    %c0_133 = arith.constant 0 : index
    %c0_134 = arith.constant 0 : index
    %129 = vector.load %arg11[%c0_132, %c0_133, %c0_134] : memref<12x12x8xf32, #tpu.memory_space<vmem>>, vector<8x8x8xf32>
    %130 = vector.shape_cast %129 : vector<8x8x8xf32> to vector<64x8xf32>
    %131 = tpu.transpose %130, [1, 0] : vector<64x8xf32> -> vector<8x64xf32>
    %c0_135 = arith.constant 0 : index
    %c0_136 = arith.constant 0 : index
    %132 = vector.load %arg14[%c0_135, %c0_136] : memref<200x64xf32, #tpu.memory_space<vmem>>, vector<8x64xf32>
    tpu.vector_store %arg14[%c0_135, %c0_136], %131 {strides = array<i32>} : memref<200x64xf32, #tpu.memory_space<vmem>>, vector<8x64xf32>,
    %c0_137 = arith.constant 0 : index
    %c1_138 = arith.constant 1 : index
    %c0_139 = arith.constant 0 : index
    %133 = vector.load %arg11[%c0_137, %c1_138, %c0_139] : memref<12x12x8xf32, #tpu.memory_space<vmem>>, vector<8x8x8xf32>
    %134 = vector.shape_cast %133 : vector<8x8x8xf32> to vector<64x8xf32>
    %135 = tpu.transpose %134, [1, 0] : vector<64x8xf32> -> vector<8x64xf32>
    %c8_140 = arith.constant 8 : index
    %c0_141 = arith.constant 0 : index
    %136 = vector.load %arg14[%c8_140, %c0_141] : memref<200x64xf32, #tpu.memory_space<vmem>>, vector<8x64xf32>
    tpu.vector_store %arg14[%c8_140, %c0_141], %135 {strides = array<i32>} : memref<200x64xf32, #tpu.memory_space<vmem>>, vector<8x64xf32>,
    %c0_142 = arith.constant 0 : index
    %c2_143 = arith.constant 2 : index
    %c0_144 = arith.constant 0 : index
    %137 = vector.load %arg11[%c0_142, %c2_143, %c0_144] : memref<12x12x8xf32, #tpu.memory_space<vmem>>, vector<8x8x8xf32>
    %138 = vector.shape_cast %137 : vector<8x8x8xf32> to vector<64x8xf32>
    %139 = tpu.transpose %138, [1, 0] : vector<64x8xf32> -> vector<8x64xf32>
    %c16_145 = arith.constant 16 : index
    %c0_146 = arith.constant 0 : index
    %140 = vector.load %arg14[%c16_145, %c0_146] : memref<200x64xf32, #tpu.memory_space<vmem>>, vector<8x64xf32>
    tpu.vector_store %arg14[%c16_145, %c0_146], %139 {strides = array<i32>} : memref<200x64xf32, #tpu.memory_space<vmem>>, vector<8x64xf32>,
    %c0_147 = arith.constant 0 : index
    %c3_148 = arith.constant 3 : index
    %c0_149 = arith.constant 0 : index
    %141 = vector.load %arg11[%c0_147, %c3_148, %c0_149] : memref<12x12x8xf32, #tpu.memory_space<vmem>>, vector<8x8x8xf32>
    %142 = vector.shape_cast %141 : vector<8x8x8xf32> to vector<64x8xf32>
    %143 = tpu.transpose %142, [1, 0] : vector<64x8xf32> -> vector<8x64xf32>
    %c24_150 = arith.constant 24 : index
    %c0_151 = arith.constant 0 : index
    %144 = vector.load %arg14[%c24_150, %c0_151] : memref<200x64xf32, #tpu.memory_space<vmem>>, vector<8x64xf32>
    tpu.vector_store %arg14[%c24_150, %c0_151], %143 {strides = array<i32>} : memref<200x64xf32, #tpu.memory_space<vmem>>, vector<8x64xf32>,
    %c0_152 = arith.constant 0 : index
    %c4_153 = arith.constant 4 : index
    %c0_154 = arith.constant 0 : index
    %145 = vector.load %arg11[%c0_152, %c4_153, %c0_154] : memref<12x12x8xf32, #tpu.memory_space<vmem>>, vector<8x8x8xf32>
    %146 = vector.shape_cast %145 : vector<8x8x8xf32> to vector<64x8xf32>
    %147 = tpu.transpose %146, [1, 0] : vector<64x8xf32> -> vector<8x64xf32>
    %c32_155 = arith.constant 32 : index
    %c0_156 = arith.constant 0 : index
    %148 = vector.load %arg14[%c32_155, %c0_156] : memref<200x64xf32, #tpu.memory_space<vmem>>, vector<8x64xf32>
    tpu.vector_store %arg14[%c32_155, %c0_156], %147 {strides = array<i32>} : memref<200x64xf32, #tpu.memory_space<vmem>>, vector<8x64xf32>,
    %c1_157 = arith.constant 1 : index
    %c0_158 = arith.constant 0 : index
    %c0_159 = arith.constant 0 : index
    %149 = vector.load %arg11[%c1_157, %c0_158, %c0_159] : memref<12x12x8xf32, #tpu.memory_space<vmem>>, vector<8x8x8xf32>
    %150 = vector.shape_cast %149 : vector<8x8x8xf32> to vector<64x8xf32>
    %151 = tpu.transpose %150, [1, 0] : vector<64x8xf32> -> vector<8x64xf32>
    %c40_160 = arith.constant 40 : index
    %c0_161 = arith.constant 0 : index
    %152 = vector.load %arg14[%c40_160, %c0_161] : memref<200x64xf32, #tpu.memory_space<vmem>>, vector<8x64xf32>
    tpu.vector_store %arg14[%c40_160, %c0_161], %151 {strides = array<i32>} : memref<200x64xf32, #tpu.memory_space<vmem>>, vector<8x64xf32>,
    %c1_162 = arith.constant 1 : index
    %c1_163 = arith.constant 1 : index
    %c0_164 = arith.constant 0 : index
    %153 = vector.load %arg11[%c1_162, %c1_163, %c0_164] : memref<12x12x8xf32, #tpu.memory_space<vmem>>, vector<8x8x8xf32>
    %154 = vector.shape_cast %153 : vector<8x8x8xf32> to vector<64x8xf32>
    %155 = tpu.transpose %154, [1, 0] : vector<64x8xf32> -> vector<8x64xf32>
    %c48_165 = arith.constant 48 : index
    %c0_166 = arith.constant 0 : index
    %156 = vector.load %arg14[%c48_165, %c0_166] : memref<200x64xf32, #tpu.memory_space<vmem>>, vector<8x64xf32>
    tpu.vector_store %arg14[%c48_165, %c0_166], %155 {strides = array<i32>} : memref<200x64xf32, #tpu.memory_space<vmem>>, vector<8x64xf32>,
    %c1_167 = arith.constant 1 : index
    %c2_168 = arith.constant 2 : index
    %c0_169 = arith.constant 0 : index
    %157 = vector.load %arg11[%c1_167, %c2_168, %c0_169] : memref<12x12x8xf32, #tpu.memory_space<vmem>>, vector<8x8x8xf32>
    %158 = vector.shape_cast %157 : vector<8x8x8xf32> to vector<64x8xf32>
    %159 = tpu.transpose %158, [1, 0] : vector<64x8xf32> -> vector<8x64xf32>
    %c56_170 = arith.constant 56 : index
    %c0_171 = arith.constant 0 : index
    %160 = vector.load %arg14[%c56_170, %c0_171] : memref<200x64xf32, #tpu.memory_space<vmem>>, vector<8x64xf32>
    tpu.vector_store %arg14[%c56_170, %c0_171], %159 {strides = array<i32>} : memref<200x64xf32, #tpu.memory_space<vmem>>, vector<8x64xf32>,
    %c1_172 = arith.constant 1 : index
    %c3_173 = arith.constant 3 : index
    %c0_174 = arith.constant 0 : index
    %161 = vector.load %arg11[%c1_172, %c3_173, %c0_174] : memref<12x12x8xf32, #tpu.memory_space<vmem>>, vector<8x8x8xf32>
    %162 = vector.shape_cast %161 : vector<8x8x8xf32> to vector<64x8xf32>
    %163 = tpu.transpose %162, [1, 0] : vector<64x8xf32> -> vector<8x64xf32>
    %c64_175 = arith.constant 64 : index
    %c0_176 = arith.constant 0 : index
    %164 = vector.load %arg14[%c64_175, %c0_176] : memref<200x64xf32, #tpu.memory_space<vmem>>, vector<8x64xf32>
    tpu.vector_store %arg14[%c64_175, %c0_176], %163 {strides = array<i32>} : memref<200x64xf32, #tpu.memory_space<vmem>>, vector<8x64xf32>,
    %c1_177 = arith.constant 1 : index
    %c4_178 = arith.constant 4 : index
    %c0_179 = arith.constant 0 : index
    %165 = vector.load %arg11[%c1_177, %c4_178, %c0_179] : memref<12x12x8xf32, #tpu.memory_space<vmem>>, vector<8x8x8xf32>
    %166 = vector.shape_cast %165 : vector<8x8x8xf32> to vector<64x8xf32>
    %167 = tpu.transpose %166, [1, 0] : vector<64x8xf32> -> vector<8x64xf32>
    %c72_180 = arith.constant 72 : index
    %c0_181 = arith.constant 0 : index
    %168 = vector.load %arg14[%c72_180, %c0_181] : memref<200x64xf32, #tpu.memory_space<vmem>>, vector<8x64xf32>
    tpu.vector_store %arg14[%c72_180, %c0_181], %167 {strides = array<i32>} : memref<200x64xf32, #tpu.memory_space<vmem>>, vector<8x64xf32>,
    %c2_182 = arith.constant 2 : index
    %c0_183 = arith.constant 0 : index
    %c0_184 = arith.constant 0 : index
    %169 = vector.load %arg11[%c2_182, %c0_183, %c0_184] : memref<12x12x8xf32, #tpu.memory_space<vmem>>, vector<8x8x8xf32>
    %170 = vector.shape_cast %169 : vector<8x8x8xf32> to vector<64x8xf32>
    %171 = tpu.transpose %170, [1, 0] : vector<64x8xf32> -> vector<8x64xf32>
    %c80_185 = arith.constant 80 : index
    %c0_186 = arith.constant 0 : index
    %172 = vector.load %arg14[%c80_185, %c0_186] : memref<200x64xf32, #tpu.memory_space<vmem>>, vector<8x64xf32>
    tpu.vector_store %arg14[%c80_185, %c0_186], %171 {strides = array<i32>} : memref<200x64xf32, #tpu.memory_space<vmem>>, vector<8x64xf32>,
    %c2_187 = arith.constant 2 : index
    %c1_188 = arith.constant 1 : index
    %c0_189 = arith.constant 0 : index
    %173 = vector.load %arg11[%c2_187, %c1_188, %c0_189] : memref<12x12x8xf32, #tpu.memory_space<vmem>>, vector<8x8x8xf32>
    %174 = vector.shape_cast %173 : vector<8x8x8xf32> to vector<64x8xf32>
    %175 = tpu.transpose %174, [1, 0] : vector<64x8xf32> -> vector<8x64xf32>
    %c88_190 = arith.constant 88 : index
    %c0_191 = arith.constant 0 : index
    %176 = vector.load %arg14[%c88_190, %c0_191] : memref<200x64xf32, #tpu.memory_space<vmem>>, vector<8x64xf32>
    tpu.vector_store %arg14[%c88_190, %c0_191], %175 {strides = array<i32>} : memref<200x64xf32, #tpu.memory_space<vmem>>, vector<8x64xf32>,
    %c2_192 = arith.constant 2 : index
    %c2_193 = arith.constant 2 : index
    %c0_194 = arith.constant 0 : index
    %177 = vector.load %arg11[%c2_192, %c2_193, %c0_194] : memref<12x12x8xf32, #tpu.memory_space<vmem>>, vector<8x8x8xf32>
    %178 = vector.shape_cast %177 : vector<8x8x8xf32> to vector<64x8xf32>
    %179 = tpu.transpose %178, [1, 0] : vector<64x8xf32> -> vector<8x64xf32>
    %c96_195 = arith.constant 96 : index
    %c0_196 = arith.constant 0 : index
    %180 = vector.load %arg14[%c96_195, %c0_196] : memref<200x64xf32, #tpu.memory_space<vmem>>, vector<8x64xf32>
    tpu.vector_store %arg14[%c96_195, %c0_196], %179 {strides = array<i32>} : memref<200x64xf32, #tpu.memory_space<vmem>>, vector<8x64xf32>,
    %c2_197 = arith.constant 2 : index
    %c3_198 = arith.constant 3 : index
    %c0_199 = arith.constant 0 : index
    %181 = vector.load %arg11[%c2_197, %c3_198, %c0_199] : memref<12x12x8xf32, #tpu.memory_space<vmem>>, vector<8x8x8xf32>
    %182 = vector.shape_cast %181 : vector<8x8x8xf32> to vector<64x8xf32>
    %183 = tpu.transpose %182, [1, 0] : vector<64x8xf32> -> vector<8x64xf32>
    %c104 = arith.constant 104 : index
    %c0_200 = arith.constant 0 : index
    %184 = vector.load %arg14[%c104, %c0_200] : memref<200x64xf32, #tpu.memory_space<vmem>>, vector<8x64xf32>
    tpu.vector_store %arg14[%c104, %c0_200], %183 {strides = array<i32>} : memref<200x64xf32, #tpu.memory_space<vmem>>, vector<8x64xf32>,
    %c2_201 = arith.constant 2 : index
    %c4_202 = arith.constant 4 : index
    %c0_203 = arith.constant 0 : index
    %185 = vector.load %arg11[%c2_201, %c4_202, %c0_203] : memref<12x12x8xf32, #tpu.memory_space<vmem>>, vector<8x8x8xf32>
    %186 = vector.shape_cast %185 : vector<8x8x8xf32> to vector<64x8xf32>
    %187 = tpu.transpose %186, [1, 0] : vector<64x8xf32> -> vector<8x64xf32>
    %c112 = arith.constant 112 : index
    %c0_204 = arith.constant 0 : index
    %188 = vector.load %arg14[%c112, %c0_204] : memref<200x64xf32, #tpu.memory_space<vmem>>, vector<8x64xf32>
    tpu.vector_store %arg14[%c112, %c0_204], %187 {strides = array<i32>} : memref<200x64xf32, #tpu.memory_space<vmem>>, vector<8x64xf32>,
    %c3_205 = arith.constant 3 : index
    %c0_206 = arith.constant 0 : index
    %c0_207 = arith.constant 0 : index
    %189 = vector.load %arg11[%c3_205, %c0_206, %c0_207] : memref<12x12x8xf32, #tpu.memory_space<vmem>>, vector<8x8x8xf32>
    %190 = vector.shape_cast %189 : vector<8x8x8xf32> to vector<64x8xf32>
    %191 = tpu.transpose %190, [1, 0] : vector<64x8xf32> -> vector<8x64xf32>
    %c120 = arith.constant 120 : index
    %c0_208 = arith.constant 0 : index
    %192 = vector.load %arg14[%c120, %c0_208] : memref<200x64xf32, #tpu.memory_space<vmem>>, vector<8x64xf32>
    tpu.vector_store %arg14[%c120, %c0_208], %191 {strides = array<i32>} : memref<200x64xf32, #tpu.memory_space<vmem>>, vector<8x64xf32>,
    %c3_209 = arith.constant 3 : index
    %c1_210 = arith.constant 1 : index
    %c0_211 = arith.constant 0 : index
    %193 = vector.load %arg11[%c3_209, %c1_210, %c0_211] : memref<12x12x8xf32, #tpu.memory_space<vmem>>, vector<8x8x8xf32>
    %194 = vector.shape_cast %193 : vector<8x8x8xf32> to vector<64x8xf32>
    %195 = tpu.transpose %194, [1, 0] : vector<64x8xf32> -> vector<8x64xf32>
    %c128 = arith.constant 128 : index
    %c0_212 = arith.constant 0 : index
    %196 = vector.load %arg14[%c128, %c0_212] : memref<200x64xf32, #tpu.memory_space<vmem>>, vector<8x64xf32>
    tpu.vector_store %arg14[%c128, %c0_212], %195 {strides = array<i32>} : memref<200x64xf32, #tpu.memory_space<vmem>>, vector<8x64xf32>,
    %c3_213 = arith.constant 3 : index
    %c2_214 = arith.constant 2 : index
    %c0_215 = arith.constant 0 : index
    %197 = vector.load %arg11[%c3_213, %c2_214, %c0_215] : memref<12x12x8xf32, #tpu.memory_space<vmem>>, vector<8x8x8xf32>
    %198 = vector.shape_cast %197 : vector<8x8x8xf32> to vector<64x8xf32>
    %199 = tpu.transpose %198, [1, 0] : vector<64x8xf32> -> vector<8x64xf32>
    %c136 = arith.constant 136 : index
    %c0_216 = arith.constant 0 : index
    %200 = vector.load %arg14[%c136, %c0_216] : memref<200x64xf32, #tpu.memory_space<vmem>>, vector<8x64xf32>
    tpu.vector_store %arg14[%c136, %c0_216], %199 {strides = array<i32>} : memref<200x64xf32, #tpu.memory_space<vmem>>, vector<8x64xf32>,
    %c3_217 = arith.constant 3 : index
    %c3_218 = arith.constant 3 : index
    %c0_219 = arith.constant 0 : index
    %201 = vector.load %arg11[%c3_217, %c3_218, %c0_219] : memref<12x12x8xf32, #tpu.memory_space<vmem>>, vector<8x8x8xf32>
    %202 = vector.shape_cast %201 : vector<8x8x8xf32> to vector<64x8xf32>
    %203 = tpu.transpose %202, [1, 0] : vector<64x8xf32> -> vector<8x64xf32>
    %c144 = arith.constant 144 : index
    %c0_220 = arith.constant 0 : index
    %204 = vector.load %arg14[%c144, %c0_220] : memref<200x64xf32, #tpu.memory_space<vmem>>, vector<8x64xf32>
    tpu.vector_store %arg14[%c144, %c0_220], %203 {strides = array<i32>} : memref<200x64xf32, #tpu.memory_space<vmem>>, vector<8x64xf32>,
    %c3_221 = arith.constant 3 : index
    %c4_222 = arith.constant 4 : index
    %c0_223 = arith.constant 0 : index
    %205 = vector.load %arg11[%c3_221, %c4_222, %c0_223] : memref<12x12x8xf32, #tpu.memory_space<vmem>>, vector<8x8x8xf32>
    %206 = vector.shape_cast %205 : vector<8x8x8xf32> to vector<64x8xf32>
    %207 = tpu.transpose %206, [1, 0] : vector<64x8xf32> -> vector<8x64xf32>
    %c152 = arith.constant 152 : index
    %c0_224 = arith.constant 0 : index
    %208 = vector.load %arg14[%c152, %c0_224] : memref<200x64xf32, #tpu.memory_space<vmem>>, vector<8x64xf32>
    tpu.vector_store %arg14[%c152, %c0_224], %207 {strides = array<i32>} : memref<200x64xf32, #tpu.memory_space<vmem>>, vector<8x64xf32>,
    %c4_225 = arith.constant 4 : index
    %c0_226 = arith.constant 0 : index
    %c0_227 = arith.constant 0 : index
    %209 = vector.load %arg11[%c4_225, %c0_226, %c0_227] : memref<12x12x8xf32, #tpu.memory_space<vmem>>, vector<8x8x8xf32>
    %210 = vector.shape_cast %209 : vector<8x8x8xf32> to vector<64x8xf32>
    %211 = tpu.transpose %210, [1, 0] : vector<64x8xf32> -> vector<8x64xf32>
    %c160 = arith.constant 160 : index
    %c0_228 = arith.constant 0 : index
    %212 = vector.load %arg14[%c160, %c0_228] : memref<200x64xf32, #tpu.memory_space<vmem>>, vector<8x64xf32>
    tpu.vector_store %arg14[%c160, %c0_228], %211 {strides = array<i32>} : memref<200x64xf32, #tpu.memory_space<vmem>>, vector<8x64xf32>,
    %c4_229 = arith.constant 4 : index
    %c1_230 = arith.constant 1 : index
    %c0_231 = arith.constant 0 : index
    %213 = vector.load %arg11[%c4_229, %c1_230, %c0_231] : memref<12x12x8xf32, #tpu.memory_space<vmem>>, vector<8x8x8xf32>
    %214 = vector.shape_cast %213 : vector<8x8x8xf32> to vector<64x8xf32>
    %215 = tpu.transpose %214, [1, 0] : vector<64x8xf32> -> vector<8x64xf32>
    %c168 = arith.constant 168 : index
    %c0_232 = arith.constant 0 : index
    %216 = vector.load %arg14[%c168, %c0_232] : memref<200x64xf32, #tpu.memory_space<vmem>>, vector<8x64xf32>
    tpu.vector_store %arg14[%c168, %c0_232], %215 {strides = array<i32>} : memref<200x64xf32, #tpu.memory_space<vmem>>, vector<8x64xf32>,
    %c4_233 = arith.constant 4 : index
    %c2_234 = arith.constant 2 : index
    %c0_235 = arith.constant 0 : index
    %217 = vector.load %arg11[%c4_233, %c2_234, %c0_235] : memref<12x12x8xf32, #tpu.memory_space<vmem>>, vector<8x8x8xf32>
    %218 = vector.shape_cast %217 : vector<8x8x8xf32> to vector<64x8xf32>
    %219 = tpu.transpose %218, [1, 0] : vector<64x8xf32> -> vector<8x64xf32>
    %c176 = arith.constant 176 : index
    %c0_236 = arith.constant 0 : index
    %220 = vector.load %arg14[%c176, %c0_236] : memref<200x64xf32, #tpu.memory_space<vmem>>, vector<8x64xf32>
    tpu.vector_store %arg14[%c176, %c0_236], %219 {strides = array<i32>} : memref<200x64xf32, #tpu.memory_space<vmem>>, vector<8x64xf32>,
    %c4_237 = arith.constant 4 : index
    %c3_238 = arith.constant 3 : index
    %c0_239 = arith.constant 0 : index
    %221 = vector.load %arg11[%c4_237, %c3_238, %c0_239] : memref<12x12x8xf32, #tpu.memory_space<vmem>>, vector<8x8x8xf32>
    %222 = vector.shape_cast %221 : vector<8x8x8xf32> to vector<64x8xf32>
    %223 = tpu.transpose %222, [1, 0] : vector<64x8xf32> -> vector<8x64xf32>
    %c184 = arith.constant 184 : index
    %c0_240 = arith.constant 0 : index
    %224 = vector.load %arg14[%c184, %c0_240] : memref<200x64xf32, #tpu.memory_space<vmem>>, vector<8x64xf32>
    tpu.vector_store %arg14[%c184, %c0_240], %223 {strides = array<i32>} : memref<200x64xf32, #tpu.memory_space<vmem>>, vector<8x64xf32>,
    %c4_241 = arith.constant 4 : index
    %c4_242 = arith.constant 4 : index
    %c0_243 = arith.constant 0 : index
    %225 = vector.load %arg11[%c4_241, %c4_242, %c0_243] : memref<12x12x8xf32, #tpu.memory_space<vmem>>, vector<8x8x8xf32>
    %226 = vector.shape_cast %225 : vector<8x8x8xf32> to vector<64x8xf32>
    %227 = tpu.transpose %226, [1, 0] : vector<64x8xf32> -> vector<8x64xf32>
    %c192 = arith.constant 192 : index
    %c0_244 = arith.constant 0 : index
    %228 = vector.load %arg14[%c192, %c0_244] : memref<200x64xf32, #tpu.memory_space<vmem>>, vector<8x64xf32>
    tpu.vector_store %arg14[%c192, %c0_244], %227 {strides = array<i32>} : memref<200x64xf32, #tpu.memory_space<vmem>>, vector<8x64xf32>,
    %c0_245 = arith.constant 0 : index
    %c0_246 = arith.constant 0 : index
    %229 = vector.load %arg4[%c0_245, %c0_246] : memref<8x200xf32, #tpu.memory_space<vmem>>, vector<8x200xf32>
    %c0_247 = arith.constant 0 : index
    %c0_248 = arith.constant 0 : index
    %230 = vector.load %arg14[%c0_247, %c0_248] : memref<200x64xf32, #tpu.memory_space<vmem>>, vector<200x64xf32>
    %cst_249 = arith.constant dense<0.000000e+00> : vector<8x64xf32>
    %231 = tpu.matmul %229, %230, %cst_249 {dimension_numbers = #tpu.dot_dimension_numbers<[1], [0], [0], [1], [0, 0, 1, 1], [], []>} : vector<8x200xf32>, vector<200x64xf32>, vector<8x64xf32> -> vector<8x64xf32>
    %c0_250 = arith.constant 0 : index
    %c0_251 = arith.constant 0 : index
    %232 = vector.load %arg5[%c0_250, %c0_251] : memref<8x1xf32, #tpu.memory_space<vmem>>, vector<8x1xf32>
    %233 = vector.broadcast %232 : vector<8x1xf32> to vector<8x64xf32>
    %234 = arith.addf %231, %233 : vector<8x64xf32>
    %c0_252 = arith.constant 0 : index
    %c0_253 = arith.constant 0 : index
    %235 = vector.load %arg8[%c0_252, %c0_253] : memref<64x256xf32, #tpu.memory_space<vmem>>, vector<64x256xf32>
    %cst_254 = arith.constant dense<0.000000e+00> : vector<8x256xf32>
    %236 = tpu.matmul %234, %235, %cst_254 {dimension_numbers = #tpu.dot_dimension_numbers<[1], [0], [0], [1], [0, 0, 1, 1], [], []>} : vector<8x64xf32>, vector<64x256xf32>, vector<8x256xf32> -> vector<8x256xf32>
    %237 = vector.shape_cast %236 : vector<8x256xf32> to vector<1x8x256xf32>
    %238 = vector.shape_cast %112 : vector<8x256xf32> to vector<1x8x256xf32>
    %239 = tpu.concatenate %237, %238 in 0 : vector<1x8x256xf32>, vector<1x8x256xf32> -> vector<2x8x256xf32>
    %240 = vector.shape_cast %239 : vector<2x8x256xf32> to vector<16x256xf32>
    %cst_255 = arith.constant 0.000000e+00 : f32
    %241 = vector.broadcast %cst_255 : f32 to vector<16x256xf32>
    %242 = arith.maximumf %240, %241 : vector<16x256xf32>
    %243 = tpu.transpose %242, [1, 0] : vector<16x256xf32> -> vector<256x16xf32>
    %244 = vector.shape_cast %243 : vector<256x16xf32> to vector<16x16x16xf32>
    %cst_256 = arith.constant 0.000000e+00 : f32
    %245 = vector.broadcast %cst_256 : f32 to vector<20x20x16xf32>
    %c0_257 = arith.constant 0 : index
    %c0_258 = arith.constant 0 : index
    %c0_259 = arith.constant 0 : index
    %246 = vector.load %arg12[%c0_257, %c0_258, %c0_259] : memref<20x20x16xf32, #tpu.memory_space<vmem>>, vector<20x20x16xf32>
    tpu.vector_store %arg12[%c0_257, %c0_258, %c0_259], %245 {strides = array<i32>} : memref<20x20x16xf32, #tpu.memory_space<vmem>>, vector<20x20x16xf32>,
    %c2_260 = arith.constant 2 : index
    %c2_261 = arith.constant 2 : index
    %c0_262 = arith.constant 0 : index
    %247 = vector.load %arg12[%c2_260, %c2_261, %c0_262] : memref<20x20x16xf32, #tpu.memory_space<vmem>>, vector<16x16x16xf32>
    tpu.vector_store %arg12[%c2_260, %c2_261, %c0_262], %244 {strides = array<i32>} : memref<20x20x16xf32, #tpu.memory_space<vmem>>, vector<16x16x16xf32>,
    %c0_263 = arith.constant 0 : index
    %c0_264 = arith.constant 0 : index
    %c0_265 = arith.constant 0 : index
    %248 = vector.load %arg12[%c0_263, %c0_264, %c0_265] : memref<20x20x16xf32, #tpu.memory_space<vmem>>, vector<16x16x16xf32>
    %249 = vector.shape_cast %248 : vector<16x16x16xf32> to vector<256x16xf32>
    %250 = tpu.transpose %249, [1, 0] : vector<256x16xf32> -> vector<16x256xf32>
    %c0_266 = arith.constant 0 : index
    %c0_267 = arith.constant 0 : index
    %251 = vector.load %arg15[%c0_266, %c0_267] : memref<400x256xf32, #tpu.memory_space<vmem>>, vector<16x256xf32>
    tpu.vector_store %arg15[%c0_266, %c0_267], %250 {strides = array<i32>} : memref<400x256xf32, #tpu.memory_space<vmem>>, vector<16x256xf32>,
    %c0_268 = arith.constant 0 : index
    %c1_269 = arith.constant 1 : index
    %c0_270 = arith.constant 0 : index
    %252 = vector.load %arg12[%c0_268, %c1_269, %c0_270] : memref<20x20x16xf32, #tpu.memory_space<vmem>>, vector<16x16x16xf32>
    %253 = vector.shape_cast %252 : vector<16x16x16xf32> to vector<256x16xf32>
    %254 = tpu.transpose %253, [1, 0] : vector<256x16xf32> -> vector<16x256xf32>
    %c16_271 = arith.constant 16 : index
    %c0_272 = arith.constant 0 : index
    %255 = vector.load %arg15[%c16_271, %c0_272] : memref<400x256xf32, #tpu.memory_space<vmem>>, vector<16x256xf32>
    tpu.vector_store %arg15[%c16_271, %c0_272], %254 {strides = array<i32>} : memref<400x256xf32, #tpu.memory_space<vmem>>, vector<16x256xf32>,
    %c0_273 = arith.constant 0 : index
    %c2_274 = arith.constant 2 : index
    %c0_275 = arith.constant 0 : index
    %256 = vector.load %arg12[%c0_273, %c2_274, %c0_275] : memref<20x20x16xf32, #tpu.memory_space<vmem>>, vector<16x16x16xf32>
    %257 = vector.shape_cast %256 : vector<16x16x16xf32> to vector<256x16xf32>
    %258 = tpu.transpose %257, [1, 0] : vector<256x16xf32> -> vector<16x256xf32>
    %c32_276 = arith.constant 32 : index
    %c0_277 = arith.constant 0 : index
    %259 = vector.load %arg15[%c32_276, %c0_277] : memref<400x256xf32, #tpu.memory_space<vmem>>, vector<16x256xf32>
    tpu.vector_store %arg15[%c32_276, %c0_277], %258 {strides = array<i32>} : memref<400x256xf32, #tpu.memory_space<vmem>>, vector<16x256xf32>,
    %c0_278 = arith.constant 0 : index
    %c3_279 = arith.constant 3 : index
    %c0_280 = arith.constant 0 : index
    %260 = vector.load %arg12[%c0_278, %c3_279, %c0_280] : memref<20x20x16xf32, #tpu.memory_space<vmem>>, vector<16x16x16xf32>
    %261 = vector.shape_cast %260 : vector<16x16x16xf32> to vector<256x16xf32>
    %262 = tpu.transpose %261, [1, 0] : vector<256x16xf32> -> vector<16x256xf32>
    %c48_281 = arith.constant 48 : index
    %c0_282 = arith.constant 0 : index
    %263 = vector.load %arg15[%c48_281, %c0_282] : memref<400x256xf32, #tpu.memory_space<vmem>>, vector<16x256xf32>
    tpu.vector_store %arg15[%c48_281, %c0_282], %262 {strides = array<i32>} : memref<400x256xf32, #tpu.memory_space<vmem>>, vector<16x256xf32>,
    %c0_283 = arith.constant 0 : index
    %c4_284 = arith.constant 4 : index
    %c0_285 = arith.constant 0 : index
    %264 = vector.load %arg12[%c0_283, %c4_284, %c0_285] : memref<20x20x16xf32, #tpu.memory_space<vmem>>, vector<16x16x16xf32>
    %265 = vector.shape_cast %264 : vector<16x16x16xf32> to vector<256x16xf32>
    %266 = tpu.transpose %265, [1, 0] : vector<256x16xf32> -> vector<16x256xf32>
    %c64_286 = arith.constant 64 : index
    %c0_287 = arith.constant 0 : index
    %267 = vector.load %arg15[%c64_286, %c0_287] : memref<400x256xf32, #tpu.memory_space<vmem>>, vector<16x256xf32>
    tpu.vector_store %arg15[%c64_286, %c0_287], %266 {strides = array<i32>} : memref<400x256xf32, #tpu.memory_space<vmem>>, vector<16x256xf32>,
    %c1_288 = arith.constant 1 : index
    %c0_289 = arith.constant 0 : index
    %c0_290 = arith.constant 0 : index
    %268 = vector.load %arg12[%c1_288, %c0_289, %c0_290] : memref<20x20x16xf32, #tpu.memory_space<vmem>>, vector<16x16x16xf32>
    %269 = vector.shape_cast %268 : vector<16x16x16xf32> to vector<256x16xf32>
    %270 = tpu.transpose %269, [1, 0] : vector<256x16xf32> -> vector<16x256xf32>
    %c80_291 = arith.constant 80 : index
    %c0_292 = arith.constant 0 : index
    %271 = vector.load %arg15[%c80_291, %c0_292] : memref<400x256xf32, #tpu.memory_space<vmem>>, vector<16x256xf32>
    tpu.vector_store %arg15[%c80_291, %c0_292], %270 {strides = array<i32>} : memref<400x256xf32, #tpu.memory_space<vmem>>, vector<16x256xf32>,
    %c1_293 = arith.constant 1 : index
    %c1_294 = arith.constant 1 : index
    %c0_295 = arith.constant 0 : index
    %272 = vector.load %arg12[%c1_293, %c1_294, %c0_295] : memref<20x20x16xf32, #tpu.memory_space<vmem>>, vector<16x16x16xf32>
    %273 = vector.shape_cast %272 : vector<16x16x16xf32> to vector<256x16xf32>
    %274 = tpu.transpose %273, [1, 0] : vector<256x16xf32> -> vector<16x256xf32>
    %c96_296 = arith.constant 96 : index
    %c0_297 = arith.constant 0 : index
    %275 = vector.load %arg15[%c96_296, %c0_297] : memref<400x256xf32, #tpu.memory_space<vmem>>, vector<16x256xf32>
    tpu.vector_store %arg15[%c96_296, %c0_297], %274 {strides = array<i32>} : memref<400x256xf32, #tpu.memory_space<vmem>>, vector<16x256xf32>,
    %c1_298 = arith.constant 1 : index
    %c2_299 = arith.constant 2 : index
    %c0_300 = arith.constant 0 : index
    %276 = vector.load %arg12[%c1_298, %c2_299, %c0_300] : memref<20x20x16xf32, #tpu.memory_space<vmem>>, vector<16x16x16xf32>
    %277 = vector.shape_cast %276 : vector<16x16x16xf32> to vector<256x16xf32>
    %278 = tpu.transpose %277, [1, 0] : vector<256x16xf32> -> vector<16x256xf32>
    %c112_301 = arith.constant 112 : index
    %c0_302 = arith.constant 0 : index
    %279 = vector.load %arg15[%c112_301, %c0_302] : memref<400x256xf32, #tpu.memory_space<vmem>>, vector<16x256xf32>
    tpu.vector_store %arg15[%c112_301, %c0_302], %278 {strides = array<i32>} : memref<400x256xf32, #tpu.memory_space<vmem>>, vector<16x256xf32>,
    %c1_303 = arith.constant 1 : index
    %c3_304 = arith.constant 3 : index
    %c0_305 = arith.constant 0 : index
    %280 = vector.load %arg12[%c1_303, %c3_304, %c0_305] : memref<20x20x16xf32, #tpu.memory_space<vmem>>, vector<16x16x16xf32>
    %281 = vector.shape_cast %280 : vector<16x16x16xf32> to vector<256x16xf32>
    %282 = tpu.transpose %281, [1, 0] : vector<256x16xf32> -> vector<16x256xf32>
    %c128_306 = arith.constant 128 : index
    %c0_307 = arith.constant 0 : index
    %283 = vector.load %arg15[%c128_306, %c0_307] : memref<400x256xf32, #tpu.memory_space<vmem>>, vector<16x256xf32>
    tpu.vector_store %arg15[%c128_306, %c0_307], %282 {strides = array<i32>} : memref<400x256xf32, #tpu.memory_space<vmem>>, vector<16x256xf32>,
    %c1_308 = arith.constant 1 : index
    %c4_309 = arith.constant 4 : index
    %c0_310 = arith.constant 0 : index
    %284 = vector.load %arg12[%c1_308, %c4_309, %c0_310] : memref<20x20x16xf32, #tpu.memory_space<vmem>>, vector<16x16x16xf32>
    %285 = vector.shape_cast %284 : vector<16x16x16xf32> to vector<256x16xf32>
    %286 = tpu.transpose %285, [1, 0] : vector<256x16xf32> -> vector<16x256xf32>
    %c144_311 = arith.constant 144 : index
    %c0_312 = arith.constant 0 : index
    %287 = vector.load %arg15[%c144_311, %c0_312] : memref<400x256xf32, #tpu.memory_space<vmem>>, vector<16x256xf32>
    tpu.vector_store %arg15[%c144_311, %c0_312], %286 {strides = array<i32>} : memref<400x256xf32, #tpu.memory_space<vmem>>, vector<16x256xf32>,
    %c2_313 = arith.constant 2 : index
    %c0_314 = arith.constant 0 : index
    %c0_315 = arith.constant 0 : index
    %288 = vector.load %arg12[%c2_313, %c0_314, %c0_315] : memref<20x20x16xf32, #tpu.memory_space<vmem>>, vector<16x16x16xf32>
    %289 = vector.shape_cast %288 : vector<16x16x16xf32> to vector<256x16xf32>
    %290 = tpu.transpose %289, [1, 0] : vector<256x16xf32> -> vector<16x256xf32>
    %c160_316 = arith.constant 160 : index
    %c0_317 = arith.constant 0 : index
    %291 = vector.load %arg15[%c160_316, %c0_317] : memref<400x256xf32, #tpu.memory_space<vmem>>, vector<16x256xf32>
    tpu.vector_store %arg15[%c160_316, %c0_317], %290 {strides = array<i32>} : memref<400x256xf32, #tpu.memory_space<vmem>>, vector<16x256xf32>,
    %c2_318 = arith.constant 2 : index
    %c1_319 = arith.constant 1 : index
    %c0_320 = arith.constant 0 : index
    %292 = vector.load %arg12[%c2_318, %c1_319, %c0_320] : memref<20x20x16xf32, #tpu.memory_space<vmem>>, vector<16x16x16xf32>
    %293 = vector.shape_cast %292 : vector<16x16x16xf32> to vector<256x16xf32>
    %294 = tpu.transpose %293, [1, 0] : vector<256x16xf32> -> vector<16x256xf32>
    %c176_321 = arith.constant 176 : index
    %c0_322 = arith.constant 0 : index
    %295 = vector.load %arg15[%c176_321, %c0_322] : memref<400x256xf32, #tpu.memory_space<vmem>>, vector<16x256xf32>
    tpu.vector_store %arg15[%c176_321, %c0_322], %294 {strides = array<i32>} : memref<400x256xf32, #tpu.memory_space<vmem>>, vector<16x256xf32>,
    %c2_323 = arith.constant 2 : index
    %c2_324 = arith.constant 2 : index
    %c0_325 = arith.constant 0 : index
    %296 = vector.load %arg12[%c2_323, %c2_324, %c0_325] : memref<20x20x16xf32, #tpu.memory_space<vmem>>, vector<16x16x16xf32>
    %297 = vector.shape_cast %296 : vector<16x16x16xf32> to vector<256x16xf32>
    %298 = tpu.transpose %297, [1, 0] : vector<256x16xf32> -> vector<16x256xf32>
    %c192_326 = arith.constant 192 : index
    %c0_327 = arith.constant 0 : index
    %299 = vector.load %arg15[%c192_326, %c0_327] : memref<400x256xf32, #tpu.memory_space<vmem>>, vector<16x256xf32>
    tpu.vector_store %arg15[%c192_326, %c0_327], %298 {strides = array<i32>} : memref<400x256xf32, #tpu.memory_space<vmem>>, vector<16x256xf32>,
    %c2_328 = arith.constant 2 : index
    %c3_329 = arith.constant 3 : index
    %c0_330 = arith.constant 0 : index
    %300 = vector.load %arg12[%c2_328, %c3_329, %c0_330] : memref<20x20x16xf32, #tpu.memory_space<vmem>>, vector<16x16x16xf32>
    %301 = vector.shape_cast %300 : vector<16x16x16xf32> to vector<256x16xf32>
    %302 = tpu.transpose %301, [1, 0] : vector<256x16xf32> -> vector<16x256xf32>
    %c208 = arith.constant 208 : index
    %c0_331 = arith.constant 0 : index
    %303 = vector.load %arg15[%c208, %c0_331] : memref<400x256xf32, #tpu.memory_space<vmem>>, vector<16x256xf32>
    tpu.vector_store %arg15[%c208, %c0_331], %302 {strides = array<i32>} : memref<400x256xf32, #tpu.memory_space<vmem>>, vector<16x256xf32>,
    %c2_332 = arith.constant 2 : index
    %c4_333 = arith.constant 4 : index
    %c0_334 = arith.constant 0 : index
    %304 = vector.load %arg12[%c2_332, %c4_333, %c0_334] : memref<20x20x16xf32, #tpu.memory_space<vmem>>, vector<16x16x16xf32>
    %305 = vector.shape_cast %304 : vector<16x16x16xf32> to vector<256x16xf32>
    %306 = tpu.transpose %305, [1, 0] : vector<256x16xf32> -> vector<16x256xf32>
    %c224 = arith.constant 224 : index
    %c0_335 = arith.constant 0 : index
    %307 = vector.load %arg15[%c224, %c0_335] : memref<400x256xf32, #tpu.memory_space<vmem>>, vector<16x256xf32>
    tpu.vector_store %arg15[%c224, %c0_335], %306 {strides = array<i32>} : memref<400x256xf32, #tpu.memory_space<vmem>>, vector<16x256xf32>,
    %c3_336 = arith.constant 3 : index
    %c0_337 = arith.constant 0 : index
    %c0_338 = arith.constant 0 : index
    %308 = vector.load %arg12[%c3_336, %c0_337, %c0_338] : memref<20x20x16xf32, #tpu.memory_space<vmem>>, vector<16x16x16xf32>
    %309 = vector.shape_cast %308 : vector<16x16x16xf32> to vector<256x16xf32>
    %310 = tpu.transpose %309, [1, 0] : vector<256x16xf32> -> vector<16x256xf32>
    %c240 = arith.constant 240 : index
    %c0_339 = arith.constant 0 : index
    %311 = vector.load %arg15[%c240, %c0_339] : memref<400x256xf32, #tpu.memory_space<vmem>>, vector<16x256xf32>
    tpu.vector_store %arg15[%c240, %c0_339], %310 {strides = array<i32>} : memref<400x256xf32, #tpu.memory_space<vmem>>, vector<16x256xf32>,
    %c3_340 = arith.constant 3 : index
    %c1_341 = arith.constant 1 : index
    %c0_342 = arith.constant 0 : index
    %312 = vector.load %arg12[%c3_340, %c1_341, %c0_342] : memref<20x20x16xf32, #tpu.memory_space<vmem>>, vector<16x16x16xf32>
    %313 = vector.shape_cast %312 : vector<16x16x16xf32> to vector<256x16xf32>
    %314 = tpu.transpose %313, [1, 0] : vector<256x16xf32> -> vector<16x256xf32>
    %c256 = arith.constant 256 : index
    %c0_343 = arith.constant 0 : index
    %315 = vector.load %arg15[%c256, %c0_343] : memref<400x256xf32, #tpu.memory_space<vmem>>, vector<16x256xf32>
    tpu.vector_store %arg15[%c256, %c0_343], %314 {strides = array<i32>} : memref<400x256xf32, #tpu.memory_space<vmem>>, vector<16x256xf32>,
    %c3_344 = arith.constant 3 : index
    %c2_345 = arith.constant 2 : index
    %c0_346 = arith.constant 0 : index
    %316 = vector.load %arg12[%c3_344, %c2_345, %c0_346] : memref<20x20x16xf32, #tpu.memory_space<vmem>>, vector<16x16x16xf32>
    %317 = vector.shape_cast %316 : vector<16x16x16xf32> to vector<256x16xf32>
    %318 = tpu.transpose %317, [1, 0] : vector<256x16xf32> -> vector<16x256xf32>
    %c272 = arith.constant 272 : index
    %c0_347 = arith.constant 0 : index
    %319 = vector.load %arg15[%c272, %c0_347] : memref<400x256xf32, #tpu.memory_space<vmem>>, vector<16x256xf32>
    tpu.vector_store %arg15[%c272, %c0_347], %318 {strides = array<i32>} : memref<400x256xf32, #tpu.memory_space<vmem>>, vector<16x256xf32>,
    %c3_348 = arith.constant 3 : index
    %c3_349 = arith.constant 3 : index
    %c0_350 = arith.constant 0 : index
    %320 = vector.load %arg12[%c3_348, %c3_349, %c0_350] : memref<20x20x16xf32, #tpu.memory_space<vmem>>, vector<16x16x16xf32>
    %321 = vector.shape_cast %320 : vector<16x16x16xf32> to vector<256x16xf32>
    %322 = tpu.transpose %321, [1, 0] : vector<256x16xf32> -> vector<16x256xf32>
    %c288 = arith.constant 288 : index
    %c0_351 = arith.constant 0 : index
    %323 = vector.load %arg15[%c288, %c0_351] : memref<400x256xf32, #tpu.memory_space<vmem>>, vector<16x256xf32>
    tpu.vector_store %arg15[%c288, %c0_351], %322 {strides = array<i32>} : memref<400x256xf32, #tpu.memory_space<vmem>>, vector<16x256xf32>,
    %c3_352 = arith.constant 3 : index
    %c4_353 = arith.constant 4 : index
    %c0_354 = arith.constant 0 : index
    %324 = vector.load %arg12[%c3_352, %c4_353, %c0_354] : memref<20x20x16xf32, #tpu.memory_space<vmem>>, vector<16x16x16xf32>
    %325 = vector.shape_cast %324 : vector<16x16x16xf32> to vector<256x16xf32>
    %326 = tpu.transpose %325, [1, 0] : vector<256x16xf32> -> vector<16x256xf32>
    %c304 = arith.constant 304 : index
    %c0_355 = arith.constant 0 : index
    %327 = vector.load %arg15[%c304, %c0_355] : memref<400x256xf32, #tpu.memory_space<vmem>>, vector<16x256xf32>
    tpu.vector_store %arg15[%c304, %c0_355], %326 {strides = array<i32>} : memref<400x256xf32, #tpu.memory_space<vmem>>, vector<16x256xf32>,
    %c4_356 = arith.constant 4 : index
    %c0_357 = arith.constant 0 : index
    %c0_358 = arith.constant 0 : index
    %328 = vector.load %arg12[%c4_356, %c0_357, %c0_358] : memref<20x20x16xf32, #tpu.memory_space<vmem>>, vector<16x16x16xf32>
    %329 = vector.shape_cast %328 : vector<16x16x16xf32> to vector<256x16xf32>
    %330 = tpu.transpose %329, [1, 0] : vector<256x16xf32> -> vector<16x256xf32>
    %c320 = arith.constant 320 : index
    %c0_359 = arith.constant 0 : index
    %331 = vector.load %arg15[%c320, %c0_359] : memref<400x256xf32, #tpu.memory_space<vmem>>, vector<16x256xf32>
    tpu.vector_store %arg15[%c320, %c0_359], %330 {strides = array<i32>} : memref<400x256xf32, #tpu.memory_space<vmem>>, vector<16x256xf32>,
    %c4_360 = arith.constant 4 : index
    %c1_361 = arith.constant 1 : index
    %c0_362 = arith.constant 0 : index
    %332 = vector.load %arg12[%c4_360, %c1_361, %c0_362] : memref<20x20x16xf32, #tpu.memory_space<vmem>>, vector<16x16x16xf32>
    %333 = vector.shape_cast %332 : vector<16x16x16xf32> to vector<256x16xf32>
    %334 = tpu.transpose %333, [1, 0] : vector<256x16xf32> -> vector<16x256xf32>
    %c336 = arith.constant 336 : index
    %c0_363 = arith.constant 0 : index
    %335 = vector.load %arg15[%c336, %c0_363] : memref<400x256xf32, #tpu.memory_space<vmem>>, vector<16x256xf32>
    tpu.vector_store %arg15[%c336, %c0_363], %334 {strides = array<i32>} : memref<400x256xf32, #tpu.memory_space<vmem>>, vector<16x256xf32>,
    %c4_364 = arith.constant 4 : index
    %c2_365 = arith.constant 2 : index
    %c0_366 = arith.constant 0 : index
    %336 = vector.load %arg12[%c4_364, %c2_365, %c0_366] : memref<20x20x16xf32, #tpu.memory_space<vmem>>, vector<16x16x16xf32>
    %337 = vector.shape_cast %336 : vector<16x16x16xf32> to vector<256x16xf32>
    %338 = tpu.transpose %337, [1, 0] : vector<256x16xf32> -> vector<16x256xf32>
    %c352 = arith.constant 352 : index
    %c0_367 = arith.constant 0 : index
    %339 = vector.load %arg15[%c352, %c0_367] : memref<400x256xf32, #tpu.memory_space<vmem>>, vector<16x256xf32>
    tpu.vector_store %arg15[%c352, %c0_367], %338 {strides = array<i32>} : memref<400x256xf32, #tpu.memory_space<vmem>>, vector<16x256xf32>,
    %c4_368 = arith.constant 4 : index
    %c3_369 = arith.constant 3 : index
    %c0_370 = arith.constant 0 : index
    %340 = vector.load %arg12[%c4_368, %c3_369, %c0_370] : memref<20x20x16xf32, #tpu.memory_space<vmem>>, vector<16x16x16xf32>
    %341 = vector.shape_cast %340 : vector<16x16x16xf32> to vector<256x16xf32>
    %342 = tpu.transpose %341, [1, 0] : vector<256x16xf32> -> vector<16x256xf32>
    %c368 = arith.constant 368 : index
    %c0_371 = arith.constant 0 : index
    %343 = vector.load %arg15[%c368, %c0_371] : memref<400x256xf32, #tpu.memory_space<vmem>>, vector<16x256xf32>
    tpu.vector_store %arg15[%c368, %c0_371], %342 {strides = array<i32>} : memref<400x256xf32, #tpu.memory_space<vmem>>, vector<16x256xf32>,
    %c4_372 = arith.constant 4 : index
    %c4_373 = arith.constant 4 : index
    %c0_374 = arith.constant 0 : index
    %344 = vector.load %arg12[%c4_372, %c4_373, %c0_374] : memref<20x20x16xf32, #tpu.memory_space<vmem>>, vector<16x16x16xf32>
    %345 = vector.shape_cast %344 : vector<16x16x16xf32> to vector<256x16xf32>
    %346 = tpu.transpose %345, [1, 0] : vector<256x16xf32> -> vector<16x256xf32>
    %c384 = arith.constant 384 : index
    %c0_375 = arith.constant 0 : index
    %347 = vector.load %arg15[%c384, %c0_375] : memref<400x256xf32, #tpu.memory_space<vmem>>, vector<16x256xf32>
    tpu.vector_store %arg15[%c384, %c0_375], %346 {strides = array<i32>} : memref<400x256xf32, #tpu.memory_space<vmem>>, vector<16x256xf32>,
    %c0_376 = arith.constant 0 : index
    %c0_377 = arith.constant 0 : index
    %348 = vector.load %arg6[%c0_376, %c0_377] : memref<4x400xf32, #tpu.memory_space<vmem>>, vector<4x400xf32>
    %c0_378 = arith.constant 0 : index
    %c0_379 = arith.constant 0 : index
    %349 = vector.load %arg15[%c0_378, %c0_379] : memref<400x256xf32, #tpu.memory_space<vmem>>, vector<400x256xf32>
    %cst_380 = arith.constant dense<0.000000e+00> : vector<4x256xf32>
    %350 = tpu.matmul %348, %349, %cst_380 {dimension_numbers = #tpu.dot_dimension_numbers<[1], [0], [0], [1], [0, 0, 1, 1], [], []>} : vector<4x400xf32>, vector<400x256xf32>, vector<4x256xf32> -> vector<4x256xf32>
    %c0_381 = arith.constant 0 : index
    %c0_382 = arith.constant 0 : index
    %351 = vector.load %arg7[%c0_381, %c0_382] : memref<4x1xf32, #tpu.memory_space<vmem>>, vector<4x1xf32>
    %352 = vector.broadcast %351 : vector<4x1xf32> to vector<4x256xf32>
    %353 = arith.addf %350, %352 : vector<4x256xf32>
    %c0_383 = arith.constant 0 : index
    %c0_384 = arith.constant 0 : index
    %c0_385 = arith.constant 0 : index
    %354 = vector.load %arg9[%c0_383, %c0_384, %c0_385] : memref<1x4x256xf32, #tpu.memory_space<vmem>>, vector<1x4x256xf32>
    %355 = vector.shape_cast %354 : vector<1x4x256xf32> to vector<4x256xf32>
    %356 = vector.shape_cast %353 : vector<4x256xf32> to vector<1x4x256xf32>
    tpu.vector_store %arg9[%c0_383, %c0_384, %c0_385], %356 {strides = array<i32>} : memref<1x4x256xf32, #tpu.memory_space<vmem>>, vector<1x4x256xf32>,
    return
  }
  func.func @transform_0(%arg0: i32) -> (i32, i32, i32, i32) {
    %c0_i32 = arith.constant 0 : i32
    %c0_i32_0 = arith.constant 0 : i32
    %c0_i32_1 = arith.constant 0 : i32
    %c0_i32_2 = arith.constant 0 : i32
    return %arg0, %c0_i32, %c0_i32_0, %c0_i32_1 : i32, i32, i32, i32
  }
  func.func @transform_1(%arg0: i32) -> (i32, i32) {
    %c0_i32 = arith.constant 0 : i32
    %c0_i32_0 = arith.constant 0 : i32
    %c0_i32_1 = arith.constant 0 : i32
    return %c0_i32, %c0_i32_0 : i32, i32
  }
  func.func @transform_2(%arg0: i32) -> (i32, i32) {
    %c0_i32 = arith.constant 0 : i32
    %c0_i32_0 = arith.constant 0 : i32
    %c0_i32_1 = arith.constant 0 : i32
    return %c0_i32, %c0_i32_0 : i32, i32
  }
  func.func @transform_3(%arg0: i32) -> (i32, i32) {
    %c0_i32 = arith.constant 0 : i32
    %c0_i32_0 = arith.constant 0 : i32
    %c0_i32_1 = arith.constant 0 : i32
    return %c0_i32, %c0_i32_0 : i32, i32
  }
  func.func @transform_4(%arg0: i32) -> (i32, i32) {
    %c0_i32 = arith.constant 0 : i32
    %c0_i32_0 = arith.constant 0 : i32
    %c0_i32_1 = arith.constant 0 : i32
    return %c0_i32, %c0_i32_0 : i32, i32
  }
  func.func @transform_5(%arg0: i32) -> (i32, i32) {
    %c0_i32 = arith.constant 0 : i32
    %c0_i32_0 = arith.constant 0 : i32
    %c0_i32_1 = arith.constant 0 : i32
    return %c0_i32, %c0_i32_0 : i32, i32
  }
  func.func @transform_6(%arg0: i32) -> (i32, i32) {
    %c0_i32 = arith.constant 0 : i32
    %c0_i32_0 = arith.constant 0 : i32
    %c0_i32_1 = arith.constant 0 : i32
    return %c0_i32, %c0_i32_0 : i32, i32
  }
  func.func @transform_7(%arg0: i32) -> (i32, i32) {
    %c0_i32 = arith.constant 0 : i32
    %c0_i32_0 = arith.constant 0 : i32
    %c0_i32_1 = arith.constant 0 : i32
    return %c0_i32, %c0_i32_0 : i32, i32
  }
  func.func @transform_8(%arg0: i32) -> (i32, i32, i32) {
    %c0_i32 = arith.constant 0 : i32
    %c0_i32_0 = arith.constant 0 : i32
    %c0_i32_1 = arith.constant 0 : i32
    return %arg0, %c0_i32, %c0_i32_0 : i32, i32, i32
  }
}

</mosaic_0001>

<bundles_post_ra>
// kernel: tpu_custom_call.1
= control target key start
LH: loop header
LB: loop body
LE: loop exit
PB: predicated region body
PF: predicated region fallthrough
CT: control target
= control target key end

     0   :  { %13 = vsyncpa [#allocation10], 0  ;;  %s11823_s0 = inlined_call_operand.vmem [shape: f32[2,16,16,4], index: 0, kind: input, shape index: {}]   ;;  %s11824_s1 = inlined_call_operand.vmem [shape: f32[8,100], index: 1, kind: input, shape index: {}]   ;;  %s11825_s2 = inlined_call_operand.vmem [shape: f32[8,1], index: 2, kind: input, shape index: {}]   ;;  %s11826_s3 = inlined_call_operand.vmem [shape: f32[8,200], index: 3, kind: input, shape index: {}]   ;;  %s11827_s4 = inlined_call_operand.vmem [shape: f32[8,1], index: 4, kind: input, shape index: {}]   ;;  %s11828_s5 = inlined_call_operand.vmem [shape: f32[4,400], index: 5, kind: input, shape index: {}]   ;;  %s11829_s6 = inlined_call_operand.vmem [shape: f32[4,1], index: 6, kind: input, shape index: {}]   ;;  %s11830_s7 = inlined_call_operand.vmem [shape: f32[64,256], index: 7, kind: input, shape index: {}]   ;;  %s11831_s8 = inlined_call_operand.hbm [shape: f32[2,4,256], index: 8, kind: output, shape index: {}]  }
   0x1   :  { %15 = vsyncpa [#allocation10 + $0x1], 0  ;;  %s8917_s27 = smov 0   ;;  %s8919_s28 = smov 0  }
   0x2   :  { %s8921_s29 = smov 0   ;;  %s8923_s30 = smov 0  }
   0x3 LB: > { %s8938_s9 = sadd.s32 4294967295, %s8866_s30   ;;  %s7509_s10 = sadd.s32 4294967294, %s8866_s30   ;;  %s8866_s30 = sphi %s8923_s30, %s12353_s30   ;;  %s8862_s29 = sphi %s8921_s29, %s12352_s29   ;;  %s8858_s28 = sphi %s8919_s28, %s12351_s28   ;;  %s8854_s27 = sphi %s8917_s27, %s12350_s27  }
   0x4   : > { %s8942_s11 = sadd.s32 1, %s8866_s30   ;;  %s201_s12 = sadd.s32 1, %s8862_s29 }
   0x5   : > { %s198_s13 = ssub.s32 %s8866_s30, %s8942_s11  ;;  %p211_p0 = scmp.ne.s32.totalorder %s8862_s29, %s8858_s28 }
   0x6   : > { %p199_p1 = scmp.eq.s32.totalorder %s198_s13, 0  ;;  %p212_p2 = scmp.eq.s32.totalorder %s8938_s9, 1 }
   0x7   : > { %p217_p3 = scmp.ne.s32.totalorder %s8858_s28, %s8854_s27  ;;  %p218_p4 = scmp.eq.s32.totalorder %s7509_s10, 1 }
   0x8   : > { %s8953_s14 = scalar_select %p199_p1, %s8862_s29, %s201_s12  }
   0x9   : > { %p8955_p5 = por %p212_p2, %p211_p0  ;;  %p8959_p6 = por %p218_p4, %p217_p3 }
   0xa   : > { %p7512_p7 = scmp.ge.s32.totalorder %s8866_s30, 1  ;;  %p265_p8 = scmp.lt.s32.totalorder %s8866_s30, 3 }
   0xc   : > { %p266_p9 = pnand %p7512_p7, %p265_p8 }
   0xe   : > { %269 = sbr.rel (%p266_p9) target bundleno = 4453 (0x1165), region = 52 }
  0x15   : > { %p299_p10 = scmp.lt.s32.totalorder %s8938_s9, 1  ;;  %vm368_vm0 = vcmask 31744   ;;  %vm371_vm1 = vcmask 27648   ;;  %v11832_v0 = vmov 0.0   ;;  %vm3025_vm2 = vcmask 1043456   ;;  %s7528_s20 = sshll.u32 %s8938_s9, 7 }
  0x16   : > { %394 = vst.msk [vmem:[#allocation2 + $0xc0] sm:$0xff] %vm368_vm0, %v11832_v0  ;;  %395 = vst.msk [vmem:[#allocation2 + $0xc8] sm:$0xff] %vm368_vm0, %v11832_v0  ;;  %3096 = vmatprep.mubr.f32.mxu0 %v11832_v0  ;;  %vm3021_vm3 = vcmask 818176   ;;  %vm3183_vm4 = vcmask 64512   ;;  %vm3248_vm5 = vcmask 60416   ;;  %vm3321_vm6 = vcmask 523264   ;;  %s11781_s25 = scalar_lea.hbm %s11831_s8, %s7528_s20 }
  0x17   : > { %369 = vst.msk [vmem:[#allocation2] sm:$0xff] %vm368_vm0, %v11832_v0  ;;  %370 = vst.msk [vmem:[#allocation2 + $0x8] sm:$0xff] %vm368_vm0, %v11832_v0  ;;  %s300_s17 = scalar_select %p299_p10, %s8938_s9, 1  ;;  %vm4343_vm7 = vcmask 588800   ;;  %vm4575_vm8 = vcmask 130048   ;;  %vm4578_vm9 = vcmask 125952  }
  0x18   : > { %373 = vst.msk [vmem:[#allocation2 + $0x18] sm:$0xff] %vm368_vm0, %v11832_v0  ;;  %374 = vst.msk [vmem:[#allocation2 + $0x20] sm:$0xff] %vm368_vm0, %v11832_v0  ;;  %s8871_s9 = smov [#allocation9]  }
  0x19   : > { %376 = vst.msk [vmem:[#allocation2 + $0x30] sm:$0xff] %vm368_vm0, %v11832_v0  ;;  %377 = vst.msk [vmem:[#allocation2 + $0x38] sm:$0xff] %vm368_vm0, %v11832_v0  ;;  %s7527_s18 = sshll.u32 %s300_s17, 8  ;;  %s8808_s12 = sshll.u32 %s8871_s9, 4  ;;  %s8809_s12 = int_to_ptr.vmem [resolvable:$false] %s8808_s12 }
  0x1a   : > { %379 = vst.msk [vmem:[#allocation2 + $0x48] sm:$0xff] %vm368_vm0, %v11832_v0  ;;  %380 = vst.msk [vmem:[#allocation2 + $0x50] sm:$0xff] %vm368_vm0, %v11832_v0  ;;  %s9093_s21 = scalar_lea.vmem %s11823_s0, %s7527_s18  ;;  %s296_s18 = sand.u32 1, %s8858_s28  }
  0x1b   : > { %382 = vst.msk [vmem:[#allocation2 + $0x60] sm:$0xff] %vm368_vm0, %v11832_v0  ;;  %383 = vst.msk [vmem:[#allocation2 + $0x68] sm:$0xff] %vm368_vm0, %v11832_v0  ;;  %v316_v1 = vld [vmem:[%s9093_s21 + $0x60] sm:$0xff]  ;;  %v317_v2 = vld [vmem:[%s9093_s21 + $0x68] sm:$0xff]  ;;  %s7513_s19 = sshll.u32 %s296_s18, 3  ;;  %s7436_s26 = scalar_lea.sflag [#allocation10], %s296_s18 }
  0x1c   : > { %385 = vst.msk [vmem:[#allocation2 + $0x78] sm:$0xff] %vm368_vm0, %v11832_v0  ;;  %386 = vst.msk [vmem:[#allocation2 + $0x80] sm:$0xff] %vm368_vm0, %v11832_v0  ;;  %v318_v3 = vld [vmem:[%s9093_s21 + $0x70] sm:$0xff]  ;;  %v348_v4 = vmax.f32 %v316_v1, 0.0  ;;  %v349_v5 = vmax.f32 %v317_v2, 0.0  ;;  %v319_v7 = vld [vmem:[%s9093_s21 + $0x78] sm:$0xff] }
  0x1d   : > { %388 = vst.msk [vmem:[#allocation2 + $0x90] sm:$0xff] %vm368_vm0, %v11832_v0  ;;  %389 = vst.msk [vmem:[#allocation2 + $0x98] sm:$0xff] %vm368_vm0, %v11832_v0  ;;  %v350_v6 = vmax.f32 %v318_v3, 0.0  ;;  %v320_v8 = vld [vmem:[%s9093_s21 + $0x80] sm:$0xff]  ;;  %v351_v11 = vmax.f32 %v319_v7, 0.0  ;;  %v321_v15 = vld [vmem:[%s9093_s21 + $0x88] sm:$0xff] }
  0x1e   : > { %391 = vst.msk [vmem:[#allocation2 + $0xa8] sm:$0xff] %vm368_vm0, %v11832_v0  ;;  %392 = vst.msk [vmem:[#allocation2 + $0xb0] sm:$0xff] %vm368_vm0, %v11832_v0  ;;  %v304_v9 = vld [vmem:[%s9093_s21] sm:$0xff]  ;;  %v352_v12 = vmax.f32 %v320_v8, 0.0  ;;  %v464_v14 = vld [vmem:[#allocation2 + $0x8] sm:$0xff]  ;;  %v353_v17 = vmax.f32 %v321_v15, 0.0 }
  0x1f   : > { %397 = vst.msk [vmem:[#allocation2 + $0xd8] sm:$0xff] %vm368_vm0, %v11832_v0  ;;  %398 = vst.msk [vmem:[#allocation2 + $0xe0] sm:$0xff] %vm368_vm0, %v11832_v0  ;;  %v463_v10 = vld [vmem:[#allocation2] sm:$0xff]  ;;  %v336_v13 = vmax.f32 %v304_v9, 0.0  ;;  %v305_v16 = vld [vmem:[%s9093_s21 + $0x8] sm:$0xff]  ;;  %s8810_s13 = scalar_lea.vmem %s8809_s12, 256 }
  0x20   : > { %400 = vst.msk [vmem:[#allocation2 + $0xf0] sm:$0xff] %vm368_vm0, %v11832_v0  ;;  %401 = vst.msk [vmem:[#allocation2 + $0xf8] sm:$0xff] %vm368_vm0, %v11832_v0  ;;  %495 = vxpose.xlu0.b32.start [1/16] (narrow) %v463_v10, 8  ;;  %v337_v18 = vmax.f32 %v305_v16, 0.0  ;;  %v322_v19 = vld [vmem:[%s9093_s21 + $0x90] sm:$0xff]  ;;  %v323_v21 = vld [vmem:[%s9093_s21 + $0x98] sm:$0xff] }
  0x21   : > { %403 = vst.msk [vmem:[#allocation2 + $0x108] sm:$0xff] %vm368_vm0, %v11832_v0  ;;  %404 = vst.msk [vmem:[#allocation2 + $0x110] sm:$0xff] %vm368_vm0, %v11832_v0  ;;  %v306_v20 = vld [vmem:[%s9093_s21 + $0x10] sm:$0xff]  ;;  %v354_v22 = vmax.f32 %v322_v19, 0.0  ;;  %v355_v24 = vmax.f32 %v323_v21, 0.0  ;;  %v307_v25 = vld [vmem:[%s9093_s21 + $0x18] sm:$0xff] }
  0x22   : > { %406 = vst.msk [vmem:[#allocation2 + $0x120] sm:$0xff] %vm368_vm0, %v11832_v0  ;;  %407 = vst.msk [vmem:[#allocation2 + $0x128] sm:$0xff] %vm368_vm0, %v11832_v0  ;;  %v338_v23 = vmax.f32 %v306_v20, 0.0  ;;  %v324_v26 = vld [vmem:[%s9093_s21 + $0xa0] sm:$0xff]  ;;  %v9115_v28 = vld [vmem:[#allocation2 + $0x18] sm:$0xff]  ;;  %v339_v29 = vmax.f32 %v307_v25, 0.0 }
  0x23   : > { %409 = vst.msk [vmem:[#allocation2 + $0x138] sm:$0xff] %vm368_vm0, %v11832_v0  ;;  %410 = vst.msk [vmem:[#allocation2 + $0x140] sm:$0xff] %vm368_vm0, %v11832_v0  ;;  %v308_v27 = vld [vmem:[%s9093_s21 + $0x20] sm:$0xff]  ;;  %v356_v30 = vmax.f32 %v324_v26, 0.0  ;;  %v325_v32 = vld [vmem:[%s9093_s21 + $0xa8] sm:$0xff] }
  0x24   : > { %412 = vst.msk [vmem:[#allocation2 + $0x150] sm:$0xff] %vm368_vm0, %v11832_v0  ;;  %413 = vst.msk [vmem:[#allocation2 + $0x158] sm:$0xff] %vm368_vm0, %v11832_v0  ;;  %v340_v31 = vmax.f32 %v308_v27, 0.0  ;;  %v309_v33 = vld [vmem:[%s9093_s21 + $0x28] sm:$0xff]  ;;  %v326_v34 = vld [vmem:[%s9093_s21 + $0xb0] sm:$0xff]  ;;  %496 = vxpose.xlu0.b32.cont [2/16] (narrow) %v464_v14, 8 }
  0x25   : > { %415 = vst.msk [vmem:[#allocation2 + $0x168] sm:$0xff] %vm368_vm0, %v11832_v0  ;;  %416 = vst.msk [vmem:[#allocation2 + $0x170] sm:$0xff] %vm368_vm0, %v11832_v0  ;;  %v357_v35 = vmax.f32 %v325_v32, 0.0  ;;  %v341_v36 = vmax.f32 %v309_v33, 0.0  ;;  %v358_v37 = vmax.f32 %v326_v34, 0.0  ;;  %v310_v38 = vld [vmem:[%s9093_s21 + $0x30] sm:$0xff] }
  0x26   : > { %418 = vst.msk [vmem:[#allocation2 + $0x180] sm:$0xff] %vm368_vm0, %v11832_v0  ;;  %419 = vst.msk [vmem:[#allocation2 + $0x188] sm:$0xff] %vm368_vm0, %v11832_v0  ;;  %v327_v39 = vld [vmem:[%s9093_s21 + $0xb8] sm:$0xff]  ;;  %v342_v40 = vmax.f32 %v310_v38, 0.0  ;;  %v328_v43 = vld [vmem:[%s9093_s21 + $0xc0] sm:$0xff] }
  0x27   : > { %421 = vst.msk [vmem:[#allocation2 + $0x198] sm:$0xff] %vm368_vm0, %v11832_v0  ;;  %422 = vst.msk [vmem:[#allocation2 + $0x1a0] sm:$0xff] %vm368_vm0, %v11832_v0  ;;  %v359_v41 = vmax.f32 %v327_v39, 0.0  ;;  %v311_v42 = vld [vmem:[%s9093_s21 + $0x38] sm:$0xff]  ;;  %v312_v44 = vld [vmem:[%s9093_s21 + $0x40] sm:$0xff]  ;;  %v360_v46 = vmax.f32 %v328_v43, 0.0 }
  0x28   : > { %424 = vst.msk [vmem:[#allocation2 + $0x1b0] sm:$0xff] %vm368_vm0, %v11832_v0  ;;  %425 = vst.msk [vmem:[#allocation2 + $0x1b8] sm:$0xff] %vm368_vm0, %v11832_v0  ;;  %v343_v45 = vmax.f32 %v311_v42, 0.0  ;;  %v344_v47 = vmax.f32 %v312_v44, 0.0  ;;  %v329_v48 = vld [vmem:[%s9093_s21 + $0xc8] sm:$0xff]  ;;  %v330_v50 = vld [vmem:[%s9093_s21 + $0xd0] sm:$0xff] }
  0x29   : > { %427 = vst.msk [vmem:[#allocation2 + $0x1c8] sm:$0xff] %vm368_vm0, %v11832_v0  ;;  %428 = vst.msk [vmem:[#allocation2 + $0x1d0] sm:$0xff] %vm368_vm0, %v11832_v0  ;;  %v313_v49 = vld [vmem:[%s9093_s21 + $0x48] sm:$0xff]  ;;  %v361_v52 = vmax.f32 %v329_v48, 0.0  ;;  %v362_v54 = vmax.f32 %v330_v50, 0.0  ;;  %497 = vxpose.xlu0.b32.cont [3/16] (narrow) %v9115_v28, 8 }
  0x2a   : > { %396 = vst.msk [vmem:[#allocation2 + $0xd0] sm:$0xf] %vm371_vm1, %v11832_v0  ;;  %372 = vst.msk [vmem:[#allocation2 + $0x10] sm:$0xf] %vm371_vm1, %v11832_v0  ;;  %v345_v53 = vmax.f32 %v313_v49, 0.0  ;;  %v9144_v56 = vld [vmem:[#allocation2 + $0x20] sm:$0xff] }
  0x2b   : > { %375 = vst.msk [vmem:[#allocation2 + $0x28] sm:$0xf] %vm371_vm1, %v11832_v0  ;;  %378 = vst.msk [vmem:[#allocation2 + $0x40] sm:$0xf] %vm371_vm1, %v11832_v0  ;;  %v314_v57 = vld [vmem:[%s9093_s21 + $0x50] sm:$0xff]  ;;  %v331_v58 = vld [vmem:[%s9093_s21 + $0xd8] sm:$0xff] }
  0x2c   : > { %381 = vst.msk [vmem:[#allocation2 + $0x58] sm:$0xf] %vm371_vm1, %v11832_v0  ;;  %384 = vst.msk [vmem:[#allocation2 + $0x70] sm:$0xf] %vm371_vm1, %v11832_v0  ;;  %v315_v59 = vld [vmem:[%s9093_s21 + $0x58] sm:$0xff]  ;;  %v346_v60 = vmax.f32 %v314_v57, 0.0 }
  0x2d   : > { %387 = vst.msk [vmem:[#allocation2 + $0x88] sm:$0xf] %vm371_vm1, %v11832_v0  ;;  %390 = vst.msk [vmem:[#allocation2 + $0xa0] sm:$0xf] %vm371_vm1, %v11832_v0  ;;  %v363_v61 = vmax.f32 %v331_v58, 0.0  ;;  %v347_v62 = vmax.f32 %v315_v59, 0.0 }
  0x2e   : > { %393 = vst.msk [vmem:[#allocation2 + $0xb8] sm:$0xf] %vm371_vm1, %v11832_v0  ;;  %399 = vst.msk [vmem:[#allocation2 + $0xe8] sm:$0xf] %vm371_vm1, %v11832_v0  ;;  %498 = vxpose.xlu0.b32.cont [4/16] (narrow) %v9144_v56, 8  ;;  %v561_v25 = vld [vmem:[#allocation2 + $0x1] sm:$0xff] }
  0x2f   : > { %402 = vst.msk [vmem:[#allocation2 + $0x100] sm:$0xf] %vm371_vm1, %v11832_v0  ;;  %405 = vst.msk [vmem:[#allocation2 + $0x118] sm:$0xf] %vm371_vm1, %v11832_v0 }
  0x30   : > { %408 = vst.msk [vmem:[#allocation2 + $0x130] sm:$0xf] %vm371_vm1, %v11832_v0  ;;  %411 = vst.msk [vmem:[#allocation2 + $0x148] sm:$0xf] %vm371_vm1, %v11832_v0 }
  0x31   : > { %414 = vst.msk [vmem:[#allocation2 + $0x160] sm:$0xf] %vm371_vm1, %v11832_v0  ;;  %417 = vst.msk [vmem:[#allocation2 + $0x178] sm:$0xf] %vm371_vm1, %v11832_v0  ;;  %v562_v27 = vld [vmem:[#allocation2 + $0x9] sm:$0xff] }
  0x32   : > { %420 = vst.msk [vmem:[#allocation2 + $0x190] sm:$0xf] %vm371_vm1, %v11832_v0  ;;  %423 = vst.msk [vmem:[#allocation2 + $0x1a8] sm:$0xf] %vm371_vm1, %v11832_v0  ;;  %v9246_v32 = vld [vmem:[#allocation2 + $0x21] sm:$0xff] }
  0x33   : > { %426 = vst.msk [vmem:[#allocation2 + $0x1c0] sm:$0xf] %vm371_vm1, %v11832_v0  ;;  %429 = vst.msk [vmem:[#allocation2 + $0x1d8] sm:$0xf] %vm371_vm1, %v11832_v0 }
  0x34   : > { %443 = vst.msk [vmem:[#allocation2 + $0xc2] sm:$0xff] %vm368_vm0, %v348_v4  ;;  %444 = vst.msk [vmem:[#allocation2 + $0xca] sm:$0xff] %vm368_vm0, %v349_v5 }
  0x35   : > { %445 = vst.msk [vmem:[#allocation2 + $0xda] sm:$0xff] %vm368_vm0, %v350_v6  ;;  %446 = vst.msk [vmem:[#allocation2 + $0xe2] sm:$0xff] %vm368_vm0, %v351_v11 }
  0x36   : > { %447 = vst.msk [vmem:[#allocation2 + $0xf2] sm:$0xff] %vm368_vm0, %v352_v12  ;;  %431 = vst.msk [vmem:[#allocation2 + $0x32] sm:$0xff] %vm368_vm0, %v336_v13 }
  0x37   : > { %448 = vst.msk [vmem:[#allocation2 + $0xfa] sm:$0xff] %vm368_vm0, %v353_v17  ;;  %432 = vst.msk [vmem:[#allocation2 + $0x3a] sm:$0xff] %vm368_vm0, %v337_v18 }
  0x38   : > { %449 = vst.msk [vmem:[#allocation2 + $0x10a] sm:$0xff] %vm368_vm0, %v354_v22  ;;  %433 = vst.msk [vmem:[#allocation2 + $0x4a] sm:$0xff] %vm368_vm0, %v338_v23 }
  0x39   : > { %450 = vst.msk [vmem:[#allocation2 + $0x112] sm:$0xff] %vm368_vm0, %v355_v24  ;;  %434 = vst.msk [vmem:[#allocation2 + $0x52] sm:$0xff] %vm368_vm0, %v339_v29 }
  0x3a   : > { %451 = vst.msk [vmem:[#allocation2 + $0x122] sm:$0xff] %vm368_vm0, %v356_v30  ;;  %435 = vst.msk [vmem:[#allocation2 + $0x62] sm:$0xff] %vm368_vm0, %v340_v31  ;;  %v9240_v30 = vld [vmem:[#allocation2 + $0x19] sm:$0xff] }
  0x3b   : > { %452 = vst.msk [vmem:[#allocation2 + $0x12a] sm:$0xff] %vm368_vm0, %v357_v35  ;;  %436 = vst.msk [vmem:[#allocation2 + $0x6a] sm:$0xff] %vm368_vm0, %v341_v36  ;;  %v479_v51 = vld [vmem:[#allocation2 + $0xc0] sm:$0xff]  ;;  %v9141_v55 = vld [vmem:[#allocation2 + $0xc8] sm:$0xff] }
  0x3c   : > { %453 = vst.msk [vmem:[#allocation2 + $0x13a] sm:$0xff] %vm368_vm0, %v358_v37  ;;  %437 = vst.msk [vmem:[#allocation2 + $0x7a] sm:$0xff] %vm368_vm0, %v342_v40  ;;  %527 = vxpose.xlu1.b32.start [1/16] (narrow) %v479_v51, 8  ;;  %v9160_v63 = vld [vmem:[#allocation2 + $0xd8] sm:$0xff]  ;;  %v9166_v2 = vld [vmem:[#allocation2 + $0xe0] sm:$0xff] }
  0x3d   : > { %454 = vst.msk [vmem:[#allocation2 + $0x142] sm:$0xff] %vm368_vm0, %v359_v41  ;;  %438 = vst.msk [vmem:[#allocation2 + $0x82] sm:$0xff] %vm368_vm0, %v343_v45  ;;  %v9162_v1 = vld [vmem:[#allocation2 + $0x30] sm:$0xff]  ;;  %v9238_v29 = vld [vmem:[#allocation2 + $0xc1] sm:$0xff] }
  0x3e   : > { %455 = vst.msk [vmem:[#allocation2 + $0x152] sm:$0xff] %vm368_vm0, %v360_v46  ;;  %439 = vst.msk [vmem:[#allocation2 + $0x92] sm:$0xff] %vm368_vm0, %v344_v47  ;;  %499 = vxpose.xlu0.b32.cont [5/16] (narrow) %v9162_v1, 8  ;;  %v9168_v3 = vld [vmem:[#allocation2 + $0x38] sm:$0xff]  ;;  %v9172_v4 = vld [vmem:[#allocation2 + $0xf0] sm:$0xff] }
  0x3f   : > { %456 = vst.msk [vmem:[#allocation2 + $0x15a] sm:$0xff] %vm368_vm0, %v361_v52  ;;  %440 = vst.msk [vmem:[#allocation2 + $0x9a] sm:$0xff] %vm368_vm0, %v345_v53  ;;  %v9174_v5 = vld [vmem:[#allocation2 + $0x48] sm:$0xff]  ;;  %v9178_v6 = vld [vmem:[#allocation2 + $0xf8] sm:$0xff] }
  0x40   : > { %457 = vst.msk [vmem:[#allocation2 + $0x16a] sm:$0xff] %vm368_vm0, %v362_v54  ;;  %528 = vxpose.xlu1.b32.cont [2/16] (narrow) %v9141_v55, 8  ;;  %441 = vst.msk [vmem:[#allocation2 + $0xaa] sm:$0xff] %vm368_vm0, %v346_v60  ;;  %v9180_v7 = vld [vmem:[#allocation2 + $0x50] sm:$0xff]  ;;  %v9184_v8 = vld [vmem:[#allocation2 + $0x108] sm:$0xff] }
  0x41   : > { %458 = vst.msk [vmem:[#allocation2 + $0x172] sm:$0xff] %vm368_vm0, %v363_v61  ;;  %442 = vst.msk [vmem:[#allocation2 + $0xb2] sm:$0xff] %vm368_vm0, %v347_v62  ;;  %v9186_v9 = vld [vmem:[#allocation2 + $0x60] sm:$0xff]  ;;  %v9190_v10 = vld [vmem:[#allocation2 + $0x110] sm:$0xff] }
  0x42   : > { %500 = vxpose.xlu0.b32.cont [6/16] (narrow) %v9168_v3, 8  ;;  %v9192_v11 = vld [vmem:[#allocation2 + $0x68] sm:$0xff]  ;;  %v9196_v12 = vld [vmem:[#allocation2 + $0x120] sm:$0xff]  ;;  %12007 = vst [vmem:[#allocation12_spill] sm:$0xff] %v9238_v29  ;;  %v9252_v34 = vld [vmem:[#allocation2 + $0x31] sm:$0xff] }
  0x43   : > { %v9198_v13 = vld [vmem:[#allocation2 + $0x78] sm:$0xff]  ;;  %v9202_v14 = vld [vmem:[#allocation2 + $0x128] sm:$0xff] }
  0x44   : > { %529 = vxpose.xlu1.b32.cont [3/16] (narrow) %v9160_v63, 8  ;;  %v9204_v15 = vld [vmem:[#allocation2 + $0x80] sm:$0xff]  ;;  %v9208_v16 = vld [vmem:[#allocation2 + $0x138] sm:$0xff]  ;;  %v9244_v31 = vld [vmem:[#allocation2 + $0xc9] sm:$0xff] }
  0x45   : > { %v9210_v17 = vld [vmem:[#allocation2 + $0x90] sm:$0xff]  ;;  %v9214_v18 = vld [vmem:[#allocation2 + $0x140] sm:$0xff]  ;;  %12008 = vst [vmem:[#allocation13_spill] sm:$0xff] %v9244_v31 }
  0x46   : > { %501 = vxpose.xlu0.b32.cont [7/16] (narrow) %v9174_v5, 8  ;;  %v9216_v19 = vld [vmem:[#allocation2 + $0x98] sm:$0xff]  ;;  %v9220_v20 = vld [vmem:[#allocation2 + $0x150] sm:$0xff]  ;;  %v9256_v35 = vld [vmem:[#allocation2 + $0xe1] sm:$0xff] }
  0x47   : > { %v9222_v21 = vld [vmem:[#allocation2 + $0xa8] sm:$0xff]  ;;  %v9226_v22 = vld [vmem:[#allocation2 + $0x158] sm:$0xff] }
  0x48   : > { %530 = vxpose.xlu1.b32.cont [4/16] (narrow) %v9166_v2, 8  ;;  %v9228_v23 = vld [vmem:[#allocation2 + $0xb0] sm:$0xff]  ;;  %v9232_v24 = vld [vmem:[#allocation2 + $0x168] sm:$0xff]  ;;  %v9250_v33 = vld [vmem:[#allocation2 + $0xd9] sm:$0xff] }
  0x49   : > { %v9235_v26 = vld [vmem:[#allocation2 + $0x170] sm:$0xff]  ;;  %v9258_v36 = vld [vmem:[#allocation2 + $0x39] sm:$0xff]  ;;  %v9276_v42 = vld [vmem:[#allocation2 + $0x61] sm:$0xff] }
  0x4a   : > { %502 = vxpose.xlu0.b32.cont [8/16] (narrow) %v9180_v7, 8  ;;  %v9262_v37 = vld [vmem:[#allocation2 + $0xf1] sm:$0xff]  ;;  %v9264_v38 = vld [vmem:[#allocation2 + $0x49] sm:$0xff]  ;;  %v9268_v39 = vld [vmem:[#allocation2 + $0xf9] sm:$0xff] }
  0x4b   : > { %v9270_v40 = vld [vmem:[#allocation2 + $0x51] sm:$0xff]  ;;  %v9274_v41 = vld [vmem:[#allocation2 + $0x109] sm:$0xff]  ;;  %v9286_v45 = vld [vmem:[#allocation2 + $0x121] sm:$0xff] }
  0x4c   : > { %531 = vxpose.xlu1.b32.cont [5/16] (narrow) %v9172_v4, 8  ;;  %v9280_v43 = vld [vmem:[#allocation2 + $0x111] sm:$0xff]  ;;  %v9282_v44 = vld [vmem:[#allocation2 + $0x69] sm:$0xff]  ;;  %v9288_v46 = vld [vmem:[#allocation2 + $0x79] sm:$0xff] }
  0x4d   : > { %v9292_v47 = vld [vmem:[#allocation2 + $0x129] sm:$0xff]  ;;  %v9294_v48 = vld [vmem:[#allocation2 + $0x81] sm:$0xff]  ;;  %v9298_v49 = vld [vmem:[#allocation2 + $0x139] sm:$0xff] }
  0x4e   : > { %503 = vxpose.xlu0.b32.cont [9/16] (narrow) %v9186_v9, 8  ;;  %v9300_v50 = vld [vmem:[#allocation2 + $0x91] sm:$0xff]  ;;  %v9304_v51 = vld [vmem:[#allocation2 + $0x141] sm:$0xff]  ;;  %v9306_v52 = vld [vmem:[#allocation2 + $0x99] sm:$0xff] }
  0x4f   : > { %v9310_v53 = vld [vmem:[#allocation2 + $0x151] sm:$0xff]  ;;  %v9312_v54 = vld [vmem:[#allocation2 + $0xa9] sm:$0xff]  ;;  %v9316_v57 = vld [vmem:[#allocation2 + $0x159] sm:$0xff] }
  0x50   : > { %532 = vxpose.xlu1.b32.cont [6/16] (narrow) %v9178_v6, 8  ;;  %v9318_v58 = vld [vmem:[#allocation2 + $0xb1] sm:$0xff]  ;;  %v9322_v59 = vld [vmem:[#allocation2 + $0x169] sm:$0xff] }
  0x51   : > { %12009 = vst [vmem:[#allocation14_spill] sm:$0xff] %v9322_v59  ;;  %v665_v60 = vld [vmem:[#allocation2 + $0x2] sm:$0xff]  ;;  %v9325_v61 = vld [vmem:[#allocation2 + $0x171] sm:$0xff] }
  0x52   : > { %504 = vxpose.xlu0.b32.cont [10/16] (narrow) %v9192_v11, 8  ;;  %12010 = vst [vmem:[#allocation15_spill] sm:$0xff] %v9325_v61  ;;  %v666_v62 = vld [vmem:[#allocation2 + $0xa] sm:$0xff] }
  0x53   : > { %v9334_v0 = vld [vmem:[#allocation2 + $0xca] sm:$0xff] }
  0x54   : > { %533 = vxpose.xlu1.b32.cont [7/16] (narrow) %v9184_v8, 8  ;;  %12013 = vst [vmem:[#allocation18_spill] sm:$0xff] %v9334_v0 }
  0x56   : > { %505 = vxpose.xlu0.b32.cont [11/16] (narrow) %v9198_v13, 8 }
  0x58   : > { %534 = vxpose.xlu1.b32.cont [8/16] (narrow) %v9190_v10, 8 }
  0x5a   : > { %506 = vxpose.xlu0.b32.cont [12/16] (narrow) %v9204_v15, 8 }
  0x5c   : > { %535 = vxpose.xlu1.b32.cont [9/16] (narrow) %v9196_v12, 8 }
  0x5e   : > { %507 = vxpose.xlu0.b32.cont [13/16] (narrow) %v9210_v17, 8 }
  0x60   : > { %536 = vxpose.xlu1.b32.cont [10/16] (narrow) %v9202_v14, 8 }
  0x62   : > { %508 = vxpose.xlu0.b32.cont [14/16] (narrow) %v9216_v19, 8 }
  0x64   : > { %537 = vxpose.xlu1.b32.cont [11/16] (narrow) %v9208_v16, 8 }
  0x66   : > { %509 = vxpose.xlu0.b32.cont [15/16] (narrow) %v9222_v21, 8 }
  0x68   : > { %538 = vxpose.xlu1.b32.cont [12/16] (narrow) %v9214_v18, 8 }
  0x6a   : > { %510 = vxpose.xlu0.b32.end [16/16] (narrow) %v9228_v23, 8 }
  0x6c   : > { %539 = vxpose.xlu1.b32.cont [13/16] (narrow) %v9220_v20, 8 }
  0x6e   : > { %593 = vxpose.xlu0.b32.start [1/16] (narrow) %v561_v25, 8  ;;  %v9328_v25 = vld [vmem:[#allocation2 + $0xc2] sm:$0xff] }
  0x6f   : > { %12011 = vst [vmem:[#allocation16_spill] sm:$0xff] %v9328_v25 }
  0x70   : > { %540 = vxpose.xlu1.b32.cont [14/16] (narrow) %v9226_v22, 8 }
  0x72   : > { %594 = vxpose.xlu0.b32.cont [2/16] (narrow) %v562_v27, 8  ;;  %v9330_v27 = vld [vmem:[#allocation2 + $0x1a] sm:$0xff] }
  0x73   : > { %12012 = vst [vmem:[#allocation17_spill] sm:$0xff] %v9330_v27 }
  0x74   : > { %541 = vxpose.xlu1.b32.cont [15/16] (narrow) %v9232_v24, 8 }
  0x76   : > { %595 = vxpose.xlu0.b32.cont [3/16] (narrow) %v9240_v30, 8 }
  0x78   : > { %542 = vxpose.xlu1.b32.end [16/16] (narrow) %v9235_v26, 8 }
  0x7a   : > { %596 = vxpose.xlu0.b32.cont [4/16] (narrow) %v9246_v32, 8 }
  0x7c   : > { %625 = vxpose.xlu1.b32.start [1/16] (narrow) %v9238_v29, 8  ;;  %v764_v29 = vld [vmem:[#allocation2 + $0xb] sm:$0xff] }
  0x7e   : > { %597 = vxpose.xlu0.b32.cont [5/16] (narrow) %v9252_v34, 8 }
  0x80   : > { %626 = vxpose.xlu1.b32.cont [2/16] (narrow) %v9244_v31, 8  ;;  %v9336_v31 = vld [vmem:[#allocation2 + $0x22] sm:$0xff] }
  0x81   : > { %12014 = vst [vmem:[#allocation19_spill] sm:$0xff] %v9336_v31 }
  0x82   : > { %598 = vxpose.xlu0.b32.cont [6/16] (narrow) %v9258_v36, 8 }
  0x84   : > { %627 = vxpose.xlu1.b32.cont [3/16] (narrow) %v9250_v33, 8 }
  0x86   : > { %599 = vxpose.xlu0.b32.cont [7/16] (narrow) %v9264_v38, 8 }
  0x88   : > { %628 = vxpose.xlu1.b32.cont [4/16] (narrow) %v9256_v35, 8 }
  0x8a   : > { %600 = vxpose.xlu0.b32.cont [8/16] (narrow) %v9270_v40, 8 }
  0x8c   : > { %629 = vxpose.xlu1.b32.cont [5/16] (narrow) %v9262_v37, 8 }
  0x8e   : > { %601 = vxpose.xlu0.b32.cont [9/16] (narrow) %v9276_v42, 8 }
  0x90   : > { %630 = vxpose.xlu1.b32.cont [6/16] (narrow) %v9268_v39, 8 }
  0x92   : > { %602 = vxpose.xlu0.b32.cont [10/16] (narrow) %v9282_v44, 8 }
  0x94   : > { %631 = vxpose.xlu1.b32.cont [7/16] (narrow) %v9274_v41, 8 }
  0x96   : > { %603 = vxpose.xlu0.b32.cont [11/16] (narrow) %v9288_v46, 8 }
  0x98   : > { %632 = vxpose.xlu1.b32.cont [8/16] (narrow) %v9280_v43, 8 }
  0x9a   : > { %604 = vxpose.xlu0.b32.cont [12/16] (narrow) %v9294_v48, 8 }
  0x9c   : > { %633 = vxpose.xlu1.b32.cont [9/16] (narrow) %v9286_v45, 8 }
  0x9e   : > { %605 = vxpose.xlu0.b32.cont [13/16] (narrow) %v9300_v50, 8 }
  0xa0   : > { %634 = vxpose.xlu1.b32.cont [10/16] (narrow) %v9292_v47, 8 }
  0xa2   : > { %606 = vxpose.xlu0.b32.cont [14/16] (narrow) %v9306_v52, 8 }
  0xa4   : > { %635 = vxpose.xlu1.b32.cont [11/16] (narrow) %v9298_v49, 8 }
  0xa6   : > { %607 = vxpose.xlu0.b32.cont [15/16] (narrow) %v9312_v54, 8 }
  0xa8   : > { %636 = vxpose.xlu1.b32.cont [12/16] (narrow) %v9304_v51, 8 }
  0xaa   : > { %608 = vxpose.xlu0.b32.end [16/16] (narrow) %v9318_v58, 8 }
  0xac   : > { %637 = vxpose.xlu1.b32.cont [13/16] (narrow) %v9310_v53, 8 }
  0xae   : > { %697 = vxpose.xlu0.b32.start [1/16] (narrow) %v665_v60, 8  ;;  %v9340_v60 = vld [vmem:[#allocation2 + $0xda] sm:$0xff] }
  0xaf   : > { %12015 = vst [vmem:[#allocation20_spill] sm:$0xff] %v9340_v60 }
  0xb0   : > { %638 = vxpose.xlu1.b32.cont [14/16] (narrow) %v9316_v57, 8 }
  0xb2   : > { %698 = vxpose.xlu0.b32.cont [2/16] (narrow) %v666_v62, 8  ;;  %v9346_v62 = vld [vmem:[#allocation2 + $0xe2] sm:$0xff] }
  0xb3   : > { %12017 = vst [vmem:[#allocation22_spill] sm:$0xff] %v9346_v62 }
  0xb4   : > { %639 = vxpose.xlu1.b32.cont [15/16] (narrow) %v9322_v59, 8  ;;  %v333_v59 = vld [vmem:[%s9093_s21 + $0xe8] sm:$0xff] }
  0xb6   : > { %699 = vxpose.xlu0.b32.cont [3/16] (narrow) %v9330_v27, 8  ;;  %v9352_v27 = vld [vmem:[#allocation2 + $0xf2] sm:$0xff] }
  0xb7   : > { %12019 = vst [vmem:[#allocation24_spill] sm:$0xff] %v9352_v27 }
  0xb8   : > { %640 = vxpose.xlu1.b32.end [16/16] (narrow) %v9325_v61, 8  ;;  %v9342_v61 = vld [vmem:[#allocation2 + $0x32] sm:$0xff] }
  0xb9   : > { %12016 = vst [vmem:[#allocation21_spill] sm:$0xff] %v9342_v61 }
  0xba   : > { %700 = vxpose.xlu0.b32.cont [4/16] (narrow) %v9336_v31, 8  ;;  %v9358_v31 = vld [vmem:[#allocation2 + $0xfa] sm:$0xff] }
  0xbb   : > { %12021 = vst [vmem:[#allocation26_spill] sm:$0xff] %v9358_v31 }
  0xbc   : > { %729 = vxpose.xlu1.b32.start [1/16] (narrow) %v9328_v25, 8  ;;  %v9348_v25 = vld [vmem:[#allocation2 + $0x3a] sm:$0xff] }
  0xbd   : > { %12018 = vst [vmem:[#allocation23_spill] sm:$0xff] %v9348_v25 }
  0xbe   : > { %701 = vxpose.xlu0.b32.cont [5/16] (narrow) %v9342_v61, 8  ;;  %v9364_v61 = vld [vmem:[#allocation2 + $0x10a] sm:$0xff] }
  0xbf   : > { %12023 = vst [vmem:[#allocation28_spill] sm:$0xff] %v9364_v61 }
  0xc0   : > { %730 = vxpose.xlu1.b32.cont [2/16] (narrow) %v9334_v0, 8  ;;  %v9354_v0 = vld [vmem:[#allocation2 + $0x4a] sm:$0xff] }
  0xc1   : > { %12020 = vst [vmem:[#allocation25_spill] sm:$0xff] %v9354_v0 }
  0xc2   : > { %702 = vxpose.xlu0.b32.cont [6/16] (narrow) %v9348_v25, 8  ;;  %v9370_v25 = vld [vmem:[#allocation2 + $0x112] sm:$0xff] }
  0xc3   : > { %12025 = vst [vmem:[#allocation30_spill] sm:$0xff] %v9370_v25 }
  0xc4   : > { %731 = vxpose.xlu1.b32.cont [3/16] (narrow) %v9340_v60, 8  ;;  %v9360_v60 = vld [vmem:[#allocation2 + $0x52] sm:$0xff] }
  0xc5   : > { %12022 = vst [vmem:[#allocation27_spill] sm:$0xff] %v9360_v60 }
  0xc6   : > { %703 = vxpose.xlu0.b32.cont [7/16] (narrow) %v9354_v0, 8  ;;  %v9376_v0 = vld [vmem:[#allocation2 + $0x122] sm:$0xff] }
  0xc7   : > { %12027 = vst [vmem:[#allocation32_spill] sm:$0xff] %v9376_v0 }
  0xc8   : > { %732 = vxpose.xlu1.b32.cont [4/16] (narrow) %v9346_v62, 8  ;;  %v9366_v62 = vld [vmem:[#allocation2 + $0x62] sm:$0xff] }
  0xc9   : > { %12024 = vst [vmem:[#allocation29_spill] sm:$0xff] %v9366_v62 }
  0xca   : > { %704 = vxpose.xlu0.b32.cont [8/16] (narrow) %v9360_v60, 8  ;;  %v9382_v60 = vld [vmem:[#allocation2 + $0x12a] sm:$0xff] }
  0xcb   : > { %12029 = vst [vmem:[#allocation34_spill] sm:$0xff] %v9382_v60 }
  0xcc   : > { %733 = vxpose.xlu1.b32.cont [5/16] (narrow) %v9352_v27, 8  ;;  %v9372_v27 = vld [vmem:[#allocation2 + $0x6a] sm:$0xff] }
  0xcd   : > { %12026 = vst [vmem:[#allocation31_spill] sm:$0xff] %v9372_v27 }
  0xce   : > { %705 = vxpose.xlu0.b32.cont [9/16] (narrow) %v9366_v62, 8  ;;  %v9388_v62 = vld [vmem:[#allocation2 + $0x13a] sm:$0xff] }
  0xcf   : > { %12031 = vst [vmem:[#allocation36_spill] sm:$0xff] %v9388_v62 }
  0xd0   : > { %734 = vxpose.xlu1.b32.cont [6/16] (narrow) %v9358_v31, 8  ;;  %v9378_v31 = vld [vmem:[#allocation2 + $0x7a] sm:$0xff] }
  0xd1   : > { %12028 = vst [vmem:[#allocation33_spill] sm:$0xff] %v9378_v31 }
  0xd2   : > { %706 = vxpose.xlu0.b32.cont [10/16] (narrow) %v9372_v27, 8  ;;  %v9394_v27 = vld [vmem:[#allocation2 + $0x142] sm:$0xff] }
  0xd3   : > { %12033 = vst [vmem:[#allocation38_spill] sm:$0xff] %v9394_v27 }
  0xd4   : > { %735 = vxpose.xlu1.b32.cont [7/16] (narrow) %v9364_v61, 8  ;;  %v9384_v61 = vld [vmem:[#allocation2 + $0x82] sm:$0xff] }
  0xd5   : > { %12030 = vst [vmem:[#allocation35_spill] sm:$0xff] %v9384_v61 }
  0xd6   : > { %707 = vxpose.xlu0.b32.cont [11/16] (narrow) %v9378_v31, 8  ;;  %v9400_v31 = vld [vmem:[#allocation2 + $0x152] sm:$0xff] }
  0xd7   : > { %12035 = vst [vmem:[#allocation40_spill] sm:$0xff] %v9400_v31 }
  0xd8   : > { %736 = vxpose.xlu1.b32.cont [8/16] (narrow) %v9370_v25, 8  ;;  %v9390_v25 = vld [vmem:[#allocation2 + $0x92] sm:$0xff] }
  0xd9   : > { %12032 = vst [vmem:[#allocation37_spill] sm:$0xff] %v9390_v25 }
  0xda   : > { %708 = vxpose.xlu0.b32.cont [12/16] (narrow) %v9384_v61, 8  ;;  %v9406_v61 = vld [vmem:[#allocation2 + $0x15a] sm:$0xff] }
  0xdb   : > { %12037 = vst [vmem:[#allocation42_spill] sm:$0xff] %v9406_v61 }
  0xdc   : > { %737 = vxpose.xlu1.b32.cont [9/16] (narrow) %v9376_v0, 8  ;;  %v9396_v0 = vld [vmem:[#allocation2 + $0x9a] sm:$0xff] }
  0xdd   : > { %12034 = vst [vmem:[#allocation39_spill] sm:$0xff] %v9396_v0 }
  0xde   : > { %709 = vxpose.xlu0.b32.cont [13/16] (narrow) %v9390_v25, 8  ;;  %v9412_v25 = vld [vmem:[#allocation2 + $0x16a] sm:$0xff] }
  0xdf   : > { %12039 = vst [vmem:[#allocation44_spill] sm:$0xff] %v9412_v25 }
  0xe0   : > { %738 = vxpose.xlu1.b32.cont [10/16] (narrow) %v9382_v60, 8  ;;  %v9402_v60 = vld [vmem:[#allocation2 + $0xaa] sm:$0xff] }
  0xe1   : > { %12036 = vst [vmem:[#allocation41_spill] sm:$0xff] %v9402_v60 }
  0xe2   : > { %710 = vxpose.xlu0.b32.cont [14/16] (narrow) %v9396_v0, 8  ;;  %v9415_v0 = vld [vmem:[#allocation2 + $0x172] sm:$0xff] }
  0xe3   : > { %12040 = vst [vmem:[#allocation45_spill] sm:$0xff] %v9415_v0 }
  0xe4   : > { %739 = vxpose.xlu1.b32.cont [11/16] (narrow) %v9388_v62, 8  ;;  %v9408_v62 = vld [vmem:[#allocation2 + $0xb2] sm:$0xff] }
  0xe5   : > { %12038 = vst [vmem:[#allocation43_spill] sm:$0xff] %v9408_v62 }
  0xe6   : > { %711 = vxpose.xlu0.b32.cont [15/16] (narrow) %v9402_v60, 8  ;;  %v9418_v60 = vld [vmem:[#allocation2 + $0xc3] sm:$0xff] }
  0xe7   : > { %12041 = vst [vmem:[#allocation46_spill] sm:$0xff] %v9418_v60 }
  0xe8   : > { %740 = vxpose.xlu1.b32.cont [12/16] (narrow) %v9394_v27, 8  ;;  %v763_v27 = vld [vmem:[#allocation2 + $0x3] sm:$0xff] }
  0xea   : > { %712 = vxpose.xlu0.b32.end [16/16] (narrow) %v9408_v62, 8  ;;  %v9424_v62 = vld [vmem:[#allocation2 + $0xcb] sm:$0xff] }
  0xeb   : > { %12043 = vst [vmem:[#allocation48_spill] sm:$0xff] %v9424_v62 }
  0xec   : > { %741 = vxpose.xlu1.b32.cont [13/16] (narrow) %v9400_v31, 8  ;;  %v9420_v31 = vld [vmem:[#allocation2 + $0x1b] sm:$0xff] }
  0xed   : > { %12042 = vst [vmem:[#allocation47_spill] sm:$0xff] %v9420_v31 }
  0xee   : > { %795 = vxpose.xlu0.b32.start [1/16] (narrow) %v763_v27, 8  ;;  %v9430_v27 = vld [vmem:[#allocation2 + $0xdb] sm:$0xff] }
  0xef   : > { %12045 = vst [vmem:[#allocation50_spill] sm:$0xff] %v9430_v27 }
  0xf0   : > { %742 = vxpose.xlu1.b32.cont [14/16] (narrow) %v9406_v61, 8  ;;  %v9426_v61 = vld [vmem:[#allocation2 + $0x23] sm:$0xff] }
  0xf1   : > { %12044 = vst [vmem:[#allocation49_spill] sm:$0xff] %v9426_v61 }
  0xf2   : > { %796 = vxpose.xlu0.b32.cont [2/16] (narrow) %v764_v29, 8  ;;  %v9436_v29 = vld [vmem:[#allocation2 + $0xe3] sm:$0xff] }
  0xf3   : > { %12047 = vst [vmem:[#allocation52_spill] sm:$0xff] %v9436_v29 }
  0xf4   : > { %743 = vxpose.xlu1.b32.cont [15/16] (narrow) %v9412_v25, 8 }
  0xf6   : > { %797 = vxpose.xlu0.b32.cont [3/16] (narrow) %v9420_v31, 8  ;;  %v9442_v31 = vld [vmem:[#allocation2 + $0xf3] sm:$0xff] }
  0xf7   : > { %12049 = vst [vmem:[#allocation54_spill] sm:$0xff] %v9442_v31 }
  0xf8   : > { %744 = vxpose.xlu1.b32.end [16/16] (narrow) %v9415_v0, 8  ;;  %v9432_v0 = vld [vmem:[#allocation2 + $0x33] sm:$0xff] }
  0xf9   : > { %12046 = vst [vmem:[#allocation51_spill] sm:$0xff] %v9432_v0 }
  0xfa   : > { %798 = vxpose.xlu0.b32.cont [4/16] (narrow) %v9426_v61, 8  ;;  %v9448_v61 = vld [vmem:[#allocation2 + $0xfb] sm:$0xff] }
  0xfb   : > { %12051 = vst [vmem:[#allocation56_spill] sm:$0xff] %v9448_v61 }
  0xfc   : > { %827 = vxpose.xlu1.b32.start [1/16] (narrow) %v9418_v60, 8  ;;  %v9438_v60 = vld [vmem:[#allocation2 + $0x3b] sm:$0xff] }
  0xfd   : > { %12048 = vst [vmem:[#allocation53_spill] sm:$0xff] %v9438_v60 }
  0xfe   : > { %799 = vxpose.xlu0.b32.cont [5/16] (narrow) %v9432_v0, 8  ;;  %v9454_v0 = vld [vmem:[#allocation2 + $0x10b] sm:$0xff] }
  0xff   : > { %12053 = vst [vmem:[#allocation58_spill] sm:$0xff] %v9454_v0 }
 0x100   : > { %828 = vxpose.xlu1.b32.cont [2/16] (narrow) %v9424_v62, 8  ;;  %v9444_v62 = vld [vmem:[#allocation2 + $0x4b] sm:$0xff] }
 0x101   : > { %12050 = vst [vmem:[#allocation55_spill] sm:$0xff] %v9444_v62 }
 0x102   : > { %800 = vxpose.xlu0.b32.cont [6/16] (narrow) %v9438_v60, 8  ;;  %v9460_v60 = vld [vmem:[#allocation2 + $0x113] sm:$0xff] }
 0x103   : > { %12055 = vst [vmem:[#allocation60_spill] sm:$0xff] %v9460_v60 }
 0x104   : > { %829 = vxpose.xlu1.b32.cont [3/16] (narrow) %v9430_v27, 8  ;;  %v9450_v27 = vld [vmem:[#allocation2 + $0x53] sm:$0xff] }
 0x105   : > { %12052 = vst [vmem:[#allocation57_spill] sm:$0xff] %v9450_v27 }
 0x106   : > { %801 = vxpose.xlu0.b32.cont [7/16] (narrow) %v9444_v62, 8  ;;  %v9466_v62 = vld [vmem:[#allocation2 + $0x123] sm:$0xff] }
 0x107   : > { %12057 = vst [vmem:[#allocation62_spill] sm:$0xff] %v9466_v62 }
 0x108   : > { %830 = vxpose.xlu1.b32.cont [4/16] (narrow) %v9436_v29, 8  ;;  %v9456_v29 = vld [vmem:[#allocation2 + $0x63] sm:$0xff] }
 0x109   : > { %12054 = vst [vmem:[#allocation59_spill] sm:$0xff] %v9456_v29 }
 0x10a   : > { %802 = vxpose.xlu0.b32.cont [8/16] (narrow) %v9450_v27, 8  ;;  %v332_v27 = vld [vmem:[%s9093_s21 + $0xe0] sm:$0xff] }
 0x10b   : > { %v364_v25 = vmax.f32 %v332_v27, 0.0  ;;  %v867_v27 = vld [vmem:[#allocation2 + $0x4] sm:$0xff] }
 0x10c   : > { %831 = vxpose.xlu1.b32.cont [5/16] (narrow) %v9442_v31, 8  ;;  %v9462_v31 = vld [vmem:[#allocation2 + $0x6b] sm:$0xff] }
 0x10d   : > { %12056 = vst [vmem:[#allocation61_spill] sm:$0xff] %v9462_v31  ;;  %459 = vst.msk [vmem:[#allocation2 + $0x182] sm:$0xff] %vm368_vm0, %v364_v25  ;;  %v868_v25 = vld [vmem:[#allocation2 + $0xc] sm:$0xff] }
 0x10e   : > { %803 = vxpose.xlu0.b32.cont [9/16] (narrow) %v9456_v29, 8  ;;  %v9474_v29 = vld [vmem:[#allocation2 + $0x83] sm:$0xff] }
 0x10f   : > { %12060 = vst [vmem:[#allocation65_spill] sm:$0xff] %v9474_v29 }
 0x110   : > { %832 = vxpose.xlu1.b32.cont [6/16] (narrow) %v9448_v61, 8  ;;  %v9468_v61 = vld [vmem:[#allocation2 + $0x7b] sm:$0xff] }
 0x111   : > { %12058 = vst [vmem:[#allocation63_spill] sm:$0xff] %v9468_v61 }
 0x112   : > { %804 = vxpose.xlu0.b32.cont [10/16] (narrow) %v9462_v31, 8  ;;  %v9480_v31 = vld [vmem:[#allocation2 + $0x93] sm:$0xff] }
 0x113   : > { %12062 = vst [vmem:[#allocation67_spill] sm:$0xff] %v9480_v31 }
 0x114   : > { %833 = vxpose.xlu1.b32.cont [7/16] (narrow) %v9454_v0, 8  ;;  %v9472_v0 = vld [vmem:[#allocation2 + $0x12b] sm:$0xff] }
 0x115   : > { %12059 = vst [vmem:[#allocation64_spill] sm:$0xff] %v9472_v0 }
 0x116   : > { %805 = vxpose.xlu0.b32.cont [11/16] (narrow) %v9468_v61, 8  ;;  %v9486_v61 = vld [vmem:[#allocation2 + $0x9b] sm:$0xff] }
 0x117   : > { %12064 = vst [vmem:[#allocation69_spill] sm:$0xff] %v9486_v61 }
 0x118   : > { %834 = vxpose.xlu1.b32.cont [8/16] (narrow) %v9460_v60, 8  ;;  %v9478_v60 = vld [vmem:[#allocation2 + $0x13b] sm:$0xff] }
 0x119   : > { %12061 = vst [vmem:[#allocation66_spill] sm:$0xff] %v9478_v60 }
 0x11a   : > { %806 = vxpose.xlu0.b32.cont [12/16] (narrow) %v9474_v29, 8  ;;  %v9492_v29 = vld [vmem:[#allocation2 + $0xab] sm:$0xff] }
 0x11b   : > { %12066 = vst [vmem:[#allocation71_spill] sm:$0xff] %v9492_v29 }
 0x11c   : > { %835 = vxpose.xlu1.b32.cont [9/16] (narrow) %v9466_v62, 8  ;;  %v9484_v62 = vld [vmem:[#allocation2 + $0x143] sm:$0xff] }
 0x11d   : > { %12063 = vst [vmem:[#allocation68_spill] sm:$0xff] %v9484_v62 }
 0x11e   : > { %807 = vxpose.xlu0.b32.cont [13/16] (narrow) %v9480_v31, 8  ;;  %v9498_v31 = vld [vmem:[#allocation2 + $0x15b] sm:$0xff] }
 0x120   : > { %836 = vxpose.xlu1.b32.cont [10/16] (narrow) %v9472_v0, 8  ;;  %v9490_v0 = vld [vmem:[#allocation2 + $0x153] sm:$0xff] }
 0x121   : > { %12065 = vst [vmem:[#allocation70_spill] sm:$0xff] %v9490_v0 }
 0x122   : > { %808 = vxpose.xlu0.b32.cont [14/16] (narrow) %v9486_v61, 8  ;;  %v9506_v61 = vld [vmem:[#allocation2 + $0x16b] sm:$0xff] }
 0x124   : > { %837 = vxpose.xlu1.b32.cont [11/16] (narrow) %v9478_v60, 8  ;;  %v9500_v60 = vld [vmem:[#allocation2 + $0xb3] sm:$0xff] }
 0x125   : > { %12067 = vst [vmem:[#allocation72_spill] sm:$0xff] %v9500_v60 }
 0x126   : > { %809 = vxpose.xlu0.b32.cont [15/16] (narrow) %v9492_v29, 8  ;;  %v9509_v29 = vld [vmem:[#allocation2 + $0x173] sm:$0xff] }
 0x127   : > { %12068 = vst [vmem:[#allocation73_spill] sm:$0xff] %v9509_v29 }
 0x128   : > { %838 = vxpose.xlu1.b32.cont [12/16] (narrow) %v9484_v62, 8  ;;  %v365_v62 = vmax.f32 %v333_v59, 0.0  ;;  %v9514_v59 = vld [vmem:[#allocation2 + $0x1c] sm:$0xff] }
 0x129   : > { %12070 = vst [vmem:[#allocation75_spill] sm:$0xff] %v9514_v59 }
 0x12a   : > { %810 = vxpose.xlu0.b32.end [16/16] (narrow) %v9500_v60, 8  ;;  %460 = vst.msk [vmem:[#allocation2 + $0x18a] sm:$0xff] %vm368_vm0, %v365_v62  ;;  %v9518_v62 = vld [vmem:[#allocation2 + $0xcc] sm:$0xff]  ;;  %v9520_v60 = vld [vmem:[#allocation2 + $0x24] sm:$0xff] }
 0x12b   : > { %12071 = vst [vmem:[#allocation76_spill] sm:$0xff] %v9518_v62  ;;  %12072 = vst [vmem:[#allocation77_spill] sm:$0xff] %v9520_v60 }
 0x12c   : > { %839 = vxpose.xlu1.b32.cont [13/16] (narrow) %v9490_v0, 8  ;;  %v9512_v0 = vld [vmem:[#allocation2 + $0xc4] sm:$0xff] }
 0x12d   : > { %12069 = vst [vmem:[#allocation74_spill] sm:$0xff] %v9512_v0 }
 0x12e   : > { %899 = vxpose.xlu0.b32.start [1/16] (narrow) %v867_v27, 8  ;;  %v9524_v27 = vld [vmem:[#allocation2 + $0xdc] sm:$0xff] }
 0x12f   : > { %12073 = vst [vmem:[#allocation78_spill] sm:$0xff] %v9524_v27 }
 0x130   : > { %840 = vxpose.xlu1.b32.cont [14/16] (narrow) %v9498_v31, 8 }
 0x132   : > { %900 = vxpose.xlu0.b32.cont [2/16] (narrow) %v868_v25, 8  ;;  %v9530_v25 = vld [vmem:[#allocation2 + $0xe4] sm:$0xff] }
 0x133   : > { %12075 = vst [vmem:[#allocation80_spill] sm:$0xff] %v9530_v25 }
 0x134   : > { %841 = vxpose.xlu1.b32.cont [15/16] (narrow) %v9506_v61, 8 }
 0x136   : > { %901 = vxpose.xlu0.b32.cont [3/16] (narrow) %v9514_v59, 8  ;;  %v9536_v59 = vld [vmem:[#allocation2 + $0xf4] sm:$0xff] }
 0x137   : > { %12077 = vst [vmem:[#allocation82_spill] sm:$0xff] %v9536_v59 }
 0x138   : > { %842 = vxpose.xlu1.b32.end [16/16] (narrow) %v9509_v29, 8  ;;  %v9526_v29 = vld [vmem:[#allocation2 + $0x34] sm:$0xff] }
 0x139   : > { %12074 = vst [vmem:[#allocation79_spill] sm:$0xff] %v9526_v29 }
 0x13a   : > { %902 = vxpose.xlu0.b32.cont [4/16] (narrow) %v9520_v60, 8  ;;  %v9542_v60 = vld [vmem:[#allocation2 + $0xfc] sm:$0xff] }
 0x13b   : > { %12079 = vst [vmem:[#allocation84_spill] sm:$0xff] %v9542_v60 }
 0x13c   : > { %931 = vxpose.xlu1.b32.start [1/16] (narrow) %v9512_v0, 8  ;;  %v9532_v0 = vld [vmem:[#allocation2 + $0x3c] sm:$0xff] }
 0x13d   : > { %12076 = vst [vmem:[#allocation81_spill] sm:$0xff] %v9532_v0 }
 0x13e   : > { %903 = vxpose.xlu0.b32.cont [5/16] (narrow) %v9526_v29, 8  ;;  %v9548_v29 = vld [vmem:[#allocation2 + $0x10c] sm:$0xff] }
 0x13f   : > { %12081 = vst [vmem:[#allocation86_spill] sm:$0xff] %v9548_v29 }
 0x140   : > { %932 = vxpose.xlu1.b32.cont [2/16] (narrow) %v9518_v62, 8  ;;  %v9538_v62 = vld [vmem:[#allocation2 + $0x4c] sm:$0xff] }
 0x141   : > { %12078 = vst [vmem:[#allocation83_spill] sm:$0xff] %v9538_v62 }
 0x142   : > { %904 = vxpose.xlu0.b32.cont [6/16] (narrow) %v9532_v0, 8  ;;  %v9554_v0 = vld [vmem:[#allocation2 + $0x114] sm:$0xff] }
 0x143   : > { %12083 = vst [vmem:[#allocation88_spill] sm:$0xff] %v9554_v0 }
 0x144   : > { %933 = vxpose.xlu1.b32.cont [3/16] (narrow) %v9524_v27, 8  ;;  %v9544_v27 = vld [vmem:[#allocation2 + $0x54] sm:$0xff] }
 0x145   : > { %12080 = vst [vmem:[#allocation85_spill] sm:$0xff] %v9544_v27 }
 0x146   : > { %905 = vxpose.xlu0.b32.cont [7/16] (narrow) %v9538_v62, 8  ;;  %v9560_v62 = vld [vmem:[#allocation2 + $0x124] sm:$0xff] }
 0x147   : > { %12085 = vst [vmem:[#allocation90_spill] sm:$0xff] %v9560_v62 }
 0x148   : > { %934 = vxpose.xlu1.b32.cont [4/16] (narrow) %v9530_v25, 8  ;;  %v9550_v25 = vld [vmem:[#allocation2 + $0x64] sm:$0xff] }
 0x149   : > { %12082 = vst [vmem:[#allocation87_spill] sm:$0xff] %v9550_v25 }
 0x14a   : > { %906 = vxpose.xlu0.b32.cont [8/16] (narrow) %v9544_v27, 8  ;;  %v9566_v27 = vld [vmem:[#allocation2 + $0x12c] sm:$0xff] }
 0x14b   : > { %12087 = vst [vmem:[#allocation92_spill] sm:$0xff] %v9566_v27 }
 0x14c   : > { %935 = vxpose.xlu1.b32.cont [5/16] (narrow) %v9536_v59, 8  ;;  %v9556_v59 = vld [vmem:[#allocation2 + $0x6c] sm:$0xff] }
 0x14d   : > { %12084 = vst [vmem:[#allocation89_spill] sm:$0xff] %v9556_v59 }
 0x14e   : > { %907 = vxpose.xlu0.b32.cont [9/16] (narrow) %v9550_v25, 8  ;;  %v9572_v25 = vld [vmem:[#allocation2 + $0x13c] sm:$0xff] }
 0x14f   : > { %12089 = vst [vmem:[#allocation94_spill] sm:$0xff] %v9572_v25 }
 0x150   : > { %936 = vxpose.xlu1.b32.cont [6/16] (narrow) %v9542_v60, 8  ;;  %v9562_v60 = vld [vmem:[#allocation2 + $0x7c] sm:$0xff] }
 0x151   : > { %12086 = vst [vmem:[#allocation91_spill] sm:$0xff] %v9562_v60 }
 0x152   : > { %908 = vxpose.xlu0.b32.cont [10/16] (narrow) %v9556_v59, 8  ;;  %v9578_v59 = vld [vmem:[#allocation2 + $0x144] sm:$0xff] }
 0x154   : > { %937 = vxpose.xlu1.b32.cont [7/16] (narrow) %v9548_v29, 8  ;;  %v9568_v29 = vld [vmem:[#allocation2 + $0x84] sm:$0xff] }
 0x155   : > { %12088 = vst [vmem:[#allocation93_spill] sm:$0xff] %v9568_v29 }
 0x156   : > { %909 = vxpose.xlu0.b32.cont [11/16] (narrow) %v9562_v60, 8  ;;  %v9584_v60 = vld [vmem:[#allocation2 + $0x154] sm:$0xff] }
 0x158   : > { %938 = vxpose.xlu1.b32.cont [8/16] (narrow) %v9554_v0, 8  ;;  %v9574_v0 = vld [vmem:[#allocation2 + $0x94] sm:$0xff] }
 0x159   : > { %12090 = vst [vmem:[#allocation95_spill] sm:$0xff] %v9574_v0 }
 0x15a   : > { %910 = vxpose.xlu0.b32.cont [12/16] (narrow) %v9568_v29, 8  ;;  %v9590_v29 = vld [vmem:[#allocation2 + $0x15c] sm:$0xff] }
 0x15c   : > { %939 = vxpose.xlu1.b32.cont [9/16] (narrow) %v9560_v62, 8  ;;  %v9580_v62 = vld [vmem:[#allocation2 + $0x9c] sm:$0xff] }
 0x15d   : > { %12091 = vst [vmem:[#allocation96_spill] sm:$0xff] %v9580_v62 }
 0x15e   : > { %911 = vxpose.xlu0.b32.cont [13/16] (narrow) %v9574_v0, 8  ;;  %v9596_v0 = vld [vmem:[#allocation2 + $0x16c] sm:$0xff] }
 0x160   : > { %940 = vxpose.xlu1.b32.cont [10/16] (narrow) %v9566_v27, 8  ;;  %v9586_v27 = vld [vmem:[#allocation2 + $0xac] sm:$0xff] }
 0x162   : > { %912 = vxpose.xlu0.b32.cont [14/16] (narrow) %v9580_v62, 8  ;;  %v9600_v62 = vld [vmem:[#allocation2 + $0x174] sm:$0xff] }
 0x164   : > { %941 = vxpose.xlu1.b32.cont [11/16] (narrow) %v9572_v25, 8  ;;  %v9592_v25 = vld [vmem:[#allocation2 + $0xb4] sm:$0xff] }
 0x166   : > { %913 = vxpose.xlu0.b32.cont [15/16] (narrow) %v9586_v27, 8 }
 0x168   : > { %942 = vxpose.xlu1.b32.cont [12/16] (narrow) %v9578_v59, 8 }
 0x16a   : > { %914 = vxpose.xlu0.b32.end [16/16] (narrow) %v9592_v25, 8 }
 0x16c   : > { %943 = vxpose.xlu1.b32.cont [13/16] (narrow) %v9584_v60, 8 }
 0x16e   : > { %998 = vxpose.xlu0.b32.start [1/16] (narrow) %v9115_v28, 8  ;;  %v9628_v28 = vld [vmem:[#allocation2 + $0xc0] sm:$0xff] }
 0x170   : > { %944 = vxpose.xlu1.b32.cont [14/16] (narrow) %v9590_v29, 8 }
 0x172   : > { %999 = vxpose.xlu0.b32.cont [2/16] (narrow) %v9144_v56, 8  ;;  %v9634_v56 = vld [vmem:[#allocation2 + $0x180] sm:$0xff] }
 0x174   : > { %945 = vxpose.xlu1.b32.cont [15/16] (narrow) %v9596_v0, 8 }
 0x176   : > { %1000 = vxpose.xlu0.b32.cont [3/16] (narrow) %v9162_v1, 8  ;;  %v12093_v1 = vld [vmem:[#allocation12_spill] sm:$0xff] }
 0x178   : > { %946 = vxpose.xlu1.b32.end [16/16] (narrow) %v9600_v62, 8 }
 0x17a   : > { %1001 = vxpose.xlu0.b32.cont [4/16] (narrow) %v9168_v3, 8  ;;  %v12095_v3 = vld [vmem:[#allocation13_spill] sm:$0xff] }
 0x17c   : > { %1030 = vxpose.xlu1.b32.start [1/16] (narrow) %v9160_v63, 8  ;;  %v9638_v63 = vld [vmem:[#allocation2 + $0x188] sm:$0xff] }
 0x17e   : > { %1002 = vxpose.xlu0.b32.cont [5/16] (narrow) %v9174_v5, 8  ;;  %v12096_v5 = vld [vmem:[#allocation17_spill] sm:$0xff] }
 0x180   : > { %1031 = vxpose.xlu1.b32.cont [2/16] (narrow) %v9166_v2, 8  ;;  %v12094_v2 = vld [vmem:[#allocation15_spill] sm:$0xff] }
 0x182   : > { %1003 = vxpose.xlu0.b32.cont [6/16] (narrow) %v9180_v7, 8  ;;  %v12097_v7 = vld [vmem:[#allocation19_spill] sm:$0xff] }
 0x184   : > { %1032 = vxpose.xlu1.b32.cont [3/16] (narrow) %v9172_v4, 8  ;;  %v9670_v4 = vld [vmem:[#allocation2 + $0x181] sm:$0xff] }
 0x186   : > { %1004 = vxpose.xlu0.b32.cont [7/16] (narrow) %v9186_v9, 8  ;;  %v12099_v9 = vld [vmem:[#allocation21_spill] sm:$0xff] }
 0x188   : > { %1033 = vxpose.xlu1.b32.cont [4/16] (narrow) %v9178_v6, 8  ;;  %v9674_v6 = vld [vmem:[#allocation2 + $0x189] sm:$0xff] }
 0x18a   : > { %1005 = vxpose.xlu0.b32.cont [8/16] (narrow) %v9192_v11, 8  ;;  %v12101_v11 = vld [vmem:[#allocation23_spill] sm:$0xff] }
 0x18c   : > { %1034 = vxpose.xlu1.b32.cont [5/16] (narrow) %v9184_v8, 8  ;;  %v12098_v8 = vld [vmem:[#allocation20_spill] sm:$0xff] }
 0x18e   : > { %1006 = vxpose.xlu0.b32.cont [9/16] (narrow) %v9198_v13, 8  ;;  %v12103_v13 = vld [vmem:[#allocation25_spill] sm:$0xff] }
 0x190   : > { %1035 = vxpose.xlu1.b32.cont [6/16] (narrow) %v9190_v10, 8  ;;  %v12100_v10 = vld [vmem:[#allocation22_spill] sm:$0xff] }
 0x192   : > { %1007 = vxpose.xlu0.b32.cont [10/16] (narrow) %v9204_v15, 8  ;;  %v12105_v15 = vld [vmem:[#allocation27_spill] sm:$0xff] }
 0x194   : > { %1036 = vxpose.xlu1.b32.cont [7/16] (narrow) %v9196_v12, 8  ;;  %v12102_v12 = vld [vmem:[#allocation24_spill] sm:$0xff] }
 0x196   : > { %1008 = vxpose.xlu0.b32.cont [11/16] (narrow) %v9210_v17, 8  ;;  %v12107_v17 = vld [vmem:[#allocation29_spill] sm:$0xff] }
 0x198   : > { %1037 = vxpose.xlu1.b32.cont [8/16] (narrow) %v9202_v14, 8  ;;  %v12104_v14 = vld [vmem:[#allocation26_spill] sm:$0xff] }
 0x19a   : > { %1009 = vxpose.xlu0.b32.cont [12/16] (narrow) %v9216_v19, 8  ;;  %v12109_v19 = vld [vmem:[#allocation31_spill] sm:$0xff] }
 0x19c   : > { %1038 = vxpose.xlu1.b32.cont [9/16] (narrow) %v9208_v16, 8  ;;  %v12106_v16 = vld [vmem:[#allocation28_spill] sm:$0xff] }
 0x19e   : > { %1010 = vxpose.xlu0.b32.cont [13/16] (narrow) %v9222_v21, 8  ;;  %v12111_v21 = vld [vmem:[#allocation33_spill] sm:$0xff] }
 0x1a0   : > { %1039 = vxpose.xlu1.b32.cont [10/16] (narrow) %v9214_v18, 8  ;;  %v12108_v18 = vld [vmem:[#allocation30_spill] sm:$0xff] }
 0x1a2   : > { %1011 = vxpose.xlu0.b32.cont [14/16] (narrow) %v9228_v23, 8  ;;  %v12113_v23 = vld [vmem:[#allocation35_spill] sm:$0xff] }
 0x1a4   : > { %1040 = vxpose.xlu1.b32.cont [11/16] (narrow) %v9220_v20, 8  ;;  %v12110_v20 = vld [vmem:[#allocation32_spill] sm:$0xff] }
 0x1a6   : > { %1012 = vxpose.xlu0.b32.cont [15/16] (narrow) %v9628_v28, 8 }
 0x1a8   : > { %1041 = vxpose.xlu1.b32.cont [12/16] (narrow) %v9226_v22, 8  ;;  %v12112_v22 = vld [vmem:[#allocation34_spill] sm:$0xff] }
 0x1aa   : > { %1013 = vxpose.xlu0.b32.end [16/16] (narrow) %v9141_v55, 8  ;;  %v12092_v55 = vld [vmem:[#allocation14_spill] sm:$0xff] }
 0x1ac   : > { %1042 = vxpose.xlu1.b32.cont [13/16] (narrow) %v9232_v24, 8  ;;  %v12114_v24 = vld [vmem:[#allocation36_spill] sm:$0xff] }
 0x1ae   : > { %1102 = vxpose.xlu0.b32.start [1/16] (narrow) %v9240_v30, 8  ;;  %v12116_v30 = vld [vmem:[#allocation38_spill] sm:$0xff] }
 0x1b0   : > { %1043 = vxpose.xlu1.b32.cont [14/16] (narrow) %v9235_v26, 8  ;;  %v12115_v26 = vld [vmem:[#allocation37_spill] sm:$0xff] }
 0x1b2   : > { %1103 = vxpose.xlu0.b32.cont [2/16] (narrow) %v9246_v32, 8  ;;  %v12117_v32 = vld [vmem:[#allocation39_spill] sm:$0xff] }
 0x1b4   : > { %1044 = vxpose.xlu1.b32.cont [15/16] (narrow) %v9634_v56, 8 }
 0x1b6   : > { %1104 = vxpose.xlu0.b32.cont [3/16] (narrow) %v9252_v34, 8  ;;  %v12119_v34 = vld [vmem:[#allocation41_spill] sm:$0xff] }
 0x1b8   : > { %1045 = vxpose.xlu1.b32.end [16/16] (narrow) %v9638_v63, 8 }
 0x1ba   : > { %1105 = vxpose.xlu0.b32.cont [4/16] (narrow) %v9258_v36, 8  ;;  %v12121_v36 = vld [vmem:[#allocation43_spill] sm:$0xff] }
 0x1bc   : > { %1134 = vxpose.xlu1.b32.start [1/16] (narrow) %v9250_v33, 8  ;;  %v12118_v33 = vld [vmem:[#allocation40_spill] sm:$0xff] }
 0x1be   : > { %1106 = vxpose.xlu0.b32.cont [5/16] (narrow) %v9264_v38, 8  ;;  %v12123_v38 = vld [vmem:[#allocation16_spill] sm:$0xff] }
 0x1c0   : > { %1135 = vxpose.xlu1.b32.cont [2/16] (narrow) %v9256_v35, 8  ;;  %v12120_v35 = vld [vmem:[#allocation42_spill] sm:$0xff] }
 0x1c2   : > { %1107 = vxpose.xlu0.b32.cont [6/16] (narrow) %v9270_v40, 8  ;;  %v12125_v40 = vld [vmem:[#allocation18_spill] sm:$0xff] }
 0x1c4   : > { %1136 = vxpose.xlu1.b32.cont [3/16] (narrow) %v9262_v37, 8  ;;  %v12122_v37 = vld [vmem:[#allocation44_spill] sm:$0xff] }
 0x1c6   : > { %1108 = vxpose.xlu0.b32.cont [7/16] (narrow) %v9276_v42, 8  ;;  %v12126_v42 = vld [vmem:[#allocation47_spill] sm:$0xff] }
 0x1c8   : > { %1137 = vxpose.xlu1.b32.cont [4/16] (narrow) %v9268_v39, 8  ;;  %v12124_v39 = vld [vmem:[#allocation45_spill] sm:$0xff] }
 0x1ca   : > { %1109 = vxpose.xlu0.b32.cont [8/16] (narrow) %v9282_v44, 8  ;;  %v12127_v44 = vld [vmem:[#allocation49_spill] sm:$0xff] }
 0x1cc   : > { %1138 = vxpose.xlu1.b32.cont [5/16] (narrow) %v9274_v41, 8  ;;  %v9706_v41 = vld [vmem:[#allocation2 + $0x182] sm:$0xff] }
 0x1ce   : > { %1110 = vxpose.xlu0.b32.cont [9/16] (narrow) %v9288_v46, 8  ;;  %v12129_v46 = vld [vmem:[#allocation51_spill] sm:$0xff] }
 0x1d0   : > { %1139 = vxpose.xlu1.b32.cont [6/16] (narrow) %v9280_v43, 8  ;;  %v9710_v43 = vld [vmem:[#allocation2 + $0x18a] sm:$0xff] }
 0x1d2   : > { %1111 = vxpose.xlu0.b32.cont [10/16] (narrow) %v9294_v48, 8  ;;  %v12131_v48 = vld [vmem:[#allocation53_spill] sm:$0xff] }
 0x1d4   : > { %1140 = vxpose.xlu1.b32.cont [7/16] (narrow) %v9286_v45, 8  ;;  %v12128_v45 = vld [vmem:[#allocation50_spill] sm:$0xff] }
 0x1d6   : > { %1112 = vxpose.xlu0.b32.cont [11/16] (narrow) %v9300_v50, 8  ;;  %v12133_v50 = vld [vmem:[#allocation55_spill] sm:$0xff] }
 0x1d8   : > { %1141 = vxpose.xlu1.b32.cont [8/16] (narrow) %v9292_v47, 8  ;;  %v12130_v47 = vld [vmem:[#allocation52_spill] sm:$0xff] }
 0x1da   : > { %1113 = vxpose.xlu0.b32.cont [12/16] (narrow) %v9306_v52, 8  ;;  %v12135_v52 = vld [vmem:[#allocation57_spill] sm:$0xff] }
 0x1dc   : > { %1142 = vxpose.xlu1.b32.cont [9/16] (narrow) %v9298_v49, 8  ;;  %v12132_v49 = vld [vmem:[#allocation54_spill] sm:$0xff] }
 0x1de   : > { %1114 = vxpose.xlu0.b32.cont [13/16] (narrow) %v9312_v54, 8  ;;  %v12137_v54 = vld [vmem:[#allocation59_spill] sm:$0xff] }
 0x1e0   : > { %1143 = vxpose.xlu1.b32.cont [10/16] (narrow) %v9304_v51, 8  ;;  %v12134_v51 = vld [vmem:[#allocation56_spill] sm:$0xff] }
 0x1e2   : > { %1115 = vxpose.xlu0.b32.cont [14/16] (narrow) %v9318_v58, 8  ;;  %v12139_v58 = vld [vmem:[#allocation61_spill] sm:$0xff] }
 0x1e4   : > { %1144 = vxpose.xlu1.b32.cont [11/16] (narrow) %v9310_v53, 8  ;;  %v12136_v53 = vld [vmem:[#allocation58_spill] sm:$0xff] }
 0x1e6   : > { %1116 = vxpose.xlu0.b32.cont [15/16] (narrow) %v12093_v1, 8  ;;  %v12141_v1 = vld [vmem:[#allocation63_spill] sm:$0xff] }
 0x1e8   : > { %1145 = vxpose.xlu1.b32.cont [12/16] (narrow) %v9316_v57, 8  ;;  %v12138_v57 = vld [vmem:[#allocation60_spill] sm:$0xff] }
 0x1ea   : > { %1117 = vxpose.xlu0.b32.end [16/16] (narrow) %v12095_v3, 8  ;;  %v12143_v3 = vld [vmem:[#allocation65_spill] sm:$0xff] }
 0x1ec   : > { %1146 = vxpose.xlu1.b32.cont [13/16] (narrow) %v12092_v55, 8  ;;  %v12140_v55 = vld [vmem:[#allocation62_spill] sm:$0xff] }
 0x1ee   : > { %1200 = vxpose.xlu0.b32.start [1/16] (narrow) %v12096_v5, 8  ;;  %v12144_v5 = vld [vmem:[#allocation66_spill] sm:$0xff] }
 0x1f0   : > { %1147 = vxpose.xlu1.b32.cont [14/16] (narrow) %v12094_v2, 8  ;;  %v12142_v2 = vld [vmem:[#allocation64_spill] sm:$0xff] }
 0x1f2   : > { %1201 = vxpose.xlu0.b32.cont [2/16] (narrow) %v12097_v7, 8  ;;  %v12145_v7 = vld [vmem:[#allocation67_spill] sm:$0xff] }
 0x1f4   : > { %1148 = vxpose.xlu1.b32.cont [15/16] (narrow) %v9670_v4, 8 }
 0x1f6   : > { %1202 = vxpose.xlu0.b32.cont [3/16] (narrow) %v12099_v9, 8  ;;  %v12147_v9 = vld [vmem:[#allocation69_spill] sm:$0xff] }
 0x1f8   : > { %1149 = vxpose.xlu1.b32.end [16/16] (narrow) %v9674_v6, 8 }
 0x1fa   : > { %1203 = vxpose.xlu0.b32.cont [4/16] (narrow) %v12101_v11, 8  ;;  %v12149_v11 = vld [vmem:[#allocation71_spill] sm:$0xff] }
 0x1fc   : > { %1232 = vxpose.xlu1.b32.start [1/16] (narrow) %v12098_v8, 8  ;;  %v12146_v8 = vld [vmem:[#allocation68_spill] sm:$0xff] }
 0x1fe   : > { %1204 = vxpose.xlu0.b32.cont [5/16] (narrow) %v12103_v13, 8  ;;  %v334_v13 = vld [vmem:[%s9093_s21 + $0xf0] sm:$0xff] }
 0x200   : > { %1233 = vxpose.xlu1.b32.cont [2/16] (narrow) %v12100_v10, 8  ;;  %v12148_v10 = vld [vmem:[#allocation70_spill] sm:$0xff] }
 0x202   : > { %1205 = vxpose.xlu0.b32.cont [6/16] (narrow) %v12105_v15, 8  ;;  %v12151_v15 = vld [vmem:[#allocation46_spill] sm:$0xff] }
 0x204   : > { %1234 = vxpose.xlu1.b32.cont [3/16] (narrow) %v12102_v12, 8  ;;  %v12150_v12 = vld [vmem:[#allocation72_spill] sm:$0xff] }
 0x206   : > { %1206 = vxpose.xlu0.b32.cont [7/16] (narrow) %v12107_v17, 8 }
 0x208   : > { %1235 = vxpose.xlu1.b32.cont [4/16] (narrow) %v12104_v14, 8  ;;  %v366_v14 = vmax.f32 %v334_v13, 0.0  ;;  %v9852_v13 = vld [vmem:[#allocation2 + $0x170] sm:$0xff] }
 0x20a   : > { %1207 = vxpose.xlu0.b32.cont [8/16] (narrow) %v12109_v19, 8  ;;  %461 = vst.msk [vmem:[#allocation2 + $0x19a] sm:$0xff] %vm368_vm0, %v366_v14  ;;  %v12153_v19 = vld [vmem:[#allocation48_spill] sm:$0xff] }
 0x20b   : > { %v9854_v14 = vld [vmem:[#allocation2 + $0xc8] sm:$0xff] }
 0x20c   : > { %1236 = vxpose.xlu1.b32.cont [5/16] (narrow) %v12106_v16, 8  ;;  %v335_v16 = vld [vmem:[%s9093_s21 + $0xf8] sm:$0xff]  ;;  %s298_s21 = scalar_lea.vmem [#allocation9], %s7513_s19 }
 0x20d   : > { %v367_v17 = vmax.f32 %v335_v16, 0.0  ;;  %v9862_v16 = vld [vmem:[#allocation2 + $0xe0] sm:$0xff]  ;;  %s7450_s22 = sshll.u32 %s298_s21, 4  ;;  %s11783_s22 = int_to_ptr.vmem [resolvable:$true] %s7450_s22 }
 0x20e   : > { %1208 = vxpose.xlu0.b32.cont [9/16] (narrow) %v12111_v21, 8  ;;  %v9750_v21 = vld [vmem:[#allocation2 + $0x18b] sm:$0xff]  ;;  %s8804_s10 = scalar_lea.vmem %s11783_s22, 128  ;;  %p8811_p0 = scmp.lt.s32.totalorder %s11783_s22, %s8809_s12 }
 0x20f   : > { %462 = vst.msk [vmem:[#allocation2 + $0x1a2] sm:$0xff] %vm368_vm0, %v367_v17  ;;  %v1572_v17 = vld [vmem:[#allocation2 + $0x31] sm:$0xff]  ;;  %p8805_p11 = scmp.ne.s32.totalorder %s11783_s22, %s8804_s10  ;;  %p8812_p1 = scmp.lt.s32.totalorder %s8810_s13, %s8804_s10 }
 0x210   : > { %1237 = vxpose.xlu1.b32.cont [6/16] (narrow) %v12108_v18, 8  ;;  %v12152_v18 = vld [vmem:[#allocation73_spill] sm:$0xff] }
 0x211   : > { %p8806_p12 = pnand %p8805_p11, %p8955_p5  ;;  %p8813_p2 = por %p8812_p1, %p8811_p0 }
 0x212   : > { %1209 = vxpose.xlu0.b32.cont [10/16] (narrow) %v12113_v23, 8  ;;  %v12157_v23 = vld [vmem:[#allocation79_spill] sm:$0xff] }
 0x213   : > { %p8807_p13 = pneg %p8806_p12 }
 0x214   : > { %1238 = vxpose.xlu1.b32.cont [7/16] (narrow) %v12110_v20, 8  ;;  %v9746_v20 = vld [vmem:[#allocation2 + $0x183] sm:$0xff] }
 0x215   : > { %p8814_p3 = pnand %p8813_p2, %p8807_p13 }
 0x216   : > { %1210 = vxpose.xlu0.b32.cont [11/16] (narrow) %v12115_v26, 8  ;;  %v12159_v26 = vld [vmem:[#allocation81_spill] sm:$0xff] }
 0x218   : > { %1239 = vxpose.xlu1.b32.cont [8/16] (narrow) %v12112_v22, 8  ;;  %v12156_v22 = vld [vmem:[#allocation78_spill] sm:$0xff] }
 0x21a   : > { %1211 = vxpose.xlu0.b32.cont [12/16] (narrow) %v12117_v32, 8  ;;  %v12161_v32 = vld [vmem:[#allocation83_spill] sm:$0xff] }
 0x21c   : > { %1240 = vxpose.xlu1.b32.cont [9/16] (narrow) %v12114_v24, 8  ;;  %v12158_v24 = vld [vmem:[#allocation80_spill] sm:$0xff] }
 0x21e   : > { %1212 = vxpose.xlu0.b32.cont [13/16] (narrow) %v12119_v34, 8  ;;  %v12163_v34 = vld [vmem:[#allocation85_spill] sm:$0xff] }
 0x220   : > { %1241 = vxpose.xlu1.b32.cont [10/16] (narrow) %v12116_v30, 8  ;;  %v12160_v30 = vld [vmem:[#allocation82_spill] sm:$0xff] }
 0x222   : > { %1213 = vxpose.xlu0.b32.cont [14/16] (narrow) %v12121_v36, 8  ;;  %v12165_v36 = vld [vmem:[#allocation87_spill] sm:$0xff] }
 0x224   : > { %1242 = vxpose.xlu1.b32.cont [11/16] (narrow) %v12118_v33, 8  ;;  %v12162_v33 = vld [vmem:[#allocation84_spill] sm:$0xff] }
 0x226   : > { %1214 = vxpose.xlu0.b32.cont [15/16] (narrow) %v12123_v38, 8  ;;  %v12167_v38 = vld [vmem:[#allocation89_spill] sm:$0xff] }
 0x228   : > { %1243 = vxpose.xlu1.b32.cont [12/16] (narrow) %v12120_v35, 8  ;;  %v12164_v35 = vld [vmem:[#allocation86_spill] sm:$0xff] }
 0x22a   : > { %1215 = vxpose.xlu0.b32.end [16/16] (narrow) %v12125_v40, 8  ;;  %v12169_v40 = vld [vmem:[#allocation91_spill] sm:$0xff] }
 0x22c   : > { %1244 = vxpose.xlu1.b32.cont [13/16] (narrow) %v12122_v37, 8  ;;  %v12166_v37 = vld [vmem:[#allocation88_spill] sm:$0xff] }
 0x22e   : > { %1304 = vxpose.xlu0.b32.start [1/16] (narrow) %v12126_v42, 8  ;;  %v12170_v42 = vld [vmem:[#allocation92_spill] sm:$0xff] }
 0x230   : > { %1245 = vxpose.xlu1.b32.cont [14/16] (narrow) %v12124_v39, 8  ;;  %v12168_v39 = vld [vmem:[#allocation90_spill] sm:$0xff] }
 0x232   : > { %1305 = vxpose.xlu0.b32.cont [2/16] (narrow) %v12127_v44, 8  ;;  %v12171_v44 = vld [vmem:[#allocation93_spill] sm:$0xff] }
 0x234   : > { %1246 = vxpose.xlu1.b32.cont [15/16] (narrow) %v9706_v41, 8 }
 0x236   : > { %1306 = vxpose.xlu0.b32.cont [3/16] (narrow) %v12129_v46, 8  ;;  %v12173_v46 = vld [vmem:[#allocation95_spill] sm:$0xff] }
 0x238   : > { %1247 = vxpose.xlu1.b32.end [16/16] (narrow) %v9710_v43, 8 }
 0x23a   : > { %1307 = vxpose.xlu0.b32.cont [4/16] (narrow) %v12131_v48, 8  ;;  %v12175_v48 = vld [vmem:[#allocation74_spill] sm:$0xff] }
 0x23c   : > { %1336 = vxpose.xlu1.b32.start [1/16] (narrow) %v12128_v45, 8  ;;  %v12172_v45 = vld [vmem:[#allocation94_spill] sm:$0xff] }
 0x23e   : > { %1308 = vxpose.xlu0.b32.cont [5/16] (narrow) %v12133_v50, 8  ;;  %v9782_v50 = vld [vmem:[#allocation2 + $0x184] sm:$0xff] }
 0x240   : > { %1337 = vxpose.xlu1.b32.cont [2/16] (narrow) %v12130_v47, 8  ;;  %v12174_v47 = vld [vmem:[#allocation96_spill] sm:$0xff] }
 0x242   : > { %1309 = vxpose.xlu0.b32.cont [6/16] (narrow) %v12135_v52, 8  ;;  %v9802_v52 = vld [vmem:[#allocation2 + $0x60] sm:$0xff] }
 0x244   : > { %1338 = vxpose.xlu1.b32.cont [3/16] (narrow) %v12132_v49, 8  ;;  %v12176_v49 = vld [vmem:[#allocation76_spill] sm:$0xff] }
 0x246   : > { %1310 = vxpose.xlu0.b32.cont [7/16] (narrow) %v12137_v54, 8  ;;  %v9808_v54 = vld [vmem:[#allocation2 + $0x68] sm:$0xff] }
 0x248   : > { %1339 = vxpose.xlu1.b32.cont [4/16] (narrow) %v12134_v51, 8  ;;  %v9800_v51 = vld [vmem:[#allocation2 + $0x108] sm:$0xff] }
 0x24a   : > { %1311 = vxpose.xlu0.b32.cont [8/16] (narrow) %v12139_v58, 8  ;;  %v9814_v58 = vld [vmem:[#allocation2 + $0x78] sm:$0xff] }
 0x24c   : > { %1340 = vxpose.xlu1.b32.cont [5/16] (narrow) %v12136_v53, 8  ;;  %v9806_v53 = vld [vmem:[#allocation2 + $0x110] sm:$0xff] }
 0x24e   : > { %1312 = vxpose.xlu0.b32.cont [9/16] (narrow) %v12141_v1, 8  ;;  %v9820_v1 = vld [vmem:[#allocation2 + $0x80] sm:$0xff] }
 0x250   : > { %1341 = vxpose.xlu1.b32.cont [6/16] (narrow) %v12138_v57, 8  ;;  %v9812_v57 = vld [vmem:[#allocation2 + $0x120] sm:$0xff] }
 0x252   : > { %1313 = vxpose.xlu0.b32.cont [10/16] (narrow) %v12143_v3, 8  ;;  %v9826_v3 = vld [vmem:[#allocation2 + $0x90] sm:$0xff] }
 0x254   : > { %1342 = vxpose.xlu1.b32.cont [7/16] (narrow) %v12140_v55, 8  ;;  %v9818_v55 = vld [vmem:[#allocation2 + $0x128] sm:$0xff] }
 0x256   : > { %1314 = vxpose.xlu0.b32.cont [11/16] (narrow) %v12145_v7, 8  ;;  %v9832_v7 = vld [vmem:[#allocation2 + $0x98] sm:$0xff] }
 0x258   : > { %1343 = vxpose.xlu1.b32.cont [8/16] (narrow) %v12142_v2, 8  ;;  %v9824_v2 = vld [vmem:[#allocation2 + $0x138] sm:$0xff] }
 0x25a   : > { %1315 = vxpose.xlu0.b32.cont [12/16] (narrow) %v12147_v9, 8  ;;  %v9838_v9 = vld [vmem:[#allocation2 + $0xa8] sm:$0xff] }
 0x25c   : > { %1344 = vxpose.xlu1.b32.cont [9/16] (narrow) %v12144_v5, 8  ;;  %v9830_v5 = vld [vmem:[#allocation2 + $0x140] sm:$0xff] }
 0x25e   : > { %1316 = vxpose.xlu0.b32.cont [13/16] (narrow) %v12149_v11, 8  ;;  %v9844_v11 = vld [vmem:[#allocation2 + $0xb0] sm:$0xff] }
 0x260   : > { %1345 = vxpose.xlu1.b32.cont [10/16] (narrow) %v12146_v8, 8  ;;  %v9836_v8 = vld [vmem:[#allocation2 + $0x150] sm:$0xff] }
 0x262   : > { %1317 = vxpose.xlu0.b32.cont [14/16] (narrow) %v12150_v12, 8  ;;  %v9848_v12 = vld [vmem:[#allocation2 + $0x168] sm:$0xff] }
 0x264   : > { %1346 = vxpose.xlu1.b32.cont [11/16] (narrow) %v12148_v10, 8  ;;  %v9842_v10 = vld [vmem:[#allocation2 + $0x158] sm:$0xff] }
 0x266   : > { %1318 = vxpose.xlu0.b32.cont [15/16] (narrow) %v12151_v15, 8  ;;  %v9858_v15 = vld [vmem:[#allocation2 + $0xd8] sm:$0xff] }
 0x268   : > { %1347 = vxpose.xlu1.b32.cont [12/16] (narrow) %v9498_v31, 8  ;;  %v12154_v31 = vld [vmem:[#allocation75_spill] sm:$0xff] }
 0x26a   : > { %1319 = vxpose.xlu0.b32.end [16/16] (narrow) %v12153_v19, 8  ;;  %v1573_v19 = vld [vmem:[#allocation2 + $0x39] sm:$0xff] }
 0x26c   : > { %1348 = vxpose.xlu1.b32.cont [13/16] (narrow) %v9506_v61, 8  ;;  %v12155_v61 = vld [vmem:[#allocation77_spill] sm:$0xff] }
 0x26e   : > { %1402 = vxpose.xlu0.b32.start [1/16] (narrow) %v12154_v31, 8  ;;  %v9874_v31 = vld [vmem:[#allocation2 + $0x49] sm:$0xff] }
 0x270   : > { %1349 = vxpose.xlu1.b32.cont [14/16] (narrow) %v12152_v18, 8  ;;  %v9869_v18 = vld [vmem:[#allocation2 + $0x1a0] sm:$0xff] }
 0x272   : > { %1403 = vxpose.xlu0.b32.cont [2/16] (narrow) %v12155_v61, 8  ;;  %v9880_v61 = vld [vmem:[#allocation2 + $0x51] sm:$0xff] }
 0x274   : > { %1350 = vxpose.xlu1.b32.cont [15/16] (narrow) %v9746_v20, 8 }
 0x276   : > { %1404 = vxpose.xlu0.b32.cont [3/16] (narrow) %v12157_v23, 8  ;;  %v9886_v23 = vld [vmem:[#allocation2 + $0x61] sm:$0xff] }
 0x278   : > { %1351 = vxpose.xlu1.b32.end [16/16] (narrow) %v9750_v21, 8 }
 0x27a   : > { %1405 = vxpose.xlu0.b32.cont [4/16] (narrow) %v12159_v26, 8  ;;  %v9892_v26 = vld [vmem:[#allocation2 + $0x69] sm:$0xff] }
 0x27c   : > { %1434 = vxpose.xlu1.b32.start [1/16] (narrow) %v12156_v22, 8  ;;  %v9884_v22 = vld [vmem:[#allocation2 + $0x109] sm:$0xff] }
 0x27e   : > { %1406 = vxpose.xlu0.b32.cont [5/16] (narrow) %v12161_v32, 8  ;;  %v9898_v32 = vld [vmem:[#allocation2 + $0x79] sm:$0xff] }
 0x280   : > { %1435 = vxpose.xlu1.b32.cont [2/16] (narrow) %v12158_v24, 8  ;;  %v9890_v24 = vld [vmem:[#allocation2 + $0x111] sm:$0xff] }
 0x282   : > { %1407 = vxpose.xlu0.b32.cont [6/16] (narrow) %v12163_v34, 8  ;;  %v9904_v34 = vld [vmem:[#allocation2 + $0x81] sm:$0xff] }
 0x284   : > { %1436 = vxpose.xlu1.b32.cont [3/16] (narrow) %v12160_v30, 8  ;;  %v9896_v30 = vld [vmem:[#allocation2 + $0x121] sm:$0xff] }
 0x286   : > { %1408 = vxpose.xlu0.b32.cont [7/16] (narrow) %v12165_v36, 8  ;;  %v9910_v36 = vld [vmem:[#allocation2 + $0x91] sm:$0xff] }
 0x288   : > { %1437 = vxpose.xlu1.b32.cont [4/16] (narrow) %v12162_v33, 8  ;;  %v9902_v33 = vld [vmem:[#allocation2 + $0x129] sm:$0xff] }
 0x28a   : > { %1409 = vxpose.xlu0.b32.cont [8/16] (narrow) %v12167_v38, 8  ;;  %v9916_v38 = vld [vmem:[#allocation2 + $0x99] sm:$0xff] }
 0x28c   : > { %1438 = vxpose.xlu1.b32.cont [5/16] (narrow) %v12164_v35, 8  ;;  %v9908_v35 = vld [vmem:[#allocation2 + $0x139] sm:$0xff] }
 0x28e   : > { %1410 = vxpose.xlu0.b32.cont [9/16] (narrow) %v12169_v40, 8  ;;  %v9922_v40 = vld [vmem:[#allocation2 + $0xa9] sm:$0xff] }
 0x290   : > { %1439 = vxpose.xlu1.b32.cont [6/16] (narrow) %v12166_v37, 8  ;;  %v9914_v37 = vld [vmem:[#allocation2 + $0x141] sm:$0xff] }
 0x292   : > { %1411 = vxpose.xlu0.b32.cont [10/16] (narrow) %v12171_v44, 8  ;;  %v9928_v44 = vld [vmem:[#allocation2 + $0xb1] sm:$0xff] }
 0x294   : > { %1440 = vxpose.xlu1.b32.cont [7/16] (narrow) %v12168_v39, 8  ;;  %v9920_v39 = vld [vmem:[#allocation2 + $0x151] sm:$0xff] }
 0x296   : > { %1412 = vxpose.xlu0.b32.cont [11/16] (narrow) %v12173_v46, 8  ;;  %v9934_v46 = vld [vmem:[#allocation2 + $0xc1] sm:$0xff] }
 0x298   : > { %1441 = vxpose.xlu1.b32.cont [8/16] (narrow) %v12170_v42, 8  ;;  %v9926_v42 = vld [vmem:[#allocation2 + $0x159] sm:$0xff] }
 0x29a   : > { %1413 = vxpose.xlu0.b32.cont [12/16] (narrow) %v12174_v47, 8  ;;  %v9938_v47 = vld [vmem:[#allocation2 + $0x171] sm:$0xff] }
 0x29c   : > { %1442 = vxpose.xlu1.b32.cont [9/16] (narrow) %v12172_v45, 8  ;;  %v9932_v45 = vld [vmem:[#allocation2 + $0x169] sm:$0xff] }
 0x29e   : > { %1414 = vxpose.xlu0.b32.cont [13/16] (narrow) %v9586_v27, 8  ;;  %v1475_v27 = vld [vmem:[#allocation2 + $0x38] sm:$0xff] }
 0x2a0   : > { %1443 = vxpose.xlu1.b32.cont [10/16] (narrow) %v9578_v59, 8  ;;  %v1474_v59 = vld [vmem:[#allocation2 + $0x30] sm:$0xff] }
 0x2a2   : > { %1415 = vxpose.xlu0.b32.cont [14/16] (narrow) %v9592_v25, 8  ;;  %v9796_v25 = vld [vmem:[#allocation2 + $0x50] sm:$0xff] }
 0x2a4   : > { %1444 = vxpose.xlu1.b32.cont [11/16] (narrow) %v9584_v60, 8  ;;  %v9785_v60 = vld [vmem:[#allocation2 + $0x18c] sm:$0xff] }
 0x2a6   : > { %1416 = vxpose.xlu0.b32.cont [15/16] (narrow) %v12175_v48, 8  ;;  %v9940_v48 = vld [vmem:[#allocation2 + $0xc9] sm:$0xff] }
 0x2a8   : > { %1445 = vxpose.xlu1.b32.cont [12/16] (narrow) %v9590_v29, 8  ;;  %v9788_v29 = vld [vmem:[#allocation2 + $0xf0] sm:$0xff] }
 0x2aa   : > { %1417 = vxpose.xlu0.b32.end [16/16] (narrow) %v12176_v49, 8  ;;  %v9944_v49 = vld [vmem:[#allocation2 + $0xd9] sm:$0xff] }
 0x2ac   : > { %1446 = vxpose.xlu1.b32.cont [13/16] (narrow) %v9596_v0, 8  ;;  %v9790_v0 = vld [vmem:[#allocation2 + $0x48] sm:$0xff] }
 0x2ae   : > { %1506 = vxpose.xlu0.b32.start [1/16] (narrow) %v1474_v59, 8  ;;  %v9948_v59 = vld [vmem:[#allocation2 + $0xe1] sm:$0xff] }
 0x2af   : > { %12179 = vst [vmem:[#allocation15_spill] sm:$0xff] %v9948_v59 }
 0x2b0   : > { %1447 = vxpose.xlu1.b32.cont [14/16] (narrow) %v9600_v62, 8  ;;  %v9794_v62 = vld [vmem:[#allocation2 + $0xf8] sm:$0xff] }
 0x2b2   : > { %1507 = vxpose.xlu0.b32.cont [2/16] (narrow) %v1475_v27, 8  ;;  %v9952_v27 = vld [vmem:[#allocation2 + $0x199] sm:$0xff] }
 0x2b4   : > { %1448 = vxpose.xlu1.b32.cont [15/16] (narrow) %v9782_v50, 8 }
 0x2b6   : > { %1508 = vxpose.xlu0.b32.cont [3/16] (narrow) %v9790_v0, 8 }
 0x2b8   : > { %1449 = vxpose.xlu1.b32.end [16/16] (narrow) %v9785_v60, 8 }
 0x2ba   : > { %1509 = vxpose.xlu0.b32.cont [4/16] (narrow) %v9796_v25, 8 }
 0x2bc   : > { %1538 = vxpose.xlu1.b32.start [1/16] (narrow) %v9788_v29, 8 }
 0x2be   : > { %1510 = vxpose.xlu0.b32.cont [5/16] (narrow) %v9802_v52, 8 }
 0x2c0   : > { %1539 = vxpose.xlu1.b32.cont [2/16] (narrow) %v9794_v62, 8 }
 0x2c2   : > { %1511 = vxpose.xlu0.b32.cont [6/16] (narrow) %v9808_v54, 8 }
 0x2c4   : > { %1540 = vxpose.xlu1.b32.cont [3/16] (narrow) %v9800_v51, 8 }
 0x2c6   : > { %1512 = vxpose.xlu0.b32.cont [7/16] (narrow) %v9814_v58, 8 }
 0x2c8   : > { %1541 = vxpose.xlu1.b32.cont [4/16] (narrow) %v9806_v53, 8 }
 0x2ca   : > { %1513 = vxpose.xlu0.b32.cont [8/16] (narrow) %v9820_v1, 8 }
 0x2cc   : > { %1542 = vxpose.xlu1.b32.cont [5/16] (narrow) %v9812_v57, 8 }
 0x2ce   : > { %1514 = vxpose.xlu0.b32.cont [9/16] (narrow) %v9826_v3, 8 }
 0x2d0   : > { %1543 = vxpose.xlu1.b32.cont [6/16] (narrow) %v9818_v55, 8 }
 0x2d2   : > { %1515 = vxpose.xlu0.b32.cont [10/16] (narrow) %v9832_v7, 8 }
 0x2d4   : > { %1544 = vxpose.xlu1.b32.cont [7/16] (narrow) %v9824_v2, 8 }
 0x2d6   : > { %1516 = vxpose.xlu0.b32.cont [11/16] (narrow) %v9838_v9, 8 }
 0x2d8   : > { %1545 = vxpose.xlu1.b32.cont [8/16] (narrow) %v9830_v5, 8 }
 0x2da   : > { %1517 = vxpose.xlu0.b32.cont [12/16] (narrow) %v9844_v11, 8 }
 0x2dc   : > { %1546 = vxpose.xlu1.b32.cont [9/16] (narrow) %v9836_v8, 8 }
 0x2de   : > { %1518 = vxpose.xlu0.b32.cont [13/16] (narrow) %v9628_v28, 8  ;;  %v9866_v28 = vld [vmem:[#allocation2 + $0x198] sm:$0xff] }
 0x2e0   : > { %1547 = vxpose.xlu1.b32.cont [10/16] (narrow) %v9842_v10, 8 }
 0x2e2   : > { %1519 = vxpose.xlu0.b32.cont [14/16] (narrow) %v9854_v14, 8 }
 0x2e4   : > { %1548 = vxpose.xlu1.b32.cont [11/16] (narrow) %v9848_v12, 8 }
 0x2e6   : > { %1520 = vxpose.xlu0.b32.cont [15/16] (narrow) %v9858_v15, 8 }
 0x2e8   : > { %1549 = vxpose.xlu1.b32.cont [12/16] (narrow) %v9852_v13, 8 }
 0x2ea   : > { %1521 = vxpose.xlu0.b32.end [16/16] (narrow) %v9862_v16, 8 }
 0x2ec   : > { %1550 = vxpose.xlu1.b32.cont [13/16] (narrow) %v9634_v56, 8  ;;  %v9872_v56 = vld [vmem:[#allocation2 + $0xf1] sm:$0xff] }
 0x2ed   : > { %12177 = vst [vmem:[#allocation14_spill] sm:$0xff] %v9872_v56 }
 0x2ee   : > { %1604 = vxpose.xlu0.b32.start [1/16] (narrow) %v1572_v17, 8  ;;  %v1676_v17 = vld [vmem:[#allocation2 + $0x32] sm:$0xff] }
 0x2f0   : > { %1551 = vxpose.xlu1.b32.cont [14/16] (narrow) %v9638_v63, 8  ;;  %v9878_v63 = vld [vmem:[#allocation2 + $0xf9] sm:$0xff] }
 0x2f1   : > { %12178 = vst [vmem:[#allocation12_spill] sm:$0xff] %v9878_v63 }
 0x2f2   : > { %1605 = vxpose.xlu0.b32.cont [2/16] (narrow) %v1573_v19, 8  ;;  %v9955_v19 = vld [vmem:[#allocation2 + $0x1a1] sm:$0xff] }
 0x2f3   : > { %12180 = vst [vmem:[#allocation13_spill] sm:$0xff] %v9955_v19 }
 0x2f4   : > { %1552 = vxpose.xlu1.b32.cont [15/16] (narrow) %v9866_v28, 8 }
 0x2f6   : > { %1606 = vxpose.xlu0.b32.cont [3/16] (narrow) %v9874_v31, 8 }
 0x2f8   : > { %1553 = vxpose.xlu1.b32.end [16/16] (narrow) %v9869_v18, 8 }
 0x2fa   : > { %1607 = vxpose.xlu0.b32.cont [4/16] (narrow) %v9880_v61, 8 }
 0x2fc   : > { %1636 = vxpose.xlu1.b32.start [1/16] (narrow) %v9872_v56, 8  ;;  %v9960_v56 = vld [vmem:[#allocation2 + $0x4a] sm:$0xff] }
 0x2fd   : > { %12182 = vst [vmem:[#allocation19_spill] sm:$0xff] %v9960_v56 }
 0x2fe   : > { %1608 = vxpose.xlu0.b32.cont [5/16] (narrow) %v9886_v23, 8 }
 0x300   : > { %1637 = vxpose.xlu1.b32.cont [2/16] (narrow) %v9878_v63, 8  ;;  %v1677_v63 = vld [vmem:[#allocation2 + $0x3a] sm:$0xff] }
 0x302   : > { %1609 = vxpose.xlu0.b32.cont [6/16] (narrow) %v9892_v26, 8 }
 0x304   : > { %1638 = vxpose.xlu1.b32.cont [3/16] (narrow) %v9884_v22, 8 }
 0x306   : > { %1610 = vxpose.xlu0.b32.cont [7/16] (narrow) %v9898_v32, 8 }
 0x308   : > { %1639 = vxpose.xlu1.b32.cont [4/16] (narrow) %v9890_v24, 8 }
 0x30a   : > { %1611 = vxpose.xlu0.b32.cont [8/16] (narrow) %v9904_v34, 8 }
 0x30c   : > { %1640 = vxpose.xlu1.b32.cont [5/16] (narrow) %v9896_v30, 8 }
 0x30e   : > { %1612 = vxpose.xlu0.b32.cont [9/16] (narrow) %v9910_v36, 8 }
 0x310   : > { %1641 = vxpose.xlu1.b32.cont [6/16] (narrow) %v9902_v33, 8 }
 0x312   : > { %1613 = vxpose.xlu0.b32.cont [10/16] (narrow) %v9916_v38, 8 }
 0x314   : > { %1642 = vxpose.xlu1.b32.cont [7/16] (narrow) %v9908_v35, 8 }
 0x316   : > { %1614 = vxpose.xlu0.b32.cont [11/16] (narrow) %v9922_v40, 8 }
 0x318   : > { %1643 = vxpose.xlu1.b32.cont [8/16] (narrow) %v9914_v37, 8 }
 0x31a   : > { %1615 = vxpose.xlu0.b32.cont [12/16] (narrow) %v9928_v44, 8 }
 0x31c   : > { %1644 = vxpose.xlu1.b32.cont [9/16] (narrow) %v9920_v39, 8 }
 0x31e   : > { %1616 = vxpose.xlu0.b32.cont [13/16] (narrow) %v9934_v46, 8 }
 0x320   : > { %1645 = vxpose.xlu1.b32.cont [10/16] (narrow) %v9926_v42, 8 }
 0x322   : > { %1617 = vxpose.xlu0.b32.cont [14/16] (narrow) %v9940_v48, 8 }
 0x324   : > { %1646 = vxpose.xlu1.b32.cont [11/16] (narrow) %v9932_v45, 8 }
 0x326   : > { %1618 = vxpose.xlu0.b32.cont [15/16] (narrow) %v9944_v49, 8 }
 0x328   : > { %1647 = vxpose.xlu1.b32.cont [12/16] (narrow) %v9938_v47, 8 }
 0x32a   : > { %1619 = vxpose.xlu0.b32.end [16/16] (narrow) %v9948_v59, 8  ;;  %v9966_v59 = vld [vmem:[#allocation2 + $0x52] sm:$0xff] }
 0x32b   : > { %12184 = vst [vmem:[#allocation21_spill] sm:$0xff] %v9966_v59 }
 0x32c   : > { %1648 = vxpose.xlu1.b32.cont [13/16] (narrow) %v9670_v4, 8  ;;  %v9958_v4 = vld [vmem:[#allocation2 + $0xf2] sm:$0xff] }
 0x32d   : > { %12181 = vst [vmem:[#allocation17_spill] sm:$0xff] %v9958_v4 }
 0x32e   : > { %1708 = vxpose.xlu0.b32.start [1/16] (narrow) %v1676_v17, 8  ;;  %v9970_v17 = vld [vmem:[#allocation2 + $0x10a] sm:$0xff] }
 0x32f   : > { %12185 = vst [vmem:[#allocation22_spill] sm:$0xff] %v9970_v17 }
 0x330   : > { %1649 = vxpose.xlu1.b32.cont [14/16] (narrow) %v9674_v6, 8  ;;  %v9964_v6 = vld [vmem:[#allocation2 + $0xfa] sm:$0xff] }
 0x331   : > { %12183 = vst [vmem:[#allocation20_spill] sm:$0xff] %v9964_v6 }
 0x332   : > { %1709 = vxpose.xlu0.b32.cont [2/16] (narrow) %v1677_v63, 8  ;;  %v9976_v63 = vld [vmem:[#allocation2 + $0x112] sm:$0xff] }
 0x333   : > { %12187 = vst [vmem:[#allocation24_spill] sm:$0xff] %v9976_v63 }
 0x334   : > { %1650 = vxpose.xlu1.b32.cont [15/16] (narrow) %v9952_v27, 8 }
 0x336   : > { %1710 = vxpose.xlu0.b32.cont [3/16] (narrow) %v9960_v56, 8  ;;  %v9982_v56 = vld [vmem:[#allocation2 + $0x122] sm:$0xff] }
 0x337   : > { %12189 = vst [vmem:[#allocation26_spill] sm:$0xff] %v9982_v56 }
 0x338   : > { %1651 = vxpose.xlu1.b32.end [16/16] (narrow) %v9955_v19, 8  ;;  %v9972_v19 = vld [vmem:[#allocation2 + $0x62] sm:$0xff] }
 0x339   : > { %12186 = vst [vmem:[#allocation23_spill] sm:$0xff] %v9972_v19 }
 0x33a   : > { %1711 = vxpose.xlu0.b32.cont [4/16] (narrow) %v9966_v59, 8  ;;  %v9988_v59 = vld [vmem:[#allocation2 + $0x12a] sm:$0xff] }
 0x33b   : > { %12191 = vst [vmem:[#allocation28_spill] sm:$0xff] %v9988_v59 }
 0x33c   : > { %1740 = vxpose.xlu1.b32.start [1/16] (narrow) %v9958_v4, 8  ;;  %v9978_v4 = vld [vmem:[#allocation2 + $0x6a] sm:$0xff] }
 0x33d   : > { %12188 = vst [vmem:[#allocation25_spill] sm:$0xff] %v9978_v4 }
 0x33e   : > { %1712 = vxpose.xlu0.b32.cont [5/16] (narrow) %v9972_v19, 8  ;;  %v9994_v19 = vld [vmem:[#allocation2 + $0x13a] sm:$0xff] }
 0x33f   : > { %12193 = vst [vmem:[#allocation30_spill] sm:$0xff] %v9994_v19 }
 0x340   : > { %1741 = vxpose.xlu1.b32.cont [2/16] (narrow) %v9964_v6, 8  ;;  %v9984_v6 = vld [vmem:[#allocation2 + $0x7a] sm:$0xff] }
 0x341   : > { %12190 = vst [vmem:[#allocation27_spill] sm:$0xff] %v9984_v6 }
 0x342   : > { %1713 = vxpose.xlu0.b32.cont [6/16] (narrow) %v9978_v4, 8  ;;  %v10000_v4 = vld [vmem:[#allocation2 + $0x142] sm:$0xff] }
 0x343   : > { %12195 = vst [vmem:[#allocation32_spill] sm:$0xff] %v10000_v4 }
 0x344   : > { %1742 = vxpose.xlu1.b32.cont [3/16] (narrow) %v9970_v17, 8  ;;  %v9990_v17 = vld [vmem:[#allocation2 + $0x82] sm:$0xff] }
 0x345   : > { %12192 = vst [vmem:[#allocation29_spill] sm:$0xff] %v9990_v17 }
 0x346   : > { %1714 = vxpose.xlu0.b32.cont [7/16] (narrow) %v9984_v6, 8  ;;  %v10006_v6 = vld [vmem:[#allocation2 + $0x152] sm:$0xff] }
 0x347   : > { %12197 = vst [vmem:[#allocation34_spill] sm:$0xff] %v10006_v6 }
 0x348   : > { %1743 = vxpose.xlu1.b32.cont [4/16] (narrow) %v9976_v63, 8  ;;  %v9996_v63 = vld [vmem:[#allocation2 + $0x92] sm:$0xff] }
 0x349   : > { %12194 = vst [vmem:[#allocation31_spill] sm:$0xff] %v9996_v63 }
 0x34a   : > { %1715 = vxpose.xlu0.b32.cont [8/16] (narrow) %v9990_v17, 8  ;;  %v10012_v17 = vld [vmem:[#allocation2 + $0x15a] sm:$0xff] }
 0x34c   : > { %1744 = vxpose.xlu1.b32.cont [5/16] (narrow) %v9982_v56, 8  ;;  %v10002_v56 = vld [vmem:[#allocation2 + $0x9a] sm:$0xff] }
 0x34d   : > { %12196 = vst [vmem:[#allocation33_spill] sm:$0xff] %v10002_v56 }
 0x34e   : > { %1716 = vxpose.xlu0.b32.cont [9/16] (narrow) %v9996_v63, 8  ;;  %v10018_v63 = vld [vmem:[#allocation2 + $0x16a] sm:$0xff] }
 0x34f   : > { %12200 = vst [vmem:[#allocation37_spill] sm:$0xff] %v10018_v63 }
 0x350   : > { %1745 = vxpose.xlu1.b32.cont [6/16] (narrow) %v9988_v59, 8  ;;  %v10008_v59 = vld [vmem:[#allocation2 + $0xaa] sm:$0xff] }
 0x351   : > { %12198 = vst [vmem:[#allocation35_spill] sm:$0xff] %v10008_v59 }
 0x352   : > { %1717 = vxpose.xlu0.b32.cont [10/16] (narrow) %v10002_v56, 8  ;;  %v10024_v56 = vld [vmem:[#allocation2 + $0x172] sm:$0xff] }
 0x353   : > { %12202 = vst [vmem:[#allocation39_spill] sm:$0xff] %v10024_v56 }
 0x354   : > { %1746 = vxpose.xlu1.b32.cont [7/16] (narrow) %v9994_v19, 8  ;;  %v10014_v19 = vld [vmem:[#allocation2 + $0xb2] sm:$0xff] }
 0x355   : > { %12199 = vst [vmem:[#allocation36_spill] sm:$0xff] %v10014_v19 }
 0x356   : > { %1718 = vxpose.xlu0.b32.cont [11/16] (narrow) %v10008_v59, 8  ;;  %v10030_v59 = vld [vmem:[#allocation2 + $0xda] sm:$0xff] }
 0x357   : > { %12204 = vst [vmem:[#allocation41_spill] sm:$0xff] %v10030_v59 }
 0x358   : > { %1747 = vxpose.xlu1.b32.cont [8/16] (narrow) %v10000_v4, 8  ;;  %v10020_v4 = vld [vmem:[#allocation2 + $0xc2] sm:$0xff] }
 0x359   : > { %12201 = vst [vmem:[#allocation38_spill] sm:$0xff] %v10020_v4 }
 0x35a   : > { %1719 = vxpose.xlu0.b32.cont [12/16] (narrow) %v10014_v19, 8  ;;  %v10034_v19 = vld [vmem:[#allocation2 + $0xe2] sm:$0xff] }
 0x35b   : > { %12205 = vst [vmem:[#allocation42_spill] sm:$0xff] %v10034_v19 }
 0x35c   : > { %1748 = vxpose.xlu1.b32.cont [9/16] (narrow) %v10006_v6, 8  ;;  %v10026_v6 = vld [vmem:[#allocation2 + $0xca] sm:$0xff] }
 0x35d   : > { %12203 = vst [vmem:[#allocation40_spill] sm:$0xff] %v10026_v6 }
 0x35e   : > { %1720 = vxpose.xlu0.b32.cont [13/16] (narrow) %v10020_v4, 8  ;;  %v10038_v4 = vld [vmem:[#allocation2 + $0x19a] sm:$0xff] }
 0x360   : > { %1749 = vxpose.xlu1.b32.cont [10/16] (narrow) %v10012_v17, 8 }
 0x362   : > { %1721 = vxpose.xlu0.b32.cont [14/16] (narrow) %v10026_v6, 8  ;;  %v1775_v6 = vld [vmem:[#allocation2 + $0x3b] sm:$0xff] }
 0x364   : > { %1750 = vxpose.xlu1.b32.cont [11/16] (narrow) %v10018_v63, 8  ;;  %v1774_v63 = vld [vmem:[#allocation2 + $0x33] sm:$0xff] }
 0x366   : > { %1722 = vxpose.xlu0.b32.cont [15/16] (narrow) %v10030_v59, 8  ;;  %v10046_v59 = vld [vmem:[#allocation2 + $0x4b] sm:$0xff] }
 0x367   : > { %12208 = vst [vmem:[#allocation16_spill] sm:$0xff] %v10046_v59 }
 0x368   : > { %1751 = vxpose.xlu1.b32.cont [12/16] (narrow) %v10024_v56, 8  ;;  %v10041_v56 = vld [vmem:[#allocation2 + $0x1a2] sm:$0xff] }
 0x369   : > { %12206 = vst [vmem:[#allocation43_spill] sm:$0xff] %v10041_v56 }
 0x36a   : > { %1723 = vxpose.xlu0.b32.end [16/16] (narrow) %v10034_v19, 8  ;;  %v10052_v19 = vld [vmem:[#allocation2 + $0x53] sm:$0xff] }
 0x36b   : > { %12210 = vst [vmem:[#allocation18_spill] sm:$0xff] %v10052_v19 }
 0x36c   : > { %1752 = vxpose.xlu1.b32.cont [13/16] (narrow) %v9706_v41, 8  ;;  %v10044_v41 = vld [vmem:[#allocation2 + $0xf3] sm:$0xff] }
 0x36d   : > { %12207 = vst [vmem:[#allocation44_spill] sm:$0xff] %v10044_v41 }
 0x36e   : > { %1806 = vxpose.xlu0.b32.start [1/16] (narrow) %v1774_v63, 8  ;;  %v10056_v63 = vld [vmem:[#allocation2 + $0x10b] sm:$0xff] }
 0x36f   : > { %12211 = vst [vmem:[#allocation47_spill] sm:$0xff] %v10056_v63 }
 0x370   : > { %1753 = vxpose.xlu1.b32.cont [14/16] (narrow) %v9710_v43, 8  ;;  %v10050_v43 = vld [vmem:[#allocation2 + $0xfb] sm:$0xff] }
 0x371   : > { %12209 = vst [vmem:[#allocation45_spill] sm:$0xff] %v10050_v43 }
 0x372   : > { %1807 = vxpose.xlu0.b32.cont [2/16] (narrow) %v1775_v6, 8  ;;  %v10062_v6 = vld [vmem:[#allocation2 + $0x113] sm:$0xff] }
 0x373   : > { %12213 = vst [vmem:[#allocation50_spill] sm:$0xff] %v10062_v6 }
 0x374   : > { %1754 = vxpose.xlu1.b32.cont [15/16] (narrow) %v10038_v4, 8 }
 0x376   : > { %1808 = vxpose.xlu0.b32.cont [3/16] (narrow) %v10046_v59, 8  ;;  %v10068_v59 = vld [vmem:[#allocation2 + $0x123] sm:$0xff] }
 0x377   : > { %12215 = vst [vmem:[#allocation52_spill] sm:$0xff] %v10068_v59 }
 0x378   : > { %1755 = vxpose.xlu1.b32.end [16/16] (narrow) %v10041_v56, 8  ;;  %v10058_v56 = vld [vmem:[#allocation2 + $0x63] sm:$0xff] }
 0x379   : > { %12212 = vst [vmem:[#allocation49_spill] sm:$0xff] %v10058_v56 }
 0x37a   : > { %1809 = vxpose.xlu0.b32.cont [4/16] (narrow) %v10052_v19, 8  ;;  %v10074_v19 = vld [vmem:[#allocation2 + $0x12b] sm:$0xff] }
 0x37b   : > { %12217 = vst [vmem:[#allocation54_spill] sm:$0xff] %v10074_v19 }
 0x37c   : > { %1838 = vxpose.xlu1.b32.start [1/16] (narrow) %v10044_v41, 8  ;;  %v10064_v41 = vld [vmem:[#allocation2 + $0x6b] sm:$0xff] }
 0x37d   : > { %12214 = vst [vmem:[#allocation51_spill] sm:$0xff] %v10064_v41 }
 0x37e   : > { %1810 = vxpose.xlu0.b32.cont [5/16] (narrow) %v10058_v56, 8  ;;  %v10080_v56 = vld [vmem:[#allocation2 + $0x13b] sm:$0xff] }
 0x37f   : > { %12219 = vst [vmem:[#allocation56_spill] sm:$0xff] %v10080_v56 }
 0x380   : > { %1839 = vxpose.xlu1.b32.cont [2/16] (narrow) %v10050_v43, 8  ;;  %v10070_v43 = vld [vmem:[#allocation2 + $0x7b] sm:$0xff] }
 0x381   : > { %12216 = vst [vmem:[#allocation53_spill] sm:$0xff] %v10070_v43 }
 0x382   : > { %1811 = vxpose.xlu0.b32.cont [6/16] (narrow) %v10064_v41, 8  ;;  %v10086_v41 = vld [vmem:[#allocation2 + $0x143] sm:$0xff] }
 0x383   : > { %12221 = vst [vmem:[#allocation58_spill] sm:$0xff] %v10086_v41 }
 0x384   : > { %1840 = vxpose.xlu1.b32.cont [3/16] (narrow) %v10056_v63, 8  ;;  %v10076_v63 = vld [vmem:[#allocation2 + $0x83] sm:$0xff] }
 0x385   : > { %12218 = vst [vmem:[#allocation55_spill] sm:$0xff] %v10076_v63 }
 0x386   : > { %1812 = vxpose.xlu0.b32.cont [7/16] (narrow) %v10070_v43, 8  ;;  %v10092_v43 = vld [vmem:[#allocation2 + $0x153] sm:$0xff] }
 0x387   : > { %12223 = vst [vmem:[#allocation60_spill] sm:$0xff] %v10092_v43 }
 0x388   : > { %1841 = vxpose.xlu1.b32.cont [4/16] (narrow) %v10062_v6, 8  ;;  %v10082_v6 = vld [vmem:[#allocation2 + $0x93] sm:$0xff] }
 0x389   : > { %12220 = vst [vmem:[#allocation57_spill] sm:$0xff] %v10082_v6 }
 0x38a   : > { %1813 = vxpose.xlu0.b32.cont [8/16] (narrow) %v10076_v63, 8  ;;  %v10098_v63 = vld [vmem:[#allocation2 + $0x15b] sm:$0xff] }
 0x38c   : > { %1842 = vxpose.xlu1.b32.cont [5/16] (narrow) %v10068_v59, 8  ;;  %v10088_v59 = vld [vmem:[#allocation2 + $0x9b] sm:$0xff] }
 0x38d   : > { %12222 = vst [vmem:[#allocation59_spill] sm:$0xff] %v10088_v59 }
 0x38e   : > { %1814 = vxpose.xlu0.b32.cont [9/16] (narrow) %v10082_v6, 8  ;;  %v10104_v6 = vld [vmem:[#allocation2 + $0x16b] sm:$0xff] }
 0x38f   : > { %12226 = vst [vmem:[#allocation63_spill] sm:$0xff] %v10104_v6 }
 0x390   : > { %1843 = vxpose.xlu1.b32.cont [6/16] (narrow) %v10074_v19, 8  ;;  %v10094_v19 = vld [vmem:[#allocation2 + $0xab] sm:$0xff] }
 0x391   : > { %12224 = vst [vmem:[#allocation61_spill] sm:$0xff] %v10094_v19 }
 0x392   : > { %1815 = vxpose.xlu0.b32.cont [10/16] (narrow) %v10088_v59, 8  ;;  %v10110_v59 = vld [vmem:[#allocation2 + $0x173] sm:$0xff] }
 0x393   : > { %12228 = vst [vmem:[#allocation65_spill] sm:$0xff] %v10110_v59 }
 0x394   : > { %1844 = vxpose.xlu1.b32.cont [7/16] (narrow) %v10080_v56, 8  ;;  %v10100_v56 = vld [vmem:[#allocation2 + $0xb3] sm:$0xff] }
 0x395   : > { %12225 = vst [vmem:[#allocation62_spill] sm:$0xff] %v10100_v56 }
 0x396   : > { %1816 = vxpose.xlu0.b32.cont [11/16] (narrow) %v10094_v19, 8  ;;  %v10116_v19 = vld [vmem:[#allocation2 + $0xdb] sm:$0xff] }
 0x397   : > { %12230 = vst [vmem:[#allocation67_spill] sm:$0xff] %v10116_v19 }
 0x398   : > { %1845 = vxpose.xlu1.b32.cont [8/16] (narrow) %v10086_v41, 8  ;;  %v10106_v41 = vld [vmem:[#allocation2 + $0xc3] sm:$0xff] }
 0x399   : > { %12227 = vst [vmem:[#allocation64_spill] sm:$0xff] %v10106_v41 }
 0x39a   : > { %1817 = vxpose.xlu0.b32.cont [12/16] (narrow) %v10100_v56, 8  ;;  %v10120_v56 = vld [vmem:[#allocation2 + $0xe3] sm:$0xff] }
 0x39b   : > { %12231 = vst [vmem:[#allocation68_spill] sm:$0xff] %v10120_v56 }
 0x39c   : > { %1846 = vxpose.xlu1.b32.cont [9/16] (narrow) %v10092_v43, 8  ;;  %v10112_v43 = vld [vmem:[#allocation2 + $0xcb] sm:$0xff] }
 0x39d   : > { %12229 = vst [vmem:[#allocation66_spill] sm:$0xff] %v10112_v43 }
 0x39e   : > { %1818 = vxpose.xlu0.b32.cont [13/16] (narrow) %v10106_v41, 8  ;;  %v10124_v41 = vld [vmem:[#allocation2 + $0x19b] sm:$0xff] }
 0x3a0   : > { %1847 = vxpose.xlu1.b32.cont [10/16] (narrow) %v10098_v63, 8 }
 0x3a2   : > { %1819 = vxpose.xlu0.b32.cont [14/16] (narrow) %v10112_v43, 8  ;;  %v1879_v43 = vld [vmem:[#allocation2 + $0x3c] sm:$0xff] }
 0x3a4   : > { %1848 = vxpose.xlu1.b32.cont [11/16] (narrow) %v10104_v6, 8  ;;  %v1878_v6 = vld [vmem:[#allocation2 + $0x34] sm:$0xff] }
 0x3a6   : > { %1820 = vxpose.xlu0.b32.cont [15/16] (narrow) %v10116_v19, 8  ;;  %v10132_v19 = vld [vmem:[#allocation2 + $0x4c] sm:$0xff] }
 0x3a7   : > { %12234 = vst [vmem:[#allocation71_spill] sm:$0xff] %v10132_v19 }
 0x3a8   : > { %1849 = vxpose.xlu1.b32.cont [12/16] (narrow) %v10110_v59, 8  ;;  %v10127_v59 = vld [vmem:[#allocation2 + $0x1a3] sm:$0xff] }
 0x3a9   : > { %12232 = vst [vmem:[#allocation69_spill] sm:$0xff] %v10127_v59 }
 0x3aa   : > { %1821 = vxpose.xlu0.b32.end [16/16] (narrow) %v10120_v56, 8  ;;  %v10138_v56 = vld [vmem:[#allocation2 + $0x54] sm:$0xff] }
 0x3ab   : > { %12236 = vst [vmem:[#allocation46_spill] sm:$0xff] %v10138_v56 }
 0x3ac   : > { %1850 = vxpose.xlu1.b32.cont [13/16] (narrow) %v9746_v20, 8  ;;  %v10130_v20 = vld [vmem:[#allocation2 + $0xf4] sm:$0xff] }
 0x3ad   : > { %12233 = vst [vmem:[#allocation70_spill] sm:$0xff] %v10130_v20 }
 0x3ae   : > { %1910 = vxpose.xlu0.b32.start [1/16] (narrow) %v1878_v6, 8  ;;  %v10142_v6 = vld [vmem:[#allocation2 + $0x10c] sm:$0xff] }
 0x3af   : > { %12237 = vst [vmem:[#allocation73_spill] sm:$0xff] %v10142_v6 }
 0x3b0   : > { %1851 = vxpose.xlu1.b32.cont [14/16] (narrow) %v9750_v21, 8  ;;  %v10136_v21 = vld [vmem:[#allocation2 + $0xfc] sm:$0xff] }
 0x3b1   : > { %12235 = vst [vmem:[#allocation72_spill] sm:$0xff] %v10136_v21 }
 0x3b2   : > { %1911 = vxpose.xlu0.b32.cont [2/16] (narrow) %v1879_v43, 8  ;;  %v10148_v43 = vld [vmem:[#allocation2 + $0x114] sm:$0xff] }
 0x3b3   : > { %12239 = vst [vmem:[#allocation75_spill] sm:$0xff] %v10148_v43 }
 0x3b4   : > { %1852 = vxpose.xlu1.b32.cont [15/16] (narrow) %v10124_v41, 8 }
 0x3b6   : > { %1912 = vxpose.xlu0.b32.cont [3/16] (narrow) %v10132_v19, 8  ;;  %v10154_v19 = vld [vmem:[#allocation2 + $0x124] sm:$0xff] }
 0x3b7   : > { %12241 = vst [vmem:[#allocation78_spill] sm:$0xff] %v10154_v19 }
 0x3b8   : > { %1853 = vxpose.xlu1.b32.end [16/16] (narrow) %v10127_v59, 8  ;;  %v10144_v59 = vld [vmem:[#allocation2 + $0x64] sm:$0xff] }
 0x3b9   : > { %12238 = vst [vmem:[#allocation48_spill] sm:$0xff] %v10144_v59 }
 0x3ba   : > { %1913 = vxpose.xlu0.b32.cont [4/16] (narrow) %v10138_v56, 8  ;;  %v10160_v56 = vld [vmem:[#allocation2 + $0x12c] sm:$0xff] }
 0x3bb   : > { %12243 = vst [vmem:[#allocation80_spill] sm:$0xff] %v10160_v56 }
 0x3bc   : > { %1942 = vxpose.xlu1.b32.start [1/16] (narrow) %v10130_v20, 8  ;;  %v10150_v20 = vld [vmem:[#allocation2 + $0x6c] sm:$0xff] }
 0x3bd   : > { %12240 = vst [vmem:[#allocation77_spill] sm:$0xff] %v10150_v20 }
 0x3be   : > { %1914 = vxpose.xlu0.b32.cont [5/16] (narrow) %v10144_v59, 8  ;;  %v10166_v59 = vld [vmem:[#allocation2 + $0x13c] sm:$0xff] }
 0x3bf   : > { %12245 = vst [vmem:[#allocation82_spill] sm:$0xff] %v10166_v59 }
 0x3c0   : > { %1943 = vxpose.xlu1.b32.cont [2/16] (narrow) %v10136_v21, 8  ;;  %v10156_v21 = vld [vmem:[#allocation2 + $0x7c] sm:$0xff] }
 0x3c1   : > { %12242 = vst [vmem:[#allocation79_spill] sm:$0xff] %v10156_v21 }
 0x3c2   : > { %1915 = vxpose.xlu0.b32.cont [6/16] (narrow) %v10150_v20, 8  ;;  %v10172_v20 = vld [vmem:[#allocation2 + $0x144] sm:$0xff] }
 0x3c3   : > { %12247 = vst [vmem:[#allocation84_spill] sm:$0xff] %v10172_v20 }
 0x3c4   : > { %1944 = vxpose.xlu1.b32.cont [3/16] (narrow) %v10142_v6, 8  ;;  %v10162_v6 = vld [vmem:[#allocation2 + $0x84] sm:$0xff] }
 0x3c5   : > { %12244 = vst [vmem:[#allocation81_spill] sm:$0xff] %v10162_v6 }
 0x3c6   : > { %1916 = vxpose.xlu0.b32.cont [7/16] (narrow) %v10156_v21, 8  ;;  %v10178_v21 = vld [vmem:[#allocation2 + $0x154] sm:$0xff] }
 0x3c7   : > { %12249 = vst [vmem:[#allocation86_spill] sm:$0xff] %v10178_v21 }
 0x3c8   : > { %1945 = vxpose.xlu1.b32.cont [4/16] (narrow) %v10148_v43, 8  ;;  %v10168_v43 = vld [vmem:[#allocation2 + $0x94] sm:$0xff] }
 0x3c9   : > { %12246 = vst [vmem:[#allocation83_spill] sm:$0xff] %v10168_v43 }
 0x3ca   : > { %1917 = vxpose.xlu0.b32.cont [8/16] (narrow) %v10162_v6, 8  ;;  %v10184_v6 = vld [vmem:[#allocation2 + $0x15c] sm:$0xff] }
 0x3cc   : > { %1946 = vxpose.xlu1.b32.cont [5/16] (narrow) %v10154_v19, 8  ;;  %v10174_v19 = vld [vmem:[#allocation2 + $0x9c] sm:$0xff] }
 0x3cd   : > { %12248 = vst [vmem:[#allocation85_spill] sm:$0xff] %v10174_v19 }
 0x3ce   : > { %1918 = vxpose.xlu0.b32.cont [9/16] (narrow) %v10168_v43, 8  ;;  %v10190_v43 = vld [vmem:[#allocation2 + $0x16c] sm:$0xff] }
 0x3d0   : > { %1947 = vxpose.xlu1.b32.cont [6/16] (narrow) %v10160_v56, 8  ;;  %v10180_v56 = vld [vmem:[#allocation2 + $0xac] sm:$0xff] }
 0x3d1   : > { %12250 = vst [vmem:[#allocation87_spill] sm:$0xff] %v10180_v56 }
 0x3d2   : > { %1919 = vxpose.xlu0.b32.cont [10/16] (narrow) %v10174_v19, 8  ;;  %v10196_v19 = vld [vmem:[#allocation2 + $0x174] sm:$0xff] }
 0x3d3   : > { %12253 = vst [vmem:[#allocation90_spill] sm:$0xff] %v10196_v19 }
 0x3d4   : > { %1948 = vxpose.xlu1.b32.cont [7/16] (narrow) %v10166_v59, 8  ;;  %v10186_v59 = vld [vmem:[#allocation2 + $0xb4] sm:$0xff] }
 0x3d5   : > { %12251 = vst [vmem:[#allocation88_spill] sm:$0xff] %v10186_v59 }
 0x3d6   : > { %1920 = vxpose.xlu0.b32.cont [11/16] (narrow) %v10180_v56, 8  ;;  %v10202_v56 = vld [vmem:[#allocation2 + $0xdc] sm:$0xff] }
 0x3d8   : > { %1949 = vxpose.xlu1.b32.cont [8/16] (narrow) %v10172_v20, 8  ;;  %v10192_v20 = vld [vmem:[#allocation2 + $0xc4] sm:$0xff] }
 0x3d9   : > { %12252 = vst [vmem:[#allocation89_spill] sm:$0xff] %v10192_v20 }
 0x3da   : > { %1921 = vxpose.xlu0.b32.cont [12/16] (narrow) %v10186_v59, 8  ;;  %v10206_v59 = vld [vmem:[#allocation2 + $0xe4] sm:$0xff] }
 0x3dc   : > { %1950 = vxpose.xlu1.b32.cont [9/16] (narrow) %v10178_v21, 8  ;;  %v10198_v21 = vld [vmem:[#allocation2 + $0xcc] sm:$0xff] }
 0x3de   : > { %1922 = vxpose.xlu0.b32.cont [13/16] (narrow) %v10192_v20, 8  ;;  %v10210_v20 = vld [vmem:[#allocation2 + $0x19c] sm:$0xff] }
 0x3e0   : > { %1951 = vxpose.xlu1.b32.cont [10/16] (narrow) %v10184_v6, 8 }
 0x3e2   : > { %1923 = vxpose.xlu0.b32.cont [14/16] (narrow) %v10198_v21, 8 }
 0x3e4   : > { %1952 = vxpose.xlu1.b32.cont [11/16] (narrow) %v10190_v43, 8 }
 0x3e6   : > { %1924 = vxpose.xlu0.b32.cont [15/16] (narrow) %v10202_v56, 8 }
 0x3e8   : > { %1953 = vxpose.xlu1.b32.cont [12/16] (narrow) %v10196_v19, 8  ;;  %v10214_v19 = vld [vmem:[#allocation2 + $0x1a4] sm:$0xff] }
 0x3ea   : > { %1925 = vxpose.xlu0.b32.end [16/16] (narrow) %v10206_v59, 8 }
 0x3ec   : > { %1954 = vxpose.xlu1.b32.cont [13/16] (narrow) %v9782_v50, 8  ;;  %v10234_v50 = vld [vmem:[#allocation2 + $0xc0] sm:$0xff] }
 0x3ee   : > { %2009 = vxpose.xlu0.b32.start [1/16] (narrow) %v9790_v0, 8  ;;  %v10244_v0 = vld [vmem:[#allocation2 + $0x188] sm:$0xff] }
 0x3f0   : > { %1955 = vxpose.xlu1.b32.cont [14/16] (narrow) %v9785_v60, 8  ;;  %v10240_v60 = vld [vmem:[#allocation2 + $0x180] sm:$0xff] }
 0x3f2   : > { %2010 = vxpose.xlu0.b32.cont [2/16] (narrow) %v9796_v25, 8  ;;  %v10252_v25 = vld [vmem:[#allocation2 + $0x1b0] sm:$0xff] }
 0x3f4   : > { %1956 = vxpose.xlu1.b32.cont [15/16] (narrow) %v10210_v20, 8 }
 0x3f6   : > { %2011 = vxpose.xlu0.b32.cont [3/16] (narrow) %v9802_v52, 8  ;;  %v12254_v52 = vld [vmem:[#allocation15_spill] sm:$0xff] }
 0x3f8   : > { %1957 = vxpose.xlu1.b32.end [16/16] (narrow) %v10214_v19, 8 }
 0x3fa   : > { %2012 = vxpose.xlu0.b32.cont [4/16] (narrow) %v9808_v54, 8  ;;  %v12256_v54 = vld [vmem:[#allocation13_spill] sm:$0xff] }
 0x3fc   : > { %2041 = vxpose.xlu1.b32.start [1/16] (narrow) %v9800_v51, 8  ;;  %v10256_v51 = vld [vmem:[#allocation2 + $0x1b8] sm:$0xff] }
 0x3fe   : > { %2013 = vxpose.xlu0.b32.cont [5/16] (narrow) %v9814_v58, 8  ;;  %v10292_v58 = vld [vmem:[#allocation2 + $0x1b1] sm:$0xff] }
 0x400   : > { %2042 = vxpose.xlu1.b32.cont [2/16] (narrow) %v9806_v53, 8  ;;  %v12255_v53 = vld [vmem:[#allocation14_spill] sm:$0xff] }
 0x402   : > { %2014 = vxpose.xlu0.b32.cont [6/16] (narrow) %v9820_v1, 8  ;;  %v10296_v1 = vld [vmem:[#allocation2 + $0x1b9] sm:$0xff] }
 0x404   : > { %2043 = vxpose.xlu1.b32.cont [3/16] (narrow) %v9812_v57, 8  ;;  %v12257_v57 = vld [vmem:[#allocation12_spill] sm:$0xff] }
 0x406   : > { %2015 = vxpose.xlu0.b32.cont [7/16] (narrow) %v9826_v3, 8  ;;  %v12260_v3 = vld [vmem:[#allocation22_spill] sm:$0xff] }
 0x408   : > { %2044 = vxpose.xlu1.b32.cont [4/16] (narrow) %v9818_v55, 8  ;;  %v12258_v55 = vld [vmem:[#allocation19_spill] sm:$0xff] }
 0x40a   : > { %2016 = vxpose.xlu0.b32.cont [8/16] (narrow) %v9832_v7, 8  ;;  %v12262_v7 = vld [vmem:[#allocation24_spill] sm:$0xff] }
 0x40c   : > { %2045 = vxpose.xlu1.b32.cont [5/16] (narrow) %v9824_v2, 8  ;;  %v12259_v2 = vld [vmem:[#allocation21_spill] sm:$0xff] }
 0x40e   : > { %2017 = vxpose.xlu0.b32.cont [9/16] (narrow) %v9838_v9, 8  ;;  %v12264_v9 = vld [vmem:[#allocation26_spill] sm:$0xff] }
 0x410   : > { %2046 = vxpose.xlu1.b32.cont [6/16] (narrow) %v9830_v5, 8  ;;  %v12261_v5 = vld [vmem:[#allocation23_spill] sm:$0xff] }
 0x412   : > { %2018 = vxpose.xlu0.b32.cont [10/16] (narrow) %v9844_v11, 8  ;;  %v12266_v11 = vld [vmem:[#allocation28_spill] sm:$0xff] }
 0x414   : > { %2047 = vxpose.xlu1.b32.cont [7/16] (narrow) %v9836_v8, 8  ;;  %v12263_v8 = vld [vmem:[#allocation25_spill] sm:$0xff] }
 0x416   : > { %2019 = vxpose.xlu0.b32.cont [11/16] (narrow) %v10234_v50, 8 }
 0x418   : > { %2048 = vxpose.xlu1.b32.cont [8/16] (narrow) %v9842_v10, 8  ;;  %v12265_v10 = vld [vmem:[#allocation27_spill] sm:$0xff] }
 0x41a   : > { %2020 = vxpose.xlu0.b32.cont [12/16] (narrow) %v9854_v14, 8  ;;  %v12269_v14 = vld [vmem:[#allocation31_spill] sm:$0xff] }
 0x41c   : > { %2049 = vxpose.xlu1.b32.cont [9/16] (narrow) %v9848_v12, 8  ;;  %v12267_v12 = vld [vmem:[#allocation29_spill] sm:$0xff] }
 0x41e   : > { %2021 = vxpose.xlu0.b32.cont [13/16] (narrow) %v9858_v15, 8  ;;  %v12270_v15 = vld [vmem:[#allocation32_spill] sm:$0xff] }
 0x420   : > { %2050 = vxpose.xlu1.b32.cont [10/16] (narrow) %v9852_v13, 8  ;;  %v12268_v13 = vld [vmem:[#allocation30_spill] sm:$0xff] }
 0x422   : > { %2022 = vxpose.xlu0.b32.cont [14/16] (narrow) %v9862_v16, 8  ;;  %v12271_v16 = vld [vmem:[#allocation33_spill] sm:$0xff] }
 0x424   : > { %2051 = vxpose.xlu1.b32.cont [11/16] (narrow) %v10240_v60, 8 }
 0x426   : > { %2023 = vxpose.xlu0.b32.cont [15/16] (narrow) %v9788_v29, 8  ;;  %v10280_v29 = vld [vmem:[#allocation2 + $0x181] sm:$0xff] }
 0x428   : > { %2052 = vxpose.xlu1.b32.cont [12/16] (narrow) %v10244_v0, 8 }
 0x42a   : > { %2024 = vxpose.xlu0.b32.end [16/16] (narrow) %v9794_v62, 8  ;;  %v10284_v62 = vld [vmem:[#allocation2 + $0x189] sm:$0xff] }
 0x42c   : > { %2053 = vxpose.xlu1.b32.cont [13/16] (narrow) %v9866_v28, 8  ;;  %v12272_v28 = vld [vmem:[#allocation34_spill] sm:$0xff] }
 0x42e   : > { %2113 = vxpose.xlu0.b32.start [1/16] (narrow) %v9874_v31, 8  ;;  %v12274_v31 = vld [vmem:[#allocation36_spill] sm:$0xff] }
 0x430   : > { %2054 = vxpose.xlu1.b32.cont [14/16] (narrow) %v9869_v18, 8  ;;  %v12273_v18 = vld [vmem:[#allocation35_spill] sm:$0xff] }
 0x432   : > { %2114 = vxpose.xlu0.b32.cont [2/16] (narrow) %v9880_v61, 8  ;;  %v12275_v61 = vld [vmem:[#allocation37_spill] sm:$0xff] }
 0x434   : > { %2055 = vxpose.xlu1.b32.cont [15/16] (narrow) %v10252_v25, 8 }
 0x436   : > { %2115 = vxpose.xlu0.b32.cont [3/16] (narrow) %v9886_v23, 8  ;;  %v12277_v23 = vld [vmem:[#allocation39_spill] sm:$0xff] }
 0x438   : > { %2056 = vxpose.xlu1.b32.end [16/16] (narrow) %v10256_v51, 8 }
 0x43a   : > { %2116 = vxpose.xlu0.b32.cont [4/16] (narrow) %v9892_v26, 8  ;;  %v10320_v26 = vld [vmem:[#allocation2 + $0x182] sm:$0xff] }
 0x43c   : > { %2145 = vxpose.xlu1.b32.start [1/16] (narrow) %v9884_v22, 8  ;;  %v12276_v22 = vld [vmem:[#allocation38_spill] sm:$0xff] }
 0x43e   : > { %2117 = vxpose.xlu0.b32.cont [5/16] (narrow) %v9898_v32, 8  ;;  %v10324_v32 = vld [vmem:[#allocation2 + $0x18a] sm:$0xff] }
 0x440   : > { %2146 = vxpose.xlu1.b32.cont [2/16] (narrow) %v9890_v24, 8  ;;  %v12278_v24 = vld [vmem:[#allocation40_spill] sm:$0xff] }
 0x442   : > { %2118 = vxpose.xlu0.b32.cont [6/16] (narrow) %v9904_v34, 8  ;;  %v12281_v34 = vld [vmem:[#allocation17_spill] sm:$0xff] }
 0x444   : > { %2147 = vxpose.xlu1.b32.cont [3/16] (narrow) %v9896_v30, 8  ;;  %v12279_v30 = vld [vmem:[#allocation41_spill] sm:$0xff] }
 0x446   : > { %2119 = vxpose.xlu0.b32.cont [7/16] (narrow) %v9910_v36, 8  ;;  %v12283_v36 = vld [vmem:[#allocation20_spill] sm:$0xff] }
 0x448   : > { %2148 = vxpose.xlu1.b32.cont [4/16] (narrow) %v9902_v33, 8  ;;  %v12280_v33 = vld [vmem:[#allocation42_spill] sm:$0xff] }
 0x44a   : > { %2120 = vxpose.xlu0.b32.cont [8/16] (narrow) %v9916_v38, 8  ;;  %v12284_v38 = vld [vmem:[#allocation16_spill] sm:$0xff] }
 0x44c   : > { %2149 = vxpose.xlu1.b32.cont [5/16] (narrow) %v9908_v35, 8  ;;  %v12282_v35 = vld [vmem:[#allocation43_spill] sm:$0xff] }
 0x44e   : > { %2121 = vxpose.xlu0.b32.cont [9/16] (narrow) %v9922_v40, 8  ;;  %v12285_v40 = vld [vmem:[#allocation18_spill] sm:$0xff] }
 0x450   : > { %2150 = vxpose.xlu1.b32.cont [6/16] (narrow) %v9914_v37, 8  ;;  %v10332_v37 = vld [vmem:[#allocation2 + $0x1b2] sm:$0xff] }
 0x452   : > { %2122 = vxpose.xlu0.b32.cont [10/16] (narrow) %v9928_v44, 8  ;;  %v12287_v44 = vld [vmem:[#allocation49_spill] sm:$0xff] }
 0x454   : > { %2151 = vxpose.xlu1.b32.cont [7/16] (narrow) %v9920_v39, 8  ;;  %v10336_v39 = vld [vmem:[#allocation2 + $0x1ba] sm:$0xff] }
 0x456   : > { %2123 = vxpose.xlu0.b32.cont [11/16] (narrow) %v9934_v46, 8  ;;  %v12289_v46 = vld [vmem:[#allocation51_spill] sm:$0xff] }
 0x458   : > { %2152 = vxpose.xlu1.b32.cont [8/16] (narrow) %v9926_v42, 8  ;;  %v12286_v42 = vld [vmem:[#allocation47_spill] sm:$0xff] }
 0x45a   : > { %2124 = vxpose.xlu0.b32.cont [12/16] (narrow) %v9940_v48, 8  ;;  %v12291_v48 = vld [vmem:[#allocation53_spill] sm:$0xff] }
 0x45c   : > { %2153 = vxpose.xlu1.b32.cont [9/16] (narrow) %v9932_v45, 8  ;;  %v12288_v45 = vld [vmem:[#allocation50_spill] sm:$0xff] }
 0x45e   : > { %2125 = vxpose.xlu0.b32.cont [13/16] (narrow) %v9944_v49, 8  ;;  %v12292_v49 = vld [vmem:[#allocation54_spill] sm:$0xff] }
 0x460   : > { %2154 = vxpose.xlu1.b32.cont [10/16] (narrow) %v9938_v47, 8  ;;  %v12290_v47 = vld [vmem:[#allocation52_spill] sm:$0xff] }
 0x462   : > { %2126 = vxpose.xlu0.b32.cont [14/16] (narrow) %v12254_v52, 8  ;;  %v12296_v52 = vld [vmem:[#allocation58_spill] sm:$0xff] }
 0x464   : > { %2155 = vxpose.xlu1.b32.cont [11/16] (narrow) %v10280_v29, 8 }
 0x466   : > { %2127 = vxpose.xlu0.b32.cont [15/16] (narrow) %v12255_v53, 8  ;;  %v12297_v53 = vld [vmem:[#allocation59_spill] sm:$0xff] }
 0x468   : > { %2156 = vxpose.xlu1.b32.cont [12/16] (narrow) %v10284_v62, 8 }
 0x46a   : > { %2128 = vxpose.xlu0.b32.end [16/16] (narrow) %v12257_v57, 8  ;;  %v12299_v57 = vld [vmem:[#allocation61_spill] sm:$0xff] }
 0x46c   : > { %2157 = vxpose.xlu1.b32.cont [13/16] (narrow) %v9952_v27, 8  ;;  %v12293_v27 = vld [vmem:[#allocation55_spill] sm:$0xff] }
 0x46e   : > { %2211 = vxpose.xlu0.b32.start [1/16] (narrow) %v12258_v55, 8  ;;  %v12300_v55 = vld [vmem:[#allocation62_spill] sm:$0xff] }
 0x470   : > { %2158 = vxpose.xlu1.b32.cont [14/16] (narrow) %v12256_v54, 8  ;;  %v12298_v54 = vld [vmem:[#allocation60_spill] sm:$0xff] }
 0x472   : > { %2212 = vxpose.xlu0.b32.cont [2/16] (narrow) %v12259_v2, 8  ;;  %v12301_v2 = vld [vmem:[#allocation63_spill] sm:$0xff] }
 0x474   : > { %2159 = vxpose.xlu1.b32.cont [15/16] (narrow) %v10292_v58, 8 }
 0x476   : > { %2213 = vxpose.xlu0.b32.cont [3/16] (narrow) %v12261_v5, 8  ;;  %v12303_v5 = vld [vmem:[#allocation65_spill] sm:$0xff] }
 0x478   : > { %2160 = vxpose.xlu1.b32.end [16/16] (narrow) %v10296_v1, 8 }
 0x47a   : > { %2214 = vxpose.xlu0.b32.cont [4/16] (narrow) %v12263_v8, 8  ;;  %v10360_v8 = vld [vmem:[#allocation2 + $0x183] sm:$0xff] }
 0x47c   : > { %2243 = vxpose.xlu1.b32.start [1/16] (narrow) %v12260_v3, 8  ;;  %v12302_v3 = vld [vmem:[#allocation64_spill] sm:$0xff] }
 0x47e   : > { %2215 = vxpose.xlu0.b32.cont [5/16] (narrow) %v12265_v10, 8  ;;  %v10364_v10 = vld [vmem:[#allocation2 + $0x18b] sm:$0xff] }
 0x480   : > { %2244 = vxpose.xlu1.b32.cont [2/16] (narrow) %v12262_v7, 8  ;;  %v12304_v7 = vld [vmem:[#allocation66_spill] sm:$0xff] }
 0x482   : > { %2216 = vxpose.xlu0.b32.cont [6/16] (narrow) %v12267_v12, 8  ;;  %v12308_v12 = vld [vmem:[#allocation69_spill] sm:$0xff] }
 0x484   : > { %2245 = vxpose.xlu1.b32.cont [3/16] (narrow) %v12264_v9, 8  ;;  %v12305_v9 = vld [vmem:[#allocation67_spill] sm:$0xff] }
 0x486   : > { %2217 = vxpose.xlu0.b32.cont [7/16] (narrow) %v12269_v14, 8  ;;  %v10372_v14 = vld [vmem:[#allocation2 + $0x1b3] sm:$0xff] }
 0x488   : > { %2246 = vxpose.xlu1.b32.cont [4/16] (narrow) %v12266_v11, 8  ;;  %v12307_v11 = vld [vmem:[#allocation44_spill] sm:$0xff] }
 0x48a   : > { %2218 = vxpose.xlu0.b32.cont [8/16] (narrow) %v12271_v16, 8  ;;  %v10376_v16 = vld [vmem:[#allocation2 + $0x1bb] sm:$0xff] }
 0x48c   : > { %2247 = vxpose.xlu1.b32.cont [5/16] (narrow) %v12268_v13, 8  ;;  %v12309_v13 = vld [vmem:[#allocation45_spill] sm:$0xff] }
 0x48e   : > { %2219 = vxpose.xlu0.b32.cont [9/16] (narrow) %v12273_v18, 8  ;;  %v12312_v18 = vld [vmem:[#allocation73_spill] sm:$0xff] }
 0x490   : > { %2248 = vxpose.xlu1.b32.cont [6/16] (narrow) %v12270_v15, 8  ;;  %v12310_v15 = vld [vmem:[#allocation71_spill] sm:$0xff] }
 0x492   : > { %2220 = vxpose.xlu0.b32.cont [10/16] (narrow) %v12274_v31, 8  ;;  %v12314_v31 = vld [vmem:[#allocation75_spill] sm:$0xff] }
 0x494   : > { %2249 = vxpose.xlu1.b32.cont [7/16] (narrow) %v12272_v28, 8  ;;  %v12311_v28 = vld [vmem:[#allocation46_spill] sm:$0xff] }
 0x496   : > { %2221 = vxpose.xlu0.b32.cont [11/16] (narrow) %v12276_v22, 8  ;;  %v12316_v22 = vld [vmem:[#allocation78_spill] sm:$0xff] }
 0x498   : > { %2250 = vxpose.xlu1.b32.cont [8/16] (narrow) %v10012_v17, 8  ;;  %v12295_v17 = vld [vmem:[#allocation57_spill] sm:$0xff] }
 0x49a   : > { %2222 = vxpose.xlu0.b32.cont [12/16] (narrow) %v12278_v24, 8  ;;  %v12318_v24 = vld [vmem:[#allocation80_spill] sm:$0xff] }
 0x49c   : > { %2251 = vxpose.xlu1.b32.cont [9/16] (narrow) %v12275_v61, 8  ;;  %v12315_v61 = vld [vmem:[#allocation77_spill] sm:$0xff] }
 0x49e   : > { %2223 = vxpose.xlu0.b32.cont [13/16] (narrow) %v12279_v30, 8  ;;  %v12319_v30 = vld [vmem:[#allocation81_spill] sm:$0xff] }
 0x4a0   : > { %2252 = vxpose.xlu1.b32.cont [10/16] (narrow) %v12277_v23, 8  ;;  %v12317_v23 = vld [vmem:[#allocation79_spill] sm:$0xff] }
 0x4a2   : > { %2224 = vxpose.xlu0.b32.cont [14/16] (narrow) %v12280_v33, 8  ;;  %v12320_v33 = vld [vmem:[#allocation82_spill] sm:$0xff] }
 0x4a4   : > { %2253 = vxpose.xlu1.b32.cont [11/16] (narrow) %v10320_v26, 8 }
 0x4a6   : > { %2225 = vxpose.xlu0.b32.cont [15/16] (narrow) %v12281_v34, 8  ;;  %v12321_v34 = vld [vmem:[#allocation83_spill] sm:$0xff] }
 0x4a8   : > { %2254 = vxpose.xlu1.b32.cont [12/16] (narrow) %v10324_v32, 8 }
 0x4aa   : > { %2226 = vxpose.xlu0.b32.end [16/16] (narrow) %v12283_v36, 8  ;;  %v12323_v36 = vld [vmem:[#allocation85_spill] sm:$0xff] }
 0x4ac   : > { %2255 = vxpose.xlu1.b32.cont [13/16] (narrow) %v10038_v4, 8  ;;  %v12294_v4 = vld [vmem:[#allocation56_spill] sm:$0xff] }
 0x4ae   : > { %2315 = vxpose.xlu0.b32.start [1/16] (narrow) %v12284_v38, 8  ;;  %v12324_v38 = vld [vmem:[#allocation86_spill] sm:$0xff] }
 0x4b0   : > { %2256 = vxpose.xlu1.b32.cont [14/16] (narrow) %v12282_v35, 8  ;;  %v12322_v35 = vld [vmem:[#allocation84_spill] sm:$0xff] }
 0x4b2   : > { %2316 = vxpose.xlu0.b32.cont [2/16] (narrow) %v12285_v40, 8  ;;  %v12325_v40 = vld [vmem:[#allocation87_spill] sm:$0xff] }
 0x4b4   : > { %2257 = vxpose.xlu1.b32.cont [15/16] (narrow) %v10332_v37, 8 }
 0x4b6   : > { %2317 = vxpose.xlu0.b32.cont [3/16] (narrow) %v12287_v44, 8  ;;  %v12327_v44 = vld [vmem:[#allocation89_spill] sm:$0xff] }
 0x4b8   : > { %2258 = vxpose.xlu1.b32.end [16/16] (narrow) %v10336_v39, 8 }
 0x4ba   : > { %2318 = vxpose.xlu0.b32.cont [4/16] (narrow) %v12289_v46, 8  ;;  %v10400_v46 = vld [vmem:[#allocation2 + $0x184] sm:$0xff] }
 0x4bc   : > { %2347 = vxpose.xlu1.b32.start [1/16] (narrow) %v12286_v42, 8  ;;  %v12326_v42 = vld [vmem:[#allocation88_spill] sm:$0xff] }
 0x4be   : > { %2319 = vxpose.xlu0.b32.cont [5/16] (narrow) %v12291_v48, 8  ;;  %v2486_v48 = vld [vmem:[#allocation2 + $0x60] sm:$0xff] }
 0x4c0   : > { %2348 = vxpose.xlu1.b32.cont [2/16] (narrow) %v12288_v45, 8  ;;  %v12328_v45 = vld [vmem:[#allocation90_spill] sm:$0xff] }
 0x4c2   : > { %2320 = vxpose.xlu0.b32.cont [6/16] (narrow) %v12293_v27, 8  ;;  %v2503_v27 = vld [vmem:[#allocation2 + $0x128] sm:$0xff] }
 0x4c4   : > { %2349 = vxpose.xlu1.b32.cont [3/16] (narrow) %v12290_v47, 8  ;;  %v10404_v47 = vld [vmem:[#allocation2 + $0x18c] sm:$0xff] }
 0x4c6   : > { %2321 = vxpose.xlu0.b32.cont [7/16] (narrow) %v12295_v17, 8  ;;  %v2490_v17 = vld [vmem:[#allocation2 + $0x90] sm:$0xff] }
 0x4c8   : > { %2350 = vxpose.xlu1.b32.cont [4/16] (narrow) %v12292_v49, 8  ;;  %v2487_v49 = vld [vmem:[#allocation2 + $0x68] sm:$0xff] }
 0x4ca   : > { %2322 = vxpose.xlu0.b32.cont [8/16] (narrow) %v12297_v53, 8  ;;  %v2491_v53 = vld [vmem:[#allocation2 + $0x98] sm:$0xff] }
 0x4cc   : > { %2351 = vxpose.xlu1.b32.cont [5/16] (narrow) %v12294_v4, 8  ;;  %v2504_v4 = vld [vmem:[#allocation2 + $0x138] sm:$0xff] }
 0x4ce   : > { %2323 = vxpose.xlu0.b32.cont [9/16] (narrow) %v12299_v57, 8  ;;  %v2492_v57 = vld [vmem:[#allocation2 + $0xa8] sm:$0xff] }
 0x4d0   : > { %2352 = vxpose.xlu1.b32.cont [6/16] (narrow) %v12296_v52, 8  ;;  %v2505_v52 = vld [vmem:[#allocation2 + $0x140] sm:$0xff] }
 0x4d2   : > { %2324 = vxpose.xlu0.b32.cont [10/16] (narrow) %v12300_v55, 8  ;;  %v2507_v55 = vld [vmem:[#allocation2 + $0x158] sm:$0xff] }
 0x4d4   : > { %2353 = vxpose.xlu1.b32.cont [7/16] (narrow) %v12298_v54, 8  ;;  %v2506_v54 = vld [vmem:[#allocation2 + $0x150] sm:$0xff] }
 0x4d6   : > { %2325 = vxpose.xlu0.b32.cont [11/16] (narrow) %v12302_v3, 8  ;;  %v2508_v3 = vld [vmem:[#allocation2 + $0x168] sm:$0xff] }
 0x4d8   : > { %2354 = vxpose.xlu1.b32.cont [8/16] (narrow) %v10098_v63, 8  ;;  %v12306_v63 = vld [vmem:[#allocation68_spill] sm:$0xff] }
 0x4da   : > { %2326 = vxpose.xlu0.b32.cont [12/16] (narrow) %v12304_v7, 8  ;;  %v2495_v7 = vld [vmem:[#allocation2 + $0xc8] sm:$0xff] }
 0x4dc   : > { %2355 = vxpose.xlu1.b32.cont [9/16] (narrow) %v12301_v2, 8  ;;  %v2493_v2 = vld [vmem:[#allocation2 + $0xb0] sm:$0xff] }
 0x4de   : > { %2327 = vxpose.xlu0.b32.cont [13/16] (narrow) %v12305_v9, 8  ;;  %v2496_v9 = vld [vmem:[#allocation2 + $0xd8] sm:$0xff] }
 0x4e0   : > { %2356 = vxpose.xlu1.b32.cont [10/16] (narrow) %v12303_v5, 8  ;;  %v2509_v5 = vld [vmem:[#allocation2 + $0x170] sm:$0xff] }
 0x4e2   : > { %2328 = vxpose.xlu0.b32.cont [14/16] (narrow) %v12306_v63, 8  ;;  %v2497_v63 = vld [vmem:[#allocation2 + $0xe0] sm:$0xff] }
 0x4e4   : > { %2357 = vxpose.xlu1.b32.cont [11/16] (narrow) %v10360_v8, 8 }
 0x4e6   : > { %2329 = vxpose.xlu0.b32.cont [15/16] (narrow) %v12307_v11, 8  ;;  %v2512_v11 = vld [vmem:[#allocation2 + $0x198] sm:$0xff] }
 0x4e8   : > { %2358 = vxpose.xlu1.b32.cont [12/16] (narrow) %v10364_v10, 8 }
 0x4ea   : > { %2330 = vxpose.xlu0.b32.end [16/16] (narrow) %v12309_v13, 8  ;;  %v2513_v13 = vld [vmem:[#allocation2 + $0x1a0] sm:$0xff] }
 0x4ec   : > { %2359 = vxpose.xlu1.b32.cont [13/16] (narrow) %v10124_v41, 8  ;;  %v12313_v41 = vld [vmem:[#allocation48_spill] sm:$0xff] }
 0x4ee   : > { %2413 = vxpose.xlu0.b32.start [1/16] (narrow) %v12310_v15, 8  ;;  %v2499_v15 = vld [vmem:[#allocation2 + $0xf8] sm:$0xff] }
 0x4f0   : > { %2360 = vxpose.xlu1.b32.cont [14/16] (narrow) %v12308_v12, 8  ;;  %v2498_v12 = vld [vmem:[#allocation2 + $0xf0] sm:$0xff] }
 0x4f2   : > { %2414 = vxpose.xlu0.b32.cont [2/16] (narrow) %v12311_v28, 8  ;;  %v2501_v28 = vld [vmem:[#allocation2 + $0x110] sm:$0xff] }
 0x4f4   : > { %2361 = vxpose.xlu1.b32.cont [15/16] (narrow) %v10372_v14, 8 }
 0x4f6   : > { %2415 = vxpose.xlu0.b32.cont [3/16] (narrow) %v12313_v41, 8  ;;  %v2585_v41 = vld [vmem:[#allocation2 + $0x69] sm:$0xff] }
 0x4f8   : > { %2362 = vxpose.xlu1.b32.end [16/16] (narrow) %v10376_v16, 8 }
 0x4fa   : > { %2416 = vxpose.xlu0.b32.cont [4/16] (narrow) %v12315_v61, 8  ;;  %v2586_v61 = vld [vmem:[#allocation2 + $0x79] sm:$0xff] }
 0x4fc   : > { %2445 = vxpose.xlu1.b32.start [1/16] (narrow) %v12312_v18, 8  ;;  %v2584_v18 = vld [vmem:[#allocation2 + $0x61] sm:$0xff] }
 0x4fe   : > { %2417 = vxpose.xlu0.b32.cont [5/16] (narrow) %v12317_v23, 8  ;;  %v2587_v23 = vld [vmem:[#allocation2 + $0x81] sm:$0xff] }
 0x500   : > { %2446 = vxpose.xlu1.b32.cont [2/16] (narrow) %v12314_v31, 8  ;;  %v2600_v31 = vld [vmem:[#allocation2 + $0x121] sm:$0xff] }
 0x502   : > { %2418 = vxpose.xlu0.b32.cont [6/16] (narrow) %v12319_v30, 8  ;;  %v2589_v30 = vld [vmem:[#allocation2 + $0x99] sm:$0xff] }
 0x504   : > { %2447 = vxpose.xlu1.b32.cont [3/16] (narrow) %v12316_v22, 8  ;;  %v2601_v22 = vld [vmem:[#allocation2 + $0x129] sm:$0xff] }
 0x506   : > { %2419 = vxpose.xlu0.b32.cont [7/16] (narrow) %v12321_v34, 8  ;;  %v2590_v34 = vld [vmem:[#allocation2 + $0xa9] sm:$0xff] }
 0x508   : > { %2448 = vxpose.xlu1.b32.cont [4/16] (narrow) %v12318_v24, 8  ;;  %v2588_v24 = vld [vmem:[#allocation2 + $0x91] sm:$0xff] }
 0x50a   : > { %2420 = vxpose.xlu0.b32.cont [8/16] (narrow) %v12323_v36, 8  ;;  %v2591_v36 = vld [vmem:[#allocation2 + $0xb1] sm:$0xff] }
 0x50c   : > { %2449 = vxpose.xlu1.b32.cont [5/16] (narrow) %v12320_v33, 8  ;;  %v2604_v33 = vld [vmem:[#allocation2 + $0x151] sm:$0xff] }
 0x50e   : > { %2421 = vxpose.xlu0.b32.cont [9/16] (narrow) %v12325_v40, 8  ;;  %v2592_v40 = vld [vmem:[#allocation2 + $0xc1] sm:$0xff] }
 0x510   : > { %2450 = vxpose.xlu1.b32.cont [6/16] (narrow) %v12322_v35, 8  ;;  %v2605_v35 = vld [vmem:[#allocation2 + $0x159] sm:$0xff] }
 0x512   : > { %2422 = vxpose.xlu0.b32.cont [10/16] (narrow) %v12326_v42, 8  ;;  %v2607_v42 = vld [vmem:[#allocation2 + $0x171] sm:$0xff] }
 0x514   : > { %2451 = vxpose.xlu1.b32.cont [7/16] (narrow) %v12324_v38, 8  ;;  %v2606_v38 = vld [vmem:[#allocation2 + $0x169] sm:$0xff] }
 0x516   : > { %2423 = vxpose.xlu0.b32.cont [11/16] (narrow) %v12327_v44, 8  ;;  %v2593_v44 = vld [vmem:[#allocation2 + $0xc9] sm:$0xff] }
 0x518   : > { %2452 = vxpose.xlu1.b32.cont [8/16] (narrow) %v10184_v6, 8  ;;  %v12329_v6 = vld [vmem:[#allocation70_spill] sm:$0xff] }
 0x51a   : > { %2424 = vxpose.xlu0.b32.cont [12/16] (narrow) %v10198_v21, 8  ;;  %v10412_v21 = vld [vmem:[#allocation2 + $0x1b4] sm:$0xff] }
 0x51c   : > { %2453 = vxpose.xlu1.b32.cont [9/16] (narrow) %v10190_v43, 8  ;;  %v12330_v43 = vld [vmem:[#allocation72_spill] sm:$0xff] }
 0x51e   : > { %2425 = vxpose.xlu0.b32.cont [13/16] (narrow) %v10202_v56, 8  ;;  %v10415_v56 = vld [vmem:[#allocation2 + $0x1bc] sm:$0xff] }
 0x520   : > { %2454 = vxpose.xlu1.b32.cont [10/16] (narrow) %v12328_v45, 8  ;;  %v2594_v45 = vld [vmem:[#allocation2 + $0xd9] sm:$0xff] }
 0x522   : > { %2426 = vxpose.xlu0.b32.cont [14/16] (narrow) %v10206_v59, 8  ;;  %v2502_v59 = vld [vmem:[#allocation2 + $0x120] sm:$0xff] }
 0x524   : > { %2455 = vxpose.xlu1.b32.cont [11/16] (narrow) %v10400_v46, 8 }
 0x526   : > { %2427 = vxpose.xlu0.b32.cont [15/16] (narrow) %v12329_v6, 8  ;;  %v2595_v6 = vld [vmem:[#allocation2 + $0xe1] sm:$0xff] }
 0x528   : > { %2456 = vxpose.xlu1.b32.cont [12/16] (narrow) %v10404_v47, 8 }
 0x52a   : > { %2428 = vxpose.xlu0.b32.end [16/16] (narrow) %v12330_v43, 8  ;;  %v2610_v43 = vld [vmem:[#allocation2 + $0x199] sm:$0xff] }
 0x52c   : > { %2457 = vxpose.xlu1.b32.cont [13/16] (narrow) %v10210_v20, 8  ;;  %v2488_v20 = vld [vmem:[#allocation2 + $0x78] sm:$0xff] }
 0x52e   : > { %2518 = vxpose.xlu0.b32.start [1/16] (narrow) %v2486_v48, 8  ;;  %v2596_v48 = vld [vmem:[#allocation2 + $0xf1] sm:$0xff] }
 0x530   : > { %2458 = vxpose.xlu1.b32.cont [14/16] (narrow) %v10214_v19, 8  ;;  %v2489_v19 = vld [vmem:[#allocation2 + $0x80] sm:$0xff] }
 0x532   : > { %2519 = vxpose.xlu0.b32.cont [2/16] (narrow) %v2487_v49, 8  ;;  %v2611_v49 = vld [vmem:[#allocation2 + $0x1a1] sm:$0xff] }
 0x534   : > { %2459 = vxpose.xlu1.b32.cont [15/16] (narrow) %v10412_v21, 8 }
 0x536   : > { %2520 = vxpose.xlu0.b32.cont [3/16] (narrow) %v2488_v20, 8  ;;  %v2598_v20 = vld [vmem:[#allocation2 + $0x109] sm:$0xff] }
 0x538   : > { %2460 = vxpose.xlu1.b32.end [16/16] (narrow) %v10415_v56, 8 }
 0x53a   : > { %2521 = vxpose.xlu0.b32.cont [4/16] (narrow) %v2489_v19, 8  ;;  %v2688_v19 = vld [vmem:[#allocation2 + $0x62] sm:$0xff] }
 0x53c   : > { %2550 = vxpose.xlu1.b32.start [1/16] (narrow) %v2502_v59, 8  ;;  %v2597_v59 = vld [vmem:[#allocation2 + $0xf9] sm:$0xff] }
 0x53e   : > { %2522 = vxpose.xlu0.b32.cont [5/16] (narrow) %v2490_v17, 8  ;;  %v2704_v17 = vld [vmem:[#allocation2 + $0x122] sm:$0xff] }
 0x540   : > { %2551 = vxpose.xlu1.b32.cont [2/16] (narrow) %v2503_v27, 8  ;;  %v2599_v27 = vld [vmem:[#allocation2 + $0x111] sm:$0xff] }
 0x542   : > { %2523 = vxpose.xlu0.b32.cont [6/16] (narrow) %v2491_v53, 8  ;;  %v2705_v53 = vld [vmem:[#allocation2 + $0x12a] sm:$0xff] }
 0x544   : > { %2552 = vxpose.xlu1.b32.cont [3/16] (narrow) %v2504_v4, 8  ;;  %v2689_v4 = vld [vmem:[#allocation2 + $0x6a] sm:$0xff] }
 0x546   : > { %2524 = vxpose.xlu0.b32.cont [7/16] (narrow) %v2492_v57, 8  ;;  %v2692_v57 = vld [vmem:[#allocation2 + $0x92] sm:$0xff] }
 0x548   : > { %2553 = vxpose.xlu1.b32.cont [4/16] (narrow) %v2505_v52, 8  ;;  %v2690_v52 = vld [vmem:[#allocation2 + $0x7a] sm:$0xff] }
 0x54a   : > { %2525 = vxpose.xlu0.b32.cont [8/16] (narrow) %v2493_v2, 8  ;;  %v543_v2 = vpop.trf.xlu1 }
 0x54b   : > { %560 = vst [vmem:[#allocation5 + $0x8] sm:$0xf] %v543_v2 }
 0x54c   : > { %2554 = vxpose.xlu1.b32.cont [5/16] (narrow) %v2506_v54, 8  ;;  %v2691_v54 = vld [vmem:[#allocation2 + $0x82] sm:$0xff] }
 0x54e   : > { %2526 = vxpose.xlu0.b32.cont [9/16] (narrow) %v10234_v50, 8  ;;  %v2500_v50 = vld [vmem:[#allocation2 + $0x108] sm:$0xff] }
 0x550   : > { %2555 = vxpose.xlu1.b32.cont [6/16] (narrow) %v2507_v55, 8  ;;  %v2693_v55 = vld [vmem:[#allocation2 + $0x9a] sm:$0xff] }
 0x552   : > { %2527 = vxpose.xlu0.b32.cont [10/16] (narrow) %v2495_v7, 8  ;;  %v2694_v7 = vld [vmem:[#allocation2 + $0xaa] sm:$0xff] }
 0x554   : > { %2556 = vxpose.xlu1.b32.cont [7/16] (narrow) %v2508_v3, 8  ;;  %v511_v3 = vpop.trf.xlu0 }
 0x555   : > { %559 = vst [vmem:[#allocation5] sm:$0xf] %v511_v3 }
 0x556   : > { %2528 = vxpose.xlu0.b32.cont [11/16] (narrow) %v2496_v9, 8  ;;  %v641_v9 = vpop.trf.xlu1 }
 0x558   : > { %2557 = vxpose.xlu1.b32.cont [8/16] (narrow) %v2509_v5, 8  ;;  %v2708_v5 = vld [vmem:[#allocation2 + $0x152] sm:$0xff] }
 0x55a   : > { %2529 = vxpose.xlu0.b32.cont [12/16] (narrow) %v2497_v63, 8  ;;  %v609_v63 = vpop.trf.xlu0 }
 0x55c   : > { %2558 = vxpose.xlu1.b32.cont [9/16] (narrow) %v10240_v60, 8  ;;  %v2516_v60 = vld [vmem:[#allocation2 + $0x1c8] sm:$0xff] }
 0x55e   : > { %2530 = vxpose.xlu0.b32.cont [13/16] (narrow) %v2498_v12, 8  ;;  %v2695_v12 = vld [vmem:[#allocation2 + $0xb2] sm:$0xff] }
 0x560   : > { %2559 = vxpose.xlu1.b32.cont [10/16] (narrow) %v10244_v0, 8  ;;  %v2517_v0 = vld [vmem:[#allocation2 + $0x1d0] sm:$0xff] }
 0x562   : > { %2531 = vxpose.xlu0.b32.cont [14/16] (narrow) %v2499_v15, 8  ;;  %v659_v15 = vrot.slane %v609_v63, 4 }
 0x564   : > { %2560 = vxpose.xlu1.b32.cont [11/16] (narrow) %v2512_v11, 8  ;;  %v2709_v11 = vld [vmem:[#allocation2 + $0x15a] sm:$0xff]  ;;  %663 = vst [vmem:[#allocation5] sm:$0xf0] %v659_v15  ;;  %v2719_v15 = vld [vmem:[#allocation2 + $0x1d2] sm:$0xff] }
 0x566   : > { %2532 = vxpose.xlu0.b32.cont [15/16] (narrow) %v2500_v50, 8  ;;  %v745_v50 = vpop.trf.xlu1 }
 0x567   : > { %762 = vst [vmem:[#allocation5 + $0x18] sm:$0xf] %v745_v50 }
 0x568   : > { %2561 = vxpose.xlu1.b32.cont [12/16] (narrow) %v2513_v13, 8  ;;  %v660_v13 = vrot.slane %v641_v9, 4 }
 0x56a   : > { %2533 = vxpose.xlu0.b32.end [16/16] (narrow) %v2501_v28, 8  ;;  %664 = vst [vmem:[#allocation5 + $0x8] sm:$0xf0] %v660_v13  ;;  %v713_v28 = vpop.trf.xlu0 }
 0x56b   : > { %761 = vst [vmem:[#allocation5 + $0x10] sm:$0xf] %v713_v28 }
 0x56c   : > { %2562 = vxpose.xlu1.b32.cont [13/16] (narrow) %v10252_v25, 8  ;;  %v2602_v25 = vld [vmem:[#allocation2 + $0x139] sm:$0xff] }
 0x56e   : > { %2616 = vxpose.xlu0.b32.start [1/16] (narrow) %v2584_v18, 8  ;;  %v2696_v18 = vld [vmem:[#allocation2 + $0xc2] sm:$0xff] }
 0x570   : > { %2563 = vxpose.xlu1.b32.cont [14/16] (narrow) %v10256_v51, 8  ;;  %v2603_v51 = vld [vmem:[#allocation2 + $0x141] sm:$0xff] }
 0x572   : > { %2617 = vxpose.xlu0.b32.cont [2/16] (narrow) %v2585_v41, 8  ;;  %v811_v41 = vpop.trf.xlu0 }
 0x574   : > { %2564 = vxpose.xlu1.b32.cont [15/16] (narrow) %v2516_v60, 8  ;;  %v2710_v60 = vld [vmem:[#allocation2 + $0x16a] sm:$0xff] }
 0x576   : > { %2618 = vxpose.xlu0.b32.cont [3/16] (narrow) %v2586_v61, 8  ;;  %v2697_v61 = vld [vmem:[#allocation2 + $0xca] sm:$0xff] }
 0x578   : > { %2565 = vxpose.xlu1.b32.end [16/16] (narrow) %v2517_v0, 8  ;;  %v843_v0 = vpop.trf.xlu1 }
 0x57a   : > { %2619 = vxpose.xlu0.b32.cont [4/16] (narrow) %v2587_v23, 8  ;;  %v861_v23 = vrot.slane %v811_v41, 4  ;;  %v2788_v41 = vld [vmem:[#allocation2 + $0x7b] sm:$0xff] }
 0x57c   : > { %2648 = vxpose.xlu1.b32.start [1/16] (narrow) %v2600_v31, 8  ;;  %v2711_v31 = vld [vmem:[#allocation2 + $0x172] sm:$0xff]  ;;  %865 = vst [vmem:[#allocation5 + $0x10] sm:$0xf0] %v861_v23 }
 0x57e   : > { %2620 = vxpose.xlu0.b32.cont [5/16] (narrow) %v2588_v24, 8  ;;  %v915_v24 = vpop.trf.xlu0 }
 0x57f   : > { %963 = vst [vmem:[#allocation5 + $0x20] sm:$0xf] %v915_v24  ;;  %v2789_v24 = vld [vmem:[#allocation2 + $0x83] sm:$0xff] }
 0x580   : > { %2649 = vxpose.xlu1.b32.cont [2/16] (narrow) %v2601_v22, 8  ;;  %v862_v22 = vrot.slane %v843_v0, 4  ;;  %v2802_v0 = vld [vmem:[#allocation2 + $0x123] sm:$0xff] }
 0x582   : > { %2621 = vxpose.xlu0.b32.cont [6/16] (narrow) %v2589_v30, 8  ;;  %866 = vst [vmem:[#allocation5 + $0x18] sm:$0xf0] %v862_v22 }
 0x584   : > { %2650 = vxpose.xlu1.b32.cont [3/16] (narrow) %v2602_v25, 8  ;;  %v947_v25 = vpop.trf.xlu1 }
 0x585   : > { %964 = vst [vmem:[#allocation5 + $0x28] sm:$0xf] %v947_v25  ;;  %v2803_v25 = vld [vmem:[#allocation2 + $0x12b] sm:$0xff] }
 0x586   : > { %2622 = vxpose.xlu0.b32.cont [7/16] (narrow) %v2590_v34, 8  ;;  %v2699_v34 = vld [vmem:[#allocation2 + $0xe2] sm:$0xff] }
 0x588   : > { %2651 = vxpose.xlu1.b32.cont [4/16] (narrow) %v2603_v51, 8  ;;  %v2698_v51 = vld [vmem:[#allocation2 + $0xda] sm:$0xff]  ;;  %v1046_v30 = vpop.trf.xlu1 }
 0x58a   : > { %2623 = vxpose.xlu0.b32.cont [8/16] (narrow) %v2591_v36, 8 }
 0x58c   : > { %2652 = vxpose.xlu1.b32.cont [5/16] (narrow) %v2604_v33, 8  ;;  %v1014_v33 = vpop.trf.xlu0 }
 0x58d   : > { %v1064_v36 = vrot.slane %v1014_v33, 4 }
 0x58e   : > { %2624 = vxpose.xlu0.b32.cont [9/16] (narrow) %v2592_v40, 8  ;;  %v1150_v40 = vpop.trf.xlu1 }
 0x58f   : > { %1068 = vst [vmem:[#allocation5 + $0x20] sm:$0xf0] %v1064_v36  ;;  %1167 = vst [vmem:[#allocation5 + $0x38] sm:$0xf] %v1150_v40 }
 0x590   : > { %2653 = vxpose.xlu1.b32.cont [6/16] (narrow) %v2605_v35, 8  ;;  %v1065_v35 = vrot.slane %v1046_v30, 4 }
 0x592   : > { %2625 = vxpose.xlu0.b32.cont [10/16] (narrow) %v2593_v44, 8  ;;  %1069 = vst [vmem:[#allocation5 + $0x28] sm:$0xf0] %v1065_v35  ;;  %v2992_v44 = vld [vmem:[#allocation5 + $0x18] sm:$0xff] }
 0x594   : > { %2654 = vxpose.xlu1.b32.cont [7/16] (narrow) %v2606_v38, 8  ;;  %v2714_v38 = vld [vmem:[#allocation2 + $0x19a] sm:$0xff] }
 0x596   : > { %2626 = vxpose.xlu0.b32.cont [11/16] (narrow) %v2594_v45, 8  ;;  %v1118_v45 = vpop.trf.xlu0 }
 0x597   : > { %1166 = vst [vmem:[#allocation5 + $0x30] sm:$0xf] %v1118_v45 }
 0x598   : > { %2655 = vxpose.xlu1.b32.cont [8/16] (narrow) %v2607_v42, 8  ;;  %v2990_v42 = vld [vmem:[#allocation5 + $0x8] sm:$0xff] }
 0x599   : > { %v2994_v2 = vld [vmem:[#allocation5 + $0x28] sm:$0xff] }
 0x59a   : > { %2627 = vxpose.xlu0.b32.cont [12/16] (narrow) %v2595_v6, 8  ;;  %v2700_v6 = vld [vmem:[#allocation2 + $0xf2] sm:$0xff] }
 0x59c   : > { %2656 = vxpose.xlu1.b32.cont [9/16] (narrow) %v10280_v29, 8  ;;  %v2614_v29 = vld [vmem:[#allocation2 + $0x1c9] sm:$0xff] }
 0x59e   : > { %2628 = vxpose.xlu0.b32.cont [13/16] (narrow) %v2596_v48, 8  ;;  %v2991_v48 = vld [vmem:[#allocation5 + $0x10] sm:$0xff] }
 0x5a0   : > { %2657 = vxpose.xlu1.b32.cont [10/16] (narrow) %v10284_v62, 8  ;;  %v2615_v62 = vld [vmem:[#allocation2 + $0x1d1] sm:$0xff] }
 0x5a2   : > { %2629 = vxpose.xlu0.b32.cont [14/16] (narrow) %v2597_v59, 8  ;;  %v1248_v59 = vpop.trf.xlu1 }
 0x5a4   : > { %2658 = vxpose.xlu1.b32.cont [11/16] (narrow) %v2610_v43, 8  ;;  %v7529_v43 = vpack.c.bf16 %v2992_v44, %v2990_v42  ;;  %v2804_v42 = vld [vmem:[#allocation2 + $0x13b] sm:$0xff]  ;;  %v2790_v44 = vld [vmem:[#allocation2 + $0x93] sm:$0xff] }
 0x5a6   : > { %2630 = vxpose.xlu0.b32.cont [15/16] (narrow) %v2598_v20, 8  ;;  %7530 = vmatprep.subr.bf16.mxu0 %v7529_v43  ;;  %v1216_v20 = vpop.trf.xlu0  ;;  %v2805_v43 = vld [vmem:[#allocation2 + $0x143] sm:$0xff] }
 0x5a8   : > { %2659 = vxpose.xlu1.b32.cont [12/16] (narrow) %v2611_v49, 8 }
 0x5aa   : > { %2631 = vxpose.xlu0.b32.end [16/16] (narrow) %v2599_v27, 8  ;;  %v2715_v27 = vld [vmem:[#allocation2 + $0x1a2] sm:$0xff] }
 0x5ac   : > { %2660 = vxpose.xlu1.b32.cont [13/16] (narrow) %v10292_v58, 8  ;;  %v2706_v58 = vld [vmem:[#allocation2 + $0x13a] sm:$0xff] }
 0x5ae   : > { %2720 = vxpose.xlu0.b32.start [1/16] (narrow) %v2688_v19, 8  ;;  %v1266_v19 = vrot.slane %v1216_v20, 4 }
 0x5b0   : > { %2661 = vxpose.xlu1.b32.cont [14/16] (narrow) %v10296_v1, 8  ;;  %v2707_v1 = vld [vmem:[#allocation2 + $0x142] sm:$0xff]  ;;  %1270 = vst [vmem:[#allocation5 + $0x30] sm:$0xf0] %v1266_v19 }
 0x5b2   : > { %2721 = vxpose.xlu0.b32.cont [2/16] (narrow) %v2689_v4, 8  ;;  %v1320_v4 = vpop.trf.xlu0 }
 0x5b3   : > { %1368 = vst [vmem:[#allocation5 + $0x40] sm:$0xf] %v1320_v4 }
 0x5b4   : > { %2662 = vxpose.xlu1.b32.cont [15/16] (narrow) %v2614_v29, 8  ;;  %v1267_v29 = vrot.slane %v1248_v59, 4 }
 0x5b6   : > { %2722 = vxpose.xlu0.b32.cont [3/16] (narrow) %v2690_v52, 8  ;;  %1271 = vst [vmem:[#allocation5 + $0x38] sm:$0xf0] %v1267_v29 }
 0x5b7   : > { %v2995_v63 = vld [vmem:[#allocation5 + $0x30] sm:$0xff] }
 0x5b8   : > { %2663 = vxpose.xlu1.b32.end [16/16] (narrow) %v2615_v62, 8  ;;  %v1352_v62 = vpop.trf.xlu1 }
 0x5b9   : > { %1369 = vst [vmem:[#allocation5 + $0x48] sm:$0xf] %v1352_v62 }
 0x5ba   : > { %2723 = vxpose.xlu0.b32.cont [4/16] (narrow) %v2691_v54, 8  ;;  %v2703_v54 = vld [vmem:[#allocation2 + $0x112] sm:$0xff] }
 0x5bc   : > { %2752 = vxpose.xlu1.b32.start [1/16] (narrow) %v2704_v17, 8  ;;  %v2702_v17 = vld [vmem:[#allocation2 + $0x10a] sm:$0xff]  ;;  %v1450_v52 = vpop.trf.xlu1 }
 0x5bd   : > { %v2996_v3 = vld [vmem:[#allocation5 + $0x38] sm:$0xff] }
 0x5be   : > { %2724 = vxpose.xlu0.b32.cont [5/16] (narrow) %v2692_v57, 8  ;;  %v7533_v9 = vpack.c.bf16 %v2996_v3, %v2994_v2 }
 0x5c0   : > { %2753 = vxpose.xlu1.b32.cont [2/16] (narrow) %v2705_v53, 8  ;;  %v1418_v53 = vpop.trf.xlu0 }
 0x5c1   : > { %v1468_v57 = vrot.slane %v1418_v53, 4 }
 0x5c2   : > { %2725 = vxpose.xlu0.b32.cont [6/16] (narrow) %v2693_v55, 8  ;;  %v1554_v55 = vpop.trf.xlu1 }
 0x5c3   : > { %1472 = vst [vmem:[#allocation5 + $0x40] sm:$0xf0] %v1468_v57  ;;  %1571 = vst [vmem:[#allocation5 + $0x58] sm:$0xf] %v1554_v55 }
 0x5c4   : > { %2754 = vxpose.xlu1.b32.cont [3/16] (narrow) %v2706_v58, 8  ;;  %v1469_v58 = vrot.slane %v1450_v52, 4  ;;  %v2793_v52 = vld [vmem:[#allocation2 + $0xb3] sm:$0xff] }
 0x5c6   : > { %2726 = vxpose.xlu0.b32.cont [7/16] (narrow) %v2694_v7, 8  ;;  %1473 = vst [vmem:[#allocation5 + $0x48] sm:$0xf0] %v1469_v58  ;;  %v2786_v7 = vld [vmem:[#allocation2 + $0x63] sm:$0xff] }
 0x5c8   : > { %2755 = vxpose.xlu1.b32.cont [4/16] (narrow) %v2707_v1, 8  ;;  %v2718_v1 = vld [vmem:[#allocation2 + $0x1ca] sm:$0xff] }
 0x5ca   : > { %2727 = vxpose.xlu0.b32.cont [8/16] (narrow) %v2695_v12, 8  ;;  %v1652_v12 = vpop.trf.xlu1  ;;  %v2997_v23 = vld [vmem:[#allocation5 + $0x40] sm:$0xff] }
 0x5cb   : > { %v1671_v50 = vrot.slane %v1652_v12, 4 }
 0x5cc   : > { %2756 = vxpose.xlu1.b32.cont [5/16] (narrow) %v2708_v5, 8  ;;  %v1522_v5 = vpop.trf.xlu0 }
 0x5cd   : > { %1570 = vst [vmem:[#allocation5 + $0x50] sm:$0xf] %v1522_v5  ;;  %1675 = vst [vmem:[#allocation5 + $0x58] sm:$0xf0] %v1671_v50  ;;  %v2998_v22 = vld [vmem:[#allocation5 + $0x48] sm:$0xff]  ;;  %v2796_v50 = vld [vmem:[#allocation2 + $0xdb] sm:$0xff] }
 0x5ce   : > { %2728 = vxpose.xlu0.b32.cont [9/16] (narrow) %v2696_v18, 8  ;;  %v2808_v5 = vld [vmem:[#allocation2 + $0x16b] sm:$0xff] }
 0x5d0   : > { %2757 = vxpose.xlu1.b32.cont [6/16] (narrow) %v2709_v11, 8  ;;  %v1620_v13 = vpop.trf.xlu0 }
 0x5d1   : > { %v1670_v28 = vrot.slane %v1620_v13, 4 }
 0x5d2   : > { %2729 = vxpose.xlu0.b32.cont [10/16] (narrow) %v2697_v61, 8 }
 0x5d3   : > { %1674 = vst [vmem:[#allocation5 + $0x50] sm:$0xf0] %v1670_v28 }
 0x5d4   : > { %2758 = vxpose.xlu1.b32.cont [7/16] (narrow) %v2710_v60, 8  ;;  %v1756_v60 = vpop.trf.xlu1  ;;  %v1724_v18 = vpop.trf.xlu0  ;;  %v3000_v33 = vld [vmem:[#allocation5 + $0x58] sm:$0xff] }
 0x5d5   : > { %1773 = vst [vmem:[#allocation5 + $0x68] sm:$0xf] %v1756_v60  ;;  %1772 = vst [vmem:[#allocation5 + $0x60] sm:$0xf] %v1724_v18  ;;  %v7537_v35 = vpack.c.bf16 %v3000_v33, %v2998_v22  ;;  %v2799_v33 = vld [vmem:[#allocation2 + $0xfb] sm:$0xff] }
 0x5d6   : > { %2730 = vxpose.xlu0.b32.cont [11/16] (narrow) %v2698_v51, 8 }
 0x5d8   : > { %2759 = vxpose.xlu1.b32.cont [8/16] (narrow) %v2711_v31, 8  ;;  %v1854_v31 = vpop.trf.xlu1  ;;  %v1822_v61 = vpop.trf.xlu0 }
 0x5d9   : > { %v1873_v51 = vrot.slane %v1854_v31, 4  ;;  %v1872_v30 = vrot.slane %v1822_v61, 4 }
 0x5da   : > { %2731 = vxpose.xlu0.b32.cont [12/16] (narrow) %v2699_v34, 8  ;;  %v2999_v34 = vld [vmem:[#allocation5 + $0x50] sm:$0xff] }
 0x5db   : > { %1877 = vst [vmem:[#allocation5 + $0x68] sm:$0xf0] %v1873_v51  ;;  %1876 = vst [vmem:[#allocation5 + $0x60] sm:$0xf0] %v1872_v30  ;;  %v7539_v36 = vpack.c.bf16 %v2999_v34, %v2997_v23  ;;  %v2812_v51 = vld [vmem:[#allocation2 + $0x19b] sm:$0xff]  ;;  %v2798_v30 = vld [vmem:[#allocation2 + $0xf3] sm:$0xff] }
 0x5dc   : > { %2760 = vxpose.xlu1.b32.cont [9/16] (narrow) %v10320_v26, 8  ;;  %v2989_v26 = vld [vmem:[#allocation5] sm:$0xff]  ;;  %v1926_v40 = vpop.trf.xlu0  ;;  %v2800_v34 = vld [vmem:[#allocation2 + $0x10b] sm:$0xff] }
 0x5dd   : > { %v7531_v49 = vpack.c.bf16 %v2991_v48, %v2989_v26  ;;  %1974 = vst [vmem:[#allocation5 + $0x70] sm:$0xf] %v1926_v40  ;;  %v2791_v26 = vld [vmem:[#allocation2 + $0x9b] sm:$0xff]  ;;  %v2817_v40 = vld [vmem:[#allocation2 + $0x1d3] sm:$0xff] }
 0x5de   : > { %2732 = vxpose.xlu0.b32.cont [13/16] (narrow) %v2700_v6, 8 }
 0x5df   : > { %7532 = vmatpush1.bf16.msra.mxu0 %v7531_v49 }
 0x5e0   : > { %2761 = vxpose.xlu1.b32.cont [10/16] (narrow) %v10324_v32, 8  ;;  %v2701_v32 = vld [vmem:[#allocation2 + $0xfa] sm:$0xff]  ;;  %7534 = vmatprep.subr.bf16.mxu0 %v7533_v9  ;;  %v2025_v6 = vpop.trf.xlu0 }
 0x5e1   : > { %v2075_v49 = vrot.slane %v2025_v6, 4  ;;  %v2907_v6 = vld [vmem:[#allocation2 + $0x12c] sm:$0xff] }
 0x5e2   : > { %2733 = vxpose.xlu0.b32.cont [14/16] (narrow) %v2701_v32, 8  ;;  %v2792_v32 = vld [vmem:[#allocation2 + $0xab] sm:$0xff]  ;;  %v3001_v4 = vld [vmem:[#allocation5 + $0x60] sm:$0xff] }
 0x5e3   : > { %2079 = vst [vmem:[#allocation5 + $0x70] sm:$0xf0] %v2075_v49  ;;  %v3002_v62 = vld [vmem:[#allocation5 + $0x68] sm:$0xff]  ;;  %v2895_v49 = vld [vmem:[#allocation2 + $0x9c] sm:$0xff] }
 0x5e4   : > { %2762 = vxpose.xlu1.b32.cont [11/16] (narrow) %v2714_v38, 8  ;;  %v1958_v38 = vpop.trf.xlu1  ;;  %v2129_v20 = vpop.trf.xlu0 }
 0x5e5   : > { %1975 = vst [vmem:[#allocation5 + $0x78] sm:$0xf] %v1958_v38  ;;  %2177 = vst [vmem:[#allocation5 + $0x80] sm:$0xf] %v2129_v20  ;;  %v2896_v20 = vld [vmem:[#allocation2 + $0xac] sm:$0xff] }
 0x5e6   : > { %2734 = vxpose.xlu0.b32.cont [15/16] (narrow) %v2702_v17, 8  ;;  %v2807_v17 = vld [vmem:[#allocation2 + $0x15b] sm:$0xff] }
 0x5e8   : > { %2763 = vxpose.xlu1.b32.cont [12/16] (narrow) %v2715_v27, 8  ;;  %v2057_v45 = vpop.trf.xlu1  ;;  %v2806_v27 = vld [vmem:[#allocation2 + $0x153] sm:$0xff]  ;;  %v2227_v19 = vpop.trf.xlu0 }
 0x5e9   : > { %v2076_v48 = vrot.slane %v2057_v45, 4  ;;  %v2892_v45 = vld [vmem:[#allocation2 + $0x7c] sm:$0xff] }
 0x5ea   : > { %2735 = vxpose.xlu0.b32.end [16/16] (narrow) %v2703_v54, 8  ;;  %v2277_v54 = vrot.slane %v2227_v19, 4  ;;  %v3003_v57 = vld [vmem:[#allocation5 + $0x70] sm:$0xff]  ;;  %v2898_v19 = vld [vmem:[#allocation2 + $0xc4] sm:$0xff] }
 0x5eb   : > { %2080 = vst [vmem:[#allocation5 + $0x78] sm:$0xf0] %v2076_v48  ;;  %v7543_v55 = vpack.c.bf16 %v3003_v57, %v3001_v4  ;;  %v2909_v48 = vld [vmem:[#allocation2 + $0x144] sm:$0xff]  ;;  %v2899_v4 = vld [vmem:[#allocation2 + $0xcc] sm:$0xff]  ;;  %v2903_v57 = vld [vmem:[#allocation2 + $0xfc] sm:$0xff] }
 0x5ec   : > { %2764 = vxpose.xlu1.b32.cont [13/16] (narrow) %v10332_v37, 8  ;;  %v2993_v37 = vld [vmem:[#allocation5 + $0x20] sm:$0xff]  ;;  %v2161_v59 = vpop.trf.xlu1  ;;  %2281 = vst [vmem:[#allocation5 + $0x80] sm:$0xf0] %v2277_v54  ;;  %v2331_v3 = vpop.trf.xlu0  ;;  %v2902_v54 = vld [vmem:[#allocation2 + $0xf4] sm:$0xff] }
 0x5ed   : > { %v7535_v11 = vpack.c.bf16 %v2995_v63, %v2993_v37  ;;  %2178 = vst [vmem:[#allocation5 + $0x88] sm:$0xf] %v2161_v59  ;;  %2379 = vst [vmem:[#allocation5 + $0x90] sm:$0xf] %v2331_v3  ;;  %v2809_v63 = vld [vmem:[#allocation2 + $0x173] sm:$0xff] }
 0x5ee   : > { %2818 = vxpose.xlu0.b32.start [1/16] (narrow) %v2786_v7, 8  ;;  %v2794_v7 = vld [vmem:[#allocation2 + $0xc3] sm:$0xff]  ;;  %v2910_v59 = vld [vmem:[#allocation2 + $0x154] sm:$0xff] }
 0x5ef   : > { %7536 = vmatpush1.bf16.msra.mxu0 %v7535_v11  ;;  %v2795_v11 = vld [vmem:[#allocation2 + $0xcb] sm:$0xff] }
 0x5f0   : > { %2765 = vxpose.xlu1.b32.cont [14/16] (narrow) %v10336_v39, 8  ;;  %v2787_v39 = vld [vmem:[#allocation2 + $0x6b] sm:$0xff]  ;;  %7538 = vmatprep.subr.bf16.mxu0 %v7537_v35  ;;  %v2259_v29 = vpop.trf.xlu1  ;;  %v2429_v37 = vpop.trf.xlu0  ;;  %v2801_v35 = vld [vmem:[#allocation2 + $0x113] sm:$0xff] }
 0x5f1   : > { %v2278_v53 = vrot.slane %v2259_v29, 4  ;;  %v2479_v13 = vrot.slane %v2429_v37, 4  ;;  %v2912_v29 = vld [vmem:[#allocation2 + $0x16c] sm:$0xff] }
 0x5f2   : > { %2819 = vxpose.xlu0.b32.cont [2/16] (narrow) %v2787_v39, 8  ;;  %v3004_v58 = vld [vmem:[#allocation5 + $0x78] sm:$0xff] }
 0x5f3   : > { %7540 = vmatpush1.bf16.msra.mxu0 %v7539_v36  ;;  %2282 = vst [vmem:[#allocation5 + $0x88] sm:$0xf0] %v2278_v53  ;;  %2483 = vst [vmem:[#allocation5 + $0x90] sm:$0xf0] %v2479_v13  ;;  %v2890_v36 = vld [vmem:[#allocation2 + $0x64] sm:$0xff]  ;;  %v2916_v53 = vld [vmem:[#allocation2 + $0x19c] sm:$0xff] }
 0x5f4   : > { %2766 = vxpose.xlu1.b32.cont [15/16] (narrow) %v2718_v1, 8  ;;  %v7541_v1 = vpack.c.bf16 %v3004_v58, %v3002_v62  ;;  %v2363_v2 = vpop.trf.xlu1  ;;  %v2534_v39 = vpop.trf.xlu0  ;;  %v2913_v62 = vld [vmem:[#allocation2 + $0x174] sm:$0xff]  ;;  %v2917_v58 = vld [vmem:[#allocation2 + $0x1a4] sm:$0xff]  ;;  %v8869_v13 = vmov 0  }
 0x5f5   : > { %2380 = vst [vmem:[#allocation5 + $0x98] sm:$0xf] %v2363_v2  ;;  %2582 = vst [vmem:[#allocation5 + $0xa0] sm:$0xf] %v2534_v39  ;;  %v2921_v2 = vld [vmem:[#allocation2 + $0x1d4] sm:$0xff] }
 0x5f6   : > { %2820 = vxpose.xlu0.b32.cont [3/16] (narrow) %v2788_v41, 8  ;;  %7542 = vmatprep.subr.bf16.mxu0 %v7541_v1  ;;  %v2797_v41 = vld [vmem:[#allocation2 + $0xe3] sm:$0xff]  ;;  %v2904_v1 = vld [vmem:[#allocation2 + $0x10c] sm:$0xff] }
 0x5f7   : > { %7544 = vmatpush1.bf16.msra.mxu0 %v7543_v55  ;;  %v2905_v55 = vld [vmem:[#allocation2 + $0x114] sm:$0xff] }
 0x5f8   : > { %2767 = vxpose.xlu1.b32.end [16/16] (narrow) %v2719_v15, 8  ;;  %v2461_v9 = vpop.trf.xlu1  ;;  %v2632_v60 = vpop.trf.xlu0 }
 0x5f9   : > { %v2480_v12 = vrot.slane %v2461_v9, 4  ;;  %v2682_v61 = vrot.slane %v2632_v60, 4 }
 0x5fa   : > { %2821 = vxpose.xlu0.b32.cont [4/16] (narrow) %v2789_v24, 8  ;;  %v3006_v18 = vld [vmem:[#allocation5 + $0x88] sm:$0xff]  ;;  %v3007_v23 = vld [vmem:[#allocation5 + $0x90] sm:$0xff] }
 0x5fb   : > { %2484 = vst [vmem:[#allocation5 + $0x98] sm:$0xf0] %v2480_v12  ;;  %2686 = vst [vmem:[#allocation5 + $0xa0] sm:$0xf0] %v2682_v61 }
 0x5fc   : > { %2850 = vxpose.xlu1.b32.start [1/16] (narrow) %v2802_v0, 8  ;;  %v2566_v15 = vpop.trf.xlu1  ;;  %v3005_v0 = vld [vmem:[#allocation5 + $0x80] sm:$0xff] }
 0x5fd   : > { %2583 = vst [vmem:[#allocation5 + $0xa8] sm:$0xf] %v2566_v15  ;;  %v7547_v24 = vpack.c.bf16 %v3007_v23, %v3005_v0  ;;  %v4337_v15 = vld [vmem:[%s11827_s4] sm:$0xff] }
 0x5fe   : > { %2822 = vxpose.xlu0.b32.cont [5/16] (narrow) %v2790_v44, 8  ;;  %v2906_v44 = vld [vmem:[#allocation2 + $0x124] sm:$0xff] }
 0x600   : > { %2851 = vxpose.xlu1.b32.cont [2/16] (narrow) %v2803_v25, 8  ;;  %v2664_v28 = vpop.trf.xlu1 }
 0x601   : > { %v2683_v31 = vrot.slane %v2664_v28, 4 }
 0x602   : > { %2823 = vxpose.xlu0.b32.cont [6/16] (narrow) %v2791_v26, 8  ;;  %v3008_v22 = vld [vmem:[#allocation5 + $0x98] sm:$0xff]  ;;  %v3009_v9 = vld [vmem:[#allocation5 + $0xa0] sm:$0xff] }
 0x603   : > { %2687 = vst [vmem:[#allocation5 + $0xa8] sm:$0xf0] %v2683_v31  ;;  %v7545_v25 = vpack.c.bf16 %v3008_v22, %v3006_v18  ;;  %v2894_v26 = vld [vmem:[#allocation2 + $0x94] sm:$0xff]  ;;  %v2988_v18 = vld [vmem:[%s11824_s1] sm:$0xff]  ;;  %v12331_v22 = vmov 0.0  }
 0x604   : > { %2852 = vxpose.xlu1.b32.cont [3/16] (narrow) %v2804_v42, 8  ;;  %v2891_v42 = vld [vmem:[#allocation2 + $0x6c] sm:$0xff]  ;;  %3247 = vst.msk [vmem:[#allocation3] sm:$0xff] %vm3183_vm4, %v12331_v22  ;;  %3250 = vst.msk [vmem:[#allocation3 + $0x10] sm:$0xff] %vm3183_vm4, %v12331_v22 }
 0x605   : > { %7546 = vmatprep.subr.bf16.mxu0 %v7545_v25  ;;  %3252 = vst.msk [vmem:[#allocation3 + $0x20] sm:$0xff] %vm3183_vm4, %v12331_v22  ;;  %3254 = vst.msk [vmem:[#allocation3 + $0x30] sm:$0xff] %vm3183_vm4, %v12331_v22 }
 0x606   : > { %2824 = vxpose.xlu0.b32.cont [7/16] (narrow) %v2792_v32, 8  ;;  %7548 = vmatpush1.bf16.msra.mxu0 %v7547_v24  ;;  %v2897_v32 = vld [vmem:[#allocation2 + $0xb4] sm:$0xff]  ;;  %3256 = vst.msk [vmem:[#allocation3 + $0x40] sm:$0xff] %vm3183_vm4, %v12331_v22  ;;  %3258 = vst.msk [vmem:[#allocation3 + $0x50] sm:$0xff] %vm3183_vm4, %v12331_v22 }
 0x607   : > { %3260 = vst.msk [vmem:[#allocation3 + $0x60] sm:$0xff] %vm3183_vm4, %v12331_v22  ;;  %3262 = vst.msk [vmem:[#allocation3 + $0x70] sm:$0xff] %vm3183_vm4, %v12331_v22 }
 0x608   : > { %2853 = vxpose.xlu1.b32.cont [4/16] (narrow) %v2805_v43, 8  ;;  %v2893_v43 = vld [vmem:[#allocation2 + $0x84] sm:$0xff]  ;;  %3264 = vst.msk [vmem:[#allocation3 + $0x80] sm:$0xff] %vm3183_vm4, %v12331_v22  ;;  %3266 = vst.msk [vmem:[#allocation3 + $0x90] sm:$0xff] %vm3183_vm4, %v12331_v22 }
 0x609   : > { %3268 = vst.msk [vmem:[#allocation3 + $0xa0] sm:$0xff] %vm3183_vm4, %v12331_v22  ;;  %3270 = vst.msk [vmem:[#allocation3 + $0xb0] sm:$0xff] %vm3183_vm4, %v12331_v22 }
 0x60a   : > { %2825 = vxpose.xlu0.b32.cont [8/16] (narrow) %v2793_v52, 8  ;;  %v2901_v52 = vld [vmem:[#allocation2 + $0xe4] sm:$0xff]  ;;  %3249 = vst.msk [vmem:[#allocation3 + $0x8] sm:$0xf] %vm3248_vm5, %v12331_v22  ;;  %3251 = vst.msk [vmem:[#allocation3 + $0x18] sm:$0xf] %vm3248_vm5, %v12331_v22 }
 0x60b   : > { %3253 = vst.msk [vmem:[#allocation3 + $0x28] sm:$0xf] %vm3248_vm5, %v12331_v22  ;;  %3255 = vst.msk [vmem:[#allocation3 + $0x38] sm:$0xf] %vm3248_vm5, %v12331_v22  ;;  %v3281_v23 = vld [vmem:[#allocation3] sm:$0xff]  ;;  %v10487_v25 = vld [vmem:[#allocation3 + $0x10] sm:$0xff] }
 0x60c   : > { %2854 = vxpose.xlu1.b32.cont [5/16] (narrow) %v2806_v27, 8  ;;  %v2911_v27 = vld [vmem:[#allocation2 + $0x15c] sm:$0xff]  ;;  %3257 = vst.msk [vmem:[#allocation3 + $0x48] sm:$0xf] %vm3248_vm5, %v12331_v22  ;;  %3259 = vst.msk [vmem:[#allocation3 + $0x58] sm:$0xf] %vm3248_vm5, %v12331_v22 }
 0x60d   : > { %3261 = vst.msk [vmem:[#allocation3 + $0x68] sm:$0xf] %vm3248_vm5, %v12331_v22  ;;  %3263 = vst.msk [vmem:[#allocation3 + $0x78] sm:$0xf] %vm3248_vm5, %v12331_v22 }
 0x60e   : > { %2826 = vxpose.xlu0.b32.cont [9/16] (narrow) %v2794_v7, 8  ;;  %3265 = vst.msk [vmem:[#allocation3 + $0x88] sm:$0xf] %vm3248_vm5, %v12331_v22  ;;  %3267 = vst.msk [vmem:[#allocation3 + $0x98] sm:$0xf] %vm3248_vm5, %v12331_v22 }
 0x60f   : > { %3269 = vst.msk [vmem:[#allocation3 + $0xa8] sm:$0xf] %vm3248_vm5, %v12331_v22  ;;  %3271 = vst.msk [vmem:[#allocation3 + $0xb8] sm:$0xf] %vm3248_vm5, %v12331_v22 }
 0x610   : > { %2855 = vxpose.xlu1.b32.cont [6/16] (narrow) %v2807_v17, 8  ;;  %v2900_v17 = vld [vmem:[#allocation2 + $0xdc] sm:$0xff]  ;;  %4583 = vst.msk [vmem:[#allocation4 + $0x30] sm:$0xff] %vm4575_vm8, %v12331_v22  ;;  %4584 = vst.msk [vmem:[#allocation4 + $0x38] sm:$0xff] %vm4575_vm8, %v12331_v22 }
 0x611   : > { %4576 = vst.msk [vmem:[#allocation4] sm:$0xff] %vm4575_vm8, %v12331_v22  ;;  %4577 = vst.msk [vmem:[#allocation4 + $0x8] sm:$0xff] %vm4575_vm8, %v12331_v22 }
 0x612   : > { %2827 = vxpose.xlu0.b32.cont [10/16] (narrow) %v2795_v11, 8  ;;  %4580 = vst.msk [vmem:[#allocation4 + $0x18] sm:$0xff] %vm4575_vm8, %v12331_v22  ;;  %4581 = vst.msk [vmem:[#allocation4 + $0x20] sm:$0xff] %vm4575_vm8, %v12331_v22 }
 0x613   : > { %4586 = vst.msk [vmem:[#allocation4 + $0x48] sm:$0xff] %vm4575_vm8, %v12331_v22  ;;  %4587 = vst.msk [vmem:[#allocation4 + $0x50] sm:$0xff] %vm4575_vm8, %v12331_v22 }
 0x614   : > { %2856 = vxpose.xlu1.b32.cont [7/16] (narrow) %v2808_v5, 8  ;;  %4589 = vst.msk [vmem:[#allocation4 + $0x60] sm:$0xff] %vm4575_vm8, %v12331_v22  ;;  %4590 = vst.msk [vmem:[#allocation4 + $0x68] sm:$0xff] %vm4575_vm8, %v12331_v22 }
 0x615   : > { %4592 = vst.msk [vmem:[#allocation4 + $0x78] sm:$0xff] %vm4575_vm8, %v12331_v22  ;;  %4593 = vst.msk [vmem:[#allocation4 + $0x80] sm:$0xff] %vm4575_vm8, %v12331_v22 }
 0x616   : > { %2828 = vxpose.xlu0.b32.cont [11/16] (narrow) %v2796_v50, 8  ;;  %4595 = vst.msk [vmem:[#allocation4 + $0x90] sm:$0xff] %vm4575_vm8, %v12331_v22  ;;  %4596 = vst.msk [vmem:[#allocation4 + $0x98] sm:$0xff] %vm4575_vm8, %v12331_v22 }
 0x617   : > { %4598 = vst.msk [vmem:[#allocation4 + $0xa8] sm:$0xff] %vm4575_vm8, %v12331_v22  ;;  %4599 = vst.msk [vmem:[#allocation4 + $0xb0] sm:$0xff] %vm4575_vm8, %v12331_v22 }
 0x618   : > { %2857 = vxpose.xlu1.b32.cont [8/16] (narrow) %v2809_v63, 8  ;;  %v3010_v63 = vld [vmem:[#allocation5 + $0xa8] sm:$0xff]  ;;  %4601 = vst.msk [vmem:[#allocation4 + $0xc0] sm:$0xff] %vm4575_vm8, %v12331_v22  ;;  %4602 = vst.msk [vmem:[#allocation4 + $0xc8] sm:$0xff] %vm4575_vm8, %v12331_v22 }
 0x619   : > { %4604 = vst.msk [vmem:[#allocation4 + $0xd8] sm:$0xff] %vm4575_vm8, %v12331_v22  ;;  %4605 = vst.msk [vmem:[#allocation4 + $0xe0] sm:$0xff] %vm4575_vm8, %v12331_v22 }
 0x61a   : > { %2829 = vxpose.xlu0.b32.cont [12/16] (narrow) %v2797_v41, 8  ;;  %4607 = vst.msk [vmem:[#allocation4 + $0xf0] sm:$0xff] %vm4575_vm8, %v12331_v22  ;;  %4608 = vst.msk [vmem:[#allocation4 + $0xf8] sm:$0xff] %vm4575_vm8, %v12331_v22 }
 0x61b   : > { %4610 = vst.msk [vmem:[#allocation4 + $0x108] sm:$0xff] %vm4575_vm8, %v12331_v22  ;;  %4611 = vst.msk [vmem:[#allocation4 + $0x110] sm:$0xff] %vm4575_vm8, %v12331_v22 }
 0x61c   : > { %2858 = vxpose.xlu1.b32.cont [9/16] (narrow) %v10360_v8, 8  ;;  %v2813_v8 = vld [vmem:[#allocation2 + $0x1a3] sm:$0xff]  ;;  %4613 = vst.msk [vmem:[#allocation4 + $0x120] sm:$0xff] %vm4575_vm8, %v12331_v22  ;;  %4614 = vst.msk [vmem:[#allocation4 + $0x128] sm:$0xff] %vm4575_vm8, %v12331_v22 }
 0x61d   : > { %4616 = vst.msk [vmem:[#allocation4 + $0x138] sm:$0xff] %vm4575_vm8, %v12331_v22  ;;  %4617 = vst.msk [vmem:[#allocation4 + $0x140] sm:$0xff] %vm4575_vm8, %v12331_v22 }
 0x61e   : > { %2830 = vxpose.xlu0.b32.cont [13/16] (narrow) %v2798_v30, 8  ;;  %v10493_v30 = vld [vmem:[#allocation3 + $0x11] sm:$0xff]  ;;  %4619 = vst.msk [vmem:[#allocation4 + $0x150] sm:$0xff] %vm4575_vm8, %v12331_v22  ;;  %4620 = vst.msk [vmem:[#allocation4 + $0x158] sm:$0xff] %vm4575_vm8, %v12331_v22 }
 0x61f   : > { %4622 = vst.msk [vmem:[#allocation4 + $0x168] sm:$0xff] %vm4575_vm8, %v12331_v22  ;;  %4623 = vst.msk [vmem:[#allocation4 + $0x170] sm:$0xff] %vm4575_vm8, %v12331_v22 }
 0x620   : > { %2859 = vxpose.xlu1.b32.cont [10/16] (narrow) %v10364_v10, 8  ;;  %v2816_v10 = vld [vmem:[#allocation2 + $0x1cb] sm:$0xff]  ;;  %4625 = vst.msk [vmem:[#allocation4 + $0x180] sm:$0xff] %vm4575_vm8, %v12331_v22  ;;  %4626 = vst.msk [vmem:[#allocation4 + $0x188] sm:$0xff] %vm4575_vm8, %v12331_v22 }
 0x621   : > { %4628 = vst.msk [vmem:[#allocation4 + $0x198] sm:$0xff] %vm4575_vm8, %v12331_v22  ;;  %4629 = vst.msk [vmem:[#allocation4 + $0x1a0] sm:$0xff] %vm4575_vm8, %v12331_v22 }
 0x622   : > { %2831 = vxpose.xlu0.b32.cont [14/16] (narrow) %v2799_v33, 8  ;;  %4631 = vst.msk [vmem:[#allocation4 + $0x1b0] sm:$0xff] %vm4575_vm8, %v12331_v22  ;;  %4632 = vst.msk [vmem:[#allocation4 + $0x1b8] sm:$0xff] %vm4575_vm8, %v12331_v22 }
 0x623   : > { %4634 = vst.msk [vmem:[#allocation4 + $0x1c8] sm:$0xff] %vm4575_vm8, %v12331_v22  ;;  %4635 = vst.msk [vmem:[#allocation4 + $0x1d0] sm:$0xff] %vm4575_vm8, %v12331_v22 }
 0x624   : > { %2860 = vxpose.xlu1.b32.cont [11/16] (narrow) %v2812_v51, 8  ;;  %v3323_v51 = vld [vmem:[#allocation3 + $0x1] sm:$0xff]  ;;  %4585 = vst.msk [vmem:[#allocation4 + $0x40] sm:$0xf] %vm4578_vm9, %v12331_v22  ;;  %4579 = vst.msk [vmem:[#allocation4 + $0x10] sm:$0xf] %vm4578_vm9, %v12331_v22 }
 0x625   : > { %4582 = vst.msk [vmem:[#allocation4 + $0x28] sm:$0xf] %vm4578_vm9, %v12331_v22  ;;  %4588 = vst.msk [vmem:[#allocation4 + $0x58] sm:$0xf] %vm4578_vm9, %v12331_v22 }
 0x626   : > { %2832 = vxpose.xlu0.b32.cont [15/16] (narrow) %v2800_v34, 8  ;;  %4591 = vst.msk [vmem:[#allocation4 + $0x70] sm:$0xf] %vm4578_vm9, %v12331_v22  ;;  %4594 = vst.msk [vmem:[#allocation4 + $0x88] sm:$0xf] %vm4578_vm9, %v12331_v22 }
 0x627   : > { %4597 = vst.msk [vmem:[#allocation4 + $0xa0] sm:$0xf] %vm4578_vm9, %v12331_v22  ;;  %4600 = vst.msk [vmem:[#allocation4 + $0xb8] sm:$0xf] %vm4578_vm9, %v12331_v22 }
 0x628   : > { %2861 = vxpose.xlu1.b32.cont [12/16] (narrow) %v2813_v8, 8  ;;  %4603 = vst.msk [vmem:[#allocation4 + $0xd0] sm:$0xf] %vm4578_vm9, %v12331_v22  ;;  %4606 = vst.msk [vmem:[#allocation4 + $0xe8] sm:$0xf] %vm4578_vm9, %v12331_v22 }
 0x629   : > { %4609 = vst.msk [vmem:[#allocation4 + $0x100] sm:$0xf] %vm4578_vm9, %v12331_v22  ;;  %4612 = vst.msk [vmem:[#allocation4 + $0x118] sm:$0xf] %vm4578_vm9, %v12331_v22 }
 0x62a   : > { %2833 = vxpose.xlu0.b32.end [16/16] (narrow) %v2801_v35, 8  ;;  %4615 = vst.msk [vmem:[#allocation4 + $0x130] sm:$0xf] %vm4578_vm9, %v12331_v22  ;;  %4618 = vst.msk [vmem:[#allocation4 + $0x148] sm:$0xf] %vm4578_vm9, %v12331_v22 }
 0x62b   : > { %4621 = vst.msk [vmem:[#allocation4 + $0x160] sm:$0xf] %vm4578_vm9, %v12331_v22  ;;  %4624 = vst.msk [vmem:[#allocation4 + $0x178] sm:$0xf] %vm4578_vm9, %v12331_v22 }
 0x62c   : > { %2862 = vxpose.xlu1.b32.cont [13/16] (narrow) %v10372_v14, 8  ;;  %4627 = vst.msk [vmem:[#allocation4 + $0x190] sm:$0xf] %vm4578_vm9, %v12331_v22  ;;  %4630 = vst.msk [vmem:[#allocation4 + $0x1a8] sm:$0xf] %vm4578_vm9, %v12331_v22 }
 0x62d   : > { %4633 = vst.msk [vmem:[#allocation4 + $0x1c0] sm:$0xf] %vm4578_vm9, %v12331_v22  ;;  %4636 = vst.msk [vmem:[#allocation4 + $0x1d8] sm:$0xf] %vm4578_vm9, %v12331_v22 }
 0x62e   : > { %2922 = vxpose.xlu0.b32.start [1/16] (narrow) %v2890_v36, 8  ;;  %v2736_v38 = vpop.trf.xlu0 }
 0x62f   : > { %2784 = vst [vmem:[#allocation5 + $0xb0] sm:$0xf] %v2736_v38 }
 0x630   : > { %2863 = vxpose.xlu1.b32.cont [14/16] (narrow) %v10376_v16, 8  ;;  %v2908_v16 = vld [vmem:[#allocation2 + $0x13c] sm:$0xff] }
 0x632   : > { %2923 = vxpose.xlu0.b32.cont [2/16] (narrow) %v2891_v42, 8 }
 0x634   : > { %2864 = vxpose.xlu1.b32.cont [15/16] (narrow) %v2816_v10, 8 }
 0x636   : > { %2924 = vxpose.xlu0.b32.cont [3/16] (narrow) %v2892_v45, 8 }
 0x638   : > { %2865 = vxpose.xlu1.b32.end [16/16] (narrow) %v2817_v40, 8 }
 0x63a   : > { %2925 = vxpose.xlu0.b32.cont [4/16] (narrow) %v2893_v43, 8 }
 0x63c   : > { %2954 = vxpose.xlu1.b32.start [1/16] (narrow) %v2906_v44, 8  ;;  %v2768_v14 = vpop.trf.xlu1 }
 0x63d   : > { %2785 = vst [vmem:[#allocation5 + $0xb8] sm:$0xf] %v2768_v14 }
 0x63e   : > { %2926 = vxpose.xlu0.b32.cont [5/16] (narrow) %v2894_v26, 8 }
 0x640   : > { %2955 = vxpose.xlu1.b32.cont [2/16] (narrow) %v2907_v6, 8 }
 0x642   : > { %2927 = vxpose.xlu0.b32.cont [6/16] (narrow) %v2895_v49, 8 }
 0x644   : > { %2956 = vxpose.xlu1.b32.cont [3/16] (narrow) %v2908_v16, 8 }
 0x646   : > { %2928 = vxpose.xlu0.b32.cont [7/16] (narrow) %v2896_v20, 8 }
 0x648   : > { %2957 = vxpose.xlu1.b32.cont [4/16] (narrow) %v2909_v48, 8 }
 0x64a   : > { %2929 = vxpose.xlu0.b32.cont [8/16] (narrow) %v2897_v32, 8 }
 0x64c   : > { %2958 = vxpose.xlu1.b32.cont [5/16] (narrow) %v2910_v59, 8 }
 0x64e   : > { %2930 = vxpose.xlu0.b32.cont [9/16] (narrow) %v2898_v19, 8 }
 0x650   : > { %2959 = vxpose.xlu1.b32.cont [6/16] (narrow) %v2911_v27, 8 }
 0x652   : > { %2931 = vxpose.xlu0.b32.cont [10/16] (narrow) %v2899_v4, 8 }
 0x654   : > { %2960 = vxpose.xlu1.b32.cont [7/16] (narrow) %v2912_v29, 8 }
 0x656   : > { %2932 = vxpose.xlu0.b32.cont [11/16] (narrow) %v2900_v17, 8 }
 0x658   : > { %2961 = vxpose.xlu1.b32.cont [8/16] (narrow) %v2913_v62, 8 }
 0x65a   : > { %2933 = vxpose.xlu0.b32.cont [12/16] (narrow) %v2901_v52, 8 }
 0x65c   : > { %2962 = vxpose.xlu1.b32.cont [9/16] (narrow) %v10400_v46, 8  ;;  %v2920_v46 = vld [vmem:[#allocation2 + $0x1cc] sm:$0xff] }
 0x65e   : > { %2934 = vxpose.xlu0.b32.cont [13/16] (narrow) %v2902_v54, 8 }
 0x660   : > { %2963 = vxpose.xlu1.b32.cont [10/16] (narrow) %v10404_v47, 8 }
 0x662   : > { %2935 = vxpose.xlu0.b32.cont [14/16] (narrow) %v2903_v57, 8 }
 0x664   : > { %2964 = vxpose.xlu1.b32.cont [11/16] (narrow) %v2916_v53, 8 }
 0x666   : > { %2936 = vxpose.xlu0.b32.cont [15/16] (narrow) %v2904_v1, 8 }
 0x668   : > { %2965 = vxpose.xlu1.b32.cont [12/16] (narrow) %v2917_v58, 8 }
 0x66a   : > { %2937 = vxpose.xlu0.b32.end [16/16] (narrow) %v2905_v55, 8 }
 0x66c   : > { %2966 = vxpose.xlu1.b32.cont [13/16] (narrow) %v10412_v21, 8 }
 0x66e   : > { %v2834_v47 = vpop.trf.xlu0 }
 0x66f   : > { %v2884_v3 = vrot.slane %v2834_v47, 4 }
 0x670   : > { %2967 = vxpose.xlu1.b32.cont [14/16] (narrow) %v10415_v56, 8  ;;  %v3015_v56 = vld [vmem:[%s11825_s2] sm:$0xff] }
 0x671   : > { %2888 = vst [vmem:[#allocation5 + $0xb0] sm:$0xf0] %v2884_v3 }
 0x674   : > { %2968 = vxpose.xlu1.b32.cont [15/16] (narrow) %v2920_v46, 8 }
 0x678   : > { %2969 = vxpose.xlu1.b32.end [16/16] (narrow) %v2921_v2, 8  ;;  %v3011_v37 = vld [vmem:[#allocation5 + $0xb0] sm:$0xff] }
 0x679   : > { %v7551_v21 = vpack.c.bf16 %v3011_v37, %v3009_v9 }
 0x67c   : > { %v2866_v5 = vpop.trf.xlu1 }
 0x67d   : > { %v2885_v7 = vrot.slane %v2866_v5, 4 }
 0x67f   : > { %2889 = vst [vmem:[#allocation5 + $0xb8] sm:$0xf0] %v2885_v7 }
 0x686   : > { %v3012_v11 = vld [vmem:[#allocation5 + $0xb8] sm:$0xff] }
 0x687   : > { %v7549_v12 = vpack.c.bf16 %v3012_v11, %v3010_v63 }
 0x689   : > { %7550 = vmatprep.subr.bf16.mxu0 %v7549_v12 }
 0x68a   : > { %7552 = vmatpush1.bf16.msra.mxu0 %v7551_v21 }
 0x693   : > { %7751 = vset.pattern.permute.xlu0 %v8869_v13 }
 0x694   : > { %3018 = vperm.xlu0 %7751, %v3015_v56  }
 0x698   : > { %4340 = vperm.xlu0 %7751, %v4337_v15  }
 0x6ae   : > { %v2938_v39 = vpop.trf.xlu0 }
 0x6af   : > { %2986 = vst [vmem:[#allocation5 + $0xc0] sm:$0xf] %v2938_v39 }
 0x6b6   : > { %v3013_v28 = vld [vmem:[#allocation5 + $0xc0] sm:$0xf]  ;;  %3289 = vxpose.xlu0.b32.start [1/8] (short) (narrow) %v3281_v23, 8 }
 0x6ba   : > { %3290 = vxpose.xlu0.b32.cont [2/8] (short) (narrow) %v10487_v25, 8 }
 0x6bc   : > { %v2970_v50 = vpop.trf.xlu1 }
 0x6bd   : > { %2987 = vst [vmem:[#allocation5 + $0xc8] sm:$0xf] %v2970_v50 }
 0x6c4   : > { %v3014_v60 = vld [vmem:[#allocation5 + $0xc8] sm:$0xf] }
 0x6c5   : > { %7516 = vmatprep.subr.msk.mxu0 %vm3025_vm2, %v3014_v60 }
 0x6c6   : > { %7517 = vmatpush1.msk.msra.mxu0 %vm3025_vm2, %v3013_v28 }
 0x6c7   : > { %7518 = vmatmul.mubr.msk.f32.vlgmr.msra.gmra.mrb[0].mxu0 %vm3021_vm3, %v2988_v18 }
 0x713   : > { %v3019_v0 = vpop.permute.xlu0 %3018 }
 0x79a   : > { %v3098_v41 = vpop.f32.mrb[0].mxu0 }
 0x79b   : > { %v10448_v31 = vadd.f32 %v3098_v41, %v3019_v0  ;;  %v3100_v61 = vpop.f32.mrb[1].mxu0 }
 0x79c   : > { %v10490_v24 = vadd.f32 %v3100_v61, %v3019_v0 }
 0x79d   : > { %3103 = vxpose.xlu1.b32.start.end [1/1] (short) %v10448_v31, 128 }
 0x7da   : > { %3135 = vxpose.xlu1.b32.start.end [1/1] (short) %v10490_v24, 128 }
 0x817   : > { %3331 = vxpose.xlu1.b32.start [1/8] (short) (narrow) %v3323_v51, 8 }
 0x81b   : > { %3332 = vxpose.xlu1.b32.cont [2/8] (short) (narrow) %v10493_v30, 8 }
 0x81d   : > { %v3119_v8 = vpop.trf.xlu1 }
 0x821   : > { %v3120_v33 = vpop.trf.xlu1 }
 0x825   : > { %v3121_v34 = vpop.trf.xlu1 }
 0x826   : > { %v3167_v35 = vmax.f32 %v3119_v8, %v3121_v34 }
 0x828   : > { %3184 = vst.msk [vmem:[#allocation8] sm:$0xff] %vm3183_vm4, %v3167_v35 }
 0x829   : > { %v3122_v10 = vpop.trf.xlu1 }
 0x82a   : > { %v3168_v36 = vmax.f32 %v3120_v33, %v3122_v10 }
 0x82c   : > { %3185 = vst.msk [vmem:[#allocation8 + $0x8] sm:$0xff] %vm3183_vm4, %v3168_v36 }
 0x82d   : > { %v3123_v38 = vpop.trf.xlu1 }
 0x831   : > { %v3124_v40 = vpop.trf.xlu1 }
 0x833   : > { %v3200_v42 = vld [vmem:[#allocation8] ss:$2 sm:$0xff]  ;;  %v3216_v44 = vld [vmem:[#allocation8 + $0x1] ss:$2 sm:$0xff] }
 0x834   : > { %v3231_v45 = vmax.f32 %v3200_v42, %v3216_v44 }
 0x835   : > { %v3125_v14 = vpop.trf.xlu1 }
 0x836   : > { %v3239_v6 = vmax.f32 %v3231_v45, 0.0  ;;  %v3169_v43 = vmax.f32 %v3123_v38, %v3125_v14 }
 0x838   : > { %3186 = vst.msk [vmem:[#allocation8 + $0x10] sm:$0xff] %vm3183_vm4, %v3169_v43  ;;  %3273 = vst.msk [vmem:[#allocation3 + $0x22] sm:$0xff] %vm3183_vm4, %v3239_v6 }
 0x839   : > { %v3126_v16 = vpop.trf.xlu1 }
 0x83a   : > { %v3170_v26 = vmax.f32 %v3124_v40, %v3126_v16 }
 0x83c   : > { %3187 = vst.msk [vmem:[#allocation8 + $0x18] sm:$0xff] %vm3183_vm4, %v3170_v26 }
 0x83d   : > { %v3127_v48 = vpop.trf.xlu1 }
 0x83f   : > { %v10501_v49 = vld [vmem:[#allocation3 + $0x21] sm:$0xff] }
 0x840   : > { %v10503_v59 = vld [vmem:[#allocation3 + $0x20] sm:$0xff]  ;;  %3333 = vxpose.xlu1.b32.cont [3/8] (short) (narrow) %v10501_v49, 8 }
 0x841   : > { %3291 = vxpose.xlu0.b32.cont [3/8] (short) (narrow) %v10503_v59, 8  ;;  %v3128_v20 = vpop.trf.xlu1 }
 0x843   : > { %v3202_v27 = vld [vmem:[#allocation8 + $0x10] ss:$2 sm:$0xff]  ;;  %v3218_v32 = vld [vmem:[#allocation8 + $0x11] ss:$2 sm:$0xff] }
 0x844   : > { %v3232_v29 = vmax.f32 %v3202_v27, %v3218_v32 }
 0x845   : > { %v3129_v19 = vpop.trf.xlu1 }
 0x846   : > { %v3240_v62 = vmax.f32 %v3232_v29, 0.0  ;;  %v3171_v4 = vmax.f32 %v3127_v48, %v3129_v19  ;;  %v3446_v29 = vld [vmem:[#allocation3 + $0x4] sm:$0xff] }
 0x847   : > { %v3364_v19 = vld [vmem:[#allocation3 + $0x2] sm:$0xff] }
 0x848   : > { %3274 = vst.msk [vmem:[#allocation3 + $0x32] sm:$0xff] %vm3183_vm4, %v3240_v62  ;;  %3188 = vst.msk [vmem:[#allocation8 + $0x20] sm:$0xff] %vm3183_vm4, %v3171_v4 }
 0x849   : > { %v3130_v17 = vpop.trf.xlu1 }
 0x84a   : > { %v3172_v52 = vmax.f32 %v3128_v20, %v3130_v17 }
 0x84c   : > { %3189 = vst.msk [vmem:[#allocation8 + $0x28] sm:$0xff] %vm3183_vm4, %v3172_v52 }
 0x84d   : > { %v3131_v53 = vpop.trf.xlu1 }
 0x84f   : > { %v10510_v54 = vld [vmem:[#allocation3 + $0x31] sm:$0xff] }
 0x850   : > { %v10512_v58 = vld [vmem:[#allocation3 + $0x30] sm:$0xff]  ;;  %3334 = vxpose.xlu1.b32.cont [4/8] (short) (narrow) %v10510_v54, 8 }
 0x851   : > { %3292 = vxpose.xlu0.b32.cont [4/8] (short) (narrow) %v10512_v58, 8  ;;  %v3132_v57 = vpop.trf.xlu1 }
 0x853   : > { %v3204_v1 = vld [vmem:[#allocation8 + $0x20] ss:$2 sm:$0xff]  ;;  %v3220_v55 = vld [vmem:[#allocation8 + $0x21] ss:$2 sm:$0xff] }
 0x854   : > { %v3233_v46 = vmax.f32 %v3204_v1, %v3220_v55 }
 0x855   : > { %v3133_v47 = vpop.trf.xlu1 }
 0x856   : > { %v3241_v2 = vmax.f32 %v3233_v46, 0.0  ;;  %v3173_v3 = vmax.f32 %v3131_v53, %v3133_v47  ;;  %v10552_v53 = vld [vmem:[#allocation3 + $0x14] sm:$0xff] }
 0x858   : > { %3275 = vst.msk [vmem:[#allocation3 + $0x42] sm:$0xff] %vm3183_vm4, %v3241_v2  ;;  %3190 = vst.msk [vmem:[#allocation8 + $0x30] sm:$0xff] %vm3183_vm4, %v3173_v3  ;;  %v10560_v3 = vld [vmem:[#allocation3 + $0x24] sm:$0xff] }
 0x859   : > { %v3134_v5 = vpop.trf.xlu1 }
 0x85a   : > { %v3174_v7 = vmax.f32 %v3132_v57, %v3134_v5  ;;  %v10554_v57 = vld [vmem:[#allocation3 + $0x12] sm:$0xff]  ;;  %v10562_v5 = vld [vmem:[#allocation3 + $0x22] sm:$0xff] }
 0x85c   : > { %3191 = vst.msk [vmem:[#allocation8 + $0x38] sm:$0xff] %vm3183_vm4, %v3174_v7  ;;  %v10567_v7 = vld [vmem:[#allocation3 + $0x34] sm:$0xff] }
 0x85d   : > { %v3151_v9 = vpop.trf.xlu1 }
 0x85f   : > { %v10519_v37 = vld [vmem:[#allocation3 + $0x41] sm:$0xff] }
 0x860   : > { %v10521_v63 = vld [vmem:[#allocation3 + $0x40] sm:$0xff]  ;;  %3335 = vxpose.xlu1.b32.cont [5/8] (short) (narrow) %v10519_v37, 8 }
 0x861   : > { %3293 = vxpose.xlu0.b32.cont [5/8] (short) (narrow) %v10521_v63, 8  ;;  %v3152_v11 = vpop.trf.xlu1 }
 0x863   : > { %v3206_v21 = vld [vmem:[#allocation8 + $0x30] ss:$2 sm:$0xff]  ;;  %v3222_v12 = vld [vmem:[#allocation8 + $0x31] ss:$2 sm:$0xff] }
 0x864   : > { %v3234_v56 = vmax.f32 %v3206_v21, %v3222_v12  ;;  %v10575_v21 = vld [vmem:[#allocation3 + $0x42] sm:$0xff] }
 0x865   : > { %v3153_v13 = vpop.trf.xlu1 }
 0x866   : > { %v3242_v15 = vmax.f32 %v3234_v56, 0.0  ;;  %v3175_v39 = vmax.f32 %v3151_v9, %v3153_v13  ;;  %v10569_v9 = vld [vmem:[#allocation3 + $0x32] sm:$0xff] }
 0x868   : > { %3276 = vst.msk [vmem:[#allocation3 + $0x52] sm:$0xff] %vm3183_vm4, %v3242_v15  ;;  %3192 = vst.msk [vmem:[#allocation8 + $0x40] sm:$0xff] %vm3183_vm4, %v3175_v39 }
 0x869   : > { %v3154_v50 = vpop.trf.xlu1 }
 0x86a   : > { %v3176_v28 = vmax.f32 %v3152_v11, %v3154_v50  ;;  %v10573_v11 = vld [vmem:[#allocation3 + $0x44] sm:$0xff] }
 0x86c   : > { %3193 = vst.msk [vmem:[#allocation8 + $0x48] sm:$0xff] %vm3183_vm4, %v3176_v28 }
 0x86d   : > { %v3155_v60 = vpop.trf.xlu1 }
 0x86f   : > { %v10528_v18 = vld [vmem:[#allocation3 + $0x51] sm:$0xff] }
 0x870   : > { %v10530_v0 = vld [vmem:[#allocation3 + $0x50] sm:$0xff]  ;;  %3336 = vxpose.xlu1.b32.cont [6/8] (short) (narrow) %v10528_v18, 8 }
 0x871   : > { %3294 = vxpose.xlu0.b32.cont [6/8] (short) (narrow) %v10530_v0, 8  ;;  %v3156_v41 = vpop.trf.xlu1  ;;  %v10579_v39 = vld [vmem:[#allocation3 + $0x54] sm:$0xff] }
 0x872   : > { %v10581_v50 = vld [vmem:[#allocation3 + $0x52] sm:$0xff] }
 0x873   : > { %v3208_v61 = vld [vmem:[#allocation8 + $0x40] ss:$2 sm:$0xff]  ;;  %v3224_v23 = vld [vmem:[#allocation8 + $0x41] ss:$2 sm:$0xff] }
 0x874   : > { %v3235_v51 = vmax.f32 %v3208_v61, %v3224_v23  ;;  %v3405_v23 = vld [vmem:[#allocation3 + $0x3] sm:$0xff] }
 0x875   : > { %v3157_v8 = vpop.trf.xlu1 }
 0x876   : > { %v3243_v33 = vmax.f32 %v3235_v51, 0.0  ;;  %v3177_v34 = vmax.f32 %v3155_v60, %v3157_v8  ;;  %v3406_v51 = vld [vmem:[#allocation3 + $0x13] sm:$0xff]  ;;  %v10600_v8 = vld [vmem:[#allocation3 + $0x23] sm:$0xff] }
 0x878   : > { %3277 = vst.msk [vmem:[#allocation3 + $0x62] sm:$0xff] %vm3183_vm4, %v3243_v33  ;;  %3194 = vst.msk [vmem:[#allocation8 + $0x50] sm:$0xff] %vm3183_vm4, %v3177_v34  ;;  %v10604_v33 = vld [vmem:[#allocation3 + $0x33] sm:$0xff]  ;;  %v10608_v34 = vld [vmem:[#allocation3 + $0x43] sm:$0xff] }
 0x879   : > { %v3158_v35 = vpop.trf.xlu1 }
 0x87a   : > { %v3178_v10 = vmax.f32 %v3156_v41, %v3158_v35 }
 0x87c   : > { %3195 = vst.msk [vmem:[#allocation8 + $0x58] sm:$0xff] %vm3183_vm4, %v3178_v10 }
 0x87d   : > { %v3159_v36 = vpop.trf.xlu1 }
 0x87f   : > { %v10537_v38 = vld [vmem:[#allocation3 + $0x61] sm:$0xff] }
 0x880   : > { %v10539_v40 = vld [vmem:[#allocation3 + $0x60] sm:$0xff]  ;;  %3337 = vxpose.xlu1.b32.cont [7/8] (short) (narrow) %v10537_v38, 8 }
 0x881   : > { %3295 = vxpose.xlu0.b32.cont [7/8] (short) (narrow) %v10539_v40, 8  ;;  %v3160_v42 = vpop.trf.xlu1  ;;  %v10586_v28 = vld [vmem:[#allocation3 + $0x64] sm:$0xff] }
 0x882   : > { %v10588_v60 = vld [vmem:[#allocation3 + $0x62] sm:$0xff] }
 0x883   : > { %v3210_v44 = vld [vmem:[#allocation8 + $0x50] ss:$2 sm:$0xff]  ;;  %v3226_v45 = vld [vmem:[#allocation8 + $0x51] ss:$2 sm:$0xff] }
 0x884   : > { %v3236_v14 = vmax.f32 %v3210_v44, %v3226_v45  ;;  %v10616_v35 = vld [vmem:[#allocation3 + $0x63] sm:$0xff] }
 0x885   : > { %v3161_v6 = vpop.trf.xlu1 }
 0x886   : > { %v3244_v43 = vmax.f32 %v3236_v14, 0.0  ;;  %v3179_v16 = vmax.f32 %v3159_v36, %v3161_v6 }
 0x888   : > { %3278 = vst.msk [vmem:[#allocation3 + $0x72] sm:$0xff] %vm3183_vm4, %v3244_v43  ;;  %3196 = vst.msk [vmem:[#allocation8 + $0x60] sm:$0xff] %vm3183_vm4, %v3179_v16  ;;  %v10741_v16 = vld [vmem:[#allocation3 + $0xa0] sm:$0xff] }
 0x889   : > { %v3162_v26 = vpop.trf.xlu1 }
 0x88a   : > { %v3180_v48 = vmax.f32 %v3160_v42, %v3162_v26  ;;  %v10743_v26 = vld [vmem:[#allocation3 + $0xa3] sm:$0xff] }
 0x88c   : > { %3197 = vst.msk [vmem:[#allocation8 + $0x68] sm:$0xff] %vm3183_vm4, %v3180_v48 }
 0x88d   : > { %v3163_v20 = vpop.trf.xlu1 }
 0x88f   : > { %v10546_v27 = vld [vmem:[#allocation3 + $0x71] sm:$0xff] }
 0x890   : > { %v10548_v32 = vld [vmem:[#allocation3 + $0x70] sm:$0xff]  ;;  %3338 = vxpose.xlu1.b32.end [8/8] (short) (narrow) %v10546_v27, 8 }
 0x891   : > { %3296 = vxpose.xlu0.b32.end [8/8] (short) (narrow) %v10548_v32, 8  ;;  %v3164_v62 = vpop.trf.xlu1  ;;  %v10592_v41 = vld [vmem:[#allocation3 + $0x74] sm:$0xff] }
 0x892   : > { %v10594_v61 = vld [vmem:[#allocation3 + $0x72] sm:$0xff] }
 0x893   : > { %v3212_v4 = vld [vmem:[#allocation8 + $0x60] ss:$2 sm:$0xff]  ;;  %v3228_v17 = vld [vmem:[#allocation8 + $0x61] ss:$2 sm:$0xff] }
 0x894   : > { %3454 = vxpose.xlu1.b32.start [1/8] (short) (narrow) %v3446_v29, 8  ;;  %v3237_v52 = vmax.f32 %v3212_v4, %v3228_v17  ;;  %v10622_v36 = vld [vmem:[#allocation3 + $0x73] sm:$0xff]  ;;  %v8870_v29 = vmov 0.0|0.0  }
 0x895   : > { %3372 = vxpose.xlu0.b32.start [1/8] (short) (narrow) %v3364_v19, 8  ;;  %v3165_v1 = vpop.trf.xlu1  ;;  %7553 = vmatprep.subr.bf16.mxu1 %v8870_v29 }
 0x896   : > { %v3245_v55 = vmax.f32 %v3237_v52, 0.0  ;;  %v3181_v46 = vmax.f32 %v3163_v20, %v3165_v1 }
 0x898   : > { %3455 = vxpose.xlu1.b32.cont [2/8] (short) (narrow) %v10552_v53, 8  ;;  %3279 = vst.msk [vmem:[#allocation3 + $0x82] sm:$0xff] %vm3183_vm4, %v3245_v55  ;;  %3198 = vst.msk [vmem:[#allocation8 + $0x70] sm:$0xff] %vm3183_vm4, %v3181_v46 }
 0x899   : > { %3373 = vxpose.xlu0.b32.cont [2/8] (short) (narrow) %v10554_v57, 8  ;;  %v3166_v47 = vpop.trf.xlu1 }
 0x89a   : > { %v3182_v2 = vmax.f32 %v3164_v62, %v3166_v47 }
 0x89c   : > { %3456 = vxpose.xlu1.b32.cont [3/8] (short) (narrow) %v10560_v3, 8  ;;  %3199 = vst.msk [vmem:[#allocation8 + $0x78] sm:$0xff] %vm3183_vm4, %v3182_v2 }
 0x89d   : > { %3374 = vxpose.xlu0.b32.cont [3/8] (short) (narrow) %v10562_v5, 8 }
 0x89f   : > { %v10620_v10 = vld [vmem:[#allocation3 + $0x81] sm:$0xff] }
 0x8a0   : > { %3457 = vxpose.xlu1.b32.cont [4/8] (short) (narrow) %v10567_v7, 8  ;;  %v10641_v42 = vld [vmem:[#allocation3 + $0x80] sm:$0xff] }
 0x8a1   : > { %3375 = vxpose.xlu0.b32.cont [4/8] (short) (narrow) %v10569_v9, 8  ;;  %v10661_v44 = vld [vmem:[#allocation3 + $0x82] sm:$0xff] }
 0x8a2   : > { %v10679_v45 = vld [vmem:[#allocation3 + $0x84] sm:$0xff] }
 0x8a3   : > { %v3214_v12 = vld [vmem:[#allocation8 + $0x70] ss:$2 sm:$0xff]  ;;  %v3230_v56 = vld [vmem:[#allocation8 + $0x71] ss:$2 sm:$0xff] }
 0x8a4   : > { %3458 = vxpose.xlu1.b32.cont [5/8] (short) (narrow) %v10573_v11, 8  ;;  %v3238_v13 = vmax.f32 %v3214_v12, %v3230_v56 }
 0x8a5   : > { %3376 = vxpose.xlu0.b32.cont [5/8] (short) (narrow) %v10575_v21, 8 }
 0x8a6   : > { %v3246_v15 = vmax.f32 %v3238_v13, 0.0 }
 0x8a8   : > { %3459 = vxpose.xlu1.b32.cont [6/8] (short) (narrow) %v10579_v39, 8  ;;  %3280 = vst.msk [vmem:[#allocation3 + $0x92] sm:$0xff] %vm3183_vm4, %v3246_v15 }
 0x8a9   : > { %3377 = vxpose.xlu0.b32.cont [6/8] (short) (narrow) %v10581_v50, 8 }
 0x8ac   : > { %3460 = vxpose.xlu1.b32.cont [7/8] (short) (narrow) %v10586_v28, 8 }
 0x8ad   : > { %3378 = vxpose.xlu0.b32.cont [7/8] (short) (narrow) %v10588_v60, 8 }
 0x8af   : > { %v10681_v14 = vld [vmem:[#allocation3 + $0x92] sm:$0xff] }
 0x8b0   : > { %3461 = vxpose.xlu1.b32.end [8/8] (short) (narrow) %v10592_v41, 8  ;;  %v10701_v6 = vld [vmem:[#allocation3 + $0x94] sm:$0xff] }
 0x8b1   : > { %3379 = vxpose.xlu0.b32.end [8/8] (short) (narrow) %v10594_v61, 8  ;;  %v10721_v43 = vld [vmem:[#allocation3 + $0x93] sm:$0xff] }
 0x8b4   : > { %3537 = vxpose.xlu1.b32.start [1/8] (short) (narrow) %v10493_v30, 8  ;;  %v10612_v30 = vld [vmem:[#allocation3 + $0x53] sm:$0xff] }
 0x8b5   : > { %3413 = vxpose.xlu0.b32.start [1/8] (short) (narrow) %v3405_v23, 8 }
 0x8b8   : > { %3538 = vxpose.xlu1.b32.cont [2/8] (short) (narrow) %v10501_v49, 8 }
 0x8b9   : > { %3414 = vxpose.xlu0.b32.cont [2/8] (short) (narrow) %v3406_v51, 8 }
 0x8bc   : > { %3539 = vxpose.xlu1.b32.cont [3/8] (short) (narrow) %v10510_v54, 8 }
 0x8bd   : > { %3415 = vxpose.xlu0.b32.cont [3/8] (short) (narrow) %v10600_v8, 8 }
 0x8c0   : > { %3540 = vxpose.xlu1.b32.cont [4/8] (short) (narrow) %v10519_v37, 8 }
 0x8c1   : > { %3416 = vxpose.xlu0.b32.cont [4/8] (short) (narrow) %v10604_v33, 8 }
 0x8c4   : > { %3541 = vxpose.xlu1.b32.cont [5/8] (short) (narrow) %v10528_v18, 8 }
 0x8c5   : > { %3417 = vxpose.xlu0.b32.cont [5/8] (short) (narrow) %v10608_v34, 8 }
 0x8c8   : > { %3542 = vxpose.xlu1.b32.cont [6/8] (short) (narrow) %v10537_v38, 8 }
 0x8c9   : > { %3418 = vxpose.xlu0.b32.cont [6/8] (short) (narrow) %v10612_v30, 8 }
 0x8cc   : > { %3543 = vxpose.xlu1.b32.cont [7/8] (short) (narrow) %v10546_v27, 8 }
 0x8cd   : > { %3419 = vxpose.xlu0.b32.cont [7/8] (short) (narrow) %v10616_v35, 8 }
 0x8d0   : > { %3544 = vxpose.xlu1.b32.end [8/8] (short) (narrow) %v10620_v10, 8 }
 0x8d1   : > { %3420 = vxpose.xlu0.b32.end [8/8] (short) (narrow) %v10622_v36, 8 }
 0x8d4   : > { %3619 = vxpose.xlu1.b32.start [1/8] (short) (narrow) %v3406_v51, 8  ;;  %v3988_v51 = vld [vmem:[#allocation3 + $0xa2] sm:$0xff] }
 0x8d5   : > { %3496 = vxpose.xlu0.b32.start [1/8] (short) (narrow) %v10487_v25, 8  ;;  %v10639_v25 = vld [vmem:[#allocation3 + $0x83] sm:$0xff] }
 0x8d8   : > { %3620 = vxpose.xlu1.b32.cont [2/8] (short) (narrow) %v10600_v8, 8 }
 0x8d9   : > { %3497 = vxpose.xlu0.b32.cont [2/8] (short) (narrow) %v10503_v59, 8 }
 0x8dc   : > { %3621 = vxpose.xlu1.b32.cont [3/8] (short) (narrow) %v10604_v33, 8 }
 0x8dd   : > { %3498 = vxpose.xlu0.b32.cont [3/8] (short) (narrow) %v10512_v58, 8 }
 0x8e0   : > { %3622 = vxpose.xlu1.b32.cont [4/8] (short) (narrow) %v10608_v34, 8 }
 0x8e1   : > { %3499 = vxpose.xlu0.b32.cont [4/8] (short) (narrow) %v10521_v63, 8 }
 0x8e4   : > { %3623 = vxpose.xlu1.b32.cont [5/8] (short) (narrow) %v10612_v30, 8 }
 0x8e5   : > { %3500 = vxpose.xlu0.b32.cont [5/8] (short) (narrow) %v10530_v0, 8 }
 0x8e8   : > { %3624 = vxpose.xlu1.b32.cont [6/8] (short) (narrow) %v10616_v35, 8 }
 0x8e9   : > { %3501 = vxpose.xlu0.b32.cont [6/8] (short) (narrow) %v10539_v40, 8 }
 0x8ec   : > { %3625 = vxpose.xlu1.b32.cont [7/8] (short) (narrow) %v10622_v36, 8 }
 0x8ed   : > { %3502 = vxpose.xlu0.b32.cont [7/8] (short) (narrow) %v10548_v32, 8 }
 0x8f0   : > { %3626 = vxpose.xlu1.b32.end [8/8] (short) (narrow) %v10639_v25, 8 }
 0x8f1   : > { %3503 = vxpose.xlu0.b32.end [8/8] (short) (narrow) %v10641_v42, 8 }
 0x8f4   : > { %3701 = vxpose.xlu1.b32.start [1/8] (short) (narrow) %v10503_v59, 8  ;;  %v10659_v59 = vld [vmem:[#allocation3 + $0x90] sm:$0xff]  ;;  %v3347_v20 = vpop.trf.xlu1 }
 0x8f5   : > { %3578 = vxpose.xlu0.b32.start [1/8] (short) (narrow) %v10554_v57, 8  ;;  %3363 = vst.msk [vmem:[#allocation6 + $0x8] sm:$0xff] %vm3321_vm6, %v3347_v20 }
 0x8f8   : > { %3702 = vxpose.xlu1.b32.cont [2/8] (short) (narrow) %v10512_v58, 8 }
 0x8f9   : > { %3579 = vxpose.xlu0.b32.cont [2/8] (short) (narrow) %v10562_v5, 8 }
 0x8fc   : > { %3703 = vxpose.xlu1.b32.cont [3/8] (short) (narrow) %v10521_v63, 8  ;;  %v4313_v52 = vld [vmem:[#allocation6 + $0x8] sm:$0xff] }
 0x8fd   : > { %3580 = vxpose.xlu0.b32.cont [3/8] (short) (narrow) %v10569_v9, 8 }
 0x900   : > { %3704 = vxpose.xlu1.b32.cont [4/8] (short) (narrow) %v10530_v0, 8 }
 0x901   : > { %3581 = vxpose.xlu0.b32.cont [4/8] (short) (narrow) %v10575_v21, 8 }
 0x904   : > { %3705 = vxpose.xlu1.b32.cont [5/8] (short) (narrow) %v10539_v40, 8 }
 0x905   : > { %3582 = vxpose.xlu0.b32.cont [5/8] (short) (narrow) %v10581_v50, 8 }
 0x908   : > { %3706 = vxpose.xlu1.b32.cont [6/8] (short) (narrow) %v10548_v32, 8 }
 0x909   : > { %3583 = vxpose.xlu0.b32.cont [6/8] (short) (narrow) %v10588_v60, 8 }
 0x90c   : > { %3707 = vxpose.xlu1.b32.cont [7/8] (short) (narrow) %v10641_v42, 8 }
 0x90d   : > { %3584 = vxpose.xlu0.b32.cont [7/8] (short) (narrow) %v10594_v61, 8 }
 0x910   : > { %3708 = vxpose.xlu1.b32.end [8/8] (short) (narrow) %v10659_v59, 8 }
 0x911   : > { %3585 = vxpose.xlu0.b32.end [8/8] (short) (narrow) %v10661_v44, 8 }
 0x914   : > { %3783 = vxpose.xlu1.b32.start [1/8] (short) (narrow) %v10562_v5, 8  ;;  %v3470_v62 = vpop.trf.xlu1 }
 0x915   : > { %3660 = vxpose.xlu0.b32.start [1/8] (short) (narrow) %v10552_v53, 8  ;;  %3486 = vst.msk [vmem:[#allocation6 + $0x20] sm:$0xff] %vm3321_vm6, %v3470_v62 }
 0x918   : > { %3784 = vxpose.xlu1.b32.cont [2/8] (short) (narrow) %v10569_v9, 8 }
 0x919   : > { %3661 = vxpose.xlu0.b32.cont [2/8] (short) (narrow) %v10560_v3, 8 }
 0x91c   : > { %3785 = vxpose.xlu1.b32.cont [3/8] (short) (narrow) %v10575_v21, 8 }
 0x91d   : > { %3662 = vxpose.xlu0.b32.cont [3/8] (short) (narrow) %v10567_v7, 8 }
 0x920   : > { %3786 = vxpose.xlu1.b32.cont [4/8] (short) (narrow) %v10581_v50, 8 }
 0x921   : > { %3663 = vxpose.xlu0.b32.cont [4/8] (short) (narrow) %v10573_v11, 8 }
 0x924   : > { %3787 = vxpose.xlu1.b32.cont [5/8] (short) (narrow) %v10588_v60, 8 }
 0x925   : > { %3664 = vxpose.xlu0.b32.cont [5/8] (short) (narrow) %v10579_v39, 8 }
 0x928   : > { %3788 = vxpose.xlu1.b32.cont [6/8] (short) (narrow) %v10594_v61, 8 }
 0x929   : > { %3665 = vxpose.xlu0.b32.cont [6/8] (short) (narrow) %v10586_v28, 8 }
 0x92c   : > { %3789 = vxpose.xlu1.b32.cont [7/8] (short) (narrow) %v10661_v44, 8 }
 0x92d   : > { %3666 = vxpose.xlu0.b32.cont [7/8] (short) (narrow) %v10592_v41, 8 }
 0x930   : > { %3790 = vxpose.xlu1.b32.end [8/8] (short) (narrow) %v10681_v14, 8 }
 0x931   : > { %3667 = vxpose.xlu0.b32.end [8/8] (short) (narrow) %v10679_v45, 8 }
 0x934   : > { %3865 = vxpose.xlu1.b32.start [1/8] (short) (narrow) %v10560_v3, 8  ;;  %v3553_v53 = vpop.trf.xlu1 }
 0x935   : > { %3742 = vxpose.xlu0.b32.start [1/8] (short) (narrow) %v10501_v49, 8  ;;  %v10699_v49 = vld [vmem:[#allocation3 + $0x91] sm:$0xff]  ;;  %3569 = vst.msk [vmem:[#allocation6 + $0x30] sm:$0xff] %vm3321_vm6, %v3553_v53 }
 0x938   : > { %3866 = vxpose.xlu1.b32.cont [2/8] (short) (narrow) %v10567_v7, 8 }
 0x939   : > { %3743 = vxpose.xlu0.b32.cont [2/8] (short) (narrow) %v10510_v54, 8 }
 0x93c   : > { %3867 = vxpose.xlu1.b32.cont [3/8] (short) (narrow) %v10573_v11, 8  ;;  %v4318_v12 = vld [vmem:[#allocation6 + $0x30] sm:$0xff] }
 0x93d   : > { %3744 = vxpose.xlu0.b32.cont [3/8] (short) (narrow) %v10519_v37, 8 }
 0x940   : > { %3868 = vxpose.xlu1.b32.cont [4/8] (short) (narrow) %v10579_v39, 8 }
 0x941   : > { %3745 = vxpose.xlu0.b32.cont [4/8] (short) (narrow) %v10528_v18, 8 }
 0x944   : > { %3869 = vxpose.xlu1.b32.cont [5/8] (short) (narrow) %v10586_v28, 8 }
 0x945   : > { %3746 = vxpose.xlu0.b32.cont [5/8] (short) (narrow) %v10537_v38, 8 }
 0x948   : > { %3870 = vxpose.xlu1.b32.cont [6/8] (short) (narrow) %v10592_v41, 8 }
 0x949   : > { %3747 = vxpose.xlu0.b32.cont [6/8] (short) (narrow) %v10546_v27, 8 }
 0x94c   : > { %3871 = vxpose.xlu1.b32.cont [7/8] (short) (narrow) %v10679_v45, 8 }
 0x94d   : > { %3748 = vxpose.xlu0.b32.cont [7/8] (short) (narrow) %v10620_v10, 8 }
 0x950   : > { %3872 = vxpose.xlu1.b32.end [8/8] (short) (narrow) %v10701_v6, 8 }
 0x951   : > { %3749 = vxpose.xlu0.b32.end [8/8] (short) (narrow) %v10699_v49, 8 }
 0x954   : > { %3948 = vxpose.xlu1.b32.start [1/8] (short) (narrow) %v10510_v54, 8  ;;  %v10719_v54 = vld [vmem:[#allocation3 + $0xa1] sm:$0xff]  ;;  %v3635_v1 = vpop.trf.xlu1 }
 0x955   : > { %3824 = vxpose.xlu0.b32.start [1/8] (short) (narrow) %v10600_v8, 8  ;;  %3651 = vst.msk [vmem:[#allocation6 + $0x40] sm:$0xff] %vm3321_vm6, %v3635_v1  ;;  %v4112_v8 = vld [vmem:[#allocation3 + $0xb0] sm:$0xff]  ;;  %v4418_v1 = vld [vmem:[%s11830_s7 + $0x8] sm:$0xff] }
 0x958   : > { %3949 = vxpose.xlu1.b32.cont [2/8] (short) (narrow) %v10519_v37, 8 }
 0x959   : > { %3825 = vxpose.xlu0.b32.cont [2/8] (short) (narrow) %v10604_v33, 8 }
 0x95c   : > { %3950 = vxpose.xlu1.b32.cont [3/8] (short) (narrow) %v10528_v18, 8  ;;  %v4320_v15 = vld [vmem:[#allocation6 + $0x40] sm:$0xff] }
 0x95d   : > { %3826 = vxpose.xlu0.b32.cont [3/8] (short) (narrow) %v10608_v34, 8 }
 0x960   : > { %3951 = vxpose.xlu1.b32.cont [4/8] (short) (narrow) %v10537_v38, 8 }
 0x961   : > { %3827 = vxpose.xlu0.b32.cont [4/8] (short) (narrow) %v10612_v30, 8 }
 0x964   : > { %3952 = vxpose.xlu1.b32.cont [5/8] (short) (narrow) %v10546_v27, 8 }
 0x965   : > { %3828 = vxpose.xlu0.b32.cont [5/8] (short) (narrow) %v10616_v35, 8 }
 0x968   : > { %3953 = vxpose.xlu1.b32.cont [6/8] (short) (narrow) %v10620_v10, 8 }
 0x969   : > { %3829 = vxpose.xlu0.b32.cont [6/8] (short) (narrow) %v10622_v36, 8 }
 0x96c   : > { %3954 = vxpose.xlu1.b32.cont [7/8] (short) (narrow) %v10699_v49, 8 }
 0x96d   : > { %3830 = vxpose.xlu0.b32.cont [7/8] (short) (narrow) %v10639_v25, 8 }
 0x970   : > { %3955 = vxpose.xlu1.b32.end [8/8] (short) (narrow) %v10719_v54, 8 }
 0x971   : > { %3831 = vxpose.xlu0.b32.end [8/8] (short) (narrow) %v10721_v43, 8 }
 0x974   : > { %4030 = vxpose.xlu1.b32.start [1/8] (short) (narrow) %v10604_v33, 8  ;;  %v3717_v47 = vpop.trf.xlu1 }
 0x975   : > { %3907 = vxpose.xlu0.b32.start [1/8] (short) (narrow) %v10512_v58, 8  ;;  %v10737_v58 = vpop.permute.xlu0 %4340  ;;  %3733 = vst.msk [vmem:[#allocation6 + $0x50] sm:$0xff] %vm3321_vm6, %v3717_v47  ;;  %v4424_v47 = vld [vmem:[%s11830_s7 + $0x38] sm:$0xff] }
 0x978   : > { %4031 = vxpose.xlu1.b32.cont [2/8] (short) (narrow) %v10608_v34, 8 }
 0x979   : > { %3908 = vxpose.xlu0.b32.cont [2/8] (short) (narrow) %v10521_v63, 8  ;;  %v3305_v48 = vpop.trf.xlu0 }
 0x97a   : > { %3322 = vst.msk [vmem:[#allocation6] sm:$0xff] %vm3321_vm6, %v3305_v48 }
 0x97c   : > { %4032 = vxpose.xlu1.b32.cont [3/8] (short) (narrow) %v10612_v30, 8 }
 0x97d   : > { %3909 = vxpose.xlu0.b32.cont [3/8] (short) (narrow) %v10530_v0, 8  ;;  %v3388_v19 = vpop.trf.xlu0 }
 0x97e   : > { %3404 = vst.msk [vmem:[#allocation6 + $0x10] sm:$0xff] %vm3321_vm6, %v3388_v19 }
 0x980   : > { %4033 = vxpose.xlu1.b32.cont [4/8] (short) (narrow) %v10616_v35, 8 }
 0x981   : > { %3910 = vxpose.xlu0.b32.cont [4/8] (short) (narrow) %v10539_v40, 8  ;;  %v3429_v4 = vpop.trf.xlu0  ;;  %v4312_v17 = vld [vmem:[#allocation6] sm:$0xff] }
 0x982   : > { %3445 = vst.msk [vmem:[#allocation6 + $0x18] sm:$0xff] %vm3321_vm6, %v3429_v4  ;;  %v7554_v57 = vpack.c.bf16 %v4313_v52, %v4312_v17 }
 0x984   : > { %4034 = vxpose.xlu1.b32.cont [5/8] (short) (narrow) %v10622_v36, 8  ;;  %7555 = vmatpush1.bf16.msra.mxu1 %v7554_v57 }
 0x985   : > { %3911 = vxpose.xlu0.b32.cont [5/8] (short) (narrow) %v10548_v32, 8  ;;  %7556 = vmatprep.subr.bf16.mxu1 %v8870_v29 }
 0x988   : > { %4035 = vxpose.xlu1.b32.cont [6/8] (short) (narrow) %v10639_v25, 8 }
 0x989   : > { %3912 = vxpose.xlu0.b32.cont [6/8] (short) (narrow) %v10641_v42, 8  ;;  %v4315_v55 = vld [vmem:[#allocation6 + $0x18] sm:$0xff] }
 0x98c   : > { %4036 = vxpose.xlu1.b32.cont [7/8] (short) (narrow) %v10721_v43, 8 }
 0x98d   : > { %3913 = vxpose.xlu0.b32.cont [7/8] (short) (narrow) %v10659_v59, 8 }
 0x990   : > { %4037 = vxpose.xlu1.b32.end [8/8] (short) (narrow) %v10743_v26, 8 }
 0x991   : > { %3914 = vxpose.xlu0.b32.end [8/8] (short) (narrow) %v10741_v16, 8 }
 0x994   : > { %4113 = vxpose.xlu1.b32.start [1/8] (short) (narrow) %v10521_v63, 8  ;;  %v3512_v63 = vpop.trf.xlu0 }
 0x995   : > { %3989 = vxpose.xlu0.b32.start [1/8] (short) (narrow) %v10569_v9, 8  ;;  %3528 = vst.msk [vmem:[#allocation6 + $0x28] sm:$0xff] %vm3321_vm6, %v3512_v63  ;;  %v3799_v9 = vpop.trf.xlu1 }
 0x996   : > { %3815 = vst.msk [vmem:[#allocation6 + $0x60] sm:$0xff] %vm3321_vm6, %v3799_v9 }
 0x998   : > { %4114 = vxpose.xlu1.b32.cont [2/8] (short) (narrow) %v10530_v0, 8  ;;  %v4314_v0 = vld [vmem:[#allocation6 + $0x10] sm:$0xff]  ;;  %v3594_v46 = vpop.trf.xlu0 }
 0x999   : > { %3990 = vxpose.xlu0.b32.cont [2/8] (short) (narrow) %v10575_v21, 8  ;;  %v7557_v2 = vpack.c.bf16 %v4315_v55, %v4314_v0  ;;  %3610 = vst.msk [vmem:[#allocation6 + $0x38] sm:$0xff] %vm3321_vm6, %v3594_v46  ;;  %v4420_v0 = vld [vmem:[%s11830_s7 + $0x18] sm:$0xff]  ;;  %v4417_v55 = vld [vmem:[%s11830_s7] sm:$0xff]  ;;  %v4422_v46 = vld [vmem:[%s11830_s7 + $0x28] sm:$0xff] }
 0x99a   : > { %v7593_v9 = vpack.c.bf16 %v4424_v47, %v4422_v46 }
 0x99b   : > { %7558 = vmatpush1.bf16.msra.mxu1 %v7557_v2 }
 0x99c   : > { %4115 = vxpose.xlu1.b32.cont [3/8] (short) (narrow) %v10539_v40, 8  ;;  %v4316_v40 = vld [vmem:[#allocation6 + $0x20] sm:$0xff]  ;;  %v3676_v3 = vpop.trf.xlu0  ;;  %v4317_v5 = vld [vmem:[#allocation6 + $0x28] sm:$0xff]  ;;  %7559 = vmatprep.subr.bf16.mxu1 %v8870_v29 }
 0x99d   : > { %3991 = vxpose.xlu0.b32.cont [3/8] (short) (narrow) %v10581_v50, 8  ;;  %3692 = vst.msk [vmem:[#allocation6 + $0x48] sm:$0xff] %vm3321_vm6, %v3676_v3  ;;  %v4310_v3 = vld [vmem:[%s11826_s3] sm:$0xff] }
 0x9a0   : > { %4116 = vxpose.xlu1.b32.cont [4/8] (short) (narrow) %v10548_v32, 8  ;;  %v7560_v32 = vpack.c.bf16 %v4317_v5, %v4316_v40  ;;  %v4319_v56 = vld [vmem:[#allocation6 + $0x38] sm:$0xff]  ;;  %v7589_v40 = vpack.c.bf16 %v4420_v0, %v4418_v1  ;;  %v4772_v1 = vld [vmem:[#allocation4 + $0x19] sm:$0xff] }
 0x9a1   : > { %3992 = vxpose.xlu0.b32.cont [4/8] (short) (narrow) %v10588_v60, 8  ;;  %v7563_v13 = vpack.c.bf16 %v4319_v56, %v4318_v12  ;;  %v4423_v12 = vld [vmem:[%s11830_s7 + $0x30] sm:$0xff]  ;;  %v4426_v56 = vld [vmem:[%s11830_s7 + $0x48] sm:$0xff] }
 0x9a2   : > { %7561 = vmatpush1.bf16.msra.mxu1 %v7560_v32  ;;  %v4421_v32 = vld [vmem:[%s11830_s7 + $0x20] sm:$0xff] }
 0x9a3   : > { %7562 = vmatprep.subr.bf16.mxu1 %v8870_v29 }
 0x9a4   : > { %4117 = vxpose.xlu1.b32.cont [5/8] (short) (narrow) %v10641_v42, 8  ;;  %v4321_v23 = vld [vmem:[#allocation6 + $0x48] sm:$0xff] }
 0x9a5   : > { %3993 = vxpose.xlu0.b32.cont [5/8] (short) (narrow) %v10594_v61, 8  ;;  %v7566_v33 = vpack.c.bf16 %v4321_v23, %v4320_v15  ;;  %v7595_v15 = vpack.c.bf16 %v4423_v12, %v4421_v32 }
 0x9a6   : > { %7564 = vmatpush1.bf16.msra.mxu1 %v7563_v13  ;;  %v4428_v13 = vld [vmem:[%s11830_s7 + $0x58] sm:$0xff] }
 0x9a7   : > { %7565 = vmatprep.subr.bf16.mxu1 %v8870_v29  ;;  %v7597_v23 = vpack.c.bf16 %v4428_v13, %v4426_v56 }
 0x9a8   : > { %4118 = vxpose.xlu1.b32.cont [6/8] (short) (narrow) %v10659_v59, 8 }
 0x9a9   : > { %3994 = vxpose.xlu0.b32.cont [6/8] (short) (narrow) %v10661_v44, 8 }
 0x9aa   : > { %7567 = vmatpush1.bf16.msra.mxu1 %v7566_v33  ;;  %v4430_v33 = vld [vmem:[%s11830_s7 + $0x68] sm:$0xff] }
 0x9ab   : > { %7568 = vmatprep.subr.bf16.mxu1 %v8870_v29 }
 0x9ac   : > { %4119 = vxpose.xlu1.b32.cont [7/8] (short) (narrow) %v10741_v16, 8  ;;  %v4322_v16 = vld [vmem:[#allocation6 + $0x50] sm:$0xff] }
 0x9ad   : > { %3995 = vxpose.xlu0.b32.cont [7/8] (short) (narrow) %v10681_v14, 8 }
 0x9b0   : > { %4120 = vxpose.xlu1.b32.end [8/8] (short) (narrow) %v4112_v8, 8  ;;  %v4427_v8 = vld [vmem:[%s11830_s7 + $0x50] sm:$0xff] }
 0x9b1   : > { %3996 = vxpose.xlu0.b32.end [8/8] (short) (narrow) %v3988_v51, 8 }
 0x9b4   : > { %4195 = vxpose.xlu1.b32.start [1/8] (short) (narrow) %v10575_v21, 8  ;;  %v3881_v59 = vpop.trf.xlu1  ;;  %v4194_v21 = vld [vmem:[#allocation3 + $0xb2] sm:$0xff] }
 0x9b5   : > { %4071 = vxpose.xlu0.b32.start [1/8] (short) (narrow) %v10567_v7, 8  ;;  %v3758_v42 = vpop.trf.xlu0  ;;  %3897 = vst.msk [vmem:[#allocation6 + $0x70] sm:$0xff] %vm3321_vm6, %v3881_v59  ;;  %v4070_v7 = vld [vmem:[#allocation3 + $0xa4] sm:$0xff] }
 0x9b6   : > { %3774 = vst.msk [vmem:[#allocation6 + $0x58] sm:$0xff] %vm3321_vm6, %v3758_v42  ;;  %v4432_v42 = vld [vmem:[%s11830_s7 + $0x78] sm:$0xff] }
 0x9b8   : > { %4196 = vxpose.xlu1.b32.cont [2/8] (short) (narrow) %v10581_v50, 8 }
 0x9b9   : > { %4072 = vxpose.xlu0.b32.cont [2/8] (short) (narrow) %v10573_v11, 8 }
 0x9bc   : > { %4197 = vxpose.xlu1.b32.cont [3/8] (short) (narrow) %v10588_v60, 8 }
 0x9bd   : > { %4073 = vxpose.xlu0.b32.cont [3/8] (short) (narrow) %v10579_v39, 8  ;;  %v4323_v48 = vld [vmem:[#allocation6 + $0x58] sm:$0xff] }
 0x9be   : > { %v7569_v20 = vpack.c.bf16 %v4323_v48, %v4322_v16  ;;  %v7601_v16 = vpack.c.bf16 %v4432_v42, %v4430_v33  ;;  %v4429_v48 = vld [vmem:[%s11830_s7 + $0x60] sm:$0xff] }
 0x9c0   : > { %7570 = vmatpush1.bf16.msra.mxu1 %v7569_v20  ;;  %4198 = vxpose.xlu1.b32.cont [4/8] (short) (narrow) %v10594_v61, 8  ;;  %v4324_v61 = vld [vmem:[#allocation6 + $0x60] sm:$0xff] }
 0x9c1   : > { %4074 = vxpose.xlu0.b32.cont [4/8] (short) (narrow) %v10586_v28, 8  ;;  %7571 = vmatprep.subr.bf16.mxu1 %v8870_v29  ;;  %v4431_v20 = vld [vmem:[%s11830_s7 + $0x70] sm:$0xff] }
 0x9c4   : > { %4199 = vxpose.xlu1.b32.cont [5/8] (short) (narrow) %v10661_v44, 8 }
 0x9c5   : > { %4075 = vxpose.xlu0.b32.cont [5/8] (short) (narrow) %v10592_v41, 8 }
 0x9c8   : > { %4200 = vxpose.xlu1.b32.cont [6/8] (short) (narrow) %v10681_v14, 8 }
 0x9c9   : > { %4076 = vxpose.xlu0.b32.cont [6/8] (short) (narrow) %v10679_v45, 8 }
 0x9cc   : > { %4201 = vxpose.xlu1.b32.cont [7/8] (short) (narrow) %v3988_v51, 8  ;;  %v4425_v51 = vld [vmem:[%s11830_s7 + $0x40] sm:$0xff] }
 0x9cd   : > { %4077 = vxpose.xlu0.b32.cont [7/8] (short) (narrow) %v10701_v6, 8  ;;  %v7599_v59 = vpack.c.bf16 %v4427_v8, %v4425_v51 }
 0x9d0   : > { %4202 = vxpose.xlu1.b32.end [8/8] (short) (narrow) %v4194_v21, 8 }
 0x9d1   : > { %4078 = vxpose.xlu0.b32.end [8/8] (short) (narrow) %v4070_v7, 8 }
 0x9d4   : > { %4277 = vxpose.xlu1.b32.start [1/8] (short) (narrow) %v10573_v11, 8  ;;  %v3964_v60 = vpop.trf.xlu1  ;;  %v4326_v11 = vld [vmem:[#allocation6 + $0x70] sm:$0xff] }
 0x9d5   : > { %4154 = vxpose.xlu0.b32.start [1/8] (short) (narrow) %v10519_v37, 8  ;;  %v3840_v50 = vpop.trf.xlu0  ;;  %3980 = vst.msk [vmem:[#allocation6 + $0x80] sm:$0xff] %vm3321_vm6, %v3964_v60  ;;  %v4153_v37 = vld [vmem:[#allocation3 + $0xb1] sm:$0xff] }
 0x9d6   : > { %3856 = vst.msk [vmem:[#allocation6 + $0x68] sm:$0xff] %vm3321_vm6, %v3840_v50 }
 0x9d8   : > { %4278 = vxpose.xlu1.b32.cont [2/8] (short) (narrow) %v10579_v39, 8 }
 0x9d9   : > { %4155 = vxpose.xlu0.b32.cont [2/8] (short) (narrow) %v10528_v18, 8  ;;  %v4276_v18 = vld [vmem:[#allocation3 + $0xb4] sm:$0xff] }
 0x9dc   : > { %4279 = vxpose.xlu1.b32.cont [3/8] (short) (narrow) %v10586_v28, 8 }
 0x9dd   : > { %4156 = vxpose.xlu0.b32.cont [3/8] (short) (narrow) %v10537_v38, 8  ;;  %v4325_v44 = vld [vmem:[#allocation6 + $0x68] sm:$0xff] }
 0x9de   : > { %v7572_v14 = vpack.c.bf16 %v4325_v44, %v4324_v61 }
 0x9e0   : > { %7573 = vmatpush1.bf16.msra.mxu1 %v7572_v14  ;;  %4280 = vxpose.xlu1.b32.cont [4/8] (short) (narrow) %v10592_v41, 8  ;;  %v4311_v41 = vld [vmem:[%s11826_s3 + $0x8] sm:$0xff]  ;;  %v4509_v14 = vmax.f32 %v10448_v31, 0.0 }
 0x9e1   : > { %4157 = vxpose.xlu0.b32.cont [4/8] (short) (narrow) %v10546_v27, 8  ;;  %7574 = vmatprep.subr.bf16.mxu1 %v8870_v29 }
 0x9e2   : > { %7519 = vmatprep.mubr.msk.f32.mxu1 %vm4343_vm7, %v4311_v41 }
 0x9e4   : > { %4281 = vxpose.xlu1.b32.cont [5/8] (short) (narrow) %v10679_v45, 8 }
 0x9e5   : > { %4158 = vxpose.xlu0.b32.cont [5/8] (short) (narrow) %v10620_v10, 8  ;;  %v4328_v10 = vld [vmem:[#allocation6 + $0x80] sm:$0xff] }
 0x9e8   : > { %4282 = vxpose.xlu1.b32.cont [6/8] (short) (narrow) %v10701_v6, 8 }
 0x9e9   : > { %4159 = vxpose.xlu0.b32.cont [6/8] (short) (narrow) %v10699_v49, 8 }
 0x9ec   : > { %4283 = vxpose.xlu1.b32.cont [7/8] (short) (narrow) %v4070_v7, 8  ;;  %v7603_v7 = vpack.c.bf16 %v4431_v20, %v4429_v48 }
 0x9ed   : > { %4160 = vxpose.xlu0.b32.cont [7/8] (short) (narrow) %v10719_v54, 8 }
 0x9f0   : > { %4284 = vxpose.xlu1.b32.end [8/8] (short) (narrow) %v4276_v18, 8 }
 0x9f1   : > { %4161 = vxpose.xlu0.b32.end [8/8] (short) (narrow) %v4153_v37, 8  ;;  %v4510_v37 = vmax.f32 %v10490_v24, 0.0 }
 0x9f4   : > { %v4046_v27 = vpop.trf.xlu1 }
 0x9f5   : > { %4236 = vxpose.xlu0.b32.start [1/8] (short) (narrow) %v10608_v34, 8  ;;  %v3923_v38 = vpop.trf.xlu0  ;;  %4062 = vst.msk [vmem:[#allocation6 + $0x90] sm:$0xff] %vm3321_vm6, %v4046_v27  ;;  %v4235_v34 = vld [vmem:[#allocation3 + $0xb3] sm:$0xff] }
 0x9f6   : > { %3939 = vst.msk [vmem:[#allocation6 + $0x78] sm:$0xff] %vm3321_vm6, %v3923_v38 }
 0x9f9   : > { %4237 = vxpose.xlu0.b32.cont [2/8] (short) (narrow) %v10612_v30, 8 }
 0x9fc   : > { %v4330_v6 = vld [vmem:[#allocation6 + $0x90] sm:$0xff] }
 0x9fd   : > { %4238 = vxpose.xlu0.b32.cont [3/8] (short) (narrow) %v10616_v35, 8  ;;  %v4327_v39 = vld [vmem:[#allocation6 + $0x78] sm:$0xff] }
 0x9fe   : > { %v7575_v28 = vpack.c.bf16 %v4327_v39, %v4326_v11 }
 0xa00   : > { %7576 = vmatpush1.bf16.msra.mxu1 %v7575_v28 }
 0xa01   : > { %4239 = vxpose.xlu0.b32.cont [4/8] (short) (narrow) %v10622_v36, 8  ;;  %7577 = vmatprep.subr.bf16.mxu1 %v8870_v29 }
 0xa05   : > { %4240 = vxpose.xlu0.b32.cont [5/8] (short) (narrow) %v10639_v25, 8 }
 0xa09   : > { %4241 = vxpose.xlu0.b32.cont [6/8] (short) (narrow) %v10721_v43, 8 }
 0xa0d   : > { %4242 = vxpose.xlu0.b32.cont [7/8] (short) (narrow) %v10743_v26, 8 }
 0xa11   : > { %4243 = vxpose.xlu0.b32.end [8/8] (short) (narrow) %v4235_v34, 8 }
 0xa14   : > { %v4129_v35 = vpop.trf.xlu1 }
 0xa15   : > { %v4005_v30 = vpop.trf.xlu0  ;;  %4145 = vst.msk [vmem:[#allocation6 + $0xa0] sm:$0xff] %vm3321_vm6, %v4129_v35 }
 0xa16   : > { %4021 = vst.msk [vmem:[#allocation6 + $0x88] sm:$0xff] %vm3321_vm6, %v4005_v30 }
 0xa1c   : > { %v4332_v62 = vld [vmem:[#allocation6 + $0xa0] sm:$0xff] }
 0xa1d   : > { %v4329_v36 = vld [vmem:[#allocation6 + $0x88] sm:$0xff] }
 0xa1e   : > { %v7578_v45 = vpack.c.bf16 %v4329_v36, %v4328_v10 }
 0xa20   : > { %7579 = vmatpush1.bf16.msra.mxu1 %v7578_v45  ;;  %v4670_v45 = vld [vmem:[#allocation4] sm:$0xff] }
 0xa21   : > { %7580 = vmatprep.subr.bf16.mxu1 %v8870_v29 }
 0xa34   : > { %v4211_v49 = vpop.trf.xlu1 }
 0xa35   : > { %v4087_v25 = vpop.trf.xlu0  ;;  %4227 = vst.msk [vmem:[#allocation6 + $0xb0] sm:$0xff] %vm3321_vm6, %v4211_v49 }
 0xa36   : > { %4103 = vst.msk [vmem:[#allocation6 + $0x98] sm:$0xff] %vm3321_vm6, %v4087_v25  ;;  %v4770_v25 = vld [vmem:[#allocation4 + $0x1] sm:$0xff] }
 0xa3c   : > { %v4334_v53 = vld [vmem:[#allocation6 + $0xb0] sm:$0xff] }
 0xa3d   : > { %v4331_v54 = vld [vmem:[#allocation6 + $0x98] sm:$0xff] }
 0xa3e   : > { %v7581_v43 = vpack.c.bf16 %v4331_v54, %v4330_v6 }
 0xa40   : > { %7582 = vmatpush1.bf16.msra.mxu1 %v7581_v43 }
 0xa41   : > { %7583 = vmatprep.subr.bf16.mxu1 %v8870_v29 }
 0xa54   : > { %v4293_v19 = vpop.trf.xlu1 }
 0xa55   : > { %v4170_v26 = vpop.trf.xlu0  ;;  %4309 = vst.msk [vmem:[#allocation6 + $0xc0] sm:$0xff] %vm3321_vm6, %v4293_v19  ;;  %v4671_v19 = vld [vmem:[#allocation4 + $0x8] sm:$0xff] }
 0xa56   : > { %4186 = vst.msk [vmem:[#allocation6 + $0xa8] sm:$0xff] %vm3321_vm6, %v4170_v26 }
 0xa5c   : > { %v4336_v2 = vld [vmem:[#allocation6 + $0xc0] sm:$0xff] }
 0xa5d   : > { %v4333_v4 = vld [vmem:[#allocation6 + $0xa8] sm:$0xff] }
 0xa5e   : > { %v7584_v17 = vpack.c.bf16 %v4333_v4, %v4332_v62  ;;  %v4771_v62 = vld [vmem:[#allocation4 + $0x9] sm:$0xff] }
 0xa60   : > { %7585 = vmatpush1.bf16.msra.mxu1 %v7584_v17 }
 0xa61   : > { %7586 = vmatprep.subr.bf16.mxu1 %v8870_v29  ;;  %v4419_v29 = vld [vmem:[%s11830_s7 + $0x10] sm:$0xff] }
 0xa62   : > { %v7591_v5 = vpack.c.bf16 %v4419_v29, %v4417_v55 }
 0xa75   : > { %v4252_v52 = vpop.trf.xlu0 }
 0xa76   : > { %4268 = vst.msk [vmem:[#allocation6 + $0xb8] sm:$0xff] %vm3321_vm6, %v4252_v52 }
 0xa7d   : > { %v4335_v57 = vld [vmem:[#allocation6 + $0xb8] sm:$0xff] }
 0xa7e   : > { %v7587_v63 = vpack.c.bf16 %v4335_v57, %v4334_v53 }
 0xa80   : > { %7588 = vmatpush1.bf16.msra.mxu1 %v7587_v63  ;;  %v4672_v63 = vld [vmem:[#allocation4 + $0x18] sm:$0xff] }
 0xa81   : > { %4395 = vmatprep.subr.mxu1 %v12331_v22 }
 0xa84   : > { %4396 = vmatpush1.msra.mxu1 %v4336_v2  ;;  %v4673_v2 = vld [vmem:[#allocation4 + $0x20] sm:$0xff] }
 0xa85   : > { %4412 = vmatmul.mubr.f32.vlgmr.msra.gmra.mrb[0].mxu1 %v4310_v3  ;;  %7590 = vmatprep.subr.bf16.mxu1 %v7589_v40  ;;  %v4773_v40 = vld [vmem:[#allocation4 + $0x21] sm:$0xff] }
 0xa86   : > { %7592 = vmatpush1.bf16.msra.mxu1 %v7591_v5  ;;  %4500 = vmatprep.mubr.f32.mxu1 %v12331_v22 }
 0xa87   : > { %7594 = vmatprep.subr.bf16.mxu1 %v7593_v9 }
 0xa8a   : > { %7596 = vmatpush1.bf16.msra.mxu1 %v7595_v15 }
 0xa8b   : > { %7598 = vmatprep.subr.bf16.mxu1 %v7597_v23 }
 0xa8e   : > { %7600 = vmatpush1.bf16.msra.mxu1 %v7599_v59 }
 0xa8f   : > { %7602 = vmatprep.subr.bf16.mxu1 %v7601_v16 }
 0xa92   : > { %7604 = vmatpush1.bf16.msra.mxu1 %v7603_v7 }
 0xb58   : > { %v4413_v21 = vpop.f32.mrb[0].mxu1 }
 0xb59   : > { %v4414_v50 = vadd.f32 %v4413_v21, %v10737_v58  ;;  %v4415_v60 = vpop.f32.mrb[1].mxu1 }
 0xb5b   : > { %7520 = vmatmul.mubr.msk.f32.vlgmr.msra.gmra.mrb[2].mxu1 %vm3321_vm6, %v4414_v50 }
 0xc2e   : > { %v4502_v58 = vpop.f32.mrb[2].mxu1 }
 0xc2f   : > { %v4507_v61 = vmax.f32 %v4502_v58, 0.0  ;;  %v4504_v44 = vpop.f32.mrb[3].mxu1 }
 0xc30   : > { %v4508_v31 = vmax.f32 %v4504_v44, 0.0 }
 0xc31   : > { %4511 = vxpose.xlu1.b32.start [1/2] (short) %v4507_v61, 128 }
 0xc35   : > { %4512 = vxpose.xlu1.b32.end [2/2] (short) %v4509_v14, 128 }
 0xc6e   : > { %4543 = vxpose.xlu1.b32.start [1/2] (short) %v4508_v31, 128 }
 0xc72   : > { %4544 = vxpose.xlu1.b32.end [2/2] (short) %v4510_v37, 128 }
 0xcb1   : > { %v4527_v18 = vpop.trf.xlu1 }
 0xcb2   : > { %4638 = vst.msk [vmem:[#allocation4 + $0x32] sm:$0xff] %vm4575_vm8, %v4527_v18 }
 0xcb5   : > { %v4528_v38 = vpop.trf.xlu1 }
 0xcb6   : > { %4639 = vst.msk [vmem:[#allocation4 + $0x3a] sm:$0xff] %vm4575_vm8, %v4528_v38 }
 0xcb9   : > { %v4529_v27 = vpop.trf.xlu1  ;;  %v4774_v56 = vld [vmem:[#allocation4 + $0x31] sm:$0xff] }
 0xcba   : > { %4640 = vst.msk [vmem:[#allocation4 + $0x4a] sm:$0xff] %vm4575_vm8, %v4529_v27  ;;  %v4674_v23 = vld [vmem:[#allocation4 + $0x30] sm:$0xff] }
 0xcbd   : > { %v4530_v11 = vpop.trf.xlu1  ;;  %v4775_v42 = vld [vmem:[#allocation4 + $0x39] sm:$0xff] }
 0xcbe   : > { %4641 = vst.msk [vmem:[#allocation4 + $0x52] sm:$0xff] %vm4575_vm8, %v4530_v11  ;;  %v4675_v48 = vld [vmem:[#allocation4 + $0x38] sm:$0xff] }
 0xcc1   : > { %v4531_v39 = vpop.trf.xlu1  ;;  %v4776_v50 = vld [vmem:[#allocation4 + $0x49] sm:$0xff] }
 0xcc2   : > { %4642 = vst.msk [vmem:[#allocation4 + $0x62] sm:$0xff] %vm4575_vm8, %v4531_v39  ;;  %v4676_v61 = vld [vmem:[#allocation4 + $0x48] sm:$0xff] }
 0xcc5   : > { %v4532_v22 = vpop.trf.xlu1  ;;  %v4777_v37 = vld [vmem:[#allocation4 + $0x51] sm:$0xff] }
 0xcc6   : > { %4643 = vst.msk [vmem:[#allocation4 + $0x6a] sm:$0xff] %vm4575_vm8, %v4532_v22  ;;  %v4677_v27 = vld [vmem:[#allocation4 + $0x50] sm:$0xff] }
 0xcc9   : > { %v4533_v24 = vpop.trf.xlu1 }
 0xcca   : > { %4644 = vst.msk [vmem:[#allocation4 + $0x7a] sm:$0xff] %vm4575_vm8, %v4533_v24  ;;  %v4778_v24 = vld [vmem:[#allocation4 + $0x61] sm:$0xff] }
 0xccd   : > { %v4534_v28 = vpop.trf.xlu1 }
 0xcce   : > { %4645 = vst.msk [vmem:[#allocation4 + $0x82] sm:$0xff] %vm4575_vm8, %v4534_v28 }
 0xcd1   : > { %v4535_v41 = vpop.trf.xlu1 }
 0xcd2   : > { %4646 = vst.msk [vmem:[#allocation4 + $0x92] sm:$0xff] %vm4575_vm8, %v4535_v41 }
 0xcd5   : > { %v4536_v34 = vpop.trf.xlu1 }
 0xcd6   : > { %4647 = vst.msk [vmem:[#allocation4 + $0x9a] sm:$0xff] %vm4575_vm8, %v4536_v34  ;;  %v4678_v34 = vld [vmem:[#allocation4 + $0x60] sm:$0xff] }
 0xcd9   : > { %v4537_v30 = vpop.trf.xlu1 }
 0xcda   : > { %4648 = vst.msk [vmem:[#allocation4 + $0xaa] sm:$0xff] %vm4575_vm8, %v4537_v30 }
 0xcdd   : > { %v4538_v35 = vpop.trf.xlu1 }
 0xcde   : > { %4649 = vst.msk [vmem:[#allocation4 + $0xb2] sm:$0xff] %vm4575_vm8, %v4538_v35 }
 0xce1   : > { %v4539_v10 = vpop.trf.xlu1 }
 0xce2   : > { %4650 = vst.msk [vmem:[#allocation4 + $0xc2] sm:$0xff] %vm4575_vm8, %v4539_v10 }
 0xce5   : > { %v4540_v36 = vpop.trf.xlu1 }
 0xce6   : > { %4651 = vst.msk [vmem:[#allocation4 + $0xca] sm:$0xff] %vm4575_vm8, %v4540_v36  ;;  %v4779_v36 = vld [vmem:[#allocation4 + $0x69] sm:$0xff] }
 0xce9   : > { %v4541_v49 = vpop.trf.xlu1  ;;  %v4686_v6 = vld [vmem:[#allocation4 + $0xc0] sm:$0xff] }
 0xcea   : > { %v11025_v54 = vld [vmem:[#allocation4 + $0xc1] sm:$0xff]  ;;  %4652 = vst.msk [vmem:[#allocation4 + $0xda] sm:$0xff] %vm4575_vm8, %v4541_v49  ;;  %v7752_v43 = vpack.i.bf16 %v4686_v6, %v4670_v45 }
 0xceb   : > { %v7794_v26 = vpack.i.bf16 %v11025_v54, %v4770_v25  ;;  %v4679_v49 = vld [vmem:[#allocation4 + $0x68] sm:$0xff] }
 0xcec   : > { %7753 = vxpose.xlu0.b32.start [1/16] (narrow) %v7752_v43, 16 }
 0xced   : > { %7795 = vxpose.xlu1.b32.start [1/16] (narrow) %v7794_v26, 16  ;;  %v4542_v4 = vpop.trf.xlu1  ;;  %v4687_v17 = vld [vmem:[#allocation4 + $0xc8] sm:$0xff] }
 0xcee   : > { %v11029_v52 = vld [vmem:[#allocation4 + $0xc9] sm:$0xff]  ;;  %4653 = vst.msk [vmem:[#allocation4 + $0xe2] sm:$0xff] %vm4575_vm8, %v4542_v4  ;;  %v7754_v53 = vpack.i.bf16 %v4687_v17, %v4671_v19  ;;  %v4780_v19 = vld [vmem:[#allocation4 + $0x79] sm:$0xff] }
 0xcef   : > { %v7796_v57 = vpack.i.bf16 %v11029_v52, %v4771_v62  ;;  %v4680_v17 = vld [vmem:[#allocation4 + $0x78] sm:$0xff] }
 0xcf0   : > { %7755 = vxpose.xlu0.b32.cont [2/16] (narrow) %v7754_v53, 16 }
 0xcf1   : > { %7797 = vxpose.xlu1.b32.cont [2/16] (narrow) %v7796_v57, 16  ;;  %v4559_v0 = vpop.trf.xlu1  ;;  %v4688_v55 = vld [vmem:[#allocation4 + $0xd8] sm:$0xff] }
 0xcf2   : > { %v4788_v29 = vld [vmem:[#allocation4 + $0xd9] sm:$0xff]  ;;  %4654 = vst.msk [vmem:[#allocation4 + $0xf2] sm:$0xff] %vm4575_vm8, %v4559_v0  ;;  %v11034_v46 = vpack.i.bf16 %v4688_v55, %v4672_v63 }
 0xcf3   : > { %v11036_v47 = vpack.i.bf16 %v4788_v29, %v4772_v1  ;;  %v4781_v1 = vld [vmem:[#allocation4 + $0x81] sm:$0xff] }
 0xcf4   : > { %7757 = vxpose.xlu0.b32.cont [3/16] (narrow) %v11034_v46, 16  ;;  %v4681_v29 = vld [vmem:[#allocation4 + $0x80] sm:$0xff] }
 0xcf5   : > { %7799 = vxpose.xlu1.b32.cont [3/16] (narrow) %v11036_v47, 16  ;;  %v4560_v3 = vpop.trf.xlu1  ;;  %v4689_v5 = vld [vmem:[#allocation4 + $0xe0] sm:$0xff] }
 0xcf6   : > { %v4789_v9 = vld [vmem:[#allocation4 + $0xe1] sm:$0xff]  ;;  %4655 = vst.msk [vmem:[#allocation4 + $0xfa] sm:$0xff] %vm4575_vm8, %v4560_v3  ;;  %v11041_v32 = vpack.i.bf16 %v4689_v5, %v4673_v2  ;;  %v4782_v5 = vld [vmem:[#allocation4 + $0x91] sm:$0xff] }
 0xcf7   : > { %v11043_v12 = vpack.i.bf16 %v4789_v9, %v4773_v40 }
 0xcf8   : > { %7759 = vxpose.xlu0.b32.cont [4/16] (narrow) %v11041_v32, 16 }
 0xcf9   : > { %7801 = vxpose.xlu1.b32.cont [4/16] (narrow) %v11043_v12, 16  ;;  %v4561_v13 = vpop.trf.xlu1  ;;  %v4790_v15 = vld [vmem:[#allocation4 + $0xf1] sm:$0xff] }
 0xcfa   : > { %v4690_v51 = vld [vmem:[#allocation4 + $0xf0] sm:$0xff]  ;;  %4656 = vst.msk [vmem:[#allocation4 + $0x10a] sm:$0xff] %vm4575_vm8, %v4561_v13  ;;  %v11048_v8 = vpack.i.bf16 %v4790_v15, %v4774_v56 }
 0xcfb   : > { %v11050_v33 = vpack.i.bf16 %v4690_v51, %v4674_v23  ;;  %v4682_v13 = vld [vmem:[#allocation4 + $0x90] sm:$0xff] }
 0xcfd   : > { %7803 = vxpose.xlu1.b32.cont [5/16] (narrow) %v11048_v8, 16  ;;  %7761 = vxpose.xlu0.b32.cont [5/16] (narrow) %v11050_v33, 16  ;;  %v4562_v59 = vpop.trf.xlu1  ;;  %v4791_v16 = vld [vmem:[#allocation4 + $0xf9] sm:$0xff] }
 0xcfe   : > { %v4691_v20 = vld [vmem:[#allocation4 + $0xf8] sm:$0xff]  ;;  %4657 = vst.msk [vmem:[#allocation4 + $0x112] sm:$0xff] %vm4575_vm8, %v4562_v59  ;;  %v11055_v7 = vpack.i.bf16 %v4791_v16, %v4775_v42 }
 0xcff   : > { %v11057_v21 = vpack.i.bf16 %v4691_v20, %v4675_v48  ;;  %v4783_v42 = vld [vmem:[#allocation4 + $0x99] sm:$0xff] }
 0xd00   : > { %v4683_v48 = vld [vmem:[#allocation4 + $0x98] sm:$0xff] }
 0xd01   : > { %7805 = vxpose.xlu1.b32.cont [6/16] (narrow) %v11055_v7, 16  ;;  %7763 = vxpose.xlu0.b32.cont [6/16] (narrow) %v11057_v21, 16  ;;  %v4563_v60 = vpop.trf.xlu1  ;;  %v4792_v58 = vld [vmem:[#allocation4 + $0x109] sm:$0xff] }
 0xd02   : > { %v4692_v44 = vld [vmem:[#allocation4 + $0x108] sm:$0xff]  ;;  %4658 = vst.msk [vmem:[#allocation4 + $0x122] sm:$0xff] %vm4575_vm8, %v4563_v60  ;;  %v11062_v14 = vpack.i.bf16 %v4792_v58, %v4776_v50 }
 0xd03   : > { %v11064_v31 = vpack.i.bf16 %v4692_v44, %v4676_v61  ;;  %v4784_v58 = vld [vmem:[#allocation4 + $0xa9] sm:$0xff] }
 0xd05   : > { %7807 = vxpose.xlu1.b32.cont [7/16] (narrow) %v11062_v14, 16  ;;  %7765 = vxpose.xlu0.b32.cont [7/16] (narrow) %v11064_v31, 16  ;;  %v4564_v18 = vpop.trf.xlu1  ;;  %v4793_v38 = vld [vmem:[#allocation4 + $0x111] sm:$0xff] }
 0xd06   : > { %v4693_v11 = vld [vmem:[#allocation4 + $0x110] sm:$0xff]  ;;  %4659 = vst.msk [vmem:[#allocation4 + $0x12a] sm:$0xff] %vm4575_vm8, %v4564_v18  ;;  %v11069_v39 = vpack.i.bf16 %v4793_v38, %v4777_v37  ;;  %v4684_v37 = vld [vmem:[#allocation4 + $0xa8] sm:$0xff] }
 0xd07   : > { %v11071_v22 = vpack.i.bf16 %v4693_v11, %v4677_v27  ;;  %v4785_v11 = vld [vmem:[#allocation4 + $0xb1] sm:$0xff] }
 0xd09   : > { %7809 = vxpose.xlu1.b32.cont [8/16] (narrow) %v11069_v39, 16  ;;  %7767 = vxpose.xlu0.b32.cont [8/16] (narrow) %v11071_v22, 16  ;;  %v4565_v28 = vpop.trf.xlu1  ;;  %v4794_v41 = vld [vmem:[#allocation4 + $0x121] sm:$0xff] }
 0xd0a   : > { %v4694_v30 = vld [vmem:[#allocation4 + $0x120] sm:$0xff]  ;;  %4660 = vst.msk [vmem:[#allocation4 + $0x13a] sm:$0xff] %vm4575_vm8, %v4565_v28  ;;  %v11076_v35 = vpack.i.bf16 %v4794_v41, %v4778_v24  ;;  %v4685_v41 = vld [vmem:[#allocation4 + $0xb0] sm:$0xff] }
 0xd0b   : > { %v11078_v10 = vpack.i.bf16 %v4694_v30, %v4678_v34 }
 0xd0d   : > { %7811 = vxpose.xlu1.b32.cont [9/16] (narrow) %v11076_v35, 16  ;;  %7769 = vxpose.xlu0.b32.cont [9/16] (narrow) %v11078_v10, 16  ;;  %v4566_v45 = vpop.trf.xlu1  ;;  %v4795_v25 = vld [vmem:[#allocation4 + $0x129] sm:$0xff] }
 0xd0e   : > { %v4695_v6 = vld [vmem:[#allocation4 + $0x128] sm:$0xff]  ;;  %4661 = vst.msk [vmem:[#allocation4 + $0x142] sm:$0xff] %vm4575_vm8, %v4566_v45  ;;  %v11083_v43 = vpack.i.bf16 %v4795_v25, %v4779_v36 }
 0xd0f   : > { %v11085_v26 = vpack.i.bf16 %v4695_v6, %v4679_v49  ;;  %v4870_v45 = vld [vmem:[#allocation4 + $0x2] sm:$0xff] }
 0xd10   : > { %v5070_v25 = vld [vmem:[#allocation4 + $0x4] sm:$0xff] }
 0xd11   : > { %7813 = vxpose.xlu1.b32.cont [10/16] (narrow) %v11083_v43, 16  ;;  %7771 = vxpose.xlu0.b32.cont [10/16] (narrow) %v11085_v26, 16  ;;  %v4567_v62 = vpop.trf.xlu1  ;;  %v4796_v4 = vld [vmem:[#allocation4 + $0x139] sm:$0xff]  ;;  %v5086_v49 = vld [vmem:[#allocation4 + $0xc4] sm:$0xff] }
 0xd12   : > { %v4696_v53 = vld [vmem:[#allocation4 + $0x138] sm:$0xff]  ;;  %4662 = vst.msk [vmem:[#allocation4 + $0x152] sm:$0xff] %vm4575_vm8, %v4567_v62  ;;  %v11090_v57 = vpack.i.bf16 %v4796_v4, %v4780_v19  ;;  %v11129_v6 = vld [vmem:[#allocation4 + $0xc2] sm:$0xff]  ;;  %v7920_v62 = vpack.i.bf16 %v5086_v49, %v5070_v25 }
 0xd13   : > { %v11092_v63 = vpack.i.bf16 %v4696_v53, %v4680_v17  ;;  %v7836_v4 = vpack.i.bf16 %v11129_v6, %v4870_v45  ;;  %v5071_v17 = vld [vmem:[#allocation4 + $0xc] sm:$0xff]  ;;  %v5075_v45 = vld [vmem:[#allocation4 + $0x3c] sm:$0xff] }
 0xd14   : > { %v5087_v53 = vld [vmem:[#allocation4 + $0xcc] sm:$0xff]  ;;  %v4875_v25 = vld [vmem:[#allocation4 + $0x3a] sm:$0xff] }
 0xd15   : > { %7815 = vxpose.xlu1.b32.cont [11/16] (narrow) %v11090_v57, 16  ;;  %7773 = vxpose.xlu0.b32.cont [11/16] (narrow) %v11092_v63, 16  ;;  %v4568_v0 = vpop.trf.xlu1  ;;  %v4797_v55 = vld [vmem:[#allocation4 + $0x141] sm:$0xff] }
 0xd16   : > { %v4697_v2 = vld [vmem:[#allocation4 + $0x140] sm:$0xff]  ;;  %4663 = vst.msk [vmem:[#allocation4 + $0x15a] sm:$0xff] %vm4575_vm8, %v4568_v0  ;;  %v11097_v40 = vpack.i.bf16 %v4797_v55, %v4781_v1  ;;  %v4871_v1 = vld [vmem:[#allocation4 + $0xa] sm:$0xff] }
 0xd17   : > { %v11099_v3 = vpack.i.bf16 %v4697_v2, %v4681_v29  ;;  %v11135_v0 = vld [vmem:[#allocation4 + $0xca] sm:$0xff]  ;;  %v7922_v29 = vpack.i.bf16 %v5087_v53, %v5071_v17 }
 0xd18   : > { %v7838_v2 = vpack.i.bf16 %v11135_v0, %v4871_v1  ;;  %v5076_v17 = vld [vmem:[#allocation4 + $0x4c] sm:$0xff] }
 0xd19   : > { %7817 = vxpose.xlu1.b32.cont [12/16] (narrow) %v11097_v40, 16  ;;  %7775 = vxpose.xlu0.b32.cont [12/16] (narrow) %v11099_v3, 16  ;;  %v4569_v9 = vpop.trf.xlu1  ;;  %v4798_v56 = vld [vmem:[#allocation4 + $0x151] sm:$0xff] }
 0xd1a   : > { %v4698_v15 = vld [vmem:[#allocation4 + $0x150] sm:$0xff]  ;;  %4664 = vst.msk [vmem:[#allocation4 + $0x16a] sm:$0xff] %vm4575_vm8, %v4569_v9  ;;  %v11104_v23 = vpack.i.bf16 %v4798_v56, %v4782_v5  ;;  %v4872_v5 = vld [vmem:[#allocation4 + $0x1a] sm:$0xff] }
 0xd1b   : > { %v11106_v51 = vpack.i.bf16 %v4698_v15, %v4682_v13  ;;  %v5072_v9 = vld [vmem:[#allocation4 + $0x1c] sm:$0xff]  ;;  %v4876_v53 = vld [vmem:[#allocation4 + $0x4a] sm:$0xff] }
 0xd1c   : > { %v5088_v56 = vld [vmem:[#allocation4 + $0xdc] sm:$0xff] }
 0xd1d   : > { %7819 = vxpose.xlu1.b32.cont [13/16] (narrow) %v11104_v23, 16  ;;  %7777 = vxpose.xlu0.b32.cont [13/16] (narrow) %v11106_v51, 16  ;;  %v4570_v59 = vpop.trf.xlu1  ;;  %v4799_v16 = vld [vmem:[#allocation4 + $0x159] sm:$0xff]  ;;  %v11139_v15 = vpack.i.bf16 %v5088_v56, %v5072_v9 }
 0xd1e   : > { %v4699_v20 = vld [vmem:[#allocation4 + $0x158] sm:$0xff]  ;;  %4665 = vst.msk [vmem:[#allocation4 + $0x172] sm:$0xff] %vm4575_vm8, %v4570_v59  ;;  %v11111_v50 = vpack.i.bf16 %v4799_v16, %v4783_v42  ;;  %v5073_v59 = vld [vmem:[#allocation4 + $0x24] sm:$0xff] }
 0xd1f   : > { %v11113_v60 = vpack.i.bf16 %v4699_v20, %v4683_v48  ;;  %v4888_v13 = vld [vmem:[#allocation4 + $0xda] sm:$0xff]  ;;  %v5089_v16 = vld [vmem:[#allocation4 + $0xe4] sm:$0xff]  ;;  %v4877_v9 = vld [vmem:[#allocation4 + $0x52] sm:$0xff] }
 0xd20   : > { %v11141_v42 = vpack.i.bf16 %v4888_v13, %v4872_v5  ;;  %v4873_v48 = vld [vmem:[#allocation4 + $0x22] sm:$0xff]  ;;  %v5077_v5 = vld [vmem:[#allocation4 + $0x54] sm:$0xff] }
 0xd21   : > { %7821 = vxpose.xlu1.b32.cont [14/16] (narrow) %v11111_v50, 16  ;;  %7779 = vxpose.xlu0.b32.cont [14/16] (narrow) %v11113_v60, 16  ;;  %v4571_v61 = vpop.trf.xlu1  ;;  %v4800_v44 = vld [vmem:[#allocation4 + $0x169] sm:$0xff] }
 0xd22   : > { %v4700_v18 = vld [vmem:[#allocation4 + $0x168] sm:$0xff]  ;;  %4666 = vst.msk [vmem:[#allocation4 + $0x182] sm:$0xff] %vm4575_vm8, %v4571_v61  ;;  %v11118_v38 = vpack.i.bf16 %v4800_v44, %v4784_v58  ;;  %v11145_v58 = vpack.i.bf16 %v5089_v16, %v5073_v59  ;;  %v5090_v44 = vld [vmem:[#allocation4 + $0xf4] sm:$0xff] }
 0xd23   : > { %v11120_v27 = vpack.i.bf16 %v4700_v18, %v4684_v37  ;;  %v4889_v20 = vld [vmem:[#allocation4 + $0xe2] sm:$0xff]  ;;  %v4890_v37 = vld [vmem:[#allocation4 + $0xf2] sm:$0xff] }
 0xd24   : > { %v11147_v61 = vpack.i.bf16 %v4889_v20, %v4873_v48  ;;  %v5074_v18 = vld [vmem:[#allocation4 + $0x34] sm:$0xff]  ;;  %v5094_v59 = vld [vmem:[#allocation4 + $0x124] sm:$0xff] }
 0xd25   : > { %7823 = vxpose.xlu1.b32.cont [15/16] (narrow) %v11118_v38, 16  ;;  %7781 = vxpose.xlu0.b32.cont [15/16] (narrow) %v11120_v27, 16  ;;  %v4572_v24 = vpop.trf.xlu1  ;;  %v4801_v28 = vld [vmem:[#allocation4 + $0x171] sm:$0xff]  ;;  %v4894_v16 = vld [vmem:[#allocation4 + $0x122] sm:$0xff] }
 0xd26   : > { %v4701_v34 = vld [vmem:[#allocation4 + $0x170] sm:$0xff]  ;;  %4667 = vst.msk [vmem:[#allocation4 + $0x18a] sm:$0xff] %vm4575_vm8, %v4572_v24  ;;  %v11125_v30 = vpack.i.bf16 %v4801_v28, %v4785_v11  ;;  %v11151_v24 = vpack.i.bf16 %v5090_v44, %v5074_v18  ;;  %v5078_v48 = vld [vmem:[#allocation4 + $0x64] sm:$0xff] }
 0xd27   : > { %v11127_v36 = vpack.i.bf16 %v4701_v34, %v4685_v41  ;;  %v4874_v11 = vld [vmem:[#allocation4 + $0x32] sm:$0xff]  ;;  %v5091_v41 = vld [vmem:[#allocation4 + $0xfc] sm:$0xff]  ;;  %v11175_v44 = vpack.i.bf16 %v5094_v59, %v5078_v48  ;;  %v5081_v59 = vld [vmem:[#allocation4 + $0x84] sm:$0xff] }
 0xd28   : > { %v11153_v28 = vpack.i.bf16 %v4890_v37, %v4874_v11  ;;  %v4891_v34 = vld [vmem:[#allocation4 + $0xfa] sm:$0xff]  ;;  %v11157_v49 = vpack.i.bf16 %v5091_v41, %v5075_v45  ;;  %v4878_v20 = vld [vmem:[#allocation4 + $0x62] sm:$0xff]  ;;  %v5095_v18 = vld [vmem:[#allocation4 + $0x12c] sm:$0xff] }
 0xd29   : > { %7825 = vxpose.xlu1.b32.end [16/16] (narrow) %v11125_v30, 16  ;;  %7783 = vxpose.xlu0.b32.end [16/16] (narrow) %v11127_v36, 16  ;;  %v4573_v19 = vpop.trf.xlu1  ;;  %12333 = vst [vmem:[#allocation92_spill] sm:$0xff] %v11175_v44  ;;  %v11177_v37 = vpack.i.bf16 %v4894_v16, %v4878_v20  ;;  %v4895_v11 = vld [vmem:[#allocation4 + $0x12a] sm:$0xff]  ;;  %v4881_v16 = vld [vmem:[#allocation4 + $0x82] sm:$0xff] }
 0xd2a   : > { %4668 = vst.msk [vmem:[#allocation4 + $0x19a] sm:$0xff] %vm4575_vm8, %v4573_v19  ;;  %v11159_v19 = vpack.i.bf16 %v4891_v34, %v4875_v25  ;;  %v5079_v41 = vld [vmem:[#allocation4 + $0x6c] sm:$0xff] }
 0xd2b   : > { %v4879_v34 = vld [vmem:[#allocation4 + $0x6a] sm:$0xff]  ;;  %v11181_v45 = vpack.i.bf16 %v5095_v18, %v5079_v41  ;;  %v5098_v18 = vld [vmem:[#allocation4 + $0x154] sm:$0xff] }
 0xd2c   : > { %v11183_v25 = vpack.i.bf16 %v4895_v11, %v4879_v34  ;;  %v4898_v11 = vld [vmem:[#allocation4 + $0x152] sm:$0xff] }
 0xd2d   : > { %7921 = vxpose.xlu1.b32.start [1/16] (narrow) %v7920_v62, 16  ;;  %7837 = vxpose.xlu0.b32.start [1/16] (narrow) %v7836_v4, 16  ;;  %v4574_v55 = vpop.trf.xlu1  ;;  %v5092_v62 = vld [vmem:[#allocation4 + $0x10c] sm:$0xff]  ;;  %12334 = vst [vmem:[#allocation93_spill] sm:$0xff] %v11181_v45  ;;  %v5082_v41 = vld [vmem:[#allocation4 + $0x94] sm:$0xff] }
 0xd2e   : > { %4669 = vst.msk [vmem:[#allocation4 + $0x1a2] sm:$0xff] %vm4575_vm8, %v4574_v55  ;;  %v4892_v4 = vld [vmem:[#allocation4 + $0x10a] sm:$0xff]  ;;  %v11163_v1 = vpack.i.bf16 %v5092_v62, %v5076_v17  ;;  %v5096_v62 = vld [vmem:[#allocation4 + $0x13c] sm:$0xff]  ;;  %v4882_v34 = vld [vmem:[#allocation4 + $0x92] sm:$0xff] }
 0xd2f   : > { %v11165_v55 = vpack.i.bf16 %v4892_v4, %v4876_v53  ;;  %v4896_v4 = vld [vmem:[#allocation4 + $0x13a] sm:$0xff] }
 0xd30   : > { %v5080_v17 = vld [vmem:[#allocation4 + $0x7c] sm:$0xff] }
 0xd31   : > { %7923 = vxpose.xlu1.b32.cont [2/16] (narrow) %v7922_v29, 16  ;;  %7839 = vxpose.xlu0.b32.cont [2/16] (narrow) %v7838_v2, 16  ;;  %v5093_v29 = vld [vmem:[#allocation4 + $0x114] sm:$0xff] }
 0xd32   : > { %v4893_v2 = vld [vmem:[#allocation4 + $0x112] sm:$0xff]  ;;  %v11169_v56 = vpack.i.bf16 %v5093_v29, %v5077_v5  ;;  %v4880_v53 = vld [vmem:[#allocation4 + $0x7a] sm:$0xff]  ;;  %v11187_v29 = vpack.i.bf16 %v5096_v62, %v5080_v17  ;;  %v5097_v5 = vld [vmem:[#allocation4 + $0x144] sm:$0xff]  ;;  %v11199_v62 = vpack.i.bf16 %v5098_v18, %v5082_v41 }
 0xd33   : > { %v11171_v13 = vpack.i.bf16 %v4893_v2, %v4877_v9  ;;  %v11189_v2 = vpack.i.bf16 %v4896_v4, %v4880_v53  ;;  %v4897_v9 = vld [vmem:[#allocation4 + $0x142] sm:$0xff]  ;;  %v11193_v48 = vpack.i.bf16 %v5097_v5, %v5081_v59  ;;  %v11201_v4 = vpack.i.bf16 %v4898_v11, %v4882_v34  ;;  %v4899_v53 = vld [vmem:[#allocation4 + $0x15a] sm:$0xff]  ;;  %v5084_v18 = vld [vmem:[#allocation4 + $0xac] sm:$0xff] }
 0xd34   : > { %12332 = vst [vmem:[#allocation91_spill] sm:$0xff] %v11169_v56  ;;  %12335 = vst [vmem:[#allocation94_spill] sm:$0xff] %v11187_v29  ;;  %v11195_v20 = vpack.i.bf16 %v4897_v9, %v4881_v16  ;;  %v5099_v17 = vld [vmem:[#allocation4 + $0x15c] sm:$0xff]  ;;  %v4884_v11 = vld [vmem:[#allocation4 + $0xaa] sm:$0xff] }
 0xd35   : > { %7925 = vxpose.xlu1.b32.cont [3/16] (narrow) %v11139_v15, 16  ;;  %7841 = vxpose.xlu0.b32.cont [3/16] (narrow) %v11141_v42, 16  ;;  %12336 = vst [vmem:[#allocation95_spill] sm:$0xff] %v11193_v48  ;;  %12337 = vst [vmem:[#allocation96_spill] sm:$0xff] %v11199_v62  ;;  %v5083_v5 = vld [vmem:[#allocation4 + $0x9c] sm:$0xff] }
 0xd36   : > { %v4883_v9 = vld [vmem:[#allocation4 + $0x9a] sm:$0xff]  ;;  %v11205_v59 = vpack.i.bf16 %v5099_v17, %v5083_v5 }
 0xd37   : > { %v11207_v16 = vpack.i.bf16 %v4899_v53, %v4883_v9  ;;  %v5085_v17 = vld [vmem:[#allocation4 + $0xb4] sm:$0xff] }
 0xd38   : > { %12338 = vst [vmem:[#allocation74_spill] sm:$0xff] %v11205_v59  ;;  %v4885_v53 = vld [vmem:[#allocation4 + $0xb2] sm:$0xff] }
 0xd39   : > { %7927 = vxpose.xlu1.b32.cont [4/16] (narrow) %v11145_v58, 16  ;;  %7843 = vxpose.xlu0.b32.cont [4/16] (narrow) %v11147_v61, 16 }
 0xd3d   : > { %7929 = vxpose.xlu1.b32.cont [5/16] (narrow) %v11151_v24, 16  ;;  %7845 = vxpose.xlu0.b32.cont [5/16] (narrow) %v11153_v28, 16 }
 0xd41   : > { %7931 = vxpose.xlu1.b32.cont [6/16] (narrow) %v11157_v49, 16  ;;  %7847 = vxpose.xlu0.b32.cont [6/16] (narrow) %v11159_v19, 16 }
 0xd45   : > { %7933 = vxpose.xlu1.b32.cont [7/16] (narrow) %v11163_v1, 16  ;;  %7849 = vxpose.xlu0.b32.cont [7/16] (narrow) %v11165_v55, 16 }
 0xd49   : > { %7935 = vxpose.xlu1.b32.cont [8/16] (narrow) %v11169_v56, 16  ;;  %7851 = vxpose.xlu0.b32.cont [8/16] (narrow) %v11171_v13, 16  ;;  %v4996_v56 = vld [vmem:[#allocation4 + $0x13b] sm:$0xff] }
 0xd4d   : > { %7937 = vxpose.xlu1.b32.cont [9/16] (narrow) %v11175_v44, 16  ;;  %7853 = vxpose.xlu0.b32.cont [9/16] (narrow) %v11177_v37, 16  ;;  %v11221_v44 = vld [vmem:[#allocation4 + $0xc3] sm:$0xff] }
 0xd51   : > { %7939 = vxpose.xlu1.b32.cont [10/16] (narrow) %v11181_v45, 16  ;;  %7855 = vxpose.xlu0.b32.cont [10/16] (narrow) %v11183_v25, 16  ;;  %v4901_v45 = vld [vmem:[#allocation4 + $0x172] sm:$0xff] }
 0xd52   : > { %v11219_v9 = vpack.i.bf16 %v4901_v45, %v4885_v53  ;;  %v4988_v45 = vld [vmem:[#allocation4 + $0xdb] sm:$0xff]  ;;  %v4973_v53 = vld [vmem:[#allocation4 + $0x23] sm:$0xff] }
 0xd55   : > { %7941 = vxpose.xlu1.b32.cont [11/16] (narrow) %v11187_v29, 16  ;;  %7857 = vxpose.xlu0.b32.cont [11/16] (narrow) %v11189_v2, 16  ;;  %v4900_v29 = vld [vmem:[#allocation4 + $0x16a] sm:$0xff] }
 0xd56   : > { %v11213_v34 = vpack.i.bf16 %v4900_v29, %v4884_v11  ;;  %v4972_v11 = vld [vmem:[#allocation4 + $0x1b] sm:$0xff] }
 0xd59   : > { %7943 = vxpose.xlu1.b32.cont [12/16] (narrow) %v11193_v48, 16  ;;  %7859 = vxpose.xlu0.b32.cont [12/16] (narrow) %v11195_v20, 16  ;;  %v5100_v48 = vld [vmem:[#allocation4 + $0x16c] sm:$0xff] }
 0xd5a   : > { %v11211_v41 = vpack.i.bf16 %v5100_v48, %v5084_v18  ;;  %v4971_v48 = vld [vmem:[#allocation4 + $0xb] sm:$0xff] }
 0xd5b   : > { %v11226_v18 = vld [vmem:[#allocation4 + $0xcb] sm:$0xff] }
 0xd5c   : > { %12339 = vst [vmem:[#allocation76_spill] sm:$0xff] %v11211_v41 }
 0xd5d   : > { %7945 = vxpose.xlu1.b32.cont [13/16] (narrow) %v11199_v62, 16  ;;  %7861 = vxpose.xlu0.b32.cont [13/16] (narrow) %v11201_v4, 16  ;;  %v5101_v62 = vld [vmem:[#allocation4 + $0x174] sm:$0xff] }
 0xd5e   : > { %v11217_v5 = vpack.i.bf16 %v5101_v62, %v5085_v17  ;;  %v7880_v62 = vpack.i.bf16 %v11226_v18, %v4971_v48  ;;  %v11231_v17 = vpack.i.bf16 %v4988_v45, %v4972_v11  ;;  %v4975_v48 = vld [vmem:[#allocation4 + $0x3b] sm:$0xff]  ;;  %v4993_v11 = vld [vmem:[#allocation4 + $0x113] sm:$0xff] }
 0xd60   : > { %12340 = vst [vmem:[#allocation15_spill] sm:$0xff] %v11217_v5 }
 0xd61   : > { %7947 = vxpose.xlu1.b32.cont [14/16] (narrow) %v11205_v59, 16  ;;  %7863 = vxpose.xlu0.b32.cont [14/16] (narrow) %v11207_v16, 16  ;;  %v4970_v59 = vld [vmem:[#allocation4 + $0x3] sm:$0xff] }
 0xd62   : > { %v7878_v29 = vpack.i.bf16 %v11221_v44, %v4970_v59 }
 0xd65   : > { %7949 = vxpose.xlu1.b32.cont [15/16] (narrow) %v11211_v41, 16  ;;  %7865 = vxpose.xlu0.b32.cont [15/16] (narrow) %v11213_v34, 16  ;;  %v4990_v41 = vld [vmem:[#allocation4 + $0xf3] sm:$0xff] }
 0xd69   : > { %7951 = vxpose.xlu1.b32.end [16/16] (narrow) %v11217_v5, 16  ;;  %7867 = vxpose.xlu0.b32.end [16/16] (narrow) %v11219_v9, 16  ;;  %v4989_v5 = vld [vmem:[#allocation4 + $0xe3] sm:$0xff] }
 0xd6a   : > { %v11235_v59 = vpack.i.bf16 %v4989_v5, %v4973_v53  ;;  %v4976_v5 = vld [vmem:[#allocation4 + $0x4b] sm:$0xff]  ;;  %v4994_v53 = vld [vmem:[#allocation4 + $0x123] sm:$0xff] }
 0xd6d   : > { %8005 = vxpose.xlu1.b32.start [1/16] (narrow) %v11036_v47, 16  ;;  %7879 = vxpose.xlu0.b32.start [1/16] (narrow) %v7878_v29, 16  ;;  %v4974_v47 = vld [vmem:[#allocation4 + $0x33] sm:$0xff] }
 0xd6e   : > { %v11239_v29 = vpack.i.bf16 %v4990_v41, %v4974_v47  ;;  %v4977_v41 = vld [vmem:[#allocation4 + $0x53] sm:$0xff] }
 0xd6f   : > { %v7892_v45 = vpack.i.bf16 %v4993_v11, %v4977_v41  ;;  %v4998_v41 = vld [vmem:[#allocation4 + $0x153] sm:$0xff] }
 0xd71   : > { %8007 = vxpose.xlu1.b32.cont [2/16] (narrow) %v11043_v12, 16  ;;  %7881 = vxpose.xlu0.b32.cont [2/16] (narrow) %v7880_v62, 16  ;;  %v4991_v12 = vld [vmem:[#allocation4 + $0xfb] sm:$0xff] }
 0xd72   : > { %v11243_v62 = vpack.i.bf16 %v4991_v12, %v4975_v48  ;;  %v4995_v12 = vld [vmem:[#allocation4 + $0x12b] sm:$0xff] }
 0xd75   : > { %8009 = vxpose.xlu1.b32.cont [3/16] (narrow) %v11048_v8, 16  ;;  %7883 = vxpose.xlu0.b32.cont [3/16] (narrow) %v11231_v17, 16  ;;  %v4992_v8 = vld [vmem:[#allocation4 + $0x10b] sm:$0xff] }
 0xd79   : > { %8011 = vxpose.xlu1.b32.cont [4/16] (narrow) %v11055_v7, 16  ;;  %7885 = vxpose.xlu0.b32.cont [4/16] (narrow) %v11235_v59, 16  ;;  %v7890_v7 = vpack.i.bf16 %v4992_v8, %v4976_v5  ;;  %v4997_v5 = vld [vmem:[#allocation4 + $0x143] sm:$0xff] }
 0xd7d   : > { %8013 = vxpose.xlu1.b32.cont [5/16] (narrow) %v11062_v14, 16  ;;  %7887 = vxpose.xlu0.b32.cont [5/16] (narrow) %v11239_v29, 16  ;;  %v4978_v14 = vld [vmem:[#allocation4 + $0x63] sm:$0xff] }
 0xd7e   : > { %v7894_v47 = vpack.i.bf16 %v4994_v53, %v4978_v14  ;;  %v4999_v14 = vld [vmem:[#allocation4 + $0x15b] sm:$0xff] }
 0xd81   : > { %8015 = vxpose.xlu1.b32.cont [6/16] (narrow) %v11069_v39, 16  ;;  %7889 = vxpose.xlu0.b32.cont [6/16] (narrow) %v11243_v62, 16  ;;  %v4979_v39 = vld [vmem:[#allocation4 + $0x6b] sm:$0xff] }
 0xd82   : > { %v7896_v48 = vpack.i.bf16 %v4995_v12, %v4979_v39  ;;  %v5000_v39 = vld [vmem:[#allocation4 + $0x16b] sm:$0xff] }
 0xd85   : > { %8017 = vxpose.xlu1.b32.cont [7/16] (narrow) %v11076_v35, 16  ;;  %7891 = vxpose.xlu0.b32.cont [7/16] (narrow) %v7890_v7, 16  ;;  %v4980_v35 = vld [vmem:[#allocation4 + $0x7b] sm:$0xff] }
 0xd86   : > { %v7898_v8 = vpack.i.bf16 %v4996_v56, %v4980_v35  ;;  %v11254_v56 = vld [vmem:[#allocation4 + $0x181] sm:$0xff] }
 0xd89   : > { %8019 = vxpose.xlu1.b32.cont [8/16] (narrow) %v11083_v43, 16  ;;  %7893 = vxpose.xlu0.b32.cont [8/16] (narrow) %v7892_v45, 16  ;;  %v4981_v43 = vld [vmem:[#allocation4 + $0x83] sm:$0xff] }
 0xd8a   : > { %v7900_v11 = vpack.i.bf16 %v4997_v5, %v4981_v43  ;;  %v5001_v5 = vld [vmem:[#allocation4 + $0x173] sm:$0xff]  ;;  %v11259_v43 = vld [vmem:[#allocation4 + $0x189] sm:$0xff] }
 0xd8d   : > { %8021 = vxpose.xlu1.b32.cont [9/16] (narrow) %v11090_v57, 16  ;;  %7895 = vxpose.xlu0.b32.cont [9/16] (narrow) %v7894_v47, 16  ;;  %v4982_v57 = vld [vmem:[#allocation4 + $0x93] sm:$0xff] }
 0xd8e   : > { %v7902_v53 = vpack.i.bf16 %v4998_v41, %v4982_v57  ;;  %v8034_v57 = vpack.i.bf16 %v11259_v43, %v11029_v52  ;;  %v11280_v52 = vld [vmem:[#allocation4 + $0x183] sm:$0xff] }
 0xd91   : > { %8023 = vxpose.xlu1.b32.cont [10/16] (narrow) %v11097_v40, 16  ;;  %7897 = vxpose.xlu0.b32.cont [10/16] (narrow) %v7896_v48, 16  ;;  %v4983_v40 = vld [vmem:[#allocation4 + $0x9b] sm:$0xff] }
 0xd92   : > { %v7904_v12 = vpack.i.bf16 %v4999_v14, %v4983_v40  ;;  %v11370_v14 = vld [vmem:[#allocation4 + $0xf9] sm:$0xff] }
 0xd93   : > { %v6088_v40 = vld [vmem:[#allocation4 + $0xfc] sm:$0xff] }
 0xd95   : > { %8025 = vxpose.xlu1.b32.cont [11/16] (narrow) %v11104_v23, 16  ;;  %7899 = vxpose.xlu0.b32.cont [11/16] (narrow) %v7898_v8, 16  ;;  %v4984_v23 = vld [vmem:[#allocation4 + $0xab] sm:$0xff] }
 0xd96   : > { %v7906_v35 = vpack.i.bf16 %v5000_v39, %v4984_v23  ;;  %v6072_v39 = vld [vmem:[#allocation4 + $0x3c] sm:$0xff] }
 0xd99   : > { %8027 = vxpose.xlu1.b32.cont [12/16] (narrow) %v11111_v50, 16  ;;  %7901 = vxpose.xlu0.b32.cont [12/16] (narrow) %v7900_v11, 16  ;;  %v8032_v50 = vpack.i.bf16 %v11254_v56, %v11025_v54  ;;  %v5201_v54 = vld [vmem:[#allocation4 + $0x180] sm:$0xff] }
 0xd9d   : > { %8029 = vxpose.xlu1.b32.cont [13/16] (narrow) %v11118_v38, 16  ;;  %7903 = vxpose.xlu0.b32.cont [13/16] (narrow) %v7902_v53, 16  ;;  %v4985_v38 = vld [vmem:[#allocation4 + $0xb3] sm:$0xff] }
 0xd9e   : > { %v7908_v41 = vpack.i.bf16 %v5001_v5, %v4985_v38  ;;  %v6089_v5 = vld [vmem:[#allocation4 + $0x10c] sm:$0xff] }
 0xd9f   : > { %v5773_v38 = vld [vmem:[#allocation4 + $0x49] sm:$0xff] }
 0xda1   : > { %8031 = vxpose.xlu1.b32.cont [14/16] (narrow) %v11125_v30, 16  ;;  %7905 = vxpose.xlu0.b32.cont [14/16] (narrow) %v7904_v12, 16  ;;  %v8116_v30 = vpack.i.bf16 %v11280_v52, %v11221_v44  ;;  %v5585_v44 = vld [vmem:[#allocation4 + $0xc4] sm:$0xff] }
 0xda5   : > { %7907 = vxpose.xlu0.b32.cont [15/16] (narrow) %v7906_v35, 16  ;;  %8033 = vxpose.xlu1.b32.cont [15/16] (narrow) %v8032_v50, 16  ;;  %v5789_v50 = vld [vmem:[#allocation4 + $0x109] sm:$0xff] }
 0xda9   : > { %7909 = vxpose.xlu0.b32.end [16/16] (narrow) %v7908_v41, 16  ;;  %8035 = vxpose.xlu1.b32.end [16/16] (narrow) %v8034_v57, 16  ;;  %v11373_v57 = vpack.i.bf16 %v5789_v50, %v5773_v38  ;;  %v5781_v50 = vld [vmem:[#allocation4 + $0xa9] sm:$0xff] }
 0xdad   : > { %7963 = vxpose.xlu0.b32.start [1/16] (narrow) %v11034_v46, 16  ;;  %8089 = vxpose.xlu1.b32.start [1/16] (narrow) %v11231_v17, 16  ;;  %v5185_v46 = vld [vmem:[#allocation4 + $0xc0] sm:$0xff]  ;;  %v11285_v17 = vld [vmem:[#allocation4 + $0x18b] sm:$0xff] }
 0xdb1   : > { %7965 = vxpose.xlu0.b32.cont [2/16] (narrow) %v11041_v32, 16  ;;  %8091 = vxpose.xlu1.b32.cont [2/16] (narrow) %v11235_v59, 16  ;;  %v7990_v32 = vpack.i.bf16 %v5201_v54, %v5185_v46  ;;  %v5202_v59 = vld [vmem:[#allocation4 + $0x188] sm:$0xff]  ;;  %v5790_v46 = vld [vmem:[#allocation4 + $0x111] sm:$0xff] }
 0xdb5   : > { %7967 = vxpose.xlu0.b32.cont [3/16] (narrow) %v11050_v33, 16  ;;  %8093 = vxpose.xlu1.b32.cont [3/16] (narrow) %v11239_v29, 16  ;;  %v5186_v29 = vld [vmem:[#allocation4 + $0xc8] sm:$0xff] }
 0xdb9   : > { %7969 = vxpose.xlu0.b32.cont [4/16] (narrow) %v11057_v21, 16  ;;  %8095 = vxpose.xlu1.b32.cont [4/16] (narrow) %v11243_v62, 16  ;;  %v8118_v62 = vpack.i.bf16 %v11285_v17, %v11226_v18 }
 0xdbd   : > { %7971 = vxpose.xlu0.b32.cont [5/16] (narrow) %v11064_v31, 16  ;;  %8097 = vxpose.xlu1.b32.cont [5/16] (narrow) %v7890_v7, 16  ;;  %v7992_v7 = vpack.i.bf16 %v5202_v59, %v5186_v29  ;;  %v6074_v59 = vld [vmem:[#allocation4 + $0x54] sm:$0xff] }
 0xdc1   : > { %7973 = vxpose.xlu0.b32.cont [6/16] (narrow) %v11071_v22, 16  ;;  %8099 = vxpose.xlu1.b32.cont [6/16] (narrow) %v7892_v45, 16  ;;  %v11365_v45 = vld [vmem:[#allocation4 + $0xf1] sm:$0xff] }
 0xdc5   : > { %7975 = vxpose.xlu0.b32.cont [7/16] (narrow) %v11078_v10, 16  ;;  %8101 = vxpose.xlu1.b32.cont [7/16] (narrow) %v7894_v47, 16  ;;  %v6087_v47 = vld [vmem:[#allocation4 + $0xf4] sm:$0xff] }
 0xdc9   : > { %7977 = vxpose.xlu0.b32.cont [8/16] (narrow) %v11085_v26, 16  ;;  %8103 = vxpose.xlu1.b32.cont [8/16] (narrow) %v7896_v48, 16  ;;  %v5771_v48 = vld [vmem:[#allocation4 + $0x31] sm:$0xff] }
 0xdcd   : > { %7979 = vxpose.xlu0.b32.cont [9/16] (narrow) %v11092_v63, 16  ;;  %8105 = vxpose.xlu1.b32.cont [9/16] (narrow) %v7898_v8, 16  ;;  %v6071_v8 = vld [vmem:[#allocation4 + $0x34] sm:$0xff] }
 0xdd1   : > { %7981 = vxpose.xlu0.b32.cont [10/16] (narrow) %v11099_v3, 16  ;;  %8107 = vxpose.xlu1.b32.cont [10/16] (narrow) %v7900_v11, 16  ;;  %v8214_v11 = vpack.i.bf16 %v11365_v45, %v5771_v48 }
 0xdd5   : > { %7983 = vxpose.xlu0.b32.cont [11/16] (narrow) %v11106_v51, 16  ;;  %8109 = vxpose.xlu1.b32.cont [11/16] (narrow) %v7902_v53, 16  ;;  %v8340_v53 = vpack.i.bf16 %v6087_v47, %v6071_v8  ;;  %v5796_v8 = vld [vmem:[#allocation4 + $0x159] sm:$0xff] }
 0xdd9   : > { %7985 = vxpose.xlu0.b32.cont [12/16] (narrow) %v11113_v60, 16  ;;  %8111 = vxpose.xlu1.b32.cont [12/16] (narrow) %v7904_v12, 16  ;;  %v5772_v12 = vld [vmem:[#allocation4 + $0x39] sm:$0xff] }
 0xdda   : > { %v8216_v23 = vpack.i.bf16 %v11370_v14, %v5772_v12 }
 0xddd   : > { %7987 = vxpose.xlu0.b32.cont [13/16] (narrow) %v11120_v27, 16  ;;  %8113 = vxpose.xlu1.b32.cont [13/16] (narrow) %v7906_v35, 16  ;;  %v8342_v35 = vpack.i.bf16 %v6088_v40, %v6072_v39  ;;  %v6080_v40 = vld [vmem:[#allocation4 + $0x9c] sm:$0xff] }
 0xde1   : > { %7989 = vxpose.xlu0.b32.cont [14/16] (narrow) %v11127_v36, 16  ;;  %8115 = vxpose.xlu1.b32.cont [14/16] (narrow) %v7908_v41, 16  ;;  %v6073_v41 = vld [vmem:[#allocation4 + $0x4c] sm:$0xff] }
 0xde2   : > { %v11375_v54 = vpack.i.bf16 %v6089_v5, %v6073_v41  ;;  %v6081_v5 = vld [vmem:[#allocation4 + $0xac] sm:$0xff] }
 0xde5   : > { %7991 = vxpose.xlu0.b32.cont [15/16] (narrow) %v7990_v32, 16  ;;  %8117 = vxpose.xlu1.b32.cont [15/16] (narrow) %v8116_v30, 16  ;;  %v5774_v30 = vld [vmem:[#allocation4 + $0x51] sm:$0xff] }
 0xde6   : > { %v11379_v29 = vpack.i.bf16 %v5790_v46, %v5774_v30  ;;  %v5798_v46 = vld [vmem:[#allocation4 + $0x171] sm:$0xff] }
 0xde7   : > { %v5782_v30 = vld [vmem:[#allocation4 + $0xb1] sm:$0xff] }
 0xde9   : > { %8119 = vxpose.xlu1.b32.end [16/16] (narrow) %v8118_v62, 16  ;;  %7993 = vxpose.xlu0.b32.end [16/16] (narrow) %v7992_v7, 16 }
 0xded   : > { %8173 = vxpose.xlu1.b32.start [1/16] (narrow) %v11050_v33, 16  ;;  %8047 = vxpose.xlu0.b32.start [1/16] (narrow) %v11141_v42, 16  ;;  %v5401_v33 = vld [vmem:[#allocation4 + $0x182] sm:$0xff] }
 0xdee   : > { %v12346_v42 = vld [vmem:[#allocation96_spill] sm:$0xff] }
 0xdf1   : > { %8175 = vxpose.xlu1.b32.cont [2/16] (narrow) %v11057_v21, 16  ;;  %8049 = vxpose.xlu0.b32.cont [2/16] (narrow) %v11147_v61, 16  ;;  %v5701_v21 = vld [vmem:[#allocation4 + $0x198] sm:$0xff]  ;;  %v11347_v61 = vld [vmem:[#allocation4 + $0xc2] sm:$0xff] }
 0xdf5   : > { %8177 = vxpose.xlu1.b32.cont [3/16] (narrow) %v11064_v31, 16  ;;  %8051 = vxpose.xlu0.b32.cont [3/16] (narrow) %v11153_v28, 16  ;;  %v5685_v31 = vld [vmem:[#allocation4 + $0xd8] sm:$0xff] }
 0xdf9   : > { %8179 = vxpose.xlu1.b32.cont [4/16] (narrow) %v11071_v22, 16  ;;  %8053 = vxpose.xlu0.b32.cont [4/16] (narrow) %v11159_v19, 16  ;;  %v8074_v22 = vpack.i.bf16 %v5401_v33, %v11129_v6  ;;  %v12343_v6 = vld [vmem:[#allocation93_spill] sm:$0xff] }
 0xdfd   : > { %8181 = vxpose.xlu1.b32.cont [5/16] (narrow) %v11078_v10, 16  ;;  %8055 = vxpose.xlu0.b32.cont [5/16] (narrow) %v11165_v55, 16  ;;  %v11316_v10 = vpack.i.bf16 %v5701_v21, %v5685_v31  ;;  %v5775_v21 = vld [vmem:[#allocation4 + $0x61] sm:$0xff] }
 0xdfe   : > { %v6075_v31 = vld [vmem:[#allocation4 + $0x64] sm:$0xff] }
 0xe01   : > { %8183 = vxpose.xlu1.b32.cont [6/16] (narrow) %v11085_v26, 16  ;;  %8057 = vxpose.xlu0.b32.cont [6/16] (narrow) %v11171_v13, 16  ;;  %v5402_v26 = vld [vmem:[#allocation4 + $0x18a] sm:$0xff] }
 0xe05   : > { %8185 = vxpose.xlu1.b32.cont [7/16] (narrow) %v11092_v63, 16  ;;  %8059 = vxpose.xlu0.b32.cont [7/16] (narrow) %v11177_v37, 16  ;;  %v5702_v63 = vld [vmem:[#allocation4 + $0x1a0] sm:$0xff] }
 0xe09   : > { %8187 = vxpose.xlu1.b32.cont [8/16] (narrow) %v11099_v3, 16  ;;  %8061 = vxpose.xlu0.b32.cont [8/16] (narrow) %v11183_v25, 16  ;;  %v5686_v3 = vld [vmem:[#allocation4 + $0xe0] sm:$0xff] }
 0xe0d   : > { %8189 = vxpose.xlu1.b32.cont [9/16] (narrow) %v11106_v51, 16  ;;  %8063 = vxpose.xlu0.b32.cont [9/16] (narrow) %v11189_v2, 16  ;;  %v8076_v51 = vpack.i.bf16 %v5402_v26, %v11135_v0  ;;  %v12344_v0 = vld [vmem:[#allocation94_spill] sm:$0xff] }
 0xe11   : > { %8191 = vxpose.xlu1.b32.cont [10/16] (narrow) %v11113_v60, 16  ;;  %8065 = vxpose.xlu0.b32.cont [10/16] (narrow) %v11195_v20, 16  ;;  %v11320_v60 = vpack.i.bf16 %v5702_v63, %v5686_v3  ;;  %v5792_v63 = vld [vmem:[#allocation4 + $0x129] sm:$0xff] }
 0xe12   : > { %v6092_v3 = vld [vmem:[#allocation4 + $0x12c] sm:$0xff] }
 0xe15   : > { %8193 = vxpose.xlu1.b32.cont [11/16] (narrow) %v11120_v27, 16  ;;  %8067 = vxpose.xlu0.b32.cont [11/16] (narrow) %v11201_v4, 16  ;;  %v12341_v27 = vld [vmem:[#allocation91_spill] sm:$0xff] }
 0xe19   : > { %8195 = vxpose.xlu1.b32.cont [12/16] (narrow) %v11127_v36, 16  ;;  %8069 = vxpose.xlu0.b32.cont [12/16] (narrow) %v11207_v16, 16  ;;  %v12342_v36 = vld [vmem:[#allocation92_spill] sm:$0xff] }
 0xe1d   : > { %8197 = vxpose.xlu1.b32.cont [13/16] (narrow) %v7990_v32, 16  ;;  %8071 = vxpose.xlu0.b32.cont [13/16] (narrow) %v11213_v34, 16  ;;  %v6090_v32 = vld [vmem:[#allocation4 + $0x114] sm:$0xff] }
 0xe1e   : > { %v11381_v62 = vpack.i.bf16 %v6090_v32, %v6074_v59  ;;  %v6098_v32 = vld [vmem:[#allocation4 + $0x174] sm:$0xff] }
 0xe1f   : > { %v6082_v59 = vld [vmem:[#allocation4 + $0xb4] sm:$0xff] }
 0xe21   : > { %8199 = vxpose.xlu1.b32.cont [14/16] (narrow) %v7992_v7, 16  ;;  %8073 = vxpose.xlu0.b32.cont [14/16] (narrow) %v11219_v9, 16  ;;  %v5791_v7 = vld [vmem:[#allocation4 + $0x121] sm:$0xff] }
 0xe25   : > { %8075 = vxpose.xlu0.b32.cont [15/16] (narrow) %v8074_v22, 16  ;;  %8201 = vxpose.xlu1.b32.cont [15/16] (narrow) %v11316_v10, 16  ;;  %v11385_v22 = vpack.i.bf16 %v5791_v7, %v5775_v21  ;;  %v11427_v7 = vpack.i.bf16 %v5798_v46, %v5782_v30  ;;  %v11433_v21 = vld [vmem:[#allocation4 + $0xc1] sm:$0xff]  ;;  %v5976_v46 = vld [vmem:[#allocation4 + $0x6b] sm:$0xff] }
 0xe26   : > { %v5977_v30 = vld [vmem:[#allocation4 + $0x7b] sm:$0xff] }
 0xe29   : > { %8077 = vxpose.xlu0.b32.end [16/16] (narrow) %v8076_v51, 16  ;;  %8203 = vxpose.xlu1.b32.end [16/16] (narrow) %v11320_v60, 16  ;;  %v5776_v51 = vld [vmem:[#allocation4 + $0x69] sm:$0xff] }
 0xe2d   : > { %8131 = vxpose.xlu0.b32.start [1/16] (narrow) %v11139_v15, 16  ;;  %8257 = vxpose.xlu1.b32.start [1/16] (narrow) %v11153_v28, 16  ;;  %v12345_v15 = vld [vmem:[#allocation95_spill] sm:$0xff]  ;;  %v12348_v28 = vld [vmem:[#allocation76_spill] sm:$0xff] }
 0xe31   : > { %8133 = vxpose.xlu0.b32.cont [2/16] (narrow) %v11145_v58, 16  ;;  %8259 = vxpose.xlu1.b32.cont [2/16] (narrow) %v11159_v19, 16  ;;  %v12347_v58 = vld [vmem:[#allocation74_spill] sm:$0xff] }
 0xe35   : > { %8135 = vxpose.xlu0.b32.cont [3/16] (narrow) %v11151_v24, 16  ;;  %8261 = vxpose.xlu1.b32.cont [3/16] (narrow) %v11165_v55, 16  ;;  %v8280_v24 = vpack.i.bf16 %v5401_v33, %v11347_v61  ;;  %v5901_v55 = vld [vmem:[#allocation4 + $0x19a] sm:$0xff]  ;;  %v6091_v33 = vld [vmem:[#allocation4 + $0x124] sm:$0xff] }
 0xe39   : > { %8137 = vxpose.xlu0.b32.cont [4/16] (narrow) %v11157_v49, 16  ;;  %8263 = vxpose.xlu1.b32.cont [4/16] (narrow) %v11171_v13, 16  ;;  %v11351_v49 = vld [vmem:[#allocation4 + $0xca] sm:$0xff]  ;;  %v12349_v13 = vld [vmem:[#allocation15_spill] sm:$0xff] }
 0xe3a   : > { %v8282_v19 = vpack.i.bf16 %v5402_v26, %v11351_v49  ;;  %v11387_v26 = vpack.i.bf16 %v6091_v33, %v6075_v31  ;;  %v11429_v33 = vpack.i.bf16 %v6098_v32, %v6082_v59  ;;  %v8238_v31 = vpack.i.bf16 %v11254_v56, %v11433_v21  ;;  %v5802_v56 = vld [vmem:[#allocation4 + $0x1a1] sm:$0xff] }
 0xe3d   : > { %8139 = vxpose.xlu0.b32.cont [5/16] (narrow) %v11163_v1, 16  ;;  %8265 = vxpose.xlu1.b32.cont [5/16] (narrow) %v11177_v37, 16  ;;  %v5601_v1 = vld [vmem:[#allocation4 + $0x184] sm:$0xff]  ;;  %v5885_v37 = vld [vmem:[#allocation4 + $0xda] sm:$0xff] }
 0xe41   : > { %8141 = vxpose.xlu0.b32.cont [6/16] (narrow) %v12341_v27, 16  ;;  %8267 = vxpose.xlu1.b32.cont [6/16] (narrow) %v11183_v25, 16  ;;  %v11355_v25 = vpack.i.bf16 %v5601_v1, %v5585_v44  ;;  %v6076_v27 = vld [vmem:[#allocation4 + $0x6c] sm:$0xff]  ;;  %v6094_v1 = vld [vmem:[#allocation4 + $0x144] sm:$0xff] }
 0xe45   : > { %8143 = vxpose.xlu0.b32.cont [7/16] (narrow) %v12342_v36, 16  ;;  %8269 = vxpose.xlu1.b32.cont [7/16] (narrow) %v11189_v2, 16  ;;  %v11357_v2 = vpack.i.bf16 %v5901_v55, %v5885_v37  ;;  %v11391_v36 = vpack.i.bf16 %v5792_v63, %v5776_v51  ;;  %v5778_v55 = vld [vmem:[#allocation4 + $0x81] sm:$0xff]  ;;  %v11438_v63 = vld [vmem:[#allocation4 + $0xc9] sm:$0xff]  ;;  %v5801_v51 = vld [vmem:[#allocation4 + $0x199] sm:$0xff] }
 0xe49   : > { %8145 = vxpose.xlu0.b32.cont [8/16] (narrow) %v12343_v6, 16  ;;  %8271 = vxpose.xlu1.b32.cont [8/16] (narrow) %v11195_v20, 16  ;;  %v5602_v20 = vld [vmem:[#allocation4 + $0x18c] sm:$0xff]  ;;  %v11393_v6 = vpack.i.bf16 %v6092_v3, %v6076_v27  ;;  %v8240_v3 = vpack.i.bf16 %v11259_v43, %v11438_v63  ;;  %v6101_v27 = vld [vmem:[#allocation4 + $0x19c] sm:$0xff] }
 0xe4d   : > { %8147 = vxpose.xlu0.b32.cont [9/16] (narrow) %v12344_v0, 16  ;;  %8273 = vxpose.xlu1.b32.cont [9/16] (narrow) %v11201_v4, 16  ;;  %v5902_v4 = vld [vmem:[#allocation4 + $0x1a2] sm:$0xff]  ;;  %v5793_v0 = vld [vmem:[#allocation4 + $0x139] sm:$0xff] }
 0xe51   : > { %8149 = vxpose.xlu0.b32.cont [10/16] (narrow) %v12345_v15, 16  ;;  %8275 = vxpose.xlu1.b32.cont [10/16] (narrow) %v11207_v16, 16  ;;  %v5586_v16 = vld [vmem:[#allocation4 + $0xcc] sm:$0xff]  ;;  %v6093_v15 = vld [vmem:[#allocation4 + $0x13c] sm:$0xff] }
 0xe55   : > { %8151 = vxpose.xlu0.b32.cont [11/16] (narrow) %v12346_v42, 16  ;;  %8277 = vxpose.xlu1.b32.cont [11/16] (narrow) %v11213_v34, 16  ;;  %v5886_v34 = vld [vmem:[#allocation4 + $0xe2] sm:$0xff]  ;;  %v5777_v42 = vld [vmem:[#allocation4 + $0x79] sm:$0xff] }
 0xe56   : > { %v11363_v18 = vpack.i.bf16 %v5902_v4, %v5886_v34  ;;  %v6095_v4 = vld [vmem:[#allocation4 + $0x154] sm:$0xff] }
 0xe57   : > { %v6079_v34 = vld [vmem:[#allocation4 + $0x94] sm:$0xff] }
 0xe58   : > { %v11411_v48 = vpack.i.bf16 %v6095_v4, %v6079_v34  ;;  %v11458_v4 = vld [vmem:[#allocation4 + $0xfb] sm:$0xff] }
 0xe59   : > { %8153 = vxpose.xlu0.b32.cont [12/16] (narrow) %v12347_v58, 16  ;;  %8279 = vxpose.xlu1.b32.cont [12/16] (narrow) %v11219_v9, 16  ;;  %v11361_v9 = vpack.i.bf16 %v5602_v20, %v5586_v16  ;;  %v6077_v58 = vld [vmem:[#allocation4 + $0x7c] sm:$0xff]  ;;  %v5795_v20 = vld [vmem:[#allocation4 + $0x151] sm:$0xff] }
 0xe5a   : > { %v5779_v16 = vld [vmem:[#allocation4 + $0x91] sm:$0xff] }
 0xe5b   : > { %v11409_v47 = vpack.i.bf16 %v5795_v20, %v5779_v16  ;;  %v5972_v16 = vld [vmem:[#allocation4 + $0x3b] sm:$0xff] }
 0xe5c   : > { %v8300_v34 = vpack.i.bf16 %v11458_v4, %v5972_v16 }
 0xe5d   : > { %8155 = vxpose.xlu0.b32.cont [13/16] (narrow) %v12348_v28, 16  ;;  %8281 = vxpose.xlu1.b32.cont [13/16] (narrow) %v8280_v24, 16  ;;  %v11397_v24 = vpack.i.bf16 %v5793_v0, %v5777_v42  ;;  %v11399_v28 = vpack.i.bf16 %v6093_v15, %v6077_v58  ;;  %v5785_v0 = vld [vmem:[#allocation4 + $0xd9] sm:$0xff] }
 0xe5e   : > { %v6085_v15 = vld [vmem:[#allocation4 + $0xdc] sm:$0xff]  ;;  %v11443_v42 = vpack.i.bf16 %v5801_v51, %v5785_v0  ;;  %v5979_v51 = vld [vmem:[#allocation4 + $0x93] sm:$0xff] }
 0xe5f   : > { %v11445_v58 = vpack.i.bf16 %v6101_v27, %v6085_v15  ;;  %v5980_v0 = vld [vmem:[#allocation4 + $0x9b] sm:$0xff] }
 0xe61   : > { %8157 = vxpose.xlu0.b32.cont [14/16] (narrow) %v12349_v13, 16  ;;  %8283 = vxpose.xlu1.b32.cont [14/16] (narrow) %v8282_v19, 16  ;;  %v5794_v19 = vld [vmem:[#allocation4 + $0x141] sm:$0xff] }
 0xe62   : > { %v6078_v13 = vld [vmem:[#allocation4 + $0x84] sm:$0xff]  ;;  %v11403_v44 = vpack.i.bf16 %v5794_v19, %v5778_v55 }
 0xe63   : > { %v11405_v37 = vpack.i.bf16 %v6094_v1, %v6078_v13  ;;  %v6102_v19 = vld [vmem:[#allocation4 + $0x1a4] sm:$0xff]  ;;  %v11453_v13 = vld [vmem:[#allocation4 + $0xf3] sm:$0xff] }
 0xe64   : > { %v6086_v1 = vld [vmem:[#allocation4 + $0xe4] sm:$0xff] }
 0xe65   : > { %8159 = vxpose.xlu0.b32.cont [15/16] (narrow) %v11355_v25, 16  ;;  %8285 = vxpose.xlu1.b32.cont [15/16] (narrow) %v11357_v2, 16  ;;  %v11451_v55 = vpack.i.bf16 %v6102_v19, %v6086_v1  ;;  %v5981_v19 = vld [vmem:[#allocation4 + $0xab] sm:$0xff]  ;;  %v5998_v1 = vld [vmem:[#allocation4 + $0x173] sm:$0xff] }
 0xe69   : > { %8161 = vxpose.xlu0.b32.end [16/16] (narrow) %v11361_v9, 16  ;;  %8287 = vxpose.xlu1.b32.end [16/16] (narrow) %v11363_v18, 16 }
 0xe6d   : > { %8215 = vxpose.xlu0.b32.start [1/16] (narrow) %v8214_v11, 16  ;;  %8341 = vxpose.xlu1.b32.start [1/16] (narrow) %v8340_v53, 16  ;;  %v6096_v11 = vld [vmem:[#allocation4 + $0x15c] sm:$0xff] }
 0xe6e   : > { %v5780_v53 = vld [vmem:[#allocation4 + $0x99] sm:$0xff]  ;;  %v11417_v39 = vpack.i.bf16 %v6096_v11, %v6080_v40  ;;  %v5973_v11 = vld [vmem:[#allocation4 + $0x4b] sm:$0xff] }
 0xe6f   : > { %v11415_v12 = vpack.i.bf16 %v5796_v8, %v5780_v53  ;;  %v5989_v8 = vld [vmem:[#allocation4 + $0x10b] sm:$0xff]  ;;  %v5990_v40 = vld [vmem:[#allocation4 + $0x113] sm:$0xff] }
 0xe70   : > { %v11463_v53 = vpack.i.bf16 %v5989_v8, %v5973_v11  ;;  %v6001_v11 = vld [vmem:[#allocation4 + $0x19b] sm:$0xff] }
 0xe71   : > { %8217 = vxpose.xlu0.b32.cont [2/16] (narrow) %v8216_v23, 16  ;;  %8343 = vxpose.xlu1.b32.cont [2/16] (narrow) %v8342_v35, 16  ;;  %v5797_v23 = vld [vmem:[#allocation4 + $0x169] sm:$0xff] }
 0xe72   : > { %v6097_v35 = vld [vmem:[#allocation4 + $0x16c] sm:$0xff]  ;;  %v11421_v38 = vpack.i.bf16 %v5797_v23, %v5781_v50  ;;  %v5991_v50 = vld [vmem:[#allocation4 + $0x123] sm:$0xff] }
 0xe73   : > { %v11423_v41 = vpack.i.bf16 %v6097_v35, %v6081_v5  ;;  %v5974_v23 = vld [vmem:[#allocation4 + $0x53] sm:$0xff] }
 0xe74   : > { %v11467_v35 = vpack.i.bf16 %v5990_v40, %v5974_v23  ;;  %v6302_v40 = vld [vmem:[#allocation4 + $0x1b1] sm:$0xff] }
 0xe75   : > { %8219 = vxpose.xlu0.b32.cont [3/16] (narrow) %v11373_v57, 16  ;;  %8345 = vxpose.xlu1.b32.cont [3/16] (narrow) %v11375_v54, 16 }
 0xe79   : > { %8221 = vxpose.xlu0.b32.cont [4/16] (narrow) %v11379_v29, 16  ;;  %8347 = vxpose.xlu1.b32.cont [4/16] (narrow) %v11381_v62, 16 }
 0xe7d   : > { %8223 = vxpose.xlu0.b32.cont [5/16] (narrow) %v11385_v22, 16  ;;  %8349 = vxpose.xlu1.b32.cont [5/16] (narrow) %v11387_v26, 16 }
 0xe81   : > { %8225 = vxpose.xlu0.b32.cont [6/16] (narrow) %v11391_v36, 16  ;;  %8351 = vxpose.xlu1.b32.cont [6/16] (narrow) %v11393_v6, 16 }
 0xe85   : > { %8227 = vxpose.xlu0.b32.cont [7/16] (narrow) %v11397_v24, 16  ;;  %8353 = vxpose.xlu1.b32.cont [7/16] (narrow) %v11399_v28, 16 }
 0xe89   : > { %8229 = vxpose.xlu0.b32.cont [8/16] (narrow) %v11403_v44, 16  ;;  %8355 = vxpose.xlu1.b32.cont [8/16] (narrow) %v11405_v37, 16 }
 0xe8d   : > { %8231 = vxpose.xlu0.b32.cont [9/16] (narrow) %v11409_v47, 16  ;;  %8357 = vxpose.xlu1.b32.cont [9/16] (narrow) %v11411_v48, 16 }
 0xe91   : > { %8233 = vxpose.xlu0.b32.cont [10/16] (narrow) %v11415_v12, 16  ;;  %8359 = vxpose.xlu1.b32.cont [10/16] (narrow) %v11417_v39, 16 }
 0xe95   : > { %8235 = vxpose.xlu0.b32.cont [11/16] (narrow) %v11421_v38, 16  ;;  %8361 = vxpose.xlu1.b32.cont [11/16] (narrow) %v11423_v41, 16 }
 0xe99   : > { %8237 = vxpose.xlu0.b32.cont [12/16] (narrow) %v11427_v7, 16  ;;  %8363 = vxpose.xlu1.b32.cont [12/16] (narrow) %v11429_v33, 16 }
 0xe9d   : > { %8239 = vxpose.xlu0.b32.cont [13/16] (narrow) %v8238_v31, 16  ;;  %8365 = vxpose.xlu1.b32.cont [13/16] (narrow) %v11355_v25, 16  ;;  %v5786_v25 = vld [vmem:[#allocation4 + $0xe1] sm:$0xff] }
 0xe9e   : > { %v11449_v43 = vpack.i.bf16 %v5802_v56, %v5786_v25  ;;  %v5978_v31 = vld [vmem:[#allocation4 + $0x83] sm:$0xff] }
 0xe9f   : > { %v6298_v56 = vld [vmem:[#allocation4 + $0x181] sm:$0xff] }
 0xea1   : > { %8241 = vxpose.xlu0.b32.cont [14/16] (narrow) %v8240_v3, 16  ;;  %8367 = vxpose.xlu1.b32.cont [14/16] (narrow) %v11361_v9, 16  ;;  %v5971_v9 = vld [vmem:[#allocation4 + $0x33] sm:$0xff] }
 0xea2   : > { %v8298_v20 = vpack.i.bf16 %v11453_v13, %v5971_v9  ;;  %v6299_v9 = vld [vmem:[#allocation4 + $0x189] sm:$0xff] }
 0xea3   : > { %v8446_v16 = vpack.i.bf16 %v6299_v9, %v11438_v63  ;;  %v5985_v63 = vld [vmem:[#allocation4 + $0xdb] sm:$0xff] }
 0xea4   : > { %v11513_v23 = vpack.i.bf16 %v6001_v11, %v5985_v63  ;;  %v6181_v11 = vld [vmem:[#allocation4 + $0xb0] sm:$0xff]  ;;  %v6498_v63 = vld [vmem:[#allocation4 + $0x183] sm:$0xff] }
 0xea5   : > { %8243 = vxpose.xlu0.b32.cont [15/16] (narrow) %v11443_v42, 16  ;;  %8369 = vxpose.xlu1.b32.cont [15/16] (narrow) %v11445_v58, 16 }
 0xea9   : > { %8245 = vxpose.xlu0.b32.end [16/16] (narrow) %v11449_v43, 16  ;;  %8371 = vxpose.xlu1.b32.end [16/16] (narrow) %v11451_v55, 16 }
 0xead   : > { %8299 = vxpose.xlu0.b32.start [1/16] (narrow) %v8298_v20, 16  ;;  %8425 = vxpose.xlu1.b32.start [1/16] (narrow) %v11373_v57, 16  ;;  %v5975_v57 = vld [vmem:[#allocation4 + $0x63] sm:$0xff] }
 0xeae   : > { %v11471_v5 = vpack.i.bf16 %v5991_v50, %v5975_v57  ;;  %v8452_v50 = vpack.i.bf16 %v6302_v40, %v11365_v45  ;;  %v6002_v57 = vld [vmem:[#allocation4 + $0x1a3] sm:$0xff]  ;;  %v6173_v45 = vld [vmem:[#allocation4 + $0x50] sm:$0xff] }
 0xeb1   : > { %8301 = vxpose.xlu0.b32.cont [2/16] (narrow) %v8300_v34, 16  ;;  %8427 = vxpose.xlu1.b32.cont [2/16] (narrow) %v11379_v29, 16  ;;  %v5992_v29 = vld [vmem:[#allocation4 + $0x12b] sm:$0xff]  ;;  %v11503_v34 = vld [vmem:[#allocation4 + $0xc3] sm:$0xff] }
 0xeb2   : > { %v11475_v32 = vpack.i.bf16 %v5992_v29, %v5976_v46  ;;  %v11520_v46 = vld [vmem:[#allocation4 + $0x108] sm:$0xff] }
 0xeb5   : > { %8303 = vxpose.xlu0.b32.cont [3/16] (narrow) %v11463_v53, 16  ;;  %8429 = vxpose.xlu1.b32.cont [3/16] (narrow) %v11385_v22, 16  ;;  %v5993_v22 = vld [vmem:[#allocation4 + $0x13b] sm:$0xff] }
 0xeb6   : > { %v11479_v59 = vpack.i.bf16 %v5993_v22, %v5977_v30  ;;  %v11524_v30 = vld [vmem:[#allocation4 + $0x110] sm:$0xff] }
 0xeb9   : > { %8305 = vxpose.xlu0.b32.cont [4/16] (narrow) %v11467_v35, 16  ;;  %8431 = vxpose.xlu1.b32.cont [4/16] (narrow) %v11391_v36, 16  ;;  %v5994_v36 = vld [vmem:[#allocation4 + $0x143] sm:$0xff] }
 0xeba   : > { %v11483_v3 = vpack.i.bf16 %v5994_v36, %v5978_v31  ;;  %v8384_v36 = vpack.i.bf16 %v11524_v30, %v6173_v45  ;;  %v6190_v31 = vld [vmem:[#allocation4 + $0x120] sm:$0xff] }
 0xebd   : > { %8307 = vxpose.xlu0.b32.cont [5/16] (narrow) %v11471_v5, 16  ;;  %8433 = vxpose.xlu1.b32.cont [5/16] (narrow) %v11397_v24, 16  ;;  %v5995_v24 = vld [vmem:[#allocation4 + $0x153] sm:$0xff] }
 0xebe   : > { %v11487_v27 = vpack.i.bf16 %v5995_v24, %v5979_v51  ;;  %v6191_v51 = vld [vmem:[#allocation4 + $0x128] sm:$0xff] }
 0xec1   : > { %8309 = vxpose.xlu0.b32.cont [6/16] (narrow) %v11475_v32, 16  ;;  %8435 = vxpose.xlu1.b32.cont [6/16] (narrow) %v11403_v44, 16  ;;  %v5996_v44 = vld [vmem:[#allocation4 + $0x15b] sm:$0xff] }
 0xec2   : > { %v11491_v15 = vpack.i.bf16 %v5996_v44, %v5980_v0  ;;  %v6175_v44 = vld [vmem:[#allocation4 + $0x68] sm:$0xff] }
 0xec3   : > { %v11533_v0 = vpack.i.bf16 %v6191_v51, %v6175_v44  ;;  %v11580_v51 = vld [vmem:[#allocation4 + $0x10a] sm:$0xff]  ;;  %v11584_v44 = vld [vmem:[#allocation4 + $0x112] sm:$0xff] }
 0xec5   : > { %8311 = vxpose.xlu0.b32.cont [7/16] (narrow) %v11479_v59, 16  ;;  %8437 = vxpose.xlu1.b32.cont [7/16] (narrow) %v11409_v47, 16  ;;  %v5997_v47 = vld [vmem:[#allocation4 + $0x16b] sm:$0xff] }
 0xec6   : > { %v11495_v25 = vpack.i.bf16 %v5997_v47, %v5981_v19  ;;  %v6192_v47 = vld [vmem:[#allocation4 + $0x138] sm:$0xff]  ;;  %v6177_v19 = vld [vmem:[#allocation4 + $0x80] sm:$0xff] }
 0xec9   : > { %8313 = vxpose.xlu0.b32.cont [8/16] (narrow) %v11483_v3, 16  ;;  %8439 = vxpose.xlu1.b32.cont [8/16] (narrow) %v11415_v12, 16  ;;  %v8444_v12 = vpack.i.bf16 %v6298_v56, %v11433_v21  ;;  %v11508_v21 = vld [vmem:[#allocation4 + $0xcb] sm:$0xff] }
 0xeca   : > { %v8324_v8 = vpack.i.bf16 %v11285_v17, %v11508_v21 }
 0xecd   : > { %8315 = vxpose.xlu0.b32.cont [9/16] (narrow) %v11487_v27, 16  ;;  %8441 = vxpose.xlu1.b32.cont [9/16] (narrow) %v11421_v38, 16  ;;  %v5982_v38 = vld [vmem:[#allocation4 + $0xb3] sm:$0xff] }
 0xece   : > { %v11499_v20 = vpack.i.bf16 %v5998_v1, %v5982_v38  ;;  %v6178_v1 = vld [vmem:[#allocation4 + $0x90] sm:$0xff]  ;;  %v6179_v38 = vld [vmem:[#allocation4 + $0x98] sm:$0xff] }
 0xed1   : > { %8317 = vxpose.xlu0.b32.cont [10/16] (narrow) %v11491_v15, 16  ;;  %8443 = vxpose.xlu1.b32.cont [10/16] (narrow) %v11427_v7, 16  ;;  %v8322_v7 = vpack.i.bf16 %v11280_v52, %v11503_v34  ;;  %v6303_v52 = vld [vmem:[#allocation4 + $0x1b9] sm:$0xff] }
 0xed2   : > { %v8454_v17 = vpack.i.bf16 %v6303_v52, %v11370_v14  ;;  %v6174_v14 = vld [vmem:[#allocation4 + $0x60] sm:$0xff]  ;;  %v6199_v52 = vld [vmem:[#allocation4 + $0x188] sm:$0xff] }
 0xed3   : > { %v11529_v24 = vpack.i.bf16 %v6190_v31, %v6174_v14  ;;  %v6187_v31 = vld [vmem:[#allocation4 + $0xf8] sm:$0xff] }
 0xed4   : > { %v6503_v14 = vld [vmem:[#allocation4 + $0x1bb] sm:$0xff] }
 0xed5   : > { %8319 = vxpose.xlu0.b32.cont [11/16] (narrow) %v11495_v25, 16  ;;  %8445 = vxpose.xlu1.b32.cont [11/16] (narrow) %v8444_v12, 16 }
 0xed9   : > { %8321 = vxpose.xlu0.b32.cont [12/16] (narrow) %v11499_v20, 16  ;;  %8447 = vxpose.xlu1.b32.cont [12/16] (narrow) %v8446_v16, 16 }
 0xedd   : > { %8323 = vxpose.xlu0.b32.cont [13/16] (narrow) %v8322_v7, 16  ;;  %8449 = vxpose.xlu1.b32.cont [13/16] (narrow) %v11443_v42, 16  ;;  %v5986_v42 = vld [vmem:[#allocation4 + $0xe3] sm:$0xff] }
 0xede   : > { %v11517_v29 = vpack.i.bf16 %v6002_v57, %v5986_v42  ;;  %v6180_v7 = vld [vmem:[#allocation4 + $0xa8] sm:$0xff] }
 0xedf   : > { %v6499_v42 = vld [vmem:[#allocation4 + $0x18b] sm:$0xff] }
 0xee1   : > { %8325 = vxpose.xlu0.b32.cont [14/16] (narrow) %v8324_v8, 16  ;;  %8451 = vxpose.xlu1.b32.cont [14/16] (narrow) %v11449_v43, 16  ;;  %v6172_v43 = vld [vmem:[#allocation4 + $0x48] sm:$0xff] }
 0xee2   : > { %v8382_v22 = vpack.i.bf16 %v11520_v46, %v6172_v43  ;;  %v8530_v43 = vpack.i.bf16 %v6499_v42, %v11508_v21  ;;  %v6203_v21 = vld [vmem:[#allocation4 + $0x1b8] sm:$0xff]  ;;  %v11609_v42 = vld [vmem:[#allocation4 + $0x142] sm:$0xff] }
 0xee5   : > { %8327 = vxpose.xlu0.b32.cont [15/16] (narrow) %v11513_v23, 16  ;;  %8453 = vxpose.xlu1.b32.cont [15/16] (narrow) %v8452_v50, 16  ;;  %v6182_v50 = vld [vmem:[#allocation4 + $0xc0] sm:$0xff] }
 0xee9   : > { %8329 = vxpose.xlu0.b32.end [16/16] (narrow) %v11517_v29, 16  ;;  %8455 = vxpose.xlu1.b32.end [16/16] (narrow) %v8454_v17, 16 }
 0xeed   : > { %8383 = vxpose.xlu0.b32.start [1/16] (narrow) %v8382_v22, 16  ;;  %8509 = vxpose.xlu1.b32.start [1/16] (narrow) %v11463_v53, 16  ;;  %v6176_v53 = vld [vmem:[#allocation4 + $0x78] sm:$0xff]  ;;  %v6202_v22 = vld [vmem:[#allocation4 + $0x1b0] sm:$0xff] }
 0xeee   : > { %v11537_v56 = vpack.i.bf16 %v6192_v47, %v6176_v53  ;;  %v6373_v47 = vld [vmem:[#allocation4 + $0x52] sm:$0xff] }
 0xeef   : > { %v8468_v53 = vpack.i.bf16 %v11584_v44, %v6373_v47 }
 0xef1   : > { %8385 = vxpose.xlu0.b32.cont [2/16] (narrow) %v8384_v36, 16  ;;  %8511 = vxpose.xlu1.b32.cont [2/16] (narrow) %v11467_v35, 16  ;;  %v6193_v35 = vld [vmem:[#allocation4 + $0x140] sm:$0xff] }
 0xef2   : > { %v11541_v12 = vpack.i.bf16 %v6193_v35, %v6177_v19  ;;  %v11588_v35 = vld [vmem:[#allocation4 + $0x122] sm:$0xff] }
 0xef3   : > { %v11591_v19 = vld [vmem:[#allocation4 + $0x62] sm:$0xff] }
 0xef5   : > { %8387 = vxpose.xlu0.b32.cont [3/16] (narrow) %v11529_v24, 16  ;;  %8513 = vxpose.xlu1.b32.cont [3/16] (narrow) %v11471_v5, 16  ;;  %v6194_v5 = vld [vmem:[#allocation4 + $0x150] sm:$0xff] }
 0xef6   : > { %v11545_v9 = vpack.i.bf16 %v6194_v5, %v6178_v1  ;;  %v8470_v5 = vpack.i.bf16 %v11588_v35, %v11591_v19  ;;  %v11595_v1 = vld [vmem:[#allocation4 + $0x12a] sm:$0xff] }
 0xef9   : > { %8389 = vxpose.xlu0.b32.cont [4/16] (narrow) %v11533_v0, 16  ;;  %8515 = vxpose.xlu1.b32.cont [4/16] (narrow) %v11475_v32, 16  ;;  %v6195_v32 = vld [vmem:[#allocation4 + $0x158] sm:$0xff] }
 0xefa   : > { %v11549_v16 = vpack.i.bf16 %v6195_v32, %v6179_v38 }
 0xefd   : > { %8391 = vxpose.xlu0.b32.cont [5/16] (narrow) %v11537_v56, 16  ;;  %8517 = vxpose.xlu1.b32.cont [5/16] (narrow) %v11479_v59, 16  ;;  %v6196_v59 = vld [vmem:[#allocation4 + $0x168] sm:$0xff] }
 0xefe   : > { %v11553_v8 = vpack.i.bf16 %v6196_v59, %v6180_v7  ;;  %v7826_v59 = vpop.trf.xlu1  ;;  %v11598_v7 = vld [vmem:[#allocation4 + $0x6a] sm:$0xff] }
 0xf01   : > { %8393 = vxpose.xlu0.b32.cont [6/16] (narrow) %v11541_v12, 16  ;;  %8519 = vxpose.xlu1.b32.cont [6/16] (narrow) %v11483_v3, 16  ;;  %v6197_v3 = vld [vmem:[#allocation4 + $0x170] sm:$0xff] }
 0xf02   : > { %v11557_v40 = vpack.i.bf16 %v6197_v3, %v6181_v11  ;;  %v11602_v3 = vld [vmem:[#allocation4 + $0x13a] sm:$0xff] }
 0xf05   : > { %8395 = vxpose.xlu0.b32.cont [7/16] (narrow) %v11545_v9, 16  ;;  %8521 = vxpose.xlu1.b32.cont [7/16] (narrow) %v11487_v27, 16  ;;  %v6198_v27 = vld [vmem:[#allocation4 + $0x180] sm:$0xff] }
 0xf06   : > { %v11561_v57 = vpack.i.bf16 %v6198_v27, %v6182_v50 }
 0xf09   : > { %8397 = vxpose.xlu0.b32.cont [8/16] (narrow) %v11549_v16, 16  ;;  %8523 = vxpose.xlu1.b32.cont [8/16] (narrow) %v11491_v15, 16  ;;  %v8528_v15 = vpack.i.bf16 %v6498_v63, %v11503_v34  ;;  %v6502_v34 = vld [vmem:[#allocation4 + $0x1b3] sm:$0xff] }
 0xf0a   : > { %v8536_v36 = vpack.i.bf16 %v6502_v34, %v11453_v13  ;;  %v7784_v13 = vpop.trf.xlu0 }
 0xf0b   : > { %v7785_v11 = vunpack.i.l.bf16 %v7784_v13 }
 0xf0d   : > { %8399 = vxpose.xlu0.b32.cont [9/16] (narrow) %v11553_v8, 16  ;;  %8525 = vxpose.xlu1.b32.cont [9/16] (narrow) %v11495_v25, 16  ;;  %v6183_v25 = vld [vmem:[#allocation4 + $0xc8] sm:$0xff] }
 0xf0e   : > { %v11565_v17 = vpack.i.bf16 %v6199_v52, %v6183_v25  ;;  %v7830_v25 = vunpack.i.h.bf16 %v7826_v59 }
 0xf11   : > { %8401 = vxpose.xlu0.b32.cont [10/16] (narrow) %v11557_v40, 16  ;;  %8527 = vxpose.xlu1.b32.cont [10/16] (narrow) %v11499_v20, 16  ;;  %v6186_v20 = vld [vmem:[#allocation4 + $0xf0] sm:$0xff] }
 0xf12   : > { %v11573_v45 = vpack.i.bf16 %v6202_v22, %v6186_v20 }
 0xf15   : > { %8403 = vxpose.xlu0.b32.cont [11/16] (narrow) %v11561_v57, 16  ;;  %8529 = vxpose.xlu1.b32.cont [11/16] (narrow) %v8528_v15, 16  ;;  %v11605_v15 = vld [vmem:[#allocation4 + $0x7a] sm:$0xff] }
 0xf16   : > { %v8474_v52 = vpack.i.bf16 %v11602_v3, %v11605_v15 }
 0xf19   : > { %8405 = vxpose.xlu0.b32.cont [12/16] (narrow) %v11565_v17, 16  ;;  %8531 = vxpose.xlu1.b32.cont [12/16] (narrow) %v8530_v43, 16  ;;  %v7827_v43 = vunpack.i.l.bf16 %v7826_v59 }
 0xf1d   : > { %8407 = vxpose.xlu0.b32.cont [13/16] (narrow) %v11316_v10, 16  ;;  %8533 = vxpose.xlu1.b32.cont [13/16] (narrow) %v11513_v23, 16  ;;  %v11577_v10 = vpack.i.bf16 %v6203_v21, %v6187_v31  ;;  %v8538_v23 = vpack.i.bf16 %v6503_v14, %v11458_v4  ;;  %v7789_v4 = vpop.trf.xlu0  ;;  %v11616_v21 = vld [vmem:[#allocation4 + $0x152] sm:$0xff] }
 0xf1e   : > { %v7793_v32 = vunpack.i.h.bf16 %v7789_v4  ;;  %v7790_v27 = vunpack.i.l.bf16 %v7789_v4  ;;  %v11619_v4 = vld [vmem:[#allocation4 + $0x92] sm:$0xff] }
 0xf20   : > { %v7607_v22 = vpack.c.bf16 %v7790_v27, %v7785_v11 }
 0xf21   : > { %8409 = vxpose.xlu0.b32.cont [14/16] (narrow) %v11320_v60, 16  ;;  %8535 = vxpose.xlu1.b32.cont [14/16] (narrow) %v11517_v29, 16  ;;  %v6372_v60 = vld [vmem:[#allocation4 + $0x4a] sm:$0xff]  ;;  %v7868_v38 = vpop.trf.xlu0 }
 0xf22   : > { %v8466_v29 = vpack.i.bf16 %v11580_v51, %v6372_v60  ;;  %v7872_v14 = vunpack.i.h.bf16 %v7868_v38 }
 0xf25   : > { %8411 = vxpose.xlu0.b32.cont [15/16] (narrow) %v11573_v45, 16  ;;  %8537 = vxpose.xlu1.b32.cont [15/16] (narrow) %v8536_v36, 16  ;;  %v7873_v63 = vpop.trf.xlu0  ;;  %v11612_v36 = vld [vmem:[#allocation4 + $0x82] sm:$0xff] }
 0xf26   : > { %v8476_v31 = vpack.i.bf16 %v11609_v42, %v11612_v36  ;;  %v7877_v60 = vunpack.i.h.bf16 %v7873_v63 }
 0xf29   : > { %8413 = vxpose.xlu0.b32.end [16/16] (narrow) %v11577_v10, 16  ;;  %8539 = vxpose.xlu1.b32.end [16/16] (narrow) %v8538_v23, 16  ;;  %v7910_v34 = vpop.trf.xlu0  ;;  %v7869_v23 = vunpack.i.l.bf16 %v7868_v38 }
 0xf2a   : > { %v7911_v59 = vunpack.i.l.bf16 %v7910_v34 }
 0xf2d   : > { %8467 = vxpose.xlu0.b32.start [1/16] (narrow) %v8466_v29, 16  ;;  %8593 = vxpose.xlu1.b32.start [1/16] (narrow) %v11529_v24, 16  ;;  %v7788_v24 = vunpack.i.h.bf16 %v7784_v13  ;;  %v7915_v47 = vpop.trf.xlu0 }
 0xf2e   : > { %v7916_v38 = vunpack.i.l.bf16 %v7915_v47 }
 0xf2f   : > { %v7605_v50 = vpack.c.bf16 %v7793_v32, %v7788_v24  ;;  %v11623_v24 = vld [vmem:[#allocation4 + $0x15a] sm:$0xff]  ;;  %v7914_v32 = vunpack.i.h.bf16 %v7910_v34 }
 0xf31   : > { %8469 = vxpose.xlu0.b32.cont [2/16] (narrow) %v8468_v53, 16  ;;  %8595 = vxpose.xlu1.b32.cont [2/16] (narrow) %v11533_v0, 16  ;;  %v8472_v0 = vpack.i.bf16 %v11595_v1, %v11598_v7  ;;  %v7994_v27 = vpop.trf.xlu0 }
 0xf32   : > { %7606 = vmatprep.subr.bf16.mxu0 %v7605_v50  ;;  %v11626_v50 = vld [vmem:[#allocation4 + $0x9a] sm:$0xff] }
 0xf33   : > { %7608 = vmatpush1.bf16.msra.mxu0 %v7607_v22  ;;  %v7619_v22 = vpack.c.bf16 %v7916_v38, %v7911_v59  ;;  %v11640_v59 = vld [vmem:[#allocation4 + $0xb2] sm:$0xff]  ;;  %v11644_v38 = vld [vmem:[#allocation4 + $0x182] sm:$0xff] }
 0xf35   : > { %8471 = vxpose.xlu0.b32.cont [3/16] (narrow) %v8470_v5, 16  ;;  %8597 = vxpose.xlu1.b32.cont [3/16] (narrow) %v11537_v56, 16  ;;  %v7831_v56 = vpop.trf.xlu1  ;;  %v8478_v5 = vpack.i.bf16 %v11616_v21, %v11619_v4  ;;  %v7999_v34 = vpop.trf.xlu0 }
 0xf36   : > { %v7835_v20 = vunpack.i.h.bf16 %v7831_v56 }
 0xf38   : > { %v7609_v29 = vpack.c.bf16 %v7835_v20, %v7830_v25 }
 0xf39   : > { %8473 = vxpose.xlu0.b32.cont [4/16] (narrow) %v8472_v0, 16  ;;  %8599 = vxpose.xlu1.b32.cont [4/16] (narrow) %v11541_v12, 16  ;;  %v7832_v12 = vunpack.i.l.bf16 %v7831_v56  ;;  %v7952_v53 = vpop.trf.xlu1  ;;  %v7613_v0 = vpack.c.bf16 %v7877_v60, %v7872_v14  ;;  %v8480_v56 = vpack.i.bf16 %v11623_v24, %v11626_v50  ;;  %v11633_v14 = vld [vmem:[#allocation4 + $0xaa] sm:$0xff]  ;;  %v11637_v60 = vld [vmem:[#allocation4 + $0x172] sm:$0xff] }
 0xf3a   : > { %7610 = vmatprep.subr.bf16.mxu0 %v7609_v29  ;;  %v7956_v25 = vunpack.i.h.bf16 %v7952_v53  ;;  %v7995_v29 = vunpack.i.l.bf16 %v7994_v27 }
 0xf3b   : > { %v7611_v13 = vpack.c.bf16 %v7832_v12, %v7827_v43  ;;  %v7953_v43 = vunpack.i.l.bf16 %v7952_v53 }
 0xf3d   : > { %8475 = vxpose.xlu0.b32.cont [5/16] (narrow) %v8474_v52, 16  ;;  %8601 = vxpose.xlu1.b32.cont [5/16] (narrow) %v11545_v9, 16  ;;  %v7874_v9 = vunpack.i.l.bf16 %v7873_v63  ;;  %v7957_v63 = vpop.trf.xlu1  ;;  %v11630_v52 = vld [vmem:[#allocation4 + $0x16a] sm:$0xff] }
 0xf3e   : > { %7612 = vmatpush1.bf16.msra.mxu0 %v7611_v13  ;;  %v7958_v20 = vunpack.i.l.bf16 %v7957_v63  ;;  %v8000_v13 = vunpack.i.l.bf16 %v7999_v34 }
 0xf3f   : > { %v7615_v11 = vpack.c.bf16 %v7874_v9, %v7869_v23  ;;  %7614 = vmatprep.subr.bf16.mxu0 %v7613_v0  ;;  %v8482_v23 = vpack.i.bf16 %v11630_v52, %v11633_v14  ;;  %v7998_v9 = vunpack.i.h.bf16 %v7994_v27  ;;  %v6699_v0 = vld [vmem:[#allocation4 + $0x198] sm:$0xff] }
 0xf40   : > { %v7623_v53 = vpack.c.bf16 %v7958_v20, %v7953_v43  ;;  %v6683_v20 = vld [vmem:[#allocation4 + $0xd8] sm:$0xff] }
 0xf41   : > { %8477 = vxpose.xlu0.b32.cont [6/16] (narrow) %v8476_v31, 16  ;;  %8603 = vxpose.xlu1.b32.cont [6/16] (narrow) %v11549_v16, 16  ;;  %v7919_v16 = vunpack.i.h.bf16 %v7915_v47  ;;  %v8036_v31 = vpop.trf.xlu1 }
 0xf42   : > { %7616 = vmatpush1.bf16.msra.mxu0 %v7615_v11  ;;  %v8040_v11 = vunpack.i.h.bf16 %v8036_v31  ;;  %v8037_v27 = vunpack.i.l.bf16 %v8036_v31 }
 0xf43   : > { %v7617_v12 = vpack.c.bf16 %v7919_v16, %v7914_v32  ;;  %v8484_v16 = vpack.i.bf16 %v11637_v60, %v11640_v59 }
 0xf45   : > { %8479 = vxpose.xlu0.b32.cont [7/16] (narrow) %v8478_v5, 16  ;;  %8605 = vxpose.xlu1.b32.cont [7/16] (narrow) %v11553_v8, 16  ;;  %v7961_v8 = vunpack.i.h.bf16 %v7957_v63  ;;  %v8078_v5 = vpop.trf.xlu0  ;;  %v8041_v32 = vpop.trf.xlu1 }
 0xf46   : > { %7618 = vmatprep.subr.bf16.mxu0 %v7617_v12  ;;  %v8042_v63 = vunpack.i.l.bf16 %v8041_v32  ;;  %v8486_v12 = vpack.i.bf16 %v11644_v38, %v11347_v61  ;;  %v8082_v31 = vunpack.i.h.bf16 %v8078_v5 }
 0xf47   : > { %7620 = vmatpush1.bf16.msra.mxu0 %v7619_v22  ;;  %v7621_v47 = vpack.c.bf16 %v7961_v8, %v7956_v25  ;;  %v7627_v25 = vpack.c.bf16 %v8000_v13, %v7995_v29  ;;  %v8612_v22 = vpack.i.bf16 %v6699_v0, %v6683_v20 }
 0xf48   : > { %v7631_v29 = vpack.c.bf16 %v8042_v63, %v8037_v27 }
 0xf49   : > { %8481 = vxpose.xlu0.b32.cont [8/16] (narrow) %v8480_v56, 16  ;;  %8607 = vxpose.xlu1.b32.cont [8/16] (narrow) %v11557_v40, 16  ;;  %v8003_v40 = vunpack.i.h.bf16 %v7999_v34  ;;  %v8083_v43 = vpop.trf.xlu0  ;;  %v8120_v8 = vpop.trf.xlu1  ;;  %v11649_v34 = vld [vmem:[#allocation4 + $0x18a] sm:$0xff] }
 0xf4a   : > { %7622 = vmatprep.subr.bf16.mxu0 %v7621_v47  ;;  %v8079_v47 = vunpack.i.l.bf16 %v8078_v5  ;;  %v8488_v61 = vpack.i.bf16 %v11649_v34, %v11351_v49  ;;  %v8124_v0 = vunpack.i.h.bf16 %v8120_v8 }
 0xf4b   : > { %7624 = vmatpush1.bf16.msra.mxu0 %v7623_v53  ;;  %v7625_v56 = vpack.c.bf16 %v8003_v40, %v7998_v9  ;;  %v8084_v53 = vunpack.i.l.bf16 %v8083_v43 }
 0xf4d   : > { %8483 = vxpose.xlu0.b32.cont [9/16] (narrow) %v8482_v23, 16  ;;  %8609 = vxpose.xlu1.b32.cont [9/16] (narrow) %v11561_v57, 16  ;;  %v8045_v57 = vunpack.i.h.bf16 %v8041_v32  ;;  %v6700_v23 = vld [vmem:[#allocation4 + $0x1a0] sm:$0xff]  ;;  %v8162_v40 = vpop.trf.xlu0  ;;  %v8125_v13 = vpop.trf.xlu1 }
 0xf4e   : > { %7626 = vmatprep.subr.bf16.mxu0 %v7625_v56  ;;  %v6684_v32 = vld [vmem:[#allocation4 + $0xe0] sm:$0xff]  ;;  %v8121_v56 = vunpack.i.l.bf16 %v8120_v8  ;;  %v8129_v5 = vunpack.i.h.bf16 %v8125_v13  ;;  %v8166_v27 = vunpack.i.h.bf16 %v8162_v40 }
 0xf4f   : > { %7628 = vmatpush1.bf16.msra.mxu0 %v7627_v25  ;;  %v7629_v9 = vpack.c.bf16 %v8045_v57, %v8040_v11  ;;  %v8126_v25 = vunpack.i.l.bf16 %v8125_v13  ;;  %v8163_v57 = vunpack.i.l.bf16 %v8162_v40 }
 0xf50   : > { %v7637_v8 = vpack.c.bf16 %v8129_v5, %v8124_v0  ;;  %v11666_v5 = vld [vmem:[#allocation4 + $0x1ba] sm:$0xff] }
 0xf51   : > { %8485 = vxpose.xlu0.b32.cont [10/16] (narrow) %v8484_v16, 16  ;;  %8611 = vxpose.xlu1.b32.cont [10/16] (narrow) %v11565_v17, 16  ;;  %v8087_v17 = vunpack.i.h.bf16 %v8083_v43  ;;  %v8614_v16 = vpack.i.bf16 %v6700_v23, %v6684_v32  ;;  %v8167_v43 = vpop.trf.xlu0  ;;  %v8204_v11 = vpop.trf.xlu1 }
 0xf52   : > { %7630 = vmatprep.subr.bf16.mxu0 %v7629_v9  ;;  %v8171_v49 = vunpack.i.h.bf16 %v8167_v43  ;;  %v8168_v63 = vunpack.i.l.bf16 %v8167_v43 }
 0xf53   : > { %7632 = vmatpush1.bf16.msra.mxu0 %v7631_v29  ;;  %v7633_v20 = vpack.c.bf16 %v8087_v17, %v8082_v31  ;;  %v11655_v29 = vld [vmem:[#allocation4 + $0xf2] sm:$0xff]  ;;  %v8208_v17 = vunpack.i.h.bf16 %v8204_v11 }
 0xf54   : > { %v11657_v31 = vld [vmem:[#allocation4 + $0x1b2] sm:$0xff]  ;;  %v7641_v40 = vpack.c.bf16 %v8171_v49, %v8166_v27  ;;  %v7643_v13 = vpack.c.bf16 %v8168_v63, %v8163_v57 }
 0xf55   : > { %8487 = vxpose.xlu0.b32.cont [11/16] (narrow) %v8486_v12, 16  ;;  %8613 = vxpose.xlu1.b32.cont [11/16] (narrow) %v8612_v22, 16  ;;  %v7635_v12 = vpack.c.bf16 %v8084_v53, %v8079_v47  ;;  %v7639_v22 = vpack.c.bf16 %v8126_v25, %v8121_v56  ;;  %v8246_v23 = vpop.trf.xlu0  ;;  %v8209_v9 = vpop.trf.xlu1  ;;  %v6703_v47 = vld [vmem:[#allocation4 + $0x1c8] sm:$0xff]  ;;  %v8205_v53 = vunpack.i.l.bf16 %v8204_v11  ;;  %v11664_v56 = vld [vmem:[#allocation4 + $0xfa] sm:$0xff]  ;;  %v6704_v25 = vld [vmem:[#allocation4 + $0x1d0] sm:$0xff] }
 0xf56   : > { %7634 = vmatprep.subr.bf16.mxu0 %v7633_v20  ;;  %v8620_v0 = vpack.i.bf16 %v6703_v47, %v11520_v46  ;;  %v8247_v20 = vunpack.i.l.bf16 %v8246_v23  ;;  %v8496_v46 = vpack.i.bf16 %v11666_v5, %v11664_v56  ;;  %v8622_v49 = vpack.i.bf16 %v6704_v25, %v11524_v30 }
 0xf57   : > { %7636 = vmatpush1.bf16.msra.mxu0 %v7635_v12  ;;  %v8678_v25 = vpack.i.bf16 %v11598_v7, %v11595_v1 }
 0xf58   : > { %7638 = vmatprep.subr.bf16.mxu0 %v7637_v8 }
 0xf59   : > { %8489 = vxpose.xlu0.b32.cont [12/16] (narrow) %v8488_v61, 16  ;;  %8615 = vxpose.xlu1.b32.cont [12/16] (narrow) %v8614_v16, 16  ;;  %v8251_v32 = vpop.trf.xlu0  ;;  %v8288_v61 = vpop.trf.xlu1  ;;  %v8494_v16 = vpack.i.bf16 %v11657_v31, %v11655_v29 }
 0xf5a   : > { %v8252_v12 = vunpack.i.l.bf16 %v8251_v32  ;;  %v8292_v63 = vunpack.i.h.bf16 %v8288_v61  ;;  %v8289_v8 = vunpack.i.l.bf16 %v8288_v61 }
 0xf5b   : > { %7640 = vmatpush1.bf16.msra.mxu0 %v7639_v22 }
 0xf5c   : > { %7642 = vmatprep.subr.bf16.mxu0 %v7641_v40  ;;  %v7651_v47 = vpack.c.bf16 %v8252_v12, %v8247_v20 }
 0xf5d   : > { %8491 = vxpose.xlu0.b32.cont [13/16] (narrow) %v11357_v2, 16  ;;  %8617 = vxpose.xlu1.b32.cont [13/16] (narrow) %v11573_v45, 16  ;;  %v8213_v2 = vunpack.i.h.bf16 %v8209_v9  ;;  %v8210_v45 = vunpack.i.l.bf16 %v8209_v9  ;;  %v8330_v27 = vpop.trf.xlu0  ;;  %v8293_v57 = vpop.trf.xlu1 }
 0xf5e   : > { %v8297_v22 = vunpack.i.h.bf16 %v8293_v57 }
 0xf5f   : > { %7644 = vmatpush1.bf16.msra.mxu0 %v7643_v13  ;;  %v7645_v43 = vpack.c.bf16 %v8213_v2, %v8208_v17  ;;  %v7647_v11 = vpack.c.bf16 %v8210_v45, %v8205_v53  ;;  %v8676_v53 = vpack.i.bf16 %v11591_v19, %v11588_v35  ;;  %v8334_v2 = vunpack.i.h.bf16 %v8330_v27 }
 0xf60   : > { %v8331_v45 = vunpack.i.l.bf16 %v8330_v27 }
 0xf61   : > { %8493 = vxpose.xlu0.b32.cont [14/16] (narrow) %v11363_v18, 16  ;;  %8619 = vxpose.xlu1.b32.cont [14/16] (narrow) %v11577_v10, 16  ;;  %v8250_v18 = vunpack.i.h.bf16 %v8246_v23  ;;  %v8255_v10 = vunpack.i.h.bf16 %v8251_v32  ;;  %v8294_v23 = vunpack.i.l.bf16 %v8293_v57  ;;  %v8335_v40 = vpop.trf.xlu0  ;;  %v8372_v17 = vpop.trf.xlu1  ;;  %v7653_v32 = vpack.c.bf16 %v8297_v22, %v8292_v63 }
 0xf62   : > { %7646 = vmatprep.subr.bf16.mxu0 %v7645_v43  ;;  %v8339_v30 = vunpack.i.h.bf16 %v8335_v40  ;;  %v8336_v13 = vunpack.i.l.bf16 %v8335_v40  ;;  %v8373_v20 = vunpack.i.l.bf16 %v8372_v17  ;;  %v8680_v43 = vpack.i.bf16 %v11605_v15, %v11602_v3 }
 0xf63   : > { %7648 = vmatpush1.bf16.msra.mxu0 %v7647_v11  ;;  %v7649_v9 = vpack.c.bf16 %v8255_v10, %v8250_v18  ;;  %v7655_v61 = vpack.c.bf16 %v8294_v23, %v8289_v8  ;;  %v8376_v18 = vunpack.i.h.bf16 %v8372_v17  ;;  %v8684_v63 = vpack.i.bf16 %v11619_v4, %v11616_v21  ;;  %v11719_v23 = vld [vmem:[#allocation4 + $0xf4] sm:$0xff] }
 0xf64   : > { %v7659_v10 = vpack.c.bf16 %v8336_v13, %v8331_v45  ;;  %v8700_v8 = vpack.i.bf16 %v11655_v29, %v11657_v31  ;;  %v8702_v22 = vpack.i.bf16 %v11664_v56, %v11666_v5  ;;  %v11727_v29 = vld [vmem:[#allocation4 + $0xfc] sm:$0xff]  ;;  %v6904_v31 = vld [vmem:[#allocation4 + $0x1d2] sm:$0xff] }
 0xf65   : > { %8495 = vxpose.xlu0.b32.cont [15/16] (narrow) %v8494_v16, 16  ;;  %8621 = vxpose.xlu1.b32.cont [15/16] (narrow) %v8620_v0, 16  ;;  %v8377_v0 = vpop.trf.xlu1  ;;  %v8706_v5 = vpack.i.bf16 %v11584_v44, %v6904_v31  ;;  %v6773_v45 = vld [vmem:[#allocation4 + $0x61] sm:$0xff] }
 0xf66   : > { %7650 = vmatprep.subr.bf16.mxu0 %v7649_v9  ;;  %v8381_v35 = vunpack.i.h.bf16 %v8377_v0  ;;  %v8378_v19 = vunpack.i.l.bf16 %v8377_v0  ;;  %v11721_v9 = vld [vmem:[#allocation4 + $0x1b4] sm:$0xff]  ;;  %v6774_v0 = vld [vmem:[#allocation4 + $0x69] sm:$0xff] }
 0xf67   : > { %7652 = vmatpush1.bf16.msra.mxu0 %v7651_v47  ;;  %v6903_v47 = vld [vmem:[#allocation4 + $0x1ca] sm:$0xff]  ;;  %v8578_v40 = vpack.i.bf16 %v11721_v9, %v11719_v23 }
 0xf68   : > { %7654 = vmatprep.subr.bf16.mxu0 %v7653_v32  ;;  %v7661_v57 = vpack.c.bf16 %v8381_v35, %v8376_v18  ;;  %v8704_v17 = vpack.i.bf16 %v11580_v51, %v6903_v47  ;;  %v7073_v51 = vld [vmem:[#allocation4 + $0x64] sm:$0xff]  ;;  %v6791_v35 = vld [vmem:[#allocation4 + $0x139] sm:$0xff] }
 0xf69   : > { %8497 = vxpose.xlu0.b32.end [16/16] (narrow) %v8496_v46, 16  ;;  %8623 = vxpose.xlu1.b32.end [16/16] (narrow) %v8622_v49, 16  ;;  %v8682_v46 = vpack.i.bf16 %v11612_v36, %v11609_v42  ;;  %v7173_v49 = vld [vmem:[%s11828_s5] sm:$0xff]  ;;  %v8688_v42 = vpack.i.bf16 %v11633_v14, %v11630_v52  ;;  %v8690_v36 = vpack.i.bf16 %v11640_v59, %v11637_v60  ;;  %v11708_v60 = vld [vmem:[#allocation4 + $0x18c] sm:$0xff] }
 0xf6a   : > { %v6883_v52 = vld [vmem:[#allocation4 + $0xda] sm:$0xff]  ;;  %v11710_v59 = vld [vmem:[#allocation4 + $0xcc] sm:$0xff] }
 0xf6b   : > { %7656 = vmatpush1.bf16.msra.mxu0 %v7655_v61  ;;  %v6790_v32 = vld [vmem:[#allocation4 + $0x129] sm:$0xff] }
 0xf6c   : > { %v7090_v61 = vld [vmem:[#allocation4 + $0x12c] sm:$0xff]  ;;  %v8636_v44 = vpack.i.bf16 %v6790_v32, %v6774_v0  ;;  %v7099_v0 = vld [vmem:[#allocation4 + $0x19c] sm:$0xff] }
 0xf6d   : > { %8551 = vxpose.xlu0.b32.start [1/16] (narrow) %v11375_v54, 16  ;;  %8677 = vxpose.xlu1.b32.start [1/16] (narrow) %v8676_v53, 16  ;;  %v8414_v16 = vpop.trf.xlu0  ;;  %v7657_v54 = vpack.c.bf16 %v8339_v30, %v8334_v2  ;;  %v6789_v53 = vld [vmem:[#allocation4 + $0x121] sm:$0xff]  ;;  %v11734_v2 = vpop.trf.xlu1 }
 0xf6e   : > { %v8418_v11 = vunpack.i.h.bf16 %v8414_v16  ;;  %v8415_v27 = vunpack.i.l.bf16 %v8414_v16  ;;  %v8634_v30 = vpack.i.bf16 %v6789_v53, %v6773_v45  ;;  %v6782_v53 = vld [vmem:[#allocation4 + $0xc9] sm:$0xff]  ;;  %v8460_v45 = vunpack.i.h.bf16 %v11734_v2 }
 0xf6f   : > { %7658 = vmatprep.subr.bf16.mxu0 %v7657_v54  ;;  %v6775_v54 = vld [vmem:[#allocation4 + $0x79] sm:$0xff] }
 0xf70   : > { %7660 = vmatpush1.bf16.msra.mxu0 %v7659_v10  ;;  %v7075_v10 = vld [vmem:[#allocation4 + $0x7c] sm:$0xff] }
 0xf71   : > { %8553 = vxpose.xlu0.b32.cont [2/16] (narrow) %v11381_v62, 16  ;;  %8679 = vxpose.xlu1.b32.cont [2/16] (narrow) %v8678_v25, 16  ;;  %v8419_v12 = vpop.trf.xlu0  ;;  %v7663_v62 = vpack.c.bf16 %v8378_v19, %v8373_v20  ;;  %v7074_v25 = vld [vmem:[#allocation4 + $0x6c] sm:$0xff]  ;;  %v11738_v18 = vpop.trf.xlu1  ;;  %v7091_v19 = vld [vmem:[#allocation4 + $0x13c] sm:$0xff] }
 0xf72   : > { %v8423_v1 = vunpack.i.h.bf16 %v8419_v12  ;;  %v8420_v7 = vunpack.i.l.bf16 %v8419_v12  ;;  %7662 = vmatprep.subr.bf16.mxu0 %v7661_v57  ;;  %v8762_v20 = vpack.i.bf16 %v7074_v25, %v7090_v61  ;;  %v8638_v12 = vpack.i.bf16 %v6791_v35, %v6775_v54  ;;  %v6783_v25 = vld [vmem:[#allocation4 + $0xd9] sm:$0xff] }
 0xf73   : > { %v8778_v61 = vpack.i.bf16 %v11710_v59, %v11708_v60 }
 0xf74   : > { %7664 = vmatpush1.bf16.msra.mxu0 %v7663_v62  ;;  %v7665_v3 = vpack.c.bf16 %v8423_v1, %v8418_v11  ;;  %v7667_v15 = vpack.c.bf16 %v8420_v7, %v8415_v27  ;;  %v6792_v11 = vld [vmem:[#allocation4 + $0x141] sm:$0xff] }
 0xf75   : > { %8555 = vxpose.xlu0.b32.cont [3/16] (narrow) %v11387_v26, 16  ;;  %8681 = vxpose.xlu1.b32.cont [3/16] (narrow) %v8680_v43, 16  ;;  %v7283_v26 = vcombine.high %v7173_v49, %v7173_v49  ;;  %v8764_v43 = vpack.i.bf16 %v7075_v10, %v7091_v19  ;;  %v7092_v27 = vld [vmem:[#allocation4 + $0x144] sm:$0xff]  ;;  %v8540_v19 = vpop.trf.xlu1 }
 0xf76   : > { %7666 = vmatprep.subr.bf16.mxu0 %v7665_v3  ;;  %v6776_v1 = vld [vmem:[#allocation4 + $0x81] sm:$0xff]  ;;  %v7093_v3 = vld [vmem:[#allocation4 + $0x154] sm:$0xff] }
 0xf77   : > { %7352 = vmatprep.mubr.f32.mxu0 %v7283_v26  ;;  %v7076_v7 = vld [vmem:[#allocation4 + $0x84] sm:$0xff]  ;;  %v8640_v57 = vpack.i.bf16 %v6792_v11, %v6776_v1 }
 0xf78   : > { %7668 = vmatpush1.bf16.msra.mxu0 %v7667_v15  ;;  %v8766_v62 = vpack.i.bf16 %v7076_v7, %v7092_v27  ;;  %v6777_v15 = vld [vmem:[#allocation4 + $0x91] sm:$0xff]  ;;  %v8544_v27 = vunpack.i.h.bf16 %v8540_v19 }
 0xf79   : > { %8557 = vxpose.xlu0.b32.cont [4/16] (narrow) %v11393_v6, 16  ;;  %8683 = vxpose.xlu1.b32.cont [4/16] (narrow) %v8682_v46, 16  ;;  %v8686_v6 = vpack.i.bf16 %v11626_v50, %v11623_v24  ;;  %v11701_v24 = vld [vmem:[#allocation4 + $0x184] sm:$0xff]  ;;  %v6899_v50 = vld [vmem:[#allocation4 + $0x19a] sm:$0xff]  ;;  %v6793_v46 = vld [vmem:[#allocation4 + $0x151] sm:$0xff] }
 0xf7a   : > { %v8696_v14 = vpack.i.bf16 %v6883_v52, %v6899_v50  ;;  %v8642_v26 = vpack.i.bf16 %v6793_v46, %v6777_v15  ;;  %v7095_v50 = vld [vmem:[#allocation4 + $0x16c] sm:$0xff] }
 0xf7b   : > { %7353 = vmatmul.mubr.f32.vlgmr.msra.gmra.mrb[2].mxu0 %v7173_v49  ;;  %v7077_v49 = vld [vmem:[#allocation4 + $0x94] sm:$0xff]  ;;  %v6779_v52 = vld [vmem:[#allocation4 + $0xa9] sm:$0xff] }
 0xf7d   : > { %8559 = vxpose.xlu0.b32.cont [5/16] (narrow) %v11399_v28, 16  ;;  %8685 = vxpose.xlu1.b32.cont [5/16] (narrow) %v8684_v63, 16  ;;  %v6881_v28 = vld [vmem:[#allocation4 + $0xc2] sm:$0xff]  ;;  %v8768_v63 = vpack.i.bf16 %v7077_v49, %v7093_v3  ;;  %v6785_v49 = vld [vmem:[#allocation4 + $0xf1] sm:$0xff] }
 0xf7e   : > { %v8692_v21 = vpack.i.bf16 %v6881_v28, %v11644_v38  ;;  %v6884_v38 = vld [vmem:[#allocation4 + $0xe2] sm:$0xff] }
 0xf7f   : > { %v7078_v28 = vld [vmem:[#allocation4 + $0x9c] sm:$0xff] }
 0xf81   : > { %8561 = vxpose.xlu0.b32.cont [6/16] (narrow) %v11405_v37, 16  ;;  %8687 = vxpose.xlu1.b32.cont [6/16] (narrow) %v8686_v6, 16  ;;  %v6882_v37 = vld [vmem:[#allocation4 + $0xca] sm:$0xff]  ;;  %v6794_v6 = vld [vmem:[#allocation4 + $0x159] sm:$0xff] }
 0xf82   : > { %v8694_v4 = vpack.i.bf16 %v6882_v37, %v11649_v34  ;;  %v8572_v34 = vpack.i.bf16 %v11708_v60, %v11710_v59  ;;  %v6784_v60 = vld [vmem:[#allocation4 + $0xe1] sm:$0xff] }
 0xf83   : > { %v7084_v59 = vld [vmem:[#allocation4 + $0xe4] sm:$0xff] }
 0xf85   : > { %8563 = vxpose.xlu0.b32.cont [7/16] (narrow) %v11411_v48, 16  ;;  %8689 = vxpose.xlu1.b32.cont [7/16] (narrow) %v8688_v42, 16  ;;  %v11704_v48 = vld [vmem:[#allocation4 + $0xc4] sm:$0xff]  ;;  %v7094_v42 = vld [vmem:[#allocation4 + $0x15c] sm:$0xff] }
 0xf86   : > { %v8770_v37 = vpack.i.bf16 %v7078_v28, %v7094_v42  ;;  %v8784_v28 = vpack.i.bf16 %v11719_v23, %v11721_v9  ;;  %v6804_v23 = vld [vmem:[#allocation4 + $0x1d1] sm:$0xff] }
 0xf87   : > { %v6788_v9 = vld [vmem:[#allocation4 + $0x111] sm:$0xff] }
 0xf89   : > { %8565 = vxpose.xlu0.b32.cont [8/16] (narrow) %v11417_v39, 16  ;;  %8691 = vxpose.xlu1.b32.cont [8/16] (narrow) %v8690_v36, 16  ;;  %v8570_v39 = vpack.i.bf16 %v11701_v24, %v11704_v48  ;;  %v6778_v36 = vld [vmem:[#allocation4 + $0x99] sm:$0xff] }
 0xf8d   : > { %8567 = vxpose.xlu0.b32.cont [9/16] (narrow) %v11423_v41, 16  ;;  %8693 = vxpose.xlu1.b32.cont [9/16] (narrow) %v8692_v21, 16  ;;  %v6900_v41 = vld [vmem:[#allocation4 + $0x1a2] sm:$0xff]  ;;  %v8644_v21 = vpack.i.bf16 %v6794_v6, %v6778_v36 }
 0xf91   : > { %8569 = vxpose.xlu0.b32.cont [10/16] (narrow) %v11429_v33, 16  ;;  %8695 = vxpose.xlu1.b32.cont [10/16] (narrow) %v8694_v4, 16  ;;  %v8698_v33 = vpack.i.bf16 %v6884_v38, %v6900_v41  ;;  %v6795_v4 = vld [vmem:[#allocation4 + $0x169] sm:$0xff]  ;;  %v6796_v38 = vld [vmem:[#allocation4 + $0x171] sm:$0xff] }
 0xf95   : > { %8571 = vxpose.xlu0.b32.cont [11/16] (narrow) %v8570_v39, 16  ;;  %8697 = vxpose.xlu1.b32.cont [11/16] (narrow) %v8696_v14, 16  ;;  %v7079_v39 = vld [vmem:[#allocation4 + $0xac] sm:$0xff]  ;;  %v8646_v14 = vpack.i.bf16 %v6795_v4, %v6779_v52 }
 0xf96   : > { %v8772_v41 = vpack.i.bf16 %v7079_v39, %v7095_v50  ;;  %v6803_v39 = vld [vmem:[#allocation4 + $0x1c9] sm:$0xff] }
 0xf99   : > { %8573 = vxpose.xlu0.b32.cont [12/16] (narrow) %v8572_v34, 16  ;;  %8699 = vxpose.xlu1.b32.cont [12/16] (narrow) %v8698_v33, 16  ;;  %v7096_v34 = vld [vmem:[#allocation4 + $0x174] sm:$0xff] }
 0xf9a   : > { %v6780_v33 = vld [vmem:[#allocation4 + $0xb1] sm:$0xff] }
 0xf9d   : > { %8575 = vxpose.xlu0.b32.cont [13/16] (narrow) %v11445_v58, 16  ;;  %8701 = vxpose.xlu1.b32.cont [13/16] (narrow) %v8700_v8, 16  ;;  %v11729_v58 = vld [vmem:[#allocation4 + $0x1bc] sm:$0xff]  ;;  %v7080_v8 = vld [vmem:[#allocation4 + $0xb4] sm:$0xff] }
 0xf9e   : > { %v8580_v56 = vpack.i.bf16 %v11729_v58, %v11727_v29  ;;  %v8774_v47 = vpack.i.bf16 %v7080_v8, %v7096_v34  ;;  %v8786_v52 = vpack.i.bf16 %v11727_v29, %v11729_v58  ;;  %v7088_v8 = vld [vmem:[#allocation4 + $0x114] sm:$0xff]  ;;  %v6973_v29 = vld [vmem:[#allocation4 + $0x63] sm:$0xff] }
 0xfa1   : > { %8577 = vxpose.xlu0.b32.cont [14/16] (narrow) %v11451_v55, 16  ;;  %8703 = vxpose.xlu1.b32.cont [14/16] (narrow) %v8702_v22, 16  ;;  %v7089_v55 = vld [vmem:[#allocation4 + $0x124] sm:$0xff]  ;;  %v8648_v22 = vpack.i.bf16 %v6796_v38, %v6780_v33  ;;  %v7103_v38 = vld [vmem:[#allocation4 + $0x1cc] sm:$0xff] }
 0xfa2   : > { %v8760_v13 = vpack.i.bf16 %v7073_v51, %v7089_v55  ;;  %v6799_v55 = vld [vmem:[#allocation4 + $0x199] sm:$0xff]  ;;  %v8457_v51 = vunpack.i.l.bf16 %v11734_v2 }
 0xfa5   : > { %8579 = vxpose.xlu0.b32.cont [15/16] (narrow) %v8578_v40, 16  ;;  %8705 = vxpose.xlu1.b32.cont [15/16] (narrow) %v8704_v17, 16  ;;  %v6797_v40 = vld [vmem:[#allocation4 + $0x181] sm:$0xff] }
 0xfa6   : > { %v6781_v17 = vld [vmem:[#allocation4 + $0xc1] sm:$0xff] }
 0xfa7   : > { %v8650_v31 = vpack.i.bf16 %v6797_v40, %v6781_v17  ;;  %v6989_v17 = vld [vmem:[#allocation4 + $0x123] sm:$0xff] }
 0xfa8   : > { %v8718_v58 = vpack.i.bf16 %v6973_v29, %v6989_v17  ;;  %v7002_v17 = vld [vmem:[#allocation4 + $0x1bb] sm:$0xff] }
 0xfa9   : > { %8581 = vxpose.xlu0.b32.end [16/16] (narrow) %v8580_v56, 16  ;;  %8707 = vxpose.xlu1.b32.end [16/16] (narrow) %v8706_v5, 16  ;;  %v8776_v56 = vpack.i.bf16 %v11704_v48, %v11701_v24  ;;  %v6798_v5 = vld [vmem:[#allocation4 + $0x189] sm:$0xff]  ;;  %v8654_v24 = vpack.i.bf16 %v6799_v55, %v6783_v25  ;;  %v7083_v48 = vld [vmem:[#allocation4 + $0xdc] sm:$0xff] }
 0xfaa   : > { %v8652_v32 = vpack.i.bf16 %v6798_v5, %v6782_v53  ;;  %v6974_v55 = vld [vmem:[#allocation4 + $0x6b] sm:$0xff] }
 0xfad   : > { %8635 = vxpose.xlu0.b32.start [1/16] (narrow) %v8634_v30, 16  ;;  %8761 = vxpose.xlu1.b32.start [1/16] (narrow) %v8760_v13, 16  ;;  %v11736_v16 = vpop.trf.xlu0  ;;  %v8465_v30 = vunpack.i.h.bf16 %v11738_v18  ;;  %v8462_v13 = vunpack.i.l.bf16 %v11738_v18  ;;  %v6800_v18 = vld [vmem:[#allocation4 + $0x1a1] sm:$0xff] }
 0xfae   : > { %v8499_v35 = vunpack.i.l.bf16 %v11736_v16  ;;  %v8656_v7 = vpack.i.bf16 %v6800_v18, %v6784_v60  ;;  %v6992_v18 = vld [vmem:[#allocation4 + $0x143] sm:$0xff] }
 0xfaf   : > { %v7669_v54 = vpack.c.bf16 %v8465_v30, %v8460_v45  ;;  %v7671_v10 = vpack.c.bf16 %v8462_v13, %v8457_v51  ;;  %v6975_v45 = vld [vmem:[#allocation4 + $0x7b] sm:$0xff] }
 0xfb1   : > { %8637 = vxpose.xlu0.b32.cont [2/16] (narrow) %v8636_v44, 16  ;;  %8763 = vxpose.xlu1.b32.cont [2/16] (narrow) %v8762_v20, 16  ;;  %v8502_v44 = vunpack.i.h.bf16 %v11736_v16  ;;  %v8780_v20 = vpack.i.bf16 %v7083_v48, %v7099_v0  ;;  %v8503_v2 = vpop.trf.xlu0  ;;  %v8545_v16 = vpop.trf.xlu1 }
 0xfb2   : > { %v8504_v11 = vunpack.i.l.bf16 %v8503_v2  ;;  %7670 = vmatprep.subr.bf16.mxu1 %v7669_v54  ;;  %v8549_v3 = vunpack.i.h.bf16 %v8545_v16  ;;  %v8546_v15 = vunpack.i.l.bf16 %v8545_v16 }
 0xfb3   : > { %7672 = vmatpush1.bf16.msra.mxu1 %v7671_v10 }
 0xfb4   : > { %v7675_v46 = vpack.c.bf16 %v8504_v11, %v8499_v35 }
 0xfb5   : > { %8639 = vxpose.xlu0.b32.cont [3/16] (narrow) %v8638_v12, 16  ;;  %8765 = vxpose.xlu1.b32.cont [3/16] (narrow) %v8764_v43, 16  ;;  %v7100_v12 = vld [vmem:[#allocation4 + $0x1a4] sm:$0xff]  ;;  %v8507_v43 = vunpack.i.h.bf16 %v8503_v2  ;;  %v11750_v6 = vpop.trf.xlu1 }
 0xfb7   : > { %v7673_v1 = vpack.c.bf16 %v8507_v43, %v8502_v44 }
 0xfb9   : > { %8641 = vxpose.xlu0.b32.cont [4/16] (narrow) %v8640_v57, 16  ;;  %8767 = vxpose.xlu1.b32.cont [4/16] (narrow) %v8766_v62, 16  ;;  %v8782_v57 = vpack.i.bf16 %v7084_v59, %v7100_v12  ;;  %v8541_v62 = vunpack.i.l.bf16 %v8540_v19  ;;  %v8629_v4 = vpop.trf.xlu1 }
 0xfba   : > { %7674 = vmatprep.subr.bf16.mxu1 %v7673_v1  ;;  %v8633_v0 = vunpack.i.h.bf16 %v8629_v4  ;;  %v8630_v48 = vunpack.i.l.bf16 %v8629_v4  ;;  %v6981_v4 = vld [vmem:[#allocation4 + $0xc3] sm:$0xff] }
 0xfbb   : > { %7676 = vmatpush1.bf16.msra.mxu1 %v7675_v46  ;;  %v7679_v42 = vpack.c.bf16 %v8546_v15, %v8541_v62  ;;  %v6977_v62 = vld [vmem:[#allocation4 + $0x93] sm:$0xff]  ;;  %v11765_v46 = vld [vmem:[%s11828_s5 + $0x8] sm:$0xff] }
 0xfbc   : > { %v7284_v15 = vcombine.high %v11765_v46, %v11765_v46 }
 0xfbd   : > { %8643 = vxpose.xlu0.b32.cont [5/16] (narrow) %v8642_v26, 16  ;;  %8769 = vxpose.xlu1.b32.cont [5/16] (narrow) %v8768_v63, 16  ;;  %v6801_v26 = vld [vmem:[#allocation4 + $0x1b1] sm:$0xff]  ;;  %v7677_v63 = vpack.c.bf16 %v8549_v3, %v8544_v27  ;;  %v6976_v27 = vld [vmem:[#allocation4 + $0x83] sm:$0xff]  ;;  %v6994_v3 = vld [vmem:[#allocation4 + $0x15b] sm:$0xff] }
 0xfbe   : > { %v8658_v36 = vpack.i.bf16 %v6801_v26, %v6785_v49  ;;  %v8724_v1 = vpack.i.bf16 %v6976_v27, %v6992_v18  ;;  %v6978_v49 = vld [vmem:[#allocation4 + $0x9b] sm:$0xff]  ;;  %7521 = vmatprep.mubr.msk.f32.mxu1 %vm4575_vm8, %v7284_v15 }
 0xfbf   : > { %7678 = vmatprep.subr.bf16.mxu1 %v7677_v63  ;;  %v8728_v26 = vpack.i.bf16 %v6978_v49, %v6994_v3  ;;  %v6995_v63 = vld [vmem:[#allocation4 + $0x16b] sm:$0xff] }
 0xfc0   : > { %7680 = vmatpush1.bf16.msra.mxu1 %v7679_v42 }
 0xfc1   : > { %8645 = vxpose.xlu0.b32.cont [6/16] (narrow) %v8644_v21, 16  ;;  %8771 = vxpose.xlu1.b32.cont [6/16] (narrow) %v8770_v37, 16  ;;  %v6786_v21 = vld [vmem:[#allocation4 + $0xf9] sm:$0xff] }
 0xfc2   : > { %v6802_v37 = vld [vmem:[#allocation4 + $0x1b9] sm:$0xff] }
 0xfc3   : > { %v8660_v50 = vpack.i.bf16 %v6802_v37, %v6786_v21  ;;  %v6997_v37 = vld [vmem:[#allocation4 + $0x183] sm:$0xff] }
 0xfc5   : > { %8647 = vxpose.xlu0.b32.cont [7/16] (narrow) %v8646_v14, 16  ;;  %8773 = vxpose.xlu1.b32.cont [7/16] (narrow) %v8772_v41, 16  ;;  %v6787_v14 = vld [vmem:[#allocation4 + $0x109] sm:$0xff] }
 0xfc6   : > { %v7087_v41 = vld [vmem:[#allocation4 + $0x10c] sm:$0xff]  ;;  %v8662_v34 = vpack.i.bf16 %v6803_v39, %v6787_v14 }
 0xfc7   : > { %v8788_v33 = vpack.i.bf16 %v7087_v41, %v7103_v38  ;;  %v6982_v39 = vld [vmem:[#allocation4 + $0xcb] sm:$0xff]  ;;  %v6999_v41 = vld [vmem:[#allocation4 + $0x19b] sm:$0xff] }
 0xfc8   : > { %v6983_v38 = vld [vmem:[#allocation4 + $0xdb] sm:$0xff] }
 0xfc9   : > { %8649 = vxpose.xlu0.b32.cont [8/16] (narrow) %v8648_v22, 16  ;;  %8775 = vxpose.xlu1.b32.cont [8/16] (narrow) %v8774_v47, 16  ;;  %v7104_v22 = vld [vmem:[#allocation4 + $0x1d4] sm:$0xff]  ;;  %v8664_v47 = vpack.i.bf16 %v6804_v23, %v6788_v9  ;;  %v6984_v23 = vld [vmem:[#allocation4 + $0xe3] sm:$0xff] }
 0xfca   : > { %v8790_v40 = vpack.i.bf16 %v7088_v8, %v7104_v22  ;;  %v6985_v8 = vld [vmem:[#allocation4 + $0xf3] sm:$0xff] }
 0xfcb   : > { %v7001_v22 = vld [vmem:[#allocation4 + $0x1b3] sm:$0xff] }
 0xfcd   : > { %8651 = vxpose.xlu0.b32.cont [9/16] (narrow) %v8650_v31, 16  ;;  %8777 = vxpose.xlu1.b32.cont [9/16] (narrow) %v8776_v56, 16  ;;  %v6990_v31 = vld [vmem:[#allocation4 + $0x12b] sm:$0xff]  ;;  %v6991_v56 = vld [vmem:[#allocation4 + $0x13b] sm:$0xff] }
 0xfce   : > { %v8720_v51 = vpack.i.bf16 %v6974_v55, %v6990_v31  ;;  %v8722_v30 = vpack.i.bf16 %v6975_v45, %v6991_v56  ;;  %v7003_v31 = vld [vmem:[#allocation4 + $0x1cb] sm:$0xff] }
 0xfd1   : > { %8653 = vxpose.xlu0.b32.cont [10/16] (narrow) %v8652_v32, 16  ;;  %8779 = vxpose.xlu1.b32.cont [10/16] (narrow) %v8778_v61, 16  ;;  %v8628_v61 = vunpack.i.h.bf16 %v11750_v6 }
 0xfd3   : > { %v7685_v11 = vpack.c.bf16 %v8633_v0, %v8628_v61 }
 0xfd5   : > { %8655 = vxpose.xlu0.b32.cont [11/16] (narrow) %v8654_v24, 16  ;;  %8781 = vxpose.xlu1.b32.cont [11/16] (narrow) %v8780_v20, 16  ;;  %v8625_v24 = vunpack.i.l.bf16 %v11750_v6  ;;  %v6979_v6 = vld [vmem:[#allocation4 + $0xab] sm:$0xff] }
 0xfd6   : > { %v8730_v42 = vpack.i.bf16 %v6979_v6, %v6995_v63 }
 0xfd9   : > { %8657 = vxpose.xlu0.b32.cont [12/16] (narrow) %v8656_v7, 16  ;;  %8783 = vxpose.xlu1.b32.cont [12/16] (narrow) %v8782_v57, 16  ;;  %v7687_v7 = vpack.c.bf16 %v8630_v48, %v8625_v24  ;;  %v6993_v57 = vld [vmem:[#allocation4 + $0x153] sm:$0xff] }
 0xfda   : > { %v8726_v16 = vpack.i.bf16 %v6977_v62, %v6993_v57 }
 0xfdd   : > { %8659 = vxpose.xlu0.b32.cont [13/16] (narrow) %v8658_v36, 16  ;;  %8785 = vxpose.xlu1.b32.cont [13/16] (narrow) %v8784_v28, 16  ;;  %v6996_v36 = vld [vmem:[#allocation4 + $0x173] sm:$0xff] }
 0xfde   : > { %v6980_v28 = vld [vmem:[#allocation4 + $0xb3] sm:$0xff] }
 0xfdf   : > { %v8732_v21 = vpack.i.bf16 %v6980_v28, %v6996_v36 }
 0xfe1   : > { %8661 = vxpose.xlu0.b32.cont [14/16] (narrow) %v8660_v50, 16  ;;  %8787 = vxpose.xlu1.b32.cont [14/16] (narrow) %v8786_v52, 16  ;;  %v8734_v50 = vpack.i.bf16 %v6981_v4, %v6997_v37  ;;  %v6998_v52 = vld [vmem:[#allocation4 + $0x18b] sm:$0xff] }
 0xfe2   : > { %v8736_v14 = vpack.i.bf16 %v6982_v39, %v6998_v52 }
 0xfe5   : > { %8663 = vxpose.xlu0.b32.cont [15/16] (narrow) %v8662_v34, 16  ;;  %8789 = vxpose.xlu1.b32.cont [15/16] (narrow) %v8788_v33, 16  ;;  %v8738_v34 = vpack.i.bf16 %v6983_v38, %v6999_v41  ;;  %v7000_v33 = vld [vmem:[#allocation4 + $0x1a3] sm:$0xff] }
 0xfe6   : > { %v8740_v9 = vpack.i.bf16 %v6984_v23, %v7000_v33 }
 0xfe9   : > { %8665 = vxpose.xlu0.b32.end [16/16] (narrow) %v8664_v47, 16  ;;  %8791 = vxpose.xlu1.b32.end [16/16] (narrow) %v8790_v40, 16  ;;  %v8742_v47 = vpack.i.bf16 %v6985_v8, %v7001_v22  ;;  %v6986_v40 = vld [vmem:[#allocation4 + $0xfb] sm:$0xff] }
 0xfea   : > { %v8744_v29 = vpack.i.bf16 %v6986_v40, %v7002_v17 }
 0xfed   : > { %8719 = vxpose.xlu0.b32.start [1/16] (narrow) %v8718_v58, 16  ;;  %v8582_v5 = vpop.trf.xlu0  ;;  %v8708_v53 = vpop.trf.xlu1  ;;  %v6987_v58 = vld [vmem:[#allocation4 + $0x10b] sm:$0xff] }
 0xfee   : > { %v8586_v13 = vunpack.i.h.bf16 %v8582_v5  ;;  %v8583_v32 = vunpack.i.l.bf16 %v8582_v5  ;;  %v8712_v44 = vunpack.i.h.bf16 %v8708_v53  ;;  %v8709_v20 = vunpack.i.l.bf16 %v8708_v53  ;;  %v6988_v5 = vld [vmem:[#allocation4 + $0x113] sm:$0xff] }
 0xfef   : > { %v8746_v56 = vpack.i.bf16 %v6987_v58, %v7003_v31  ;;  %v7004_v53 = vld [vmem:[#allocation4 + $0x1d3] sm:$0xff] }
 0xff0   : > { %v8748_v55 = vpack.i.bf16 %v6988_v5, %v7004_v53 }
 0xff1   : > { %8721 = vxpose.xlu0.b32.cont [2/16] (narrow) %v8720_v51, 16  ;;  %v8587_v25 = vpop.trf.xlu0  ;;  %v8713_v35 = vpop.trf.xlu1 }
 0xff2   : > { %v8591_v2 = vunpack.i.h.bf16 %v8587_v25  ;;  %v8588_v19 = vunpack.i.l.bf16 %v8587_v25  ;;  %v8717_v54 = vunpack.i.h.bf16 %v8713_v35  ;;  %v8714_v10 = vunpack.i.l.bf16 %v8713_v35 }
 0xff4   : > { %v7681_v12 = vpack.c.bf16 %v8591_v2, %v8586_v13  ;;  %v7683_v43 = vpack.c.bf16 %v8588_v19, %v8583_v32  ;;  %v11758_v60 = vpack.c.bf16 %v8714_v10, %v8709_v20  ;;  %v11760_v59 = vpack.c.bf16 %v8717_v54, %v8712_v44  ;;  %v7275_v10 = vld [vmem:[%s11829_s6] sm:$0xf] }
 0xff5   : > { %8723 = vxpose.xlu0.b32.cont [3/16] (narrow) %v8722_v30, 16 }
 0xff6   : > { %7682 = vmatprep.subr.bf16.mxu1 %v7681_v12 }
 0xff7   : > { %7684 = vmatpush1.bf16.msra.mxu1 %v7683_v43 }
 0xff8   : > { %7686 = vmatprep.subr.bf16.mxu1 %v7685_v11 }
 0xff9   : > { %8725 = vxpose.xlu0.b32.cont [4/16] (narrow) %v8724_v1, 16 }
 0xffb   : > { %7688 = vmatpush1.bf16.msra.mxu1 %v7687_v7 }
 0xffd   : > { %8727 = vxpose.xlu0.b32.cont [5/16] (narrow) %v8726_v16, 16 }
0x1001   : > { %8729 = vxpose.xlu0.b32.cont [6/16] (narrow) %v8728_v26, 16 }
0x1005   : > { %8731 = vxpose.xlu0.b32.cont [7/16] (narrow) %v8730_v42, 16 }
0x1009   : > { %8733 = vxpose.xlu0.b32.cont [8/16] (narrow) %v8732_v21, 16 }
0x100d   : > { %8735 = vxpose.xlu0.b32.cont [9/16] (narrow) %v8734_v50, 16 }
0x1011   : > { %8737 = vxpose.xlu0.b32.cont [10/16] (narrow) %v8736_v14, 16 }
0x1015   : > { %8739 = vxpose.xlu0.b32.cont [11/16] (narrow) %v8738_v34, 16 }
0x1019   : > { %8741 = vxpose.xlu0.b32.cont [12/16] (narrow) %v8740_v9, 16 }
0x101d   : > { %8743 = vxpose.xlu0.b32.cont [13/16] (narrow) %v8742_v47, 16 }
0x1021   : > { %8745 = vxpose.xlu0.b32.cont [14/16] (narrow) %v8744_v29, 16 }
0x1025   : > { %8747 = vxpose.xlu0.b32.cont [15/16] (narrow) %v8746_v56, 16 }
0x1029   : > { %8749 = vxpose.xlu0.b32.end [16/16] (narrow) %v8748_v55, 16 }
0x102d   : > { %v8666_v45 = vpop.trf.xlu0  ;;  %v8792_v51 = vpop.trf.xlu1 }
0x102e   : > { %v8670_v30 = vunpack.i.h.bf16 %v8666_v45  ;;  %v8667_v13 = vunpack.i.l.bf16 %v8666_v45  ;;  %v8796_v61 = vunpack.i.h.bf16 %v8792_v51  ;;  %v8793_v0 = vunpack.i.l.bf16 %v8792_v51 }
0x1031   : > { %v8671_v32 = vpop.trf.xlu0  ;;  %v8797_v25 = vpop.trf.xlu1 }
0x1032   : > { %v8675_v24 = vunpack.i.h.bf16 %v8671_v32  ;;  %v8672_v48 = vunpack.i.l.bf16 %v8671_v32  ;;  %v8801_v44 = vunpack.i.h.bf16 %v8797_v25  ;;  %v8798_v20 = vunpack.i.l.bf16 %v8797_v25 }
0x1034   : > { %v7689_v35 = vpack.c.bf16 %v8675_v24, %v8670_v30  ;;  %v7691_v2 = vpack.c.bf16 %v8672_v48, %v8667_v13  ;;  %v7703_v19 = vpack.c.bf16 %v8801_v44, %v8796_v61  ;;  %v7701_v54 = vpack.c.bf16 %v8798_v20, %v8793_v0 }
0x1036   : > { %7690 = vmatprep.subr.bf16.mxu1 %v7689_v35 }
0x1037   : > { %7692 = vmatpush1.bf16.msra.mxu1 %v7691_v2 }
0x1038   : > { %7694 = vmatprep.subr.bf16.mxu1 %v11758_v60 }
0x103b   : > { %7696 = vmatpush1.bf16.msra.mxu1 %v11760_v59 }
0x104e   : > { %v7354_v18 = vpop.f32.mrb[2].mxu0 }
0x104f   : > { %v7356_v12 = vpop.f32.mrb[3].mxu0 }
0x1052   : > { %7278 = vperm.xlu0 %7751, %v7275_v10  }
0x106d   : > { %v8750_v43 = vpop.trf.xlu0 }
0x106e   : > { %v8754_v11 = vunpack.i.h.bf16 %v8750_v43  ;;  %v8751_v27 = vunpack.i.l.bf16 %v8750_v43 }
0x1071   : > { %v8755_v1 = vpop.trf.xlu0 }
0x1072   : > { %v8759_v7 = vunpack.i.h.bf16 %v8755_v1  ;;  %v8756_v57 = vunpack.i.l.bf16 %v8755_v1 }
0x1074   : > { %v7697_v62 = vpack.c.bf16 %v8756_v57, %v8751_v27  ;;  %v7699_v16 = vpack.c.bf16 %v8759_v7, %v8754_v11 }
0x1076   : > { %7698 = vmatprep.subr.bf16.mxu1 %v7697_v62 }
0x1077   : > { %7700 = vmatpush1.bf16.msra.mxu1 %v7699_v16 }
0x1078   : > { %7702 = vmatprep.subr.bf16.mxu1 %v7701_v54 }
0x107b   : > { %7704 = vmatpush1.bf16.msra.mxu1 %v7703_v19 }
0x107e   : > { %7424 = vmatmul.mubr.f32.vlgmr.msra.gmra.mrb[4].mxu1 %v11765_v46 }
0x10d1   : > { %v7279_v60 = vpop.permute.xlu0 %7278 }
0x10d2   : > { %v7355_v59 = vadd.f32 %v7354_v18, %v7279_v60  ;;  %v7357_v3 = vadd.f32 %v7356_v12, %v7279_v60 }
0x1151   : > { %v7425_v15 = vpop.f32.mrb[4].mxu1 }
0x1152   : > { %v7426_v49 = vadd.f32 %v7425_v15, %v7355_v59  ;;  %v7427_v26 = vpop.f32.mrb[5].mxu1 }
0x1153   : > { %v7428_v63 = vadd.f32 %v7427_v26, %v7357_v3 }
0x1155   : > { %v7432_v6 = vcombine.low %v7426_v49, %v7428_v63 }
0x1157   : > { %7434 = vst [vmem:[%s298_s21] sm:$0xff] %v7432_v6 }
0x1158   : > { %8817 = shalt.err (!%p8814_p3)
}
0x1159   : > { %s8818_s17 = scalar_lea.hbm %s11781_s25, 128  ;;  %s8822_s20 = scalar_lea.hbm %s11831_s8, 256 }
0x115a   : > { %p8819_p4 = scmp.ne.s32.totalorder %s11781_s25, %s8818_s17  ;;  %p8823_p9 = scmp.lt.u32.totalorder %s11781_s25, %s11831_s8 }
0x115b   : > { %p8824_p10 = scmp.lt.u32.totalorder %s8822_s20, %s8818_s17  ;;  %p8826_p12 = scmp.lt.u32.totalorder %s8818_s17, %s11781_s25 }
0x115c   : > { %p8820_p7 = pnand %p8819_p4, %p8955_p5 }
0x115d   : > { %p8825_p11 = por %p8824_p10, %p8823_p9 }
0x115e   : > { %p8821_p8 = pneg %p8820_p7 }
0x115f   : > { %p8827_p13 = por %p8826_p12, %p8825_p11 }
0x1161   : > { %p8828_p0 = pnand %p8827_p13, %p8821_p8 }
0x1163   : > { %8831 = shalt.err (!%p8828_p0)
}
0x1164   : > { %7709 = dma.vmem_to_hbm [thread:$0]  (%p8955_p5), %s11783_s22, 128, %s11781_s25, %s7436_s26  }
0x1165 PF: > { %p7715_p1 = scmp.ge.s32.totalorder %s8866_s30, 2  ;;  %s7462_s24 = sand.u32 1, %s8854_s27  }
0x1166   : > { %s7463_s10 = scalar_lea.sflag [#allocation10], %s7462_s24 }
0x1167   : > { %p7712_p2 = pnand %p7715_p1, %p8959_p6 }
0x1169   : > { %8849 = dma.done.wait (!%p7712_p2), %s7463_s10, 128  }
0x116a   : > { %8851 = vsyncadd (!%p7712_p2), %s7463_s10, 4294967168  ;;  %p18_p3 = scmp.ge.s32.totalorder %s8942_s11, 4   ;;  %s12350_s27 = smov %s8858_s28 }
0x116b   : > { %s12351_s28 = smov %s8862_s29  ;;  %s12352_s29 = smov %s8953_s14 }
0x116c   : > { %s12353_s30 = smov %s8942_s11  ;;  %20 = sbr.rel (!%p18_p3) target bundleno = 3 (0x3), region = 114 }
0x1173   :  { %7468 = vsyncpa [#allocation10], 1 }
0x1174   :  { %7470 = vsyncpa [#allocation10 + $0x1], 1 }

</bundles_post_ra>
